<compile_context>
chip_gen: v7x
topology: tpu7x:2x2x1
jax: 0.10.0
libtpu: 0.0.40
codegen_flags: <defaults>
</compile_context>

<pallas_src>
import jax
import jax.numpy as jnp
from jax.experimental import pallas as pl
from jax.experimental.pallas import tpu as pltpu


def _cdiv(a, b):
    return -(-a // b)


def _round_up(a, b):
    return _cdiv(a, b) * b


# --------------------------------------------------------------------------
# Pallas kernel: conv-as-matmul + bias + leaky_relu + 2x2 maxpool + BN scale/shift
# --------------------------------------------------------------------------
def make_conv_pool_kernel(neg_slope, tm, kp):
    def kernel(p_ref, w_ref, aux_ref, o_ref):
        # p_ref:   (4, tm, Kp) bf16 — the 4 pool positions on a leading axis
        # w_ref:   (Kp, Coutp) bf16
        # aux_ref: (8, Coutp)  f32 — row0 bias, row1 BN scale, row2 BN shift
        # o_ref:   (tm, Coutp) out dtype
        p = p_ref[...].reshape(4 * tm, kp)        # contiguous merge: tm % 16 == 0
        y = jnp.dot(p, w_ref[...], preferred_element_type=jnp.float32)
        y = y + aux_ref[0:1, :]
        if neg_slope == 0.0:
            y = jnp.maximum(y, 0.0)               # ReLU (loc layers)
        else:
            y = jnp.maximum(y, neg_slope * y)     # leaky_relu, 0 < slope < 1
        m01 = jnp.maximum(y[0 * tm:1 * tm], y[1 * tm:2 * tm])
        m23 = jnp.maximum(y[2 * tm:3 * tm], y[3 * tm:4 * tm])
        out = jnp.maximum(m01, m23) * aux_ref[1:2, :] + aux_ref[2:3, :]
        o_ref[...] = out.astype(o_ref.dtype)

    return kernel


_MAX_TM = 512                       # pooled-window rows per grid block (multiple of 16)
_VMEM_LIMIT = 40 * 1024 * 1024      # explicit: > v5e's 16 MiB default, < v7x's 64 MiB


def _choose_tiling(m):
    g = _cdiv(m, _MAX_TM)
    if g < 2 and m >= 32:
        g = 2                       # >=2 blocks when M permits -> both TCs busy on v7x
    tm = _round_up(_cdiv(m, g), 16)  # 16 = bf16 sublane tile (keeps in-kernel reshape free)
    g = _cdiv(m, tm)
    return tm, g


# --------------------------------------------------------------------------
# Fused conv block: valid conv -> leaky_relu -> 2x2/2 maxpool -> BN scale/shift
# --------------------------------------------------------------------------
def conv_pool_block(x_nhwc, w_torch, b, *, neg_slope, bn_scale=None, bn_shift=None,
                    out_dtype=jnp.bfloat16):
    cout, cin, kh, kw = (int(s) for s in w_torch.shape)
    n, h, w, cin_x = x_nhwc.shape                 # cin_x >= cin (lane-padded channels)
    oh, ow = h - kh + 1, w - kw + 1
    ph, pw = oh // 2, ow // 2
    m = n * ph * pw
    k = kh * kw * cin                             # REAL channels only — no padded K
    kp = _round_up(k, 128)
    coutp = _round_up(cout, 128)
    tm, g = _choose_tiling(m)
    m_pad = g * tm

    # ---- im2col over real channels; K in natural (dy, dx, cin) order;
    #      pool positions pulled out with strided slices, stacked on a leading axis ----
    xb = x_nhwc[..., :cin].astype(jnp.bfloat16)
    cols = [xb[:, dy:dy + oh, dx:dx + ow, :] for dy in range(kh) for dx in range(kw)]
    pat = jnp.concatenate(cols, axis=-1)                              # (N, OH, OW, K)
    pos = [pat[:, py:py + 2 * ph:2, px:px + 2 * pw:2, :].reshape(m, k)
           for py in range(2) for px in range(2)]
    p4 = jnp.stack(pos, axis=0)                                       # (4, M, K)
    p4 = jnp.pad(p4, ((0, 0), (0, m_pad - m), (0, kp - k)))           # (4, Mp, Kp)
    # TODO(synk): move im2col into the kernel (DMA raw NHWC tiles with halo, loop over
    # kh*kw taps accumulating into a VMEM scratch) to avoid the HBM patch expansion.

    # ---- weight: (Cout, Cin, kh, kw) -> (kh*kw*Cin, Cout_pad), matches patch K order ----
    wm = jnp.transpose(w_torch, (2, 3, 1, 0))                         # (kh, kw, cin, cout)
    wm = jnp.pad(wm, ((0, 0), (0, 0), (0, 0), (0, coutp - cout)))
    w_mat = jnp.pad(wm.reshape(k, coutp), ((0, kp - k), (0, 0))).astype(jnp.bfloat16)

    # ---- bias / BN scale / BN shift packed into one (8, Coutp) f32 operand ----
    scale = jnp.ones((cout,), jnp.float32) if bn_scale is None else bn_scale
    shift = jnp.zeros((cout,), jnp.float32) if bn_shift is None else bn_shift
    aux = jnp.stack([
        jnp.pad(b.astype(jnp.float32), (0, coutp - cout)),
        jnp.pad(scale, (0, coutp - cout), constant_values=1.0),
        jnp.pad(shift, (0, coutp - cout)),
    ], axis=0)
    aux = jnp.pad(aux, ((0, 8 - aux.shape[0]), (0, 0)))               # (8, Coutp) f32

    out = pl.pallas_call(
        make_conv_pool_kernel(neg_slope, tm, kp),
        out_shape=jax.ShapeDtypeStruct((g * tm, coutp), out_dtype),
        grid=(g,),
        in_specs=[
            pl.BlockSpec((4, tm, kp), lambda i: (0, i, 0)),
            pl.BlockSpec((kp, coutp), lambda i: (0, 0)),
            pl.BlockSpec((8, coutp), lambda i: (0, 0)),
        ],
        out_specs=pl.BlockSpec((tm, coutp), lambda i: (i, 0)),
        compiler_params=pltpu.CompilerParams(
            dimension_semantics=("parallel",),
            vmem_limit_bytes=_VMEM_LIMIT),
    )(p4, w_mat, aux)

    return out[:m].reshape(n, ph, pw, coutp)


# --------------------------------------------------------------------------
# Tiny fc_loc layers: plain XLA (a pallas_call costs more than these matmuls)
# --------------------------------------------------------------------------
def linear(x, w_torch, b, *, relu):
    y = jnp.dot(x.astype(jnp.float32), w_torch.T) + b
    return jnp.maximum(y, 0.0) if relu else y


# --------------------------------------------------------------------------
# affine_grid / grid_sample — XLA glue.  grid_sample is expressed as a one-hot
# interpolation matmul (vectorized) instead of advanced-index gathers, which
# lower poorly (scalarized) on TPU.
# TODO(synk): for large batch, replace with a Pallas scalar-prefetch gather kernel
# (the one-hot matrix is N*(H*W)^2 and grows quadratically in H*W).
# --------------------------------------------------------------------------
def affine_grid(theta, n, h, w):
    xs = (2.0 * jnp.arange(w, dtype=jnp.float32) + 1.0) / w - 1.0
    ys = (2.0 * jnp.arange(h, dtype=jnp.float32) + 1.0) / h - 1.0
    gx, gy = jnp.meshgrid(xs, ys)
    base = jnp.stack([gx, gy, jnp.ones_like(gx)], axis=-1)            # (H, W, 3)
    return jnp.einsum("nkc,hwc->nhwk", theta, base)                   # (N, H, W, 2)


def grid_sample_bilinear_zeros(x_nhwc, grid):
    n, h, w, c = x_nhwc.shape
    hw = h * w
    gx, gy = grid[..., 0], grid[..., 1]
    ix = (gx + 1.0) * w / 2.0 - 0.5
    iy = (gy + 1.0) * h / 2.0 - 0.5
    ix0 = jnp.floor(ix)
    iy0 = jnp.floor(iy)
    ix1, iy1 = ix0 + 1.0, iy0 + 1.0
    wx1, wy1 = ix - ix0, iy - iy0
    wx0, wy0 = 1.0 - wx1, 1.0 - wy1

    x_flat = x_nhwc.reshape(n, hw, c).astype(jnp.float32)
    col = jnp.arange(hw, dtype=jnp.int32)

    def corner(iy_, ix_, wgt):
        valid = (ix_ >= 0) & (ix_ <= w - 1) & (iy_ >= 0) & (iy_ <= h - 1)
        idx = (jnp.clip(iy_, 0, h - 1).astype(jnp.int32) * w
               + jnp.clip(ix_, 0, w - 1).astype(jnp.int32)).reshape(n, hw)
        wt = (wgt * valid.astype(jnp.float32)).reshape(n, hw)
        onehot = (idx[..., None] == col).astype(jnp.float32)          # (N, HWout, HWin)
        return onehot * wt[..., None]

    s = (corner(iy0, ix0, wy0 * wx0) + corner(iy0, ix1, wy0 * wx1)
         + corner(iy1, ix0, wy1 * wx0) + corner(iy1, ix1, wy1 * wx1))
    out = jnp.einsum("npq,nqc->npc", s, x_flat)
    return out.reshape(n, h, w, c)


# --------------------------------------------------------------------------
# Parameters (deterministic, synthetic, torch layouts)
# --------------------------------------------------------------------------
def init_params(key):
    def conv_init(kk, cout, cin, kh, kw):
        k1, k2 = jax.random.split(kk)
        bound = 1.0 / jnp.sqrt(cin * kh * kw)
        w = jax.random.uniform(k1, (cout, cin, kh, kw), jnp.float32, -bound, bound)
        b = jax.random.uniform(k2, (cout,), jnp.float32, -bound, bound)
        return w, b

    def lin_init(kk, cout, cin):
        k1, k2 = jax.random.split(kk)
        bound = 1.0 / jnp.sqrt(cin)
        w = jax.random.uniform(k1, (cout, cin), jnp.float32, -bound, bound)
        b = jax.random.uniform(k2, (cout,), jnp.float32, -bound, bound)
        return w, b

    ks = jax.random.split(key, 8)
    p = {}
    p["conv1_w"], p["conv1_b"] = conv_init(ks[0], 100, 3, 5, 5)
    p["conv2_w"], p["conv2_b"] = conv_init(ks[1], 150, 100, 3, 3)
    p["conv3_w"], p["conv3_b"] = conv_init(ks[2], 250, 150, 3, 3)
    p["loc1_w"], p["loc1_b"] = conv_init(ks[3], 8, 3, 7, 7)
    p["loc2_w"], p["loc2_b"] = conv_init(ks[4], 10, 8, 5, 5)
    p["fc1_w"], p["fc1_b"] = lin_init(ks[5], 32, 10 * 4 * 4)
    # fc_loc[2]: weight zeroed, bias = identity affine (as in the module __init__)
    p["fc2_w"] = jnp.zeros((6, 32), jnp.float32)
    p["fc2_b"] = jnp.array([1, 0, 0, 0, 1, 0], jnp.float32)
    # BatchNorm (inference, freshly-initialized running stats)
    eps = 1e-5
    for name, c in (("bn1", 100), ("bn2", 150), ("bn3", 250)):
        gamma = jnp.ones((c,), jnp.float32)
        beta = jnp.zeros((c,), jnp.float32)
        mean = jnp.zeros((c,), jnp.float32)
        var = jnp.ones((c,), jnp.float32)
        scale = gamma / jnp.sqrt(var + eps)
        p[name + "_scale"] = scale
        p[name + "_shift"] = beta - mean * scale
    return p


# --------------------------------------------------------------------------
# Forward pass
# --------------------------------------------------------------------------
@jax.jit
def encoder_forward(x_nchw, params):
    x = jnp.transpose(x_nchw, (0, 2, 3, 1)).astype(jnp.float32)       # NCHW -> NHWC
    n, h, w, _ = x.shape

    # ---- STN localization (Conv -> MaxPool -> ReLU; ReLU/pool commute, fused) ----
    l1 = conv_pool_block(x, params["loc1_w"], params["loc1_b"],
                         neg_slope=0.0)                                # (N,13,13,128) bf16
    l2 = conv_pool_block(l1, params["loc2_w"], params["loc2_b"],
                         neg_slope=0.0, out_dtype=jnp.float32)         # (N,4,4,128) f32
    xs = jnp.transpose(l2[..., :10], (0, 3, 1, 2)).reshape(n, 10 * 4 * 4)   # torch flatten
    hfc = linear(xs, params["fc1_w"], params["fc1_b"], relu=True)
    theta = linear(hfc, params["fc2_w"], params["fc2_b"], relu=False).reshape(n, 2, 3)

    grid = affine_grid(theta, n, h, w)
    xw = grid_sample_bilinear_zeros(x, grid)

    # ---- main trunk: bn(maxpool(leaky_relu(conv(.)))) x3; Dropout2d = identity (eval) ----
    # TODO(synk): merge conv2+conv3 into one pallas_call at tiny batch (launch-bound regime).
    y1 = conv_pool_block(xw, params["conv1_w"], params["conv1_b"], neg_slope=0.01,
                         bn_scale=params["bn1_scale"], bn_shift=params["bn1_shift"])  # (N,14,14,128)
    y2 = conv_pool_block(y1, params["conv2_w"], params["conv2_b"], neg_slope=0.01,
                         bn_scale=params["bn2_scale"], bn_shift=params["bn2_shift"])  # (N,6,6,256)
    y3 = conv_pool_block(y2, params["conv3_w"], params["conv3_b"], neg_slope=0.01,
                         bn_scale=params["bn3_scale"], bn_shift=params["bn3_shift"],
                         out_dtype=jnp.float32)                                       # (N,2,2,256)

    # x.view(-1, 250*2*2) on NCHW -> channel-major flatten (drop channel padding first)
    return jnp.transpose(y3[..., :250], (0, 3, 1, 2)).reshape(n, 250 * 2 * 2)


# --------------------------------------------------------------------------
if __name__ == "__main__":
    key = jax.random.PRNGKey(0)
    k_x, k_p = jax.random.split(key)
    # Input must be 32x32 so the localization branch yields 10*4*4 features.
    x = jax.random.normal(k_x, (2, 3, 32, 32), jnp.float32)
    params = init_params(k_p)

    out = encoder_forward(x, params)
    out = jax.block_until_ready(out)
    assert out.shape == (2, 1000), out.shape
    assert jnp.all(jnp.isfinite(out))
    print("KERNEL_OK")
</pallas_src>

<mosaic_0001>
module attributes {stable_mosaic.version = 11 : i64} {
  func.func @kernel(%arg0: i32, %arg1: memref<4x176x256xbf16, #tpu.memory_space<vmem>>, %arg2: memref<256x128xbf16, #tpu.memory_space<vmem>>, %arg3: memref<8x128xf32, #tpu.memory_space<vmem>>, %arg4: memref<176x128xbf16, #tpu.memory_space<vmem>>) attributes {dimension_semantics = [#tpu.dimension_semantics<parallel>], iteration_bounds = array<i64: 2>, scalar_prefetch = 0 : i64, scratch_operands = 0 : i64, tpu.core_type = #tpu.core_type<tc>, window_params = [{transform_indices = @transform_0, window_bounds = array<i64: 4, 176, 256>}, {pipeline_mode = #tpu.pipeline_mode<synchronous>, transform_indices = @transform_1, window_bounds = array<i64: 256, 128>}, {pipeline_mode = #tpu.pipeline_mode<synchronous>, transform_indices = @transform_2, window_bounds = array<i64: 8, 128>}, {transform_indices = @transform_3, window_bounds = array<i64: 176, 128>}]} {
    %c0 = arith.constant 0 : index
    %c0_0 = arith.constant 0 : index
    %c0_1 = arith.constant 0 : index
    %0 = vector.load %arg1[%c0, %c0_0, %c0_1] : memref<4x176x256xbf16, #tpu.memory_space<vmem>>, vector<4x176x256xbf16>
    %1 = vector.shape_cast %0 : vector<4x176x256xbf16> to vector<704x256xbf16>
    %c0_2 = arith.constant 0 : index
    %c0_3 = arith.constant 0 : index
    %2 = vector.load %arg2[%c0_2, %c0_3] : memref<256x128xbf16, #tpu.memory_space<vmem>>, vector<256x128xbf16>
    %cst = arith.constant dense<0.000000e+00> : vector<704x128xf32>
    %3 = tpu.matmul %1, %2, %cst {dimension_numbers = #tpu.dot_dimension_numbers<[1], [0], [0], [1], [0, 0, 1, 1], [], []>} : vector<704x256xbf16>, vector<256x128xbf16>, vector<704x128xf32> -> vector<704x128xf32>
    %c0_4 = arith.constant 0 : index
    %c0_5 = arith.constant 0 : index
    %4 = vector.load %arg3[%c0_4, %c0_5] : memref<8x128xf32, #tpu.memory_space<vmem>>, vector<1x128xf32>
    %5 = vector.broadcast %4 : vector<1x128xf32> to vector<704x128xf32>
    %6 = arith.addf %3, %5 : vector<704x128xf32>
    %cst_6 = arith.constant 0.000000e+00 : f32
    %7 = vector.broadcast %cst_6 : f32 to vector<704x128xf32>
    %8 = arith.maximumf %6, %7 : vector<704x128xf32>
    %9 = vector.extract_strided_slice %8 {offsets = [0, 0], sizes = [176, 128], strides = [1, 1]} : vector<704x128xf32> to vector<176x128xf32>
    %10 = vector.extract_strided_slice %8 {offsets = [176, 0], sizes = [176, 128], strides = [1, 1]} : vector<704x128xf32> to vector<176x128xf32>
    %11 = arith.maximumf %9, %10 : vector<176x128xf32>
    %12 = vector.extract_strided_slice %8 {offsets = [352, 0], sizes = [176, 128], strides = [1, 1]} : vector<704x128xf32> to vector<176x128xf32>
    %13 = vector.extract_strided_slice %8 {offsets = [528, 0], sizes = [176, 128], strides = [1, 1]} : vector<704x128xf32> to vector<176x128xf32>
    %14 = arith.maximumf %12, %13 : vector<176x128xf32>
    %15 = arith.maximumf %11, %14 : vector<176x128xf32>
    %c1 = arith.constant 1 : index
    %c0_7 = arith.constant 0 : index
    %16 = vector.load %arg3[%c1, %c0_7] : memref<8x128xf32, #tpu.memory_space<vmem>>, vector<1x128xf32>
    %17 = vector.broadcast %16 : vector<1x128xf32> to vector<176x128xf32>
    %18 = arith.mulf %15, %17 : vector<176x128xf32>
    %c2 = arith.constant 2 : index
    %c0_8 = arith.constant 0 : index
    %19 = vector.load %arg3[%c2, %c0_8] : memref<8x128xf32, #tpu.memory_space<vmem>>, vector<1x128xf32>
    %20 = vector.broadcast %19 : vector<1x128xf32> to vector<176x128xf32>
    %21 = arith.addf %18, %20 : vector<176x128xf32>
    %22 = arith.truncf %21 : vector<176x128xf32> to vector<176x128xbf16>
    %c0_9 = arith.constant 0 : index
    %c0_10 = arith.constant 0 : index
    %23 = vector.load %arg4[%c0_9, %c0_10] : memref<176x128xbf16, #tpu.memory_space<vmem>>, vector<176x128xbf16>
    tpu.vector_store %arg4[%c0_9, %c0_10], %22 {strides = array<i32>} : memref<176x128xbf16, #tpu.memory_space<vmem>>, vector<176x128xbf16>,
    return
  }
  func.func @transform_0(%arg0: i32) -> (i32, i32, i32) {
    %c0_i32 = arith.constant 0 : i32
    %c0_i32_0 = arith.constant 0 : i32
    %c0_i32_1 = arith.constant 0 : i32
    return %c0_i32, %arg0, %c0_i32_0 : i32, i32, i32
  }
  func.func @transform_1(%arg0: i32) -> (i32, i32) {
    %c0_i32 = arith.constant 0 : i32
    %c0_i32_0 = arith.constant 0 : i32
    %c0_i32_1 = arith.constant 0 : i32
    return %c0_i32, %c0_i32_0 : i32, i32
  }
  func.func @transform_2(%arg0: i32) -> (i32, i32) {
    %c0_i32 = arith.constant 0 : i32
    %c0_i32_0 = arith.constant 0 : i32
    %c0_i32_1 = arith.constant 0 : i32
    return %c0_i32, %c0_i32_0 : i32, i32
  }
  func.func @transform_3(%arg0: i32) -> (i32, i32) {
    %c0_i32 = arith.constant 0 : i32
    %c0_i32_0 = arith.constant 0 : i32
    return %arg0, %c0_i32 : i32, i32
  }
}

module attributes {stable_mosaic.version = 11 : i64} {
  func.func @kernel(%arg0: i32, %arg1: memref<4x16x256xbf16, #tpu.memory_space<vmem>>, %arg2: memref<256x128xbf16, #tpu.memory_space<vmem>>, %arg3: memref<8x128xf32, #tpu.memory_space<vmem>>, %arg4: memref<16x128xf32, #tpu.memory_space<vmem>>) attributes {dimension_semantics = [#tpu.dimension_semantics<parallel>], iteration_bounds = array<i64: 2>, scalar_prefetch = 0 : i64, scratch_operands = 0 : i64, tpu.core_type = #tpu.core_type<tc>, window_params = [{transform_indices = @transform_0, window_bounds = array<i64: 4, 16, 256>}, {pipeline_mode = #tpu.pipeline_mode<synchronous>, transform_indices = @transform_1, window_bounds = array<i64: 256, 128>}, {pipeline_mode = #tpu.pipeline_mode<synchronous>, transform_indices = @transform_2, window_bounds = array<i64: 8, 128>}, {transform_indices = @transform_3, window_bounds = array<i64: 16, 128>}]} {
    %c0 = arith.constant 0 : index
    %c0_0 = arith.constant 0 : index
    %c0_1 = arith.constant 0 : index
    %0 = vector.load %arg1[%c0, %c0_0, %c0_1] : memref<4x16x256xbf16, #tpu.memory_space<vmem>>, vector<4x16x256xbf16>
    %1 = vector.shape_cast %0 : vector<4x16x256xbf16> to vector<64x256xbf16>
    %c0_2 = arith.constant 0 : index
    %c0_3 = arith.constant 0 : index
    %2 = vector.load %arg2[%c0_2, %c0_3] : memref<256x128xbf16, #tpu.memory_space<vmem>>, vector<256x128xbf16>
    %cst = arith.constant dense<0.000000e+00> : vector<64x128xf32>
    %3 = tpu.matmul %1, %2, %cst {dimension_numbers = #tpu.dot_dimension_numbers<[1], [0], [0], [1], [0, 0, 1, 1], [], []>} : vector<64x256xbf16>, vector<256x128xbf16>, vector<64x128xf32> -> vector<64x128xf32>
    %c0_4 = arith.constant 0 : index
    %c0_5 = arith.constant 0 : index
    %4 = vector.load %arg3[%c0_4, %c0_5] : memref<8x128xf32, #tpu.memory_space<vmem>>, vector<1x128xf32>
    %5 = vector.broadcast %4 : vector<1x128xf32> to vector<64x128xf32>
    %6 = arith.addf %3, %5 : vector<64x128xf32>
    %cst_6 = arith.constant 0.000000e+00 : f32
    %7 = vector.broadcast %cst_6 : f32 to vector<64x128xf32>
    %8 = arith.maximumf %6, %7 : vector<64x128xf32>
    %9 = vector.extract_strided_slice %8 {offsets = [0, 0], sizes = [16, 128], strides = [1, 1]} : vector<64x128xf32> to vector<16x128xf32>
    %10 = vector.extract_strided_slice %8 {offsets = [16, 0], sizes = [16, 128], strides = [1, 1]} : vector<64x128xf32> to vector<16x128xf32>
    %11 = arith.maximumf %9, %10 : vector<16x128xf32>
    %12 = vector.extract_strided_slice %8 {offsets = [32, 0], sizes = [16, 128], strides = [1, 1]} : vector<64x128xf32> to vector<16x128xf32>
    %13 = vector.extract_strided_slice %8 {offsets = [48, 0], sizes = [16, 128], strides = [1, 1]} : vector<64x128xf32> to vector<16x128xf32>
    %14 = arith.maximumf %12, %13 : vector<16x128xf32>
    %15 = arith.maximumf %11, %14 : vector<16x128xf32>
    %c1 = arith.constant 1 : index
    %c0_7 = arith.constant 0 : index
    %16 = vector.load %arg3[%c1, %c0_7] : memref<8x128xf32, #tpu.memory_space<vmem>>, vector<1x128xf32>
    %17 = vector.broadcast %16 : vector<1x128xf32> to vector<16x128xf32>
    %18 = arith.mulf %15, %17 : vector<16x128xf32>
    %c2 = arith.constant 2 : index
    %c0_8 = arith.constant 0 : index
    %19 = vector.load %arg3[%c2, %c0_8] : memref<8x128xf32, #tpu.memory_space<vmem>>, vector<1x128xf32>
    %20 = vector.broadcast %19 : vector<1x128xf32> to vector<16x128xf32>
    %21 = arith.addf %18, %20 : vector<16x128xf32>
    %c0_9 = arith.constant 0 : index
    %c0_10 = arith.constant 0 : index
    %22 = vector.load %arg4[%c0_9, %c0_10] : memref<16x128xf32, #tpu.memory_space<vmem>>, vector<16x128xf32>
    tpu.vector_store %arg4[%c0_9, %c0_10], %21 {strides = array<i32>} : memref<16x128xf32, #tpu.memory_space<vmem>>, vector<16x128xf32>,
    return
  }
  func.func @transform_0(%arg0: i32) -> (i32, i32, i32) {
    %c0_i32 = arith.constant 0 : i32
    %c0_i32_0 = arith.constant 0 : i32
    %c0_i32_1 = arith.constant 0 : i32
    return %c0_i32, %arg0, %c0_i32_0 : i32, i32, i32
  }
  func.func @transform_1(%arg0: i32) -> (i32, i32) {
    %c0_i32 = arith.constant 0 : i32
    %c0_i32_0 = arith.constant 0 : i32
    %c0_i32_1 = arith.constant 0 : i32
    return %c0_i32, %c0_i32_0 : i32, i32
  }
  func.func @transform_2(%arg0: i32) -> (i32, i32) {
    %c0_i32 = arith.constant 0 : i32
    %c0_i32_0 = arith.constant 0 : i32
    %c0_i32_1 = arith.constant 0 : i32
    return %c0_i32, %c0_i32_0 : i32, i32
  }
  func.func @transform_3(%arg0: i32) -> (i32, i32) {
    %c0_i32 = arith.constant 0 : i32
    %c0_i32_0 = arith.constant 0 : i32
    return %arg0, %c0_i32 : i32, i32
  }
}

module attributes {stable_mosaic.version = 11 : i64} {
  func.func @kernel(%arg0: i32, %arg1: memref<4x208x128xbf16, #tpu.memory_space<vmem>>, %arg2: memref<128x128xbf16, #tpu.memory_space<vmem>>, %arg3: memref<8x128xf32, #tpu.memory_space<vmem>>, %arg4: memref<208x128xbf16, #tpu.memory_space<vmem>>) attributes {dimension_semantics = [#tpu.dimension_semantics<parallel>], iteration_bounds = array<i64: 2>, scalar_prefetch = 0 : i64, scratch_operands = 0 : i64, tpu.core_type = #tpu.core_type<tc>, window_params = [{transform_indices = @transform_0, window_bounds = array<i64: 4, 208, 128>}, {pipeline_mode = #tpu.pipeline_mode<synchronous>, transform_indices = @transform_1, window_bounds = array<i64: 128, 128>}, {pipeline_mode = #tpu.pipeline_mode<synchronous>, transform_indices = @transform_2, window_bounds = array<i64: 8, 128>}, {transform_indices = @transform_3, window_bounds = array<i64: 208, 128>}]} {
    %c0 = arith.constant 0 : index
    %c0_0 = arith.constant 0 : index
    %c0_1 = arith.constant 0 : index
    %0 = vector.load %arg1[%c0, %c0_0, %c0_1] : memref<4x208x128xbf16, #tpu.memory_space<vmem>>, vector<4x208x128xbf16>
    %1 = vector.shape_cast %0 : vector<4x208x128xbf16> to vector<832x128xbf16>
    %c0_2 = arith.constant 0 : index
    %c0_3 = arith.constant 0 : index
    %2 = vector.load %arg2[%c0_2, %c0_3] : memref<128x128xbf16, #tpu.memory_space<vmem>>, vector<128x128xbf16>
    %cst = arith.constant dense<0.000000e+00> : vector<832x128xf32>
    %3 = tpu.matmul %1, %2, %cst {dimension_numbers = #tpu.dot_dimension_numbers<[1], [0], [0], [1], [0, 0, 1, 1], [], []>} : vector<832x128xbf16>, vector<128x128xbf16>, vector<832x128xf32> -> vector<832x128xf32>
    %c0_4 = arith.constant 0 : index
    %c0_5 = arith.constant 0 : index
    %4 = vector.load %arg3[%c0_4, %c0_5] : memref<8x128xf32, #tpu.memory_space<vmem>>, vector<1x128xf32>
    %5 = vector.broadcast %4 : vector<1x128xf32> to vector<832x128xf32>
    %6 = arith.addf %3, %5 : vector<832x128xf32>
    %cst_6 = arith.constant 0.00999999977 : f32
    %7 = vector.broadcast %cst_6 : f32 to vector<832x128xf32>
    %8 = arith.mulf %7, %6 : vector<832x128xf32>
    %9 = arith.maximumf %6, %8 : vector<832x128xf32>
    %10 = vector.extract_strided_slice %9 {offsets = [0, 0], sizes = [208, 128], strides = [1, 1]} : vector<832x128xf32> to vector<208x128xf32>
    %11 = vector.extract_strided_slice %9 {offsets = [208, 0], sizes = [208, 128], strides = [1, 1]} : vector<832x128xf32> to vector<208x128xf32>
    %12 = arith.maximumf %10, %11 : vector<208x128xf32>
    %13 = vector.extract_strided_slice %9 {offsets = [416, 0], sizes = [208, 128], strides = [1, 1]} : vector<832x128xf32> to vector<208x128xf32>
    %14 = vector.extract_strided_slice %9 {offsets = [624, 0], sizes = [208, 128], strides = [1, 1]} : vector<832x128xf32> to vector<208x128xf32>
    %15 = arith.maximumf %13, %14 : vector<208x128xf32>
    %16 = arith.maximumf %12, %15 : vector<208x128xf32>
    %c1 = arith.constant 1 : index
    %c0_7 = arith.constant 0 : index
    %17 = vector.load %arg3[%c1, %c0_7] : memref<8x128xf32, #tpu.memory_space<vmem>>, vector<1x128xf32>
    %18 = vector.broadcast %17 : vector<1x128xf32> to vector<208x128xf32>
    %19 = arith.mulf %16, %18 : vector<208x128xf32>
    %c2 = arith.constant 2 : index
    %c0_8 = arith.constant 0 : index
    %20 = vector.load %arg3[%c2, %c0_8] : memref<8x128xf32, #tpu.memory_space<vmem>>, vector<1x128xf32>
    %21 = vector.broadcast %20 : vector<1x128xf32> to vector<208x128xf32>
    %22 = arith.addf %19, %21 : vector<208x128xf32>
    %23 = arith.truncf %22 : vector<208x128xf32> to vector<208x128xbf16>
    %c0_9 = arith.constant 0 : index
    %c0_10 = arith.constant 0 : index
    %24 = vector.load %arg4[%c0_9, %c0_10] : memref<208x128xbf16, #tpu.memory_space<vmem>>, vector<208x128xbf16>
    tpu.vector_store %arg4[%c0_9, %c0_10], %23 {strides = array<i32>} : memref<208x128xbf16, #tpu.memory_space<vmem>>, vector<208x128xbf16>,
    return
  }
  func.func @transform_0(%arg0: i32) -> (i32, i32, i32) {
    %c0_i32 = arith.constant 0 : i32
    %c0_i32_0 = arith.constant 0 : i32
    %c0_i32_1 = arith.constant 0 : i32
    return %c0_i32, %arg0, %c0_i32_0 : i32, i32, i32
  }
  func.func @transform_1(%arg0: i32) -> (i32, i32) {
    %c0_i32 = arith.constant 0 : i32
    %c0_i32_0 = arith.constant 0 : i32
    %c0_i32_1 = arith.constant 0 : i32
    return %c0_i32, %c0_i32_0 : i32, i32
  }
  func.func @transform_2(%arg0: i32) -> (i32, i32) {
    %c0_i32 = arith.constant 0 : i32
    %c0_i32_0 = arith.constant 0 : i32
    %c0_i32_1 = arith.constant 0 : i32
    return %c0_i32, %c0_i32_0 : i32, i32
  }
  func.func @transform_3(%arg0: i32) -> (i32, i32) {
    %c0_i32 = arith.constant 0 : i32
    %c0_i32_0 = arith.constant 0 : i32
    return %arg0, %c0_i32 : i32, i32
  }
}

module attributes {stable_mosaic.version = 11 : i64} {
  func.func @kernel(%arg0: i32, %arg1: memref<4x48x1024xbf16, #tpu.memory_space<vmem>>, %arg2: memref<1024x256xbf16, #tpu.memory_space<vmem>>, %arg3: memref<8x256xf32, #tpu.memory_space<vmem>>, %arg4: memref<48x256xbf16, #tpu.memory_space<vmem>>) attributes {dimension_semantics = [#tpu.dimension_semantics<parallel>], iteration_bounds = array<i64: 2>, scalar_prefetch = 0 : i64, scratch_operands = 0 : i64, tpu.core_type = #tpu.core_type<tc>, window_params = [{transform_indices = @transform_0, window_bounds = array<i64: 4, 48, 1024>}, {pipeline_mode = #tpu.pipeline_mode<synchronous>, transform_indices = @transform_1, window_bounds = array<i64: 1024, 256>}, {pipeline_mode = #tpu.pipeline_mode<synchronous>, transform_indices = @transform_2, window_bounds = array<i64: 8, 256>}, {transform_indices = @transform_3, window_bounds = array<i64: 48, 256>}]} {
    %c0 = arith.constant 0 : index
    %c0_0 = arith.constant 0 : index
    %c0_1 = arith.constant 0 : index
    %0 = vector.load %arg1[%c0, %c0_0, %c0_1] : memref<4x48x1024xbf16, #tpu.memory_space<vmem>>, vector<4x48x1024xbf16>
    %1 = vector.shape_cast %0 : vector<4x48x1024xbf16> to vector<192x1024xbf16>
    %c0_2 = arith.constant 0 : index
    %c0_3 = arith.constant 0 : index
    %2 = vector.load %arg2[%c0_2, %c0_3] : memref<1024x256xbf16, #tpu.memory_space<vmem>>, vector<1024x256xbf16>
    %cst = arith.constant dense<0.000000e+00> : vector<192x256xf32>
    %3 = tpu.matmul %1, %2, %cst {dimension_numbers = #tpu.dot_dimension_numbers<[1], [0], [0], [1], [0, 0, 1, 1], [], []>} : vector<192x1024xbf16>, vector<1024x256xbf16>, vector<192x256xf32> -> vector<192x256xf32>
    %c0_4 = arith.constant 0 : index
    %c0_5 = arith.constant 0 : index
    %4 = vector.load %arg3[%c0_4, %c0_5] : memref<8x256xf32, #tpu.memory_space<vmem>>, vector<1x256xf32>
    %5 = vector.broadcast %4 : vector<1x256xf32> to vector<192x256xf32>
    %6 = arith.addf %3, %5 : vector<192x256xf32>
    %cst_6 = arith.constant 0.00999999977 : f32
    %7 = vector.broadcast %cst_6 : f32 to vector<192x256xf32>
    %8 = arith.mulf %7, %6 : vector<192x256xf32>
    %9 = arith.maximumf %6, %8 : vector<192x256xf32>
    %10 = vector.extract_strided_slice %9 {offsets = [0, 0], sizes = [48, 256], strides = [1, 1]} : vector<192x256xf32> to vector<48x256xf32>
    %11 = vector.extract_strided_slice %9 {offsets = [48, 0], sizes = [48, 256], strides = [1, 1]} : vector<192x256xf32> to vector<48x256xf32>
    %12 = arith.maximumf %10, %11 : vector<48x256xf32>
    %13 = vector.extract_strided_slice %9 {offsets = [96, 0], sizes = [48, 256], strides = [1, 1]} : vector<192x256xf32> to vector<48x256xf32>
    %14 = vector.extract_strided_slice %9 {offsets = [144, 0], sizes = [48, 256], strides = [1, 1]} : vector<192x256xf32> to vector<48x256xf32>
    %15 = arith.maximumf %13, %14 : vector<48x256xf32>
    %16 = arith.maximumf %12, %15 : vector<48x256xf32>
    %c1 = arith.constant 1 : index
    %c0_7 = arith.constant 0 : index
    %17 = vector.load %arg3[%c1, %c0_7] : memref<8x256xf32, #tpu.memory_space<vmem>>, vector<1x256xf32>
    %18 = vector.broadcast %17 : vector<1x256xf32> to vector<48x256xf32>
    %19 = arith.mulf %16, %18 : vector<48x256xf32>
    %c2 = arith.constant 2 : index
    %c0_8 = arith.constant 0 : index
    %20 = vector.load %arg3[%c2, %c0_8] : memref<8x256xf32, #tpu.memory_space<vmem>>, vector<1x256xf32>
    %21 = vector.broadcast %20 : vector<1x256xf32> to vector<48x256xf32>
    %22 = arith.addf %19, %21 : vector<48x256xf32>
    %23 = arith.truncf %22 : vector<48x256xf32> to vector<48x256xbf16>
    %c0_9 = arith.constant 0 : index
    %c0_10 = arith.constant 0 : index
    %24 = vector.load %arg4[%c0_9, %c0_10] : memref<48x256xbf16, #tpu.memory_space<vmem>>, vector<48x256xbf16>
    tpu.vector_store %arg4[%c0_9, %c0_10], %23 {strides = array<i32>} : memref<48x256xbf16, #tpu.memory_space<vmem>>, vector<48x256xbf16>,
    return
  }
  func.func @transform_0(%arg0: i32) -> (i32, i32, i32) {
    %c0_i32 = arith.constant 0 : i32
    %c0_i32_0 = arith.constant 0 : i32
    %c0_i32_1 = arith.constant 0 : i32
    return %c0_i32, %arg0, %c0_i32_0 : i32, i32, i32
  }
  func.func @transform_1(%arg0: i32) -> (i32, i32) {
    %c0_i32 = arith.constant 0 : i32
    %c0_i32_0 = arith.constant 0 : i32
    %c0_i32_1 = arith.constant 0 : i32
    return %c0_i32, %c0_i32_0 : i32, i32
  }
  func.func @transform_2(%arg0: i32) -> (i32, i32) {
    %c0_i32 = arith.constant 0 : i32
    %c0_i32_0 = arith.constant 0 : i32
    %c0_i32_1 = arith.constant 0 : i32
    return %c0_i32, %c0_i32_0 : i32, i32
  }
  func.func @transform_3(%arg0: i32) -> (i32, i32) {
    %c0_i32 = arith.constant 0 : i32
    %c0_i32_0 = arith.constant 0 : i32
    return %arg0, %c0_i32 : i32, i32
  }
}

module attributes {stable_mosaic.version = 11 : i64} {
  func.func @kernel(%arg0: i32, %arg1: memref<4x16x1408xbf16, #tpu.memory_space<vmem>>, %arg2: memref<1408x256xbf16, #tpu.memory_space<vmem>>, %arg3: memref<8x256xf32, #tpu.memory_space<vmem>>, %arg4: memref<16x256xf32, #tpu.memory_space<vmem>>) attributes {dimension_semantics = [#tpu.dimension_semantics<parallel>], iteration_bounds = array<i64: 1>, scalar_prefetch = 0 : i64, scratch_operands = 0 : i64, tpu.core_type = #tpu.core_type<tc>, window_params = [{transform_indices = @transform_0, window_bounds = array<i64: 4, 16, 1408>}, {pipeline_mode = #tpu.pipeline_mode<synchronous>, transform_indices = @transform_1, window_bounds = array<i64: 1408, 256>}, {pipeline_mode = #tpu.pipeline_mode<synchronous>, transform_indices = @transform_2, window_bounds = array<i64: 8, 256>}, {transform_indices = @transform_3, window_bounds = array<i64: 16, 256>}]} {
    %c0 = arith.constant 0 : index
    %c0_0 = arith.constant 0 : index
    %c0_1 = arith.constant 0 : index
    %0 = vector.load %arg1[%c0, %c0_0, %c0_1] : memref<4x16x1408xbf16, #tpu.memory_space<vmem>>, vector<4x16x1408xbf16>
    %1 = vector.shape_cast %0 : vector<4x16x1408xbf16> to vector<64x1408xbf16>
    %c0_2 = arith.constant 0 : index
    %c0_3 = arith.constant 0 : index
    %2 = vector.load %arg2[%c0_2, %c0_3] : memref<1408x256xbf16, #tpu.memory_space<vmem>>, vector<1408x256xbf16>
    %cst = arith.constant dense<0.000000e+00> : vector<64x256xf32>
    %3 = tpu.matmul %1, %2, %cst {dimension_numbers = #tpu.dot_dimension_numbers<[1], [0], [0], [1], [0, 0, 1, 1], [], []>} : vector<64x1408xbf16>, vector<1408x256xbf16>, vector<64x256xf32> -> vector<64x256xf32>
    %c0_4 = arith.constant 0 : index
    %c0_5 = arith.constant 0 : index
    %4 = vector.load %arg3[%c0_4, %c0_5] : memref<8x256xf32, #tpu.memory_space<vmem>>, vector<1x256xf32>
    %5 = vector.broadcast %4 : vector<1x256xf32> to vector<64x256xf32>
    %6 = arith.addf %3, %5 : vector<64x256xf32>
    %cst_6 = arith.constant 0.00999999977 : f32
    %7 = vector.broadcast %cst_6 : f32 to vector<64x256xf32>
    %8 = arith.mulf %7, %6 : vector<64x256xf32>
    %9 = arith.maximumf %6, %8 : vector<64x256xf32>
    %10 = vector.extract_strided_slice %9 {offsets = [0, 0], sizes = [16, 256], strides = [1, 1]} : vector<64x256xf32> to vector<16x256xf32>
    %11 = vector.extract_strided_slice %9 {offsets = [16, 0], sizes = [16, 256], strides = [1, 1]} : vector<64x256xf32> to vector<16x256xf32>
    %12 = arith.maximumf %10, %11 : vector<16x256xf32>
    %13 = vector.extract_strided_slice %9 {offsets = [32, 0], sizes = [16, 256], strides = [1, 1]} : vector<64x256xf32> to vector<16x256xf32>
    %14 = vector.extract_strided_slice %9 {offsets = [48, 0], sizes = [16, 256], strides = [1, 1]} : vector<64x256xf32> to vector<16x256xf32>
    %15 = arith.maximumf %13, %14 : vector<16x256xf32>
    %16 = arith.maximumf %12, %15 : vector<16x256xf32>
    %c1 = arith.constant 1 : index
    %c0_7 = arith.constant 0 : index
    %17 = vector.load %arg3[%c1, %c0_7] : memref<8x256xf32, #tpu.memory_space<vmem>>, vector<1x256xf32>
    %18 = vector.broadcast %17 : vector<1x256xf32> to vector<16x256xf32>
    %19 = arith.mulf %16, %18 : vector<16x256xf32>
    %c2 = arith.constant 2 : index
    %c0_8 = arith.constant 0 : index
    %20 = vector.load %arg3[%c2, %c0_8] : memref<8x256xf32, #tpu.memory_space<vmem>>, vector<1x256xf32>
    %21 = vector.broadcast %20 : vector<1x256xf32> to vector<16x256xf32>
    %22 = arith.addf %19, %21 : vector<16x256xf32>
    %c0_9 = arith.constant 0 : index
    %c0_10 = arith.constant 0 : index
    %23 = vector.load %arg4[%c0_9, %c0_10] : memref<16x256xf32, #tpu.memory_space<vmem>>, vector<16x256xf32>
    tpu.vector_store %arg4[%c0_9, %c0_10], %22 {strides = array<i32>} : memref<16x256xf32, #tpu.memory_space<vmem>>, vector<16x256xf32>,
    return
  }
  func.func @transform_0(%arg0: i32) -> (i32, i32, i32) {
    %c0_i32 = arith.constant 0 : i32
    %c0_i32_0 = arith.constant 0 : i32
    %c0_i32_1 = arith.constant 0 : i32
    return %c0_i32, %arg0, %c0_i32_0 : i32, i32, i32
  }
  func.func @transform_1(%arg0: i32) -> (i32, i32) {
    %c0_i32 = arith.constant 0 : i32
    %c0_i32_0 = arith.constant 0 : i32
    %c0_i32_1 = arith.constant 0 : i32
    return %c0_i32, %c0_i32_0 : i32, i32
  }
  func.func @transform_2(%arg0: i32) -> (i32, i32) {
    %c0_i32 = arith.constant 0 : i32
    %c0_i32_0 = arith.constant 0 : i32
    %c0_i32_1 = arith.constant 0 : i32
    return %c0_i32, %c0_i32_0 : i32, i32
  }
  func.func @transform_3(%arg0: i32) -> (i32, i32) {
    %c0_i32 = arith.constant 0 : i32
    %c0_i32_0 = arith.constant 0 : i32
    return %arg0, %c0_i32 : i32, i32
  }
}

</mosaic_0001>

<bundles_post_ra>
// kernel: encoder_forward.5
= control target key start
LH: loop header
LB: loop body
LE: loop exit
PB: predicated region body
PF: predicated region fallthrough
CT: control target
= control target key end

     0   :  { %s2465_s12 = smov 0   ;;  %s2467_s13 = smov 0   ;;  %s3168_s0 = inlined_call_operand.vmem [shape: bf16[4,352,256], index: 0, kind: input, shape index: {}]   ;;  %s3169_s1 = inlined_call_operand.vmem [shape: bf16[256,128], index: 1, kind: input, shape index: {}]   ;;  %s3170_s2 = inlined_call_operand.vmem [shape: f32[8,128], index: 2, kind: input, shape index: {}]   ;;  %s3171_s3 = inlined_call_operand.vmem [shape: bf16[352,128], index: 3, kind: output, shape index: {}]  }
   0x1   :  { %s2469_s14 = smov 0  }
   0x2 LB: > { %s1984_s15 = sadd.s32 4294967295, %s2442_s14   ;;  %s2482_s16 = sadd.s32 1, %s2442_s14   ;;  %s2442_s14 = sphi %s2469_s14, %s3174_s14   ;;  %s2438_s13 = sphi %s2467_s13, %s3173_s13   ;;  %s2434_s12 = sphi %s2465_s12, %s3172_s12  }
   0x3   : > { %s17_s17 = ssub.s32 %s2442_s14, %s2482_s16  ;;  %s20_s18 = sadd.s32 1, %s2438_s13 }
   0x4   : > { %p18_p0 = scmp.eq.s32.totalorder %s17_s17, 0  ;;  %p27_p1 = scmp.ne.s32.totalorder %s2438_s13, %s2434_s12 }
   0x5   : > { %p28_p2 = scmp.eq.s32.totalorder %s2442_s14, 0  ;;  %p1987_p4 = scmp.ge.s32.totalorder %s2442_s14, 2 }
   0x6   : > { %s2491_s19 = scalar_select %p18_p0, %s2438_s13, %s20_s18  }
   0x7   : > { %p29_p3 = por %p28_p2, %p27_p1  ;;  %127 = sbr.rel (%p1987_p4) target bundleno = 63 (0x3f), region = 24 }
   0xe   : > { %130 = sbr.rel (!%p29_p3) target bundleno = 63 (0x3f), region = 28  ;;  %s132_s20 = sand.u32 (%p29_p3), 1, %s2438_s13  }
   0xf   : > { %s2202_s21 = smul.u32 (%p29_p3), 176, %s2442_s14 }
  0x10   : > { %s2245_s22 = smul.u32 (%p29_p3), 704, %s132_s20 }
  0x11   : > { %s2499_s25 = scalar_lea.vmem (%p29_p3), %s3168_s0, %s2202_s21 }
  0x12   : > { %v340_v0 = vld [vmem:[%s2499_s25] sm:$0xff] (%p29_p3)  ;;  %v342_v1 = vld [vmem:[%s2499_s25 + $0x8] sm:$0xff] (%p29_p3)  ;;  %v344_v2 = vld [vmem:[%s2499_s25 + $0x10] sm:$0xff] (%p29_p3)  ;;  %s2504_s26 = scalar_lea.vmem (%p29_p3), [#allocation2], %s2245_s22 }
  0x13   : > { %341 = vst [vmem:[%s2504_s26] sm:$0xff] (%p29_p3), %v340_v0  ;;  %343 = vst [vmem:[%s2504_s26 + $0x8] sm:$0xff] (%p29_p3), %v342_v1  ;;  %v346_v3 = vld [vmem:[%s2499_s25 + $0x18] sm:$0xff] (%p29_p3)  ;;  %v348_v4 = vld [vmem:[%s2499_s25 + $0x20] sm:$0xff] (%p29_p3) }
  0x14   : > { %345 = vst [vmem:[%s2504_s26 + $0x10] sm:$0xff] (%p29_p3), %v344_v2  ;;  %v350_v5 = vld [vmem:[%s2499_s25 + $0x28] sm:$0xff] (%p29_p3)  ;;  %347 = vst [vmem:[%s2504_s26 + $0x18] sm:$0xff] (%p29_p3), %v346_v3  ;;  %v352_v6 = vld [vmem:[%s2499_s25 + $0x30] sm:$0xff] (%p29_p3) }
  0x15   : > { %349 = vst [vmem:[%s2504_s26 + $0x20] sm:$0xff] %v348_v4  ;;  %351 = vst [vmem:[%s2504_s26 + $0x28] sm:$0xff] %v350_v5  ;;  %v354_v7 = vld [vmem:[%s2499_s25 + $0x38] sm:$0xff]  ;;  %v356_v8 = vld [vmem:[%s2499_s25 + $0x40] sm:$0xff] }
  0x16   : > { %353 = vst [vmem:[%s2504_s26 + $0x30] sm:$0xff] %v352_v6  ;;  %355 = vst [vmem:[%s2504_s26 + $0x38] sm:$0xff] %v354_v7  ;;  %v358_v9 = vld [vmem:[%s2499_s25 + $0x48] sm:$0xff]  ;;  %v360_v10 = vld [vmem:[%s2499_s25 + $0x50] sm:$0xff] }
  0x17   : > { %357 = vst [vmem:[%s2504_s26 + $0x40] sm:$0xff] %v356_v8  ;;  %v362_v11 = vld [vmem:[%s2499_s25 + $0x58] sm:$0xff]  ;;  %359 = vst [vmem:[%s2504_s26 + $0x48] sm:$0xff] %v358_v9  ;;  %v364_v12 = vld [vmem:[%s2499_s25 + $0x60] sm:$0xff] }
  0x18   : > { %361 = vst [vmem:[%s2504_s26 + $0x50] sm:$0xff] %v360_v10  ;;  %363 = vst [vmem:[%s2504_s26 + $0x58] sm:$0xff] %v362_v11  ;;  %v366_v13 = vld [vmem:[%s2499_s25 + $0x68] sm:$0xff]  ;;  %v368_v14 = vld [vmem:[%s2499_s25 + $0x70] sm:$0xff] }
  0x19   : > { %365 = vst [vmem:[%s2504_s26 + $0x60] sm:$0xff] %v364_v12  ;;  %367 = vst [vmem:[%s2504_s26 + $0x68] sm:$0xff] %v366_v13  ;;  %v370_v15 = vld [vmem:[%s2499_s25 + $0x78] sm:$0xff]  ;;  %v372_v16 = vld [vmem:[%s2499_s25 + $0x80] sm:$0xff] }
  0x1a   : > { %369 = vst [vmem:[%s2504_s26 + $0x70] sm:$0xff] %v368_v14  ;;  %v374_v17 = vld [vmem:[%s2499_s25 + $0x88] sm:$0xff]  ;;  %371 = vst [vmem:[%s2504_s26 + $0x78] sm:$0xff] %v370_v15  ;;  %v376_v18 = vld [vmem:[%s2499_s25 + $0x90] sm:$0xff] }
  0x1b   : > { %373 = vst [vmem:[%s2504_s26 + $0x80] sm:$0xff] %v372_v16  ;;  %375 = vst [vmem:[%s2504_s26 + $0x88] sm:$0xff] %v374_v17  ;;  %v378_v19 = vld [vmem:[%s2499_s25 + $0x98] sm:$0xff]  ;;  %v380_v20 = vld [vmem:[%s2499_s25 + $0xa0] sm:$0xff] }
  0x1c   : > { %377 = vst [vmem:[%s2504_s26 + $0x90] sm:$0xff] %v376_v18  ;;  %379 = vst [vmem:[%s2504_s26 + $0x98] sm:$0xff] %v378_v19  ;;  %v382_v21 = vld [vmem:[%s2499_s25 + $0xa8] sm:$0xff]  ;;  %v384_v22 = vld [vmem:[%s2499_s25 + $0x160] sm:$0xff] }
  0x1d   : > { %381 = vst [vmem:[%s2504_s26 + $0xa0] sm:$0xff] %v380_v20  ;;  %v386_v23 = vld [vmem:[%s2499_s25 + $0x168] sm:$0xff]  ;;  %383 = vst [vmem:[%s2504_s26 + $0xa8] sm:$0xff] %v382_v21  ;;  %v388_v24 = vld [vmem:[%s2499_s25 + $0x170] sm:$0xff] }
  0x1e   : > { %385 = vst [vmem:[%s2504_s26 + $0xb0] sm:$0xff] %v384_v22  ;;  %387 = vst [vmem:[%s2504_s26 + $0xb8] sm:$0xff] %v386_v23  ;;  %v390_v25 = vld [vmem:[%s2499_s25 + $0x178] sm:$0xff]  ;;  %v392_v26 = vld [vmem:[%s2499_s25 + $0x180] sm:$0xff] }
  0x1f   : > { %389 = vst [vmem:[%s2504_s26 + $0xc0] sm:$0xff] %v388_v24  ;;  %391 = vst [vmem:[%s2504_s26 + $0xc8] sm:$0xff] %v390_v25  ;;  %v394_v27 = vld [vmem:[%s2499_s25 + $0x188] sm:$0xff]  ;;  %v396_v28 = vld [vmem:[%s2499_s25 + $0x190] sm:$0xff] }
  0x20   : > { %393 = vst [vmem:[%s2504_s26 + $0xd0] sm:$0xff] %v392_v26  ;;  %v398_v29 = vld [vmem:[%s2499_s25 + $0x198] sm:$0xff]  ;;  %395 = vst [vmem:[%s2504_s26 + $0xd8] sm:$0xff] %v394_v27  ;;  %v400_v30 = vld [vmem:[%s2499_s25 + $0x1a0] sm:$0xff] }
  0x21   : > { %397 = vst [vmem:[%s2504_s26 + $0xe0] sm:$0xff] %v396_v28  ;;  %399 = vst [vmem:[%s2504_s26 + $0xe8] sm:$0xff] %v398_v29  ;;  %v402_v31 = vld [vmem:[%s2499_s25 + $0x1a8] sm:$0xff]  ;;  %v404_v32 = vld [vmem:[%s2499_s25 + $0x1b0] sm:$0xff] }
  0x22   : > { %401 = vst [vmem:[%s2504_s26 + $0xf0] sm:$0xff] %v400_v30  ;;  %403 = vst [vmem:[%s2504_s26 + $0xf8] sm:$0xff] %v402_v31  ;;  %v406_v33 = vld [vmem:[%s2499_s25 + $0x1b8] sm:$0xff]  ;;  %v408_v34 = vld [vmem:[%s2499_s25 + $0x1c0] sm:$0xff] }
  0x23   : > { %405 = vst [vmem:[%s2504_s26 + $0x100] sm:$0xff] %v404_v32  ;;  %v410_v35 = vld [vmem:[%s2499_s25 + $0x1c8] sm:$0xff]  ;;  %407 = vst [vmem:[%s2504_s26 + $0x108] sm:$0xff] %v406_v33  ;;  %v412_v36 = vld [vmem:[%s2499_s25 + $0x1d0] sm:$0xff] }
  0x24   : > { %409 = vst [vmem:[%s2504_s26 + $0x110] sm:$0xff] %v408_v34  ;;  %411 = vst [vmem:[%s2504_s26 + $0x118] sm:$0xff] %v410_v35  ;;  %v414_v37 = vld [vmem:[%s2499_s25 + $0x1d8] sm:$0xff]  ;;  %v416_v38 = vld [vmem:[%s2499_s25 + $0x1e0] sm:$0xff] }
  0x25   : > { %413 = vst [vmem:[%s2504_s26 + $0x120] sm:$0xff] %v412_v36  ;;  %415 = vst [vmem:[%s2504_s26 + $0x128] sm:$0xff] %v414_v37  ;;  %v418_v39 = vld [vmem:[%s2499_s25 + $0x1e8] sm:$0xff]  ;;  %v420_v40 = vld [vmem:[%s2499_s25 + $0x1f0] sm:$0xff] }
  0x26   : > { %417 = vst [vmem:[%s2504_s26 + $0x130] sm:$0xff] %v416_v38  ;;  %v422_v41 = vld [vmem:[%s2499_s25 + $0x1f8] sm:$0xff]  ;;  %419 = vst [vmem:[%s2504_s26 + $0x138] sm:$0xff] %v418_v39  ;;  %v424_v42 = vld [vmem:[%s2499_s25 + $0x200] sm:$0xff] }
  0x27   : > { %421 = vst [vmem:[%s2504_s26 + $0x140] sm:$0xff] %v420_v40  ;;  %423 = vst [vmem:[%s2504_s26 + $0x148] sm:$0xff] %v422_v41  ;;  %v426_v43 = vld [vmem:[%s2499_s25 + $0x208] sm:$0xff]  ;;  %v428_v44 = vld [vmem:[%s2499_s25 + $0x2c0] sm:$0xff] }
  0x28   : > { %425 = vst [vmem:[%s2504_s26 + $0x150] sm:$0xff] %v424_v42  ;;  %427 = vst [vmem:[%s2504_s26 + $0x158] sm:$0xff] %v426_v43  ;;  %v430_v45 = vld [vmem:[%s2499_s25 + $0x2c8] sm:$0xff]  ;;  %v432_v46 = vld [vmem:[%s2499_s25 + $0x2d0] sm:$0xff] }
  0x29   : > { %429 = vst [vmem:[%s2504_s26 + $0x160] sm:$0xff] %v428_v44  ;;  %v434_v47 = vld [vmem:[%s2499_s25 + $0x2d8] sm:$0xff]  ;;  %431 = vst [vmem:[%s2504_s26 + $0x168] sm:$0xff] %v430_v45  ;;  %v436_v48 = vld [vmem:[%s2499_s25 + $0x2e0] sm:$0xff] }
  0x2a   : > { %433 = vst [vmem:[%s2504_s26 + $0x170] sm:$0xff] %v432_v46  ;;  %435 = vst [vmem:[%s2504_s26 + $0x178] sm:$0xff] %v434_v47  ;;  %v438_v49 = vld [vmem:[%s2499_s25 + $0x2e8] sm:$0xff]  ;;  %v440_v50 = vld [vmem:[%s2499_s25 + $0x2f0] sm:$0xff] }
  0x2b   : > { %437 = vst [vmem:[%s2504_s26 + $0x180] sm:$0xff] %v436_v48  ;;  %439 = vst [vmem:[%s2504_s26 + $0x188] sm:$0xff] %v438_v49  ;;  %v442_v51 = vld [vmem:[%s2499_s25 + $0x2f8] sm:$0xff]  ;;  %v444_v52 = vld [vmem:[%s2499_s25 + $0x300] sm:$0xff] }
  0x2c   : > { %441 = vst [vmem:[%s2504_s26 + $0x190] sm:$0xff] %v440_v50  ;;  %v446_v53 = vld [vmem:[%s2499_s25 + $0x308] sm:$0xff]  ;;  %443 = vst [vmem:[%s2504_s26 + $0x198] sm:$0xff] %v442_v51  ;;  %v448_v54 = vld [vmem:[%s2499_s25 + $0x310] sm:$0xff] }
  0x2d   : > { %445 = vst [vmem:[%s2504_s26 + $0x1a0] sm:$0xff] %v444_v52  ;;  %447 = vst [vmem:[%s2504_s26 + $0x1a8] sm:$0xff] %v446_v53  ;;  %v450_v55 = vld [vmem:[%s2499_s25 + $0x318] sm:$0xff]  ;;  %v452_v56 = vld [vmem:[%s2499_s25 + $0x320] sm:$0xff] }
  0x2e   : > { %449 = vst [vmem:[%s2504_s26 + $0x1b0] sm:$0xff] %v448_v54  ;;  %451 = vst [vmem:[%s2504_s26 + $0x1b8] sm:$0xff] %v450_v55  ;;  %v454_v57 = vld [vmem:[%s2499_s25 + $0x328] sm:$0xff]  ;;  %v456_v58 = vld [vmem:[%s2499_s25 + $0x330] sm:$0xff] }
  0x2f   : > { %453 = vst [vmem:[%s2504_s26 + $0x1c0] sm:$0xff] %v452_v56  ;;  %v458_v59 = vld [vmem:[%s2499_s25 + $0x338] sm:$0xff]  ;;  %455 = vst [vmem:[%s2504_s26 + $0x1c8] sm:$0xff] %v454_v57  ;;  %v460_v60 = vld [vmem:[%s2499_s25 + $0x340] sm:$0xff] }
  0x30   : > { %457 = vst [vmem:[%s2504_s26 + $0x1d0] sm:$0xff] %v456_v58  ;;  %459 = vst [vmem:[%s2504_s26 + $0x1d8] sm:$0xff] %v458_v59  ;;  %v462_v61 = vld [vmem:[%s2499_s25 + $0x348] sm:$0xff]  ;;  %v464_v62 = vld [vmem:[%s2499_s25 + $0x350] sm:$0xff] }
  0x31   : > { %461 = vst [vmem:[%s2504_s26 + $0x1e0] sm:$0xff] %v460_v60  ;;  %463 = vst [vmem:[%s2504_s26 + $0x1e8] sm:$0xff] %v462_v61  ;;  %v466_v63 = vld [vmem:[%s2499_s25 + $0x358] sm:$0xff]  ;;  %v468_v0 = vld [vmem:[%s2499_s25 + $0x360] sm:$0xff] }
  0x32   : > { %465 = vst [vmem:[%s2504_s26 + $0x1f0] sm:$0xff] %v464_v62  ;;  %v470_v1 = vld [vmem:[%s2499_s25 + $0x368] sm:$0xff]  ;;  %467 = vst [vmem:[%s2504_s26 + $0x1f8] sm:$0xff] %v466_v63  ;;  %v472_v2 = vld [vmem:[%s2499_s25 + $0x420] sm:$0xff] }
  0x33   : > { %469 = vst [vmem:[%s2504_s26 + $0x200] sm:$0xff] %v468_v0  ;;  %471 = vst [vmem:[%s2504_s26 + $0x208] sm:$0xff] %v470_v1  ;;  %v474_v3 = vld [vmem:[%s2499_s25 + $0x428] sm:$0xff]  ;;  %v476_v4 = vld [vmem:[%s2499_s25 + $0x430] sm:$0xff] }
  0x34   : > { %473 = vst [vmem:[%s2504_s26 + $0x210] sm:$0xff] %v472_v2  ;;  %475 = vst [vmem:[%s2504_s26 + $0x218] sm:$0xff] %v474_v3  ;;  %v478_v5 = vld [vmem:[%s2499_s25 + $0x438] sm:$0xff]  ;;  %v480_v6 = vld [vmem:[%s2499_s25 + $0x440] sm:$0xff] }
  0x35   : > { %477 = vst [vmem:[%s2504_s26 + $0x220] sm:$0xff] %v476_v4  ;;  %v482_v7 = vld [vmem:[%s2499_s25 + $0x448] sm:$0xff]  ;;  %479 = vst [vmem:[%s2504_s26 + $0x228] sm:$0xff] %v478_v5  ;;  %v484_v8 = vld [vmem:[%s2499_s25 + $0x450] sm:$0xff] }
  0x36   : > { %481 = vst [vmem:[%s2504_s26 + $0x230] sm:$0xff] %v480_v6  ;;  %483 = vst [vmem:[%s2504_s26 + $0x238] sm:$0xff] %v482_v7  ;;  %v486_v9 = vld [vmem:[%s2499_s25 + $0x458] sm:$0xff]  ;;  %v488_v10 = vld [vmem:[%s2499_s25 + $0x460] sm:$0xff] }
  0x37   : > { %485 = vst [vmem:[%s2504_s26 + $0x240] sm:$0xff] %v484_v8  ;;  %487 = vst [vmem:[%s2504_s26 + $0x248] sm:$0xff] %v486_v9  ;;  %v490_v11 = vld [vmem:[%s2499_s25 + $0x468] sm:$0xff]  ;;  %v492_v12 = vld [vmem:[%s2499_s25 + $0x470] sm:$0xff] }
  0x38   : > { %489 = vst [vmem:[%s2504_s26 + $0x250] sm:$0xff] %v488_v10  ;;  %v494_v13 = vld [vmem:[%s2499_s25 + $0x478] sm:$0xff]  ;;  %491 = vst [vmem:[%s2504_s26 + $0x258] sm:$0xff] %v490_v11  ;;  %v496_v14 = vld [vmem:[%s2499_s25 + $0x480] sm:$0xff] }
  0x39   : > { %493 = vst [vmem:[%s2504_s26 + $0x260] sm:$0xff] %v492_v12  ;;  %495 = vst [vmem:[%s2504_s26 + $0x268] sm:$0xff] %v494_v13  ;;  %v498_v15 = vld [vmem:[%s2499_s25 + $0x488] sm:$0xff]  ;;  %v500_v16 = vld [vmem:[%s2499_s25 + $0x490] sm:$0xff] }
  0x3a   : > { %497 = vst [vmem:[%s2504_s26 + $0x270] sm:$0xff] %v496_v14  ;;  %499 = vst [vmem:[%s2504_s26 + $0x278] sm:$0xff] %v498_v15  ;;  %v502_v17 = vld [vmem:[%s2499_s25 + $0x498] sm:$0xff]  ;;  %v504_v18 = vld [vmem:[%s2499_s25 + $0x4a0] sm:$0xff] }
  0x3b   : > { %501 = vst [vmem:[%s2504_s26 + $0x280] sm:$0xff] %v500_v16  ;;  %v506_v19 = vld [vmem:[%s2499_s25 + $0x4a8] sm:$0xff]  ;;  %503 = vst [vmem:[%s2504_s26 + $0x288] sm:$0xff] %v502_v17  ;;  %v508_v20 = vld [vmem:[%s2499_s25 + $0x4b0] sm:$0xff] }
  0x3c   : > { %505 = vst [vmem:[%s2504_s26 + $0x290] sm:$0xff] %v504_v18  ;;  %507 = vst [vmem:[%s2504_s26 + $0x298] sm:$0xff] %v506_v19  ;;  %v510_v21 = vld [vmem:[%s2499_s25 + $0x4b8] sm:$0xff]  ;;  %v512_v22 = vld [vmem:[%s2499_s25 + $0x4c0] sm:$0xff] }
  0x3d   : > { %509 = vst [vmem:[%s2504_s26 + $0x2a0] sm:$0xff] %v508_v20  ;;  %511 = vst [vmem:[%s2504_s26 + $0x2a8] sm:$0xff] %v510_v21  ;;  %v514_v23 = vld [vmem:[%s2499_s25 + $0x4c8] sm:$0xff] }
  0x3e   : > { %513 = vst [vmem:[%s2504_s26 + $0x2b0] sm:$0xff] %v512_v22  ;;  %515 = vst [vmem:[%s2504_s26 + $0x2b8] sm:$0xff] %v514_v23 }
  0x3f PF: > { %p1990_p5 = scmp.ge.s32.totalorder %s2442_s14, 1  ;;  %p520_p6 = scmp.lt.s32.totalorder %s2442_s14, 3 }
  0x41   : > { %p521_p7 = pnand %p1990_p5, %p520_p6 }
  0x42   : > { %v2272_v24 = vld [vmem:[%s3169_s1] sm:$0xff] (!%p521_p7)   ;;  %v2444_v25 = vmov (!%p521_p7), 0   ;;  %v2273_v26 = vld [vmem:[%s3169_s1 + $0x8] sm:$0xff] (!%p521_p7)   ;;  %v2274_v27 = vld [vmem:[%s3169_s1 + $0x10] sm:$0xff] (!%p521_p7)   ;;  %s527_s6 = sand.u32 (!%p521_p7), 1, %s2434_s12   ;;  %s2951_s20 = smul.u32 (!%p521_p7), 22, %s1984_s15 }
  0x43   : > { %524 = sbr.rel (%p521_p7) target bundleno = 528 (0x210), region = 66  ;;  %1219 = vmatprep.subr.bf16.mxu0 (!%p521_p7), %v2444_v25  ;;  %2213 = vmatprep.subr.bf16.mxu1 (!%p521_p7), %v2444_v25  ;;  %v2275_v28 = vld [vmem:[%s3169_s1 + $0x18] sm:$0xff] (!%p521_p7)   ;;  %v2276_v29 = vld [vmem:[%s3169_s1 + $0x20] sm:$0xff] (!%p521_p7)   ;;  %v2277_v31 = vld [vmem:[%s3169_s1 + $0x28] sm:$0xff] (!%p521_p7)  }
  0x44   : > { %1220 = vmatpush1.bf16.msra.mxu0 (!%p521_p7), %v2272_v24  ;;  %2229 = vmatpush1.bf16.msra.mxu1 (!%p521_p7), %v2272_v24  ;;  %s2246_s9 = smul.u32 (!%p521_p7), 704, %s527_s6  ;;  %v2278_v33 = vld [vmem:[%s3169_s1 + $0x30] sm:$0xff] (!%p521_p7)   ;;  %v2279_v34 = vld [vmem:[%s3169_s1 + $0x38] sm:$0xff] (!%p521_p7)   ;;  %v2280_v35 = vld [vmem:[%s3169_s1 + $0x40] sm:$0xff] (!%p521_p7)   ;;  %p552_p8 = scmp.lt.s32.totalorder (!%p521_p7), %s2951_s20, 43 }
  0x45   : > { %1221 = vmatprep.subr.bf16.mxu0 (!%p521_p7), %v2444_v25  ;;  %2214 = vmatprep.subr.bf16.mxu1 (!%p521_p7), %v2444_v25  ;;  %v2281_v36 = vld [vmem:[%s3169_s1 + $0x48] sm:$0xff] (!%p521_p7)   ;;  %v2282_v37 = vld [vmem:[%s3169_s1 + $0x50] sm:$0xff] (!%p521_p7)   ;;  %v2283_v38 = vld [vmem:[%s3169_s1 + $0x58] sm:$0xff] (!%p521_p7)  }
  0x46   : > { %s2707_s12 = scalar_lea.vmem (!%p521_p7), [#allocation2], %s2246_s9  ;;  %v2284_v39 = vld [vmem:[%s3169_s1 + $0x60] sm:$0xff] (!%p521_p7)   ;;  %v2285_v40 = vld [vmem:[%s3169_s1 + $0x68] sm:$0xff] (!%p521_p7)   ;;  %v2286_v41 = vld [vmem:[%s3169_s1 + $0x70] sm:$0xff] (!%p521_p7)  }
  0x47   : > { %v2290_v30 = vld [vmem:[%s2707_s12 + $0x4] ss:$8 sps:$4 sm:$0xff] (!%p521_p7)   ;;  %v2287_v42 = vld [vmem:[%s3169_s1 + $0x78] sm:$0xff] (!%p521_p7)   ;;  %v2288_v43 = vld [vmem:[%s2707_s12] ss:$8 sps:$4 sm:$0xff] (!%p521_p7)  }
  0x48   : > { %1222 = vmatpush1.bf16.msra.mxu0 (!%p521_p7), %v2273_v26  ;;  %2230 = vmatpush1.bf16.msra.mxu1 (!%p521_p7), %v2273_v26  ;;  %v2293_v32 = vld [vmem:[%s2707_s12 + $0x164] ss:$8 sps:$4 sm:$0xff] (!%p521_p7)   ;;  %v2291_v44 = vld [vmem:[%s2707_s12 + $0x160] ss:$8 sps:$4 sm:$0xff] (!%p521_p7)   ;;  %v2294_v45 = vld [vmem:[%s2707_s12 + $0x14] ss:$8 sps:$4 sm:$0xff] (!%p521_p7)  }
  0x49   : > { %1223 = vmatprep.subr.bf16.mxu0 (!%p521_p7), %v2444_v25  ;;  %2215 = vmatprep.subr.bf16.mxu1 (!%p521_p7), %v2444_v25  ;;  %v2296_v46 = vld [vmem:[%s2707_s12 + $0x174] ss:$8 sps:$4 sm:$0xff] (!%p521_p7)   ;;  %v2298_v47 = vld [vmem:[%s2707_s12 + $0x10] ss:$8 sps:$4 sm:$0xff] (!%p521_p7)   ;;  %v2300_v49 = vld [vmem:[%s2707_s12 + $0x24] ss:$8 sps:$4 sm:$0xff] (!%p521_p7)  }
  0x4a   : > { %1251 = vmatprep.mubr.bf16.mxu0 %v2290_v30  ;;  %1427 = vmatprep.mubr.bf16.mxu1 %v2293_v32  ;;  %v2299_v48 = vld [vmem:[%s2707_s12 + $0x170] ss:$8 sps:$4 sm:$0xff]   ;;  %v2302_v50 = vld [vmem:[%s2707_s12 + $0x184] ss:$8 sps:$4 sm:$0xff]   ;;  %v2304_v51 = vld [vmem:[%s2707_s12 + $0x20] ss:$8 sps:$4 sm:$0xff]  }
  0x4b   : > { %v2305_v52 = vld [vmem:[%s2707_s12 + $0x180] ss:$8 sps:$4 sm:$0xff]   ;;  %v2306_v53 = vld [vmem:[%s2707_s12 + $0x34] ss:$8 sps:$4 sm:$0xff]   ;;  %v2310_v55 = vld [vmem:[%s2707_s12 + $0x30] ss:$8 sps:$4 sm:$0xff]  }
  0x4c   : > { %1224 = vmatpush1.bf16.msra.mxu0 %v2274_v27  ;;  %2231 = vmatpush1.bf16.msra.mxu1 %v2274_v27  ;;  %v2308_v54 = vld [vmem:[%s2707_s12 + $0x194] ss:$8 sps:$4 sm:$0xff]   ;;  %v2311_v56 = vld [vmem:[%s2707_s12 + $0x190] ss:$8 sps:$4 sm:$0xff]   ;;  %v2312_v57 = vld [vmem:[%s2707_s12 + $0x44] ss:$8 sps:$4 sm:$0xff]  }
  0x4d   : > { %1225 = vmatprep.subr.bf16.mxu0 %v2444_v25  ;;  %2216 = vmatprep.subr.bf16.mxu1 %v2444_v25  ;;  %v2314_v58 = vld [vmem:[%s2707_s12 + $0x1a4] ss:$8 sps:$4 sm:$0xff]   ;;  %v2316_v59 = vld [vmem:[%s2707_s12 + $0x40] ss:$8 sps:$4 sm:$0xff]   ;;  %v2318_v61 = vld [vmem:[%s2707_s12 + $0x54] ss:$8 sps:$4 sm:$0xff]  }
  0x4e   : > { %v2317_v60 = vld [vmem:[%s2707_s12 + $0x1a0] ss:$8 sps:$4 sm:$0xff]   ;;  %v2320_v62 = vld [vmem:[%s2707_s12 + $0x1b4] ss:$8 sps:$4 sm:$0xff]   ;;  %v2322_v63 = vld [vmem:[%s2707_s12 + $0x50] ss:$8 sps:$4 sm:$0xff]  }
  0x4f   : > { %v2323_v0 = vld [vmem:[%s2707_s12 + $0x1b0] ss:$8 sps:$4 sm:$0xff]   ;;  %v2324_v1 = vld [vmem:[%s2707_s12 + $0x64] ss:$8 sps:$4 sm:$0xff]   ;;  %v2328_v3 = vld [vmem:[%s2707_s12 + $0x60] ss:$8 sps:$4 sm:$0xff]  }
  0x50   : > { %1226 = vmatpush1.bf16.msra.mxu0 %v2275_v28  ;;  %2232 = vmatpush1.bf16.msra.mxu1 %v2275_v28  ;;  %v2326_v2 = vld [vmem:[%s2707_s12 + $0x1c4] ss:$8 sps:$4 sm:$0xff]   ;;  %v2329_v4 = vld [vmem:[%s2707_s12 + $0x1c0] ss:$8 sps:$4 sm:$0xff]   ;;  %v2330_v5 = vld [vmem:[%s2707_s12 + $0x74] ss:$8 sps:$4 sm:$0xff]  }
  0x51   : > { %1227 = vmatprep.subr.bf16.mxu0 %v2444_v25  ;;  %2217 = vmatprep.subr.bf16.mxu1 %v2444_v25  ;;  %v2332_v6 = vld [vmem:[%s2707_s12 + $0x1d4] ss:$8 sps:$4 sm:$0xff]   ;;  %v2334_v7 = vld [vmem:[%s2707_s12 + $0x70] ss:$8 sps:$4 sm:$0xff]   ;;  %v2336_v9 = vld [vmem:[%s2707_s12 + $0x84] ss:$8 sps:$4 sm:$0xff]  }
  0x52   : > { %v2335_v8 = vld [vmem:[%s2707_s12 + $0x1d0] ss:$8 sps:$4 sm:$0xff]   ;;  %v2338_v10 = vld [vmem:[%s2707_s12 + $0x1e4] ss:$8 sps:$4 sm:$0xff]   ;;  %v2340_v11 = vld [vmem:[%s2707_s12 + $0x80] ss:$8 sps:$4 sm:$0xff]  }
  0x53   : > { %v2341_v12 = vld [vmem:[%s2707_s12 + $0x1e0] ss:$8 sps:$4 sm:$0xff]   ;;  %v2342_v13 = vld [vmem:[%s2707_s12 + $0x94] ss:$8 sps:$4 sm:$0xff]   ;;  %v2346_v15 = vld [vmem:[%s2707_s12 + $0x90] ss:$8 sps:$4 sm:$0xff]  }
  0x54   : > { %1228 = vmatpush1.bf16.msra.mxu0 %v2276_v29  ;;  %2233 = vmatpush1.bf16.msra.mxu1 %v2276_v29  ;;  %v2344_v14 = vld [vmem:[%s2707_s12 + $0x1f4] ss:$8 sps:$4 sm:$0xff]   ;;  %v2347_v16 = vld [vmem:[%s2707_s12 + $0x1f0] ss:$8 sps:$4 sm:$0xff]   ;;  %v2348_v17 = vld [vmem:[%s2707_s12 + $0xa4] ss:$8 sps:$4 sm:$0xff]  }
  0x55   : > { %1229 = vmatprep.subr.bf16.mxu0 %v2444_v25  ;;  %2218 = vmatprep.subr.bf16.mxu1 %v2444_v25  ;;  %v2350_v18 = vld [vmem:[%s2707_s12 + $0x204] ss:$8 sps:$4 sm:$0xff]   ;;  %v2352_v19 = vld [vmem:[%s2707_s12 + $0xa0] ss:$8 sps:$4 sm:$0xff]   ;;  %v2354_v21 = vld [vmem:[%s2707_s12 + $0xb4] ss:$8 sps:$4 sm:$0xff]  }
  0x56   : > { %v2353_v20 = vld [vmem:[%s2707_s12 + $0x200] ss:$8 sps:$4 sm:$0xff]   ;;  %v2356_v22 = vld [vmem:[%s2707_s12 + $0x214] ss:$8 sps:$4 sm:$0xff]   ;;  %v2358_v23 = vld [vmem:[%s2707_s12 + $0xb0] ss:$8 sps:$4 sm:$0xff]  }
  0x57   : > { %v2359_v24 = vld [vmem:[%s2707_s12 + $0x210] ss:$8 sps:$4 sm:$0xff]   ;;  %v2362_v26 = vld [vmem:[%s2707_s12 + $0x224] ss:$8 sps:$4 sm:$0xff]   ;;  %v2364_v27 = vld [vmem:[%s2707_s12 + $0xc0] ss:$8 sps:$4 sm:$0xff]  }
  0x58   : > { %1230 = vmatpush1.bf16.msra.mxu0 %v2277_v31  ;;  %2234 = vmatpush1.bf16.msra.mxu1 %v2277_v31  ;;  %v2365_v28 = vld [vmem:[%s2707_s12 + $0x220] ss:$8 sps:$4 sm:$0xff]   ;;  %v2366_v29 = vld [vmem:[%s2707_s12 + $0xd4] ss:$8 sps:$4 sm:$0xff]   ;;  %v2370_v31 = vld [vmem:[%s2707_s12 + $0xd0] ss:$8 sps:$4 sm:$0xff]  }
  0x59   : > { %1231 = vmatprep.subr.bf16.mxu0 %v2444_v25  ;;  %2219 = vmatprep.subr.bf16.mxu1 %v2444_v25  ;;  %v2368_v30 = vld [vmem:[%s2707_s12 + $0x234] ss:$8 sps:$4 sm:$0xff]   ;;  %v2371_v32 = vld [vmem:[%s2707_s12 + $0x230] ss:$8 sps:$4 sm:$0xff]   ;;  %s3176_s20 = smov (!%p552_p8, %s2951_s20), 43 }
  0x5a   : > { %s1991_s23 = sshll.u32 %s3176_s20, 2 }
  0x5b   : > { %s2999_s26 = scalar_lea.vmem %s3171_s3, %s1991_s23 }
  0x5c   : > { %1232 = vmatpush1.bf16.msra.mxu0 %v2278_v33  ;;  %2235 = vmatpush1.bf16.msra.mxu1 %v2278_v33  ;;  %v2372_v33 = vld [vmem:[%s2707_s12 + $0xe4] ss:$8 sps:$4 sm:$0xff]  }
  0x5d   : > { %1233 = vmatprep.subr.bf16.mxu0 %v2444_v25  ;;  %2220 = vmatprep.subr.bf16.mxu1 %v2444_v25 }
  0x60   : > { %1234 = vmatpush1.bf16.msra.mxu0 %v2279_v34  ;;  %2236 = vmatpush1.bf16.msra.mxu1 %v2279_v34  ;;  %v2374_v34 = vld [vmem:[%s2707_s12 + $0x244] ss:$8 sps:$4 sm:$0xff]  }
  0x61   : > { %1235 = vmatprep.subr.bf16.mxu0 %v2444_v25  ;;  %2221 = vmatprep.subr.bf16.mxu1 %v2444_v25 }
  0x64   : > { %1236 = vmatpush1.bf16.msra.mxu0 %v2280_v35  ;;  %2237 = vmatpush1.bf16.msra.mxu1 %v2280_v35  ;;  %v2376_v35 = vld [vmem:[%s2707_s12 + $0xe0] ss:$8 sps:$4 sm:$0xff]  }
  0x65   : > { %1237 = vmatprep.subr.bf16.mxu0 %v2444_v25  ;;  %2222 = vmatprep.subr.bf16.mxu1 %v2444_v25 }
  0x68   : > { %1238 = vmatpush1.bf16.msra.mxu0 %v2281_v36  ;;  %2238 = vmatpush1.bf16.msra.mxu1 %v2281_v36  ;;  %v2377_v36 = vld [vmem:[%s2707_s12 + $0x240] ss:$8 sps:$4 sm:$0xff]  }
  0x69   : > { %1239 = vmatprep.subr.bf16.mxu0 %v2444_v25  ;;  %2223 = vmatprep.subr.bf16.mxu1 %v2444_v25 }
  0x6c   : > { %1240 = vmatpush1.bf16.msra.mxu0 %v2282_v37  ;;  %2239 = vmatpush1.bf16.msra.mxu1 %v2282_v37  ;;  %v2378_v37 = vld [vmem:[%s2707_s12 + $0xf4] ss:$8 sps:$4 sm:$0xff]  }
  0x6d   : > { %1241 = vmatprep.subr.bf16.mxu0 %v2444_v25  ;;  %2224 = vmatprep.subr.bf16.mxu1 %v2444_v25 }
  0x70   : > { %1242 = vmatpush1.bf16.msra.mxu0 %v2283_v38  ;;  %2240 = vmatpush1.bf16.msra.mxu1 %v2283_v38  ;;  %v2380_v38 = vld [vmem:[%s2707_s12 + $0x254] ss:$8 sps:$4 sm:$0xff]  }
  0x71   : > { %1243 = vmatprep.subr.bf16.mxu0 %v2444_v25  ;;  %2225 = vmatprep.subr.bf16.mxu1 %v2444_v25 }
  0x74   : > { %1244 = vmatpush1.bf16.msra.mxu0 %v2284_v39  ;;  %2241 = vmatpush1.bf16.msra.mxu1 %v2284_v39  ;;  %v2382_v39 = vld [vmem:[%s2707_s12 + $0xf0] ss:$8 sps:$4 sm:$0xff]  }
  0x75   : > { %1245 = vmatprep.subr.bf16.mxu0 %v2444_v25  ;;  %2226 = vmatprep.subr.bf16.mxu1 %v2444_v25 }
  0x78   : > { %1246 = vmatpush1.bf16.msra.mxu0 %v2285_v40  ;;  %2242 = vmatpush1.bf16.msra.mxu1 %v2285_v40  ;;  %v2383_v40 = vld [vmem:[%s2707_s12 + $0x250] ss:$8 sps:$4 sm:$0xff]  }
  0x79   : > { %1247 = vmatprep.subr.bf16.mxu0 %v2444_v25  ;;  %2227 = vmatprep.subr.bf16.mxu1 %v2444_v25 }
  0x7c   : > { %1248 = vmatpush1.bf16.msra.mxu0 %v2286_v41  ;;  %2243 = vmatpush1.bf16.msra.mxu1 %v2286_v41  ;;  %v2384_v41 = vld [vmem:[%s2707_s12 + $0x104] ss:$8 sps:$4 sm:$0xff]  }
  0x7d   : > { %1249 = vmatprep.subr.bf16.mxu0 %v2444_v25  ;;  %2228 = vmatprep.subr.bf16.mxu1 %v2444_v25  ;;  %v2360_v25 = vld [vmem:[%s2707_s12 + $0xc4] ss:$8 sps:$4 sm:$0xff]  }
  0x80   : > { %1250 = vmatpush1.bf16.msra.mxu0 %v2287_v42  ;;  %2244 = vmatpush1.bf16.msra.mxu1 %v2287_v42  ;;  %v2386_v42 = vld [vmem:[%s2707_s12 + $0x264] ss:$8 sps:$4 sm:$0xff]  }
  0x83   : > { %1252 = vmatmul.mubr.bf16.vlgmr.msra.gmra.mrb[0].mxu0 %v2288_v43  ;;  %1428 = vmatmul.mubr.bf16.vlgmr.msra.gmra.mrb[0].mxu1 %v2291_v44  ;;  %v2388_v43 = vld [vmem:[%s2707_s12 + $0x100] ss:$8 sps:$4 sm:$0xff]  }
  0x84   : > { %1259 = vmatprep.mubr.bf16.mxu0 %v2294_v45  ;;  %1435 = vmatprep.mubr.bf16.mxu1 %v2296_v46  ;;  %v2389_v44 = vld [vmem:[%s2707_s12 + $0x260] ss:$8 sps:$4 sm:$0xff]   ;;  %v2390_v45 = vld [vmem:[%s2707_s12 + $0x114] ss:$8 sps:$4 sm:$0xff]  }
  0x85   : > { %v2392_v46 = vld [vmem:[%s2707_s12 + $0x274] ss:$8 sps:$4 sm:$0xff]  }
  0x8b   : > { %1260 = vmatmul.mubr.bf16.gmra.mrb[4].mxu0 %v2298_v47  ;;  %1436 = vmatmul.mubr.bf16.gmra.mrb[4].mxu1 %v2299_v48  ;;  %v2394_v47 = vld [vmem:[%s2707_s12 + $0x110] ss:$8 sps:$4 sm:$0xff]  }
  0x8c   : > { %1267 = vmatprep.mubr.bf16.mxu0 %v2300_v49  ;;  %1443 = vmatprep.mubr.bf16.mxu1 %v2302_v50  ;;  %v2395_v48 = vld [vmem:[%s2707_s12 + $0x270] ss:$8 sps:$4 sm:$0xff]   ;;  %v2396_v49 = vld [vmem:[%s2707_s12 + $0x124] ss:$8 sps:$4 sm:$0xff]  }
  0x8d   : > { %v2398_v50 = vld [vmem:[%s2707_s12 + $0x284] ss:$8 sps:$4 sm:$0xff]  }
  0x93   : > { %1268 = vmatmul.mubr.bf16.gmra.mrb[8].mxu0 %v2304_v51  ;;  %1444 = vmatmul.mubr.bf16.gmra.mrb[8].mxu1 %v2305_v52  ;;  %v2400_v51 = vld [vmem:[%s2707_s12 + $0x120] ss:$8 sps:$4 sm:$0xff]  }
  0x94   : > { %1275 = vmatprep.mubr.bf16.mxu0 %v2306_v53  ;;  %1451 = vmatprep.mubr.bf16.mxu1 %v2308_v54  ;;  %v2401_v52 = vld [vmem:[%s2707_s12 + $0x280] ss:$8 sps:$4 sm:$0xff]   ;;  %v2402_v53 = vld [vmem:[%s2707_s12 + $0x134] ss:$8 sps:$4 sm:$0xff]  }
  0x95   : > { %v2404_v54 = vld [vmem:[%s2707_s12 + $0x294] ss:$8 sps:$4 sm:$0xff]  }
  0x9b   : > { %1276 = vmatmul.mubr.bf16.gmra.mrb[12].mxu0 %v2310_v55  ;;  %1452 = vmatmul.mubr.bf16.gmra.mrb[12].mxu1 %v2311_v56  ;;  %v2406_v55 = vld [vmem:[%s2707_s12 + $0x130] ss:$8 sps:$4 sm:$0xff]  }
  0x9c   : > { %1283 = vmatprep.mubr.bf16.mxu0 %v2312_v57  ;;  %1459 = vmatprep.mubr.bf16.mxu1 %v2314_v58  ;;  %v2407_v56 = vld [vmem:[%s2707_s12 + $0x290] ss:$8 sps:$4 sm:$0xff]   ;;  %v2408_v57 = vld [vmem:[%s2707_s12 + $0x144] ss:$8 sps:$4 sm:$0xff]  }
  0x9d   : > { %v2410_v58 = vld [vmem:[%s2707_s12 + $0x2a4] ss:$8 sps:$4 sm:$0xff]  }
  0xa3   : > { %1284 = vmatmul.mubr.bf16.gmra.mrb[16].mxu0 %v2316_v59  ;;  %1460 = vmatmul.mubr.bf16.gmra.mrb[16].mxu1 %v2317_v60  ;;  %v2412_v59 = vld [vmem:[%s2707_s12 + $0x140] ss:$8 sps:$4 sm:$0xff]  }
  0xa4   : > { %1291 = vmatprep.mubr.bf16.mxu0 %v2318_v61  ;;  %1467 = vmatprep.mubr.bf16.mxu1 %v2320_v62  ;;  %v2413_v60 = vld [vmem:[%s2707_s12 + $0x2a0] ss:$8 sps:$4 sm:$0xff]   ;;  %v2414_v61 = vld [vmem:[%s2707_s12 + $0x154] ss:$8 sps:$4 sm:$0xff]  }
  0xa5   : > { %v2416_v62 = vld [vmem:[%s2707_s12 + $0x2b4] ss:$8 sps:$4 sm:$0xff]  }
  0xab   : > { %1292 = vmatmul.mubr.bf16.gmra.mrb[20].mxu0 %v2322_v63  ;;  %1468 = vmatmul.mubr.bf16.gmra.mrb[20].mxu1 %v2323_v0  ;;  %v2418_v63 = vld [vmem:[%s2707_s12 + $0x150] ss:$8 sps:$4 sm:$0xff]  }
  0xac   : > { %1299 = vmatprep.mubr.bf16.mxu0 %v2324_v1  ;;  %1475 = vmatprep.mubr.bf16.mxu1 %v2326_v2  ;;  %v2419_v0 = vld [vmem:[%s2707_s12 + $0x2b0] ss:$8 sps:$4 sm:$0xff]  }
  0xb3   : > { %1300 = vmatmul.mubr.bf16.gmra.mrb[24].mxu0 %v2328_v3  ;;  %1476 = vmatmul.mubr.bf16.gmra.mrb[24].mxu1 %v2329_v4 }
  0xb4   : > { %1307 = vmatprep.mubr.bf16.mxu0 %v2330_v5  ;;  %1483 = vmatprep.mubr.bf16.mxu1 %v2332_v6 }
  0xbb   : > { %1308 = vmatmul.mubr.bf16.gmra.mrb[28].mxu0 %v2334_v7  ;;  %1484 = vmatmul.mubr.bf16.gmra.mrb[28].mxu1 %v2335_v8 }
  0xbc   : > { %1315 = vmatprep.mubr.bf16.mxu0 %v2336_v9  ;;  %1491 = vmatprep.mubr.bf16.mxu1 %v2338_v10 }
  0xc3   : > { %1316 = vmatmul.mubr.bf16.gmra.mrb[32].mxu0 %v2340_v11  ;;  %1492 = vmatmul.mubr.bf16.gmra.mrb[32].mxu1 %v2341_v12 }
  0xc4   : > { %1323 = vmatprep.mubr.bf16.mxu0 %v2342_v13  ;;  %1499 = vmatprep.mubr.bf16.mxu1 %v2344_v14 }
  0xcb   : > { %1324 = vmatmul.mubr.bf16.gmra.mrb[36].mxu0 %v2346_v15  ;;  %1500 = vmatmul.mubr.bf16.gmra.mrb[36].mxu1 %v2347_v16 }
  0xcc   : > { %1331 = vmatprep.mubr.bf16.mxu0 %v2348_v17  ;;  %1507 = vmatprep.mubr.bf16.mxu1 %v2350_v18 }
  0xd3   : > { %1332 = vmatmul.mubr.bf16.gmra.mrb[40].mxu0 %v2352_v19  ;;  %1508 = vmatmul.mubr.bf16.gmra.mrb[40].mxu1 %v2353_v20 }
  0xd4   : > { %1339 = vmatprep.mubr.bf16.mxu0 %v2354_v21  ;;  %1515 = vmatprep.mubr.bf16.mxu1 %v2356_v22 }
  0xdb   : > { %1340 = vmatmul.mubr.bf16.gmra.mrb[44].mxu0 %v2358_v23  ;;  %1516 = vmatmul.mubr.bf16.gmra.mrb[44].mxu1 %v2359_v24 }
  0xdc   : > { %1347 = vmatprep.mubr.bf16.mxu0 %v2360_v25  ;;  %1523 = vmatprep.mubr.bf16.mxu1 %v2362_v26 }
  0xe3   : > { %1348 = vmatmul.mubr.bf16.gmra.mrb[48].mxu0 %v2364_v27  ;;  %1524 = vmatmul.mubr.bf16.gmra.mrb[48].mxu1 %v2365_v28 }
  0xe4   : > { %1355 = vmatprep.mubr.bf16.mxu0 %v2366_v29  ;;  %1531 = vmatprep.mubr.bf16.mxu1 %v2368_v30 }
  0xeb   : > { %1356 = vmatmul.mubr.bf16.gmra.mrb[52].mxu0 %v2370_v31  ;;  %1532 = vmatmul.mubr.bf16.gmra.mrb[52].mxu1 %v2371_v32 }
  0xec   : > { %1363 = vmatprep.mubr.bf16.mxu0 %v2372_v33  ;;  %1539 = vmatprep.mubr.bf16.mxu1 %v2374_v34 }
  0xf3   : > { %1364 = vmatmul.mubr.bf16.gmra.mrb[56].mxu0 %v2376_v35  ;;  %1540 = vmatmul.mubr.bf16.gmra.mrb[56].mxu1 %v2377_v36 }
  0xf4   : > { %1371 = vmatprep.mubr.bf16.mxu0 %v2378_v37  ;;  %1547 = vmatprep.mubr.bf16.mxu1 %v2380_v38 }
  0xfb   : > { %1372 = vmatmul.mubr.bf16.gmra.mrb[60].mxu0 %v2382_v39  ;;  %1548 = vmatmul.mubr.bf16.gmra.mrb[60].mxu1 %v2383_v40 }
  0xfc   : > { %1379 = vmatprep.mubr.bf16.mxu0 %v2384_v41  ;;  %1555 = vmatprep.mubr.bf16.mxu1 %v2386_v42 }
 0x103   : > { %1380 = vmatmul.mubr.bf16.gmra.mrb[64].mxu0 %v2388_v43  ;;  %1556 = vmatmul.mubr.bf16.gmra.mrb[64].mxu1 %v2389_v44 }
 0x104   : > { %1387 = vmatprep.mubr.bf16.mxu0 %v2390_v45  ;;  %1563 = vmatprep.mubr.bf16.mxu1 %v2392_v46 }
 0x10b   : > { %1388 = vmatmul.mubr.bf16.gmra.mrb[68].mxu0 %v2394_v47  ;;  %1564 = vmatmul.mubr.bf16.gmra.mrb[68].mxu1 %v2395_v48 }
 0x10c   : > { %1395 = vmatprep.mubr.bf16.mxu0 %v2396_v49  ;;  %1571 = vmatprep.mubr.bf16.mxu1 %v2398_v50 }
 0x113   : > { %1396 = vmatmul.mubr.bf16.gmra.mrb[72].mxu0 %v2400_v51  ;;  %1572 = vmatmul.mubr.bf16.gmra.mrb[72].mxu1 %v2401_v52 }
 0x114   : > { %1403 = vmatprep.mubr.bf16.mxu0 %v2402_v53  ;;  %1579 = vmatprep.mubr.bf16.mxu1 %v2404_v54 }
 0x11b   : > { %1404 = vmatmul.mubr.bf16.gmra.mrb[76].mxu0 %v2406_v55  ;;  %1580 = vmatmul.mubr.bf16.gmra.mrb[76].mxu1 %v2407_v56 }
 0x11c   : > { %1411 = vmatprep.mubr.bf16.mxu0 %v2408_v57  ;;  %1587 = vmatprep.mubr.bf16.mxu1 %v2410_v58 }
 0x123   : > { %1412 = vmatmul.mubr.bf16.gmra.mrb[80].mxu0 %v2412_v59  ;;  %1588 = vmatmul.mubr.bf16.gmra.mrb[80].mxu1 %v2413_v60 }
 0x124   : > { %1419 = vmatprep.mubr.bf16.mxu0 %v2414_v61  ;;  %1595 = vmatprep.mubr.bf16.mxu1 %v2416_v62 }
 0x12b   : > { %1420 = vmatmul.mubr.bf16.gmra.mrb[84].mxu0 %v2418_v63  ;;  %1596 = vmatmul.mubr.bf16.gmra.mrb[84].mxu1 %v2419_v0 }
 0x156   : > { %v2852_v1 = vpop.f32.mrb[0].mxu0  ;;  %v2854_v2 = vpop.f32.mrb[0].mxu1 }
 0x157   : > { %v1255_v3 = vpop.f32.mrb[1].mxu0  ;;  %v1431_v4 = vpop.f32.mrb[1].mxu1 }
 0x158   : > { %v2856_v5 = vpop.f32.mrb[2].mxu0  ;;  %v2858_v6 = vpop.f32.mrb[2].mxu1 }
 0x159   : > { %v1258_v7 = vpop.f32.mrb[3].mxu0  ;;  %v1434_v8 = vpop.f32.mrb[3].mxu1 }
 0x15e   : > { %v2860_v9 = vpop.f32.mrb[4].mxu0  ;;  %v2862_v10 = vpop.f32.mrb[4].mxu1 }
 0x15f   : > { %v1263_v11 = vpop.f32.mrb[5].mxu0  ;;  %v1439_v12 = vpop.f32.mrb[5].mxu1 }
 0x160   : > { %v2864_v13 = vpop.f32.mrb[6].mxu0  ;;  %v2866_v14 = vpop.f32.mrb[6].mxu1 }
 0x161   : > { %v1266_v15 = vpop.f32.mrb[7].mxu0  ;;  %v1442_v16 = vpop.f32.mrb[7].mxu1 }
 0x166   : > { %v2868_v17 = vpop.f32.mrb[8].mxu0  ;;  %v2870_v18 = vpop.f32.mrb[8].mxu1 }
 0x167   : > { %v1271_v19 = vpop.f32.mrb[9].mxu0  ;;  %v1447_v20 = vpop.f32.mrb[9].mxu1 }
 0x168   : > { %v2872_v21 = vpop.f32.mrb[10].mxu0  ;;  %v2874_v22 = vpop.f32.mrb[10].mxu1 }
 0x169   : > { %v1274_v23 = vpop.f32.mrb[11].mxu0  ;;  %v1450_v24 = vpop.f32.mrb[11].mxu1 }
 0x16e   : > { %v2876_v25 = vpop.f32.mrb[12].mxu0  ;;  %v2878_v26 = vpop.f32.mrb[12].mxu1 }
 0x16f   : > { %v1279_v27 = vpop.f32.mrb[13].mxu0  ;;  %v1455_v28 = vpop.f32.mrb[13].mxu1 }
 0x170   : > { %v2880_v29 = vpop.f32.mrb[14].mxu0  ;;  %v2882_v30 = vpop.f32.mrb[14].mxu1 }
 0x171   : > { %v1282_v31 = vpop.f32.mrb[15].mxu0  ;;  %v1458_v32 = vpop.f32.mrb[15].mxu1 }
 0x176   : > { %v2884_v33 = vpop.f32.mrb[16].mxu0  ;;  %v2886_v34 = vpop.f32.mrb[16].mxu1 }
 0x177   : > { %v1287_v35 = vpop.f32.mrb[17].mxu0  ;;  %v1463_v36 = vpop.f32.mrb[17].mxu1 }
 0x178   : > { %v2888_v37 = vpop.f32.mrb[18].mxu0  ;;  %v2890_v38 = vpop.f32.mrb[18].mxu1 }
 0x179   : > { %v1290_v39 = vpop.f32.mrb[19].mxu0  ;;  %v1466_v40 = vpop.f32.mrb[19].mxu1 }
 0x17e   : > { %v2892_v41 = vpop.f32.mrb[20].mxu0  ;;  %v2894_v42 = vpop.f32.mrb[20].mxu1 }
 0x17f   : > { %v1295_v43 = vpop.f32.mrb[21].mxu0  ;;  %v1471_v44 = vpop.f32.mrb[21].mxu1 }
 0x180   : > { %v2896_v45 = vpop.f32.mrb[22].mxu0  ;;  %v2898_v46 = vpop.f32.mrb[22].mxu1 }
 0x181   : > { %v1298_v47 = vpop.f32.mrb[23].mxu0  ;;  %v1474_v48 = vpop.f32.mrb[23].mxu1 }
 0x182   : > { %v2943_v47 = vld [vmem:[%s3170_s2] ss:$0 sm:$0xff] }
 0x186   : > { %v2900_v49 = vpop.f32.mrb[24].mxu0  ;;  %v2902_v50 = vpop.f32.mrb[24].mxu1 }
 0x187   : > { %v1303_v51 = vpop.f32.mrb[25].mxu0  ;;  %v1479_v52 = vpop.f32.mrb[25].mxu1 }
 0x188   : > { %v2904_v53 = vpop.f32.mrb[26].mxu0  ;;  %v2906_v54 = vpop.f32.mrb[26].mxu1  ;;  %v1254_v52 = vadd.f32 %v2943_v47, %v2852_v1 }
 0x189   : > { %v1306_v55 = vpop.f32.mrb[27].mxu0  ;;  %v1482_v56 = vpop.f32.mrb[27].mxu1 }
 0x18a   : > { %v1430_v55 = vadd.f32 %v2943_v47, %v2854_v2  ;;  %v1257_v56 = vadd.f32 %v2943_v47, %v2856_v5 }
 0x18c   : > { %v1648_v2 = vmax.f32 %v1430_v55, 0.0  ;;  %v1262_v55 = vadd.f32 %v2943_v47, %v2860_v9 }
 0x18e   : > { %v2908_v57 = vpop.f32.mrb[28].mxu0  ;;  %v2910_v58 = vpop.f32.mrb[28].mxu1 }
 0x18f   : > { %v1311_v59 = vpop.f32.mrb[29].mxu0  ;;  %v1487_v60 = vpop.f32.mrb[29].mxu1 }
 0x190   : > { %v2912_v61 = vpop.f32.mrb[30].mxu0  ;;  %v2914_v62 = vpop.f32.mrb[30].mxu1  ;;  %v1433_v59 = vadd.f32 %v2943_v47, %v2858_v6 }
 0x191   : > { %v1314_v63 = vpop.f32.mrb[31].mxu0  ;;  %v1490_v0 = vpop.f32.mrb[31].mxu1 }
 0x196   : > { %v2916_v3 = vpop.f32.mrb[32].mxu0  ;;  %v2918_v4 = vpop.f32.mrb[32].mxu1 }
 0x197   : > { %v1319_v7 = vpop.f32.mrb[33].mxu0  ;;  %v1495_v8 = vpop.f32.mrb[33].mxu1 }
 0x198   : > { %v2920_v11 = vpop.f32.mrb[34].mxu0  ;;  %v2922_v12 = vpop.f32.mrb[34].mxu1 }
 0x199   : > { %v1322_v15 = vpop.f32.mrb[35].mxu0  ;;  %v1498_v16 = vpop.f32.mrb[35].mxu1 }
 0x19a   : > { %v1604_v15 = vmax.f32 %v1254_v52, 0.0 }
 0x19e   : > { %v2924_v19 = vpop.f32.mrb[36].mxu0  ;;  %v2926_v20 = vpop.f32.mrb[36].mxu1 }
 0x19f   : > { %v1327_v23 = vpop.f32.mrb[37].mxu0  ;;  %v1503_v24 = vpop.f32.mrb[37].mxu1 }
 0x1a0   : > { %v2928_v27 = vpop.f32.mrb[38].mxu0  ;;  %v2930_v28 = vpop.f32.mrb[38].mxu1 }
 0x1a1   : > { %v1330_v31 = vpop.f32.mrb[39].mxu0  ;;  %v1506_v32 = vpop.f32.mrb[39].mxu1 }
 0x1a6   : > { %v2932_v35 = vpop.f32.mrb[40].mxu0  ;;  %v2934_v36 = vpop.f32.mrb[40].mxu1 }
 0x1a7   : > { %v1335_v39 = vpop.f32.mrb[41].mxu0  ;;  %v1511_v40 = vpop.f32.mrb[41].mxu1 }
 0x1a8   : > { %v2936_v43 = vpop.f32.mrb[42].mxu0  ;;  %v2938_v44 = vpop.f32.mrb[42].mxu1  ;;  %v1605_v40 = vmax.f32 %v1257_v56, 0.0 }
 0x1a9   : > { %v1338_v48 = vpop.f32.mrb[43].mxu0  ;;  %v1514_v51 = vpop.f32.mrb[43].mxu1 }
 0x1aa   : > { %v1649_v48 = vmax.f32 %v1433_v59, 0.0  ;;  %v1265_v59 = vadd.f32 %v2943_v47, %v2864_v13 }
 0x1ae   : > { %v1341_v60 = vpop.f32.mrb[44].mxu0  ;;  %v1517_v63 = vpop.f32.mrb[44].mxu1 }
 0x1af   : > { %v1342_v0 = vadd.f32 %v2943_v47, %v1341_v60  ;;  %v1518_v7 = vadd.f32 %v2943_v47, %v1517_v63  ;;  %v1343_v1 = vpop.f32.mrb[45].mxu0  ;;  %v1519_v8 = vpop.f32.mrb[45].mxu1 }
 0x1b0   : > { %v1344_v16 = vpop.f32.mrb[46].mxu0  ;;  %v1520_v23 = vpop.f32.mrb[46].mxu1 }
 0x1b1   : > { %v1626_v24 = vmax.f32 %v1342_v0, 0.0  ;;  %v1670_v31 = vmax.f32 %v1518_v7, 0.0  ;;  %v1345_v32 = vadd.f32 %v2943_v47, %v1344_v16  ;;  %v1521_v5 = vadd.f32 %v2943_v47, %v1520_v23  ;;  %v1346_v6 = vpop.f32.mrb[47].mxu0  ;;  %v1522_v39 = vpop.f32.mrb[47].mxu1  ;;  %v2967_v0 = vld [vmem:[%s3170_s2 + $0x1] ss:$0 sm:$0xff] }
 0x1b2   : > { %v1438_v7 = vadd.f32 %v2943_v47, %v2862_v10  ;;  %v2986_v6 = vld [vmem:[%s3170_s2 + $0x2] ss:$0 sm:$0xff] }
 0x1b3   : > { %v1692_v51 = vmax.f32 %v1604_v15, %v1626_v24  ;;  %v1714_v60 = vmax.f32 %v1648_v2, %v1670_v31  ;;  %v1627_v63 = vmax.f32 %v1345_v32, 0.0  ;;  %v1671_v52 = vmax.f32 %v1521_v5, 0.0 }
 0x1b4   : > { %v1606_v32 = vmax.f32 %v1262_v55, 0.0  ;;  %v1441_v5 = vadd.f32 %v2943_v47, %v2866_v14 }
 0x1b5   : > { %v1736_v1 = vmax.f32 %v1692_v51, %v1714_v60  ;;  %v1693_v8 = vmax.f32 %v1605_v40, %v1627_v63  ;;  %v1715_v56 = vmax.f32 %v1649_v48, %v1671_v52  ;;  %v1650_v40 = vmax.f32 %v1438_v7, 0.0 }
 0x1b6   : > { %v1349_v15 = vpop.f32.mrb[48].mxu0  ;;  %v1525_v9 = vpop.f32.mrb[48].mxu1  ;;  %v1270_v7 = vadd.f32 %v2943_v47, %v2868_v17 }
 0x1b7   : > { %v1763_v2 = vmul.f32 %v2967_v0, %v1736_v1  ;;  %v1737_v16 = vmax.f32 %v1693_v8, %v1715_v56  ;;  %v1350_v23 = vadd.f32 %v2943_v47, %v1349_v15  ;;  %v1526_v24 = vadd.f32 %v2943_v47, %v1525_v9  ;;  %v1351_v10 = vpop.f32.mrb[49].mxu0  ;;  %v1527_v31 = vpop.f32.mrb[49].mxu1 }
 0x1b8   : > { %v1352_v13 = vpop.f32.mrb[50].mxu0  ;;  %v1528_v39 = vpop.f32.mrb[50].mxu1  ;;  %v1607_v1 = vmax.f32 %v1265_v59, 0.0  ;;  %v1651_v10 = vmax.f32 %v1441_v5, 0.0  ;;  %v1273_v31 = vadd.f32 %v2943_v47, %v2872_v21 }
 0x1b9   : > { %v1764_v48 = vmul.f32 %v2967_v0, %v1737_v16  ;;  %v1628_v51 = vmax.f32 %v1350_v23, 0.0  ;;  %v1672_v60 = vmax.f32 %v1526_v24, 0.0  ;;  %v1354_v63 = vpop.f32.mrb[51].mxu0  ;;  %v1530_v52 = vpop.f32.mrb[51].mxu1  ;;  %v1353_v55 = vadd.f32 %v2943_v47, %v1352_v13 }
 0x1ba   : > { %v1529_v14 = vadd.f32 %v2943_v47, %v1528_v39  ;;  %v1790_v8 = vadd.f32 %v2986_v6, %v1763_v2  ;;  %v1446_v23 = vadd.f32 %v2943_v47, %v2870_v18  ;;  %v1449_v39 = vadd.f32 %v2943_v47, %v2874_v22 }
 0x1bb   : > { %v1791_v56 = vadd.f32 %v2986_v6, %v1764_v48  ;;  %v1694_v15 = vmax.f32 %v1606_v32, %v1628_v51  ;;  %v1716_v9 = vmax.f32 %v1650_v40, %v1672_v60  ;;  %v1629_v59 = vmax.f32 %v1353_v55, 0.0 }
 0x1bc   : > { %v1673_v16 = vmax.f32 %v1529_v14, 0.0  ;;  %v1608_v18 = vmax.f32 %v1270_v7, 0.0 }
 0x1bd   : > { %v2150_v2 = vpack.c.bf16 %v1791_v56, %v1790_v8  ;;  %v1738_v24 = vmax.f32 %v1694_v15, %v1716_v9  ;;  %v1695_v32 = vmax.f32 %v1607_v1, %v1629_v59  ;;  %v1652_v1 = vmax.f32 %v1446_v23, 0.0 }
 0x1be   : > { %v1717_v5 = vmax.f32 %v1651_v10, %v1673_v16  ;;  %v1357_v13 = vpop.f32.mrb[52].mxu0  ;;  %v1533_v17 = vpop.f32.mrb[52].mxu1  ;;  %v1609_v9 = vmax.f32 %v1273_v31, 0.0  ;;  %v1653_v16 = vmax.f32 %v1449_v39, 0.0  ;;  %v1454_v31 = vadd.f32 %v2943_v47, %v2878_v26 }
 0x1bf   : > { %2151 = vst [vmem:[%s2999_s26] sm:$0xff] %v2150_v2   ;;  %v1358_v40 = vadd.f32 %v2943_v47, %v1357_v13  ;;  %v1534_v48 = vadd.f32 %v2943_v47, %v1533_v17  ;;  %v1359_v51 = vpop.f32.mrb[53].mxu0  ;;  %v1535_v60 = vpop.f32.mrb[53].mxu1  ;;  %v1765_v63 = vmul.f32 %v2967_v0, %v1738_v24  ;;  %v1278_v24 = vadd.f32 %v2943_v47, %v2876_v25 }
 0x1c0   : > { %v1739_v52 = vmax.f32 %v1695_v32, %v1717_v5  ;;  %v1360_v55 = vpop.f32.mrb[54].mxu0  ;;  %v1536_v21 = vpop.f32.mrb[54].mxu1  ;;  %v1281_v39 = vadd.f32 %v2943_v47, %v2880_v29  ;;  %v1457_v25 = vadd.f32 %v2943_v47, %v2882_v30 }
 0x1c1   : > { %v1630_v14 = vmax.f32 %v1358_v40, 0.0  ;;  %v1674_v8 = vmax.f32 %v1534_v48, 0.0  ;;  %v1361_v56 = vadd.f32 %v2943_v47, %v1360_v55  ;;  %v1362_v15 = vpop.f32.mrb[55].mxu0  ;;  %v1538_v22 = vpop.f32.mrb[55].mxu1  ;;  %v1537_v59 = vadd.f32 %v2943_v47, %v1536_v21 }
 0x1c2   : > { %v1766_v10 = vmul.f32 %v2967_v0, %v1739_v52  ;;  %v1792_v23 = vadd.f32 %v2986_v6, %v1765_v63 }
 0x1c3   : > { %v1696_v2 = vmax.f32 %v1608_v18, %v1630_v14  ;;  %v1718_v7 = vmax.f32 %v1652_v1, %v1674_v8  ;;  %v1631_v13 = vmax.f32 %v1361_v56, 0.0  ;;  %v1675_v5 = vmax.f32 %v1537_v59, 0.0 }
 0x1c4   : > { %v1793_v32 = vadd.f32 %v2986_v6, %v1766_v10  ;;  %v1610_v1 = vmax.f32 %v1278_v24, 0.0  ;;  %v1654_v56 = vmax.f32 %v1454_v31, 0.0  ;;  %v1611_v59 = vmax.f32 %v1281_v39, 0.0 }
 0x1c5   : > { %v1740_v17 = vmax.f32 %v1696_v2, %v1718_v7  ;;  %v1697_v40 = vmax.f32 %v1609_v9, %v1631_v13  ;;  %v1719_v51 = vmax.f32 %v1653_v16, %v1675_v5  ;;  %v1655_v7 = vmax.f32 %v1457_v25, 0.0 }
 0x1c6   : > { %v2155_v48 = vpack.c.bf16 %v1793_v32, %v1792_v23  ;;  %v1365_v60 = vpop.f32.mrb[56].mxu0  ;;  %v1541_v18 = vpop.f32.mrb[56].mxu1  ;;  %v1286_v32 = vadd.f32 %v2943_v47, %v2884_v33  ;;  %v1465_v33 = vadd.f32 %v2943_v47, %v2890_v38 }
 0x1c7   : > { %v1366_v63 = vadd.f32 %v2943_v47, %v1365_v60  ;;  %v1542_v52 = vadd.f32 %v2943_v47, %v1541_v18  ;;  %v1367_v55 = vpop.f32.mrb[57].mxu0  ;;  %v1543_v21 = vpop.f32.mrb[57].mxu1  ;;  %v1767_v26 = vmul.f32 %v2967_v0, %v1740_v17  ;;  %v1741_v14 = vmax.f32 %v1697_v40, %v1719_v51 }
 0x1c8   : > { %2203 = vst [vmem:[%s2999_s26 + $0x8] sm:$0xff] %v2155_v48   ;;  %v1368_v8 = vpop.f32.mrb[58].mxu0  ;;  %v1544_v29 = vpop.f32.mrb[58].mxu1  ;;  %v1462_v40 = vadd.f32 %v2943_v47, %v2886_v34  ;;  %v1289_v51 = vadd.f32 %v2943_v47, %v2888_v37 }
 0x1c9   : > { %v1632_v15 = vmax.f32 %v1366_v63, 0.0  ;;  %v1676_v22 = vmax.f32 %v1542_v52, 0.0  ;;  %v1369_v9 = vadd.f32 %v2943_v47, %v1368_v8  ;;  %v1370_v10 = vpop.f32.mrb[59].mxu0  ;;  %v1546_v30 = vpop.f32.mrb[59].mxu1  ;;  %v1768_v16 = vmul.f32 %v2967_v0, %v1741_v14 }
 0x1ca   : > { %v1545_v2 = vadd.f32 %v2943_v47, %v1544_v29  ;;  %v1794_v5 = vadd.f32 %v2986_v6, %v1767_v26  ;;  %v1612_v26 = vmax.f32 %v1286_v32, 0.0  ;;  %v1656_v29 = vmax.f32 %v1462_v40, 0.0 }
 0x1cb   : > { %v1698_v13 = vmax.f32 %v1610_v1, %v1632_v15  ;;  %v1720_v24 = vmax.f32 %v1654_v56, %v1676_v22  ;;  %v1633_v23 = vmax.f32 %v1369_v9, 0.0  ;;  %v1795_v31 = vadd.f32 %v2986_v6, %v1768_v16 }
 0x1cc   : > { %v1677_v17 = vmax.f32 %v1545_v2, 0.0  ;;  %v1613_v10 = vmax.f32 %v1289_v51, 0.0  ;;  %v1657_v16 = vmax.f32 %v1465_v33, 0.0 }
 0x1cd   : > { %v1742_v39 = vmax.f32 %v1698_v13, %v1720_v24  ;;  %v1699_v48 = vmax.f32 %v1611_v59, %v1633_v23  ;;  %v2160_v60 = vpack.c.bf16 %v1795_v31, %v1794_v5  ;;  %v1294_v24 = vadd.f32 %v2943_v47, %v2892_v41 }
 0x1ce   : > { %v1721_v18 = vmax.f32 %v1655_v7, %v1677_v17  ;;  %v1373_v25 = vpop.f32.mrb[60].mxu0  ;;  %v1549_v63 = vpop.f32.mrb[60].mxu1  ;;  %v1470_v31 = vadd.f32 %v2943_v47, %v2894_v42  ;;  %v1473_v41 = vadd.f32 %v2943_v47, %v2898_v46 }
 0x1cf   : > { %v1374_v52 = vadd.f32 %v2943_v47, %v1373_v25  ;;  %v1550_v55 = vadd.f32 %v2943_v47, %v1549_v63  ;;  %v1375_v21 = vpop.f32.mrb[61].mxu0  ;;  %v1551_v1 = vpop.f32.mrb[61].mxu1  ;;  %2204 = vst [vmem:[%s2999_s26 + $0x10] sm:$0xff] %v2160_v60   ;;  %v1769_v34 = vmul.f32 %v2967_v0, %v1742_v39  ;;  %v1297_v39 = vadd.f32 %v2943_v47, %v2896_v45 }
 0x1d0   : > { %v1743_v14 = vmax.f32 %v1699_v48, %v1721_v18  ;;  %v1376_v8 = vpop.f32.mrb[62].mxu0  ;;  %v1552_v37 = vpop.f32.mrb[62].mxu1 }
 0x1d1   : > { %v1634_v56 = vmax.f32 %v1374_v52, 0.0  ;;  %v1678_v15 = vmax.f32 %v1550_v55, 0.0  ;;  %v1377_v22 = vadd.f32 %v2943_v47, %v1376_v8  ;;  %v1378_v9 = vpop.f32.mrb[63].mxu0  ;;  %v1554_v38 = vpop.f32.mrb[63].mxu1  ;;  %v1553_v59 = vadd.f32 %v2943_v47, %v1552_v37 }
 0x1d2   : > { %v1770_v30 = vmul.f32 %v2967_v0, %v1743_v14  ;;  %v1796_v23 = vadd.f32 %v2986_v6, %v1769_v34  ;;  %v1614_v55 = vmax.f32 %v1294_v24, 0.0 }
 0x1d3   : > { %v1700_v2 = vmax.f32 %v1612_v26, %v1634_v56  ;;  %v1722_v7 = vmax.f32 %v1656_v29, %v1678_v15  ;;  %v1635_v13 = vmax.f32 %v1377_v22, 0.0  ;;  %v1679_v5 = vmax.f32 %v1553_v59, 0.0 }
 0x1d4   : > { %v1797_v32 = vadd.f32 %v2986_v6, %v1770_v30  ;;  %v1658_v26 = vmax.f32 %v1470_v31, 0.0  ;;  %v1615_v29 = vmax.f32 %v1297_v39, 0.0  ;;  %v1659_v22 = vmax.f32 %v1473_v41, 0.0 }
 0x1d5   : > { %v1744_v17 = vmax.f32 %v1700_v2, %v1722_v7  ;;  %v1701_v40 = vmax.f32 %v1613_v10, %v1635_v13  ;;  %v1723_v51 = vmax.f32 %v1657_v16, %v1679_v5  ;;  %v1302_v30 = vadd.f32 %v2943_v47, %v2900_v49 }
 0x1d6   : > { %v2165_v48 = vpack.c.bf16 %v1797_v32, %v1796_v23  ;;  %v1381_v60 = vpop.f32.mrb[64].mxu0  ;;  %v1557_v18 = vpop.f32.mrb[64].mxu1  ;;  %v1478_v7 = vadd.f32 %v2943_v47, %v2902_v50  ;;  %v1305_v23 = vadd.f32 %v2943_v47, %v2904_v53  ;;  %v1481_v49 = vadd.f32 %v2943_v47, %v2906_v54 }
 0x1d7   : > { %v1382_v25 = vadd.f32 %v2943_v47, %v1381_v60  ;;  %v1558_v63 = vadd.f32 %v2943_v47, %v1557_v18  ;;  %v1383_v33 = vpop.f32.mrb[65].mxu0  ;;  %v1559_v52 = vpop.f32.mrb[65].mxu1  ;;  %v1771_v42 = vmul.f32 %v2967_v0, %v1744_v17  ;;  %v1745_v21 = vmax.f32 %v1701_v40, %v1723_v51 }
 0x1d8   : > { %2205 = vst [vmem:[%s2999_s26 + $0x18] sm:$0xff] %v2165_v48   ;;  %v1384_v1 = vpop.f32.mrb[66].mxu0  ;;  %v1560_v45 = vpop.f32.mrb[66].mxu1  ;;  %v1616_v60 = vmax.f32 %v1302_v30, 0.0 }
 0x1d9   : > { %v1636_v34 = vmax.f32 %v1382_v25, 0.0  ;;  %v1680_v14 = vmax.f32 %v1558_v63, 0.0  ;;  %v1385_v8 = vadd.f32 %v2943_v47, %v1384_v1  ;;  %v1386_v37 = vpop.f32.mrb[67].mxu0  ;;  %v1562_v46 = vpop.f32.mrb[67].mxu1  ;;  %v1772_v56 = vmul.f32 %v2967_v0, %v1745_v21 }
 0x1da   : > { %v1561_v15 = vadd.f32 %v2943_v47, %v1560_v45  ;;  %v1798_v59 = vadd.f32 %v2986_v6, %v1771_v42  ;;  %v1660_v25 = vmax.f32 %v1478_v7, 0.0  ;;  %v1617_v42 = vmax.f32 %v1305_v23, 0.0 }
 0x1db   : > { %v1702_v9 = vmax.f32 %v1614_v55, %v1636_v34  ;;  %v1724_v38 = vmax.f32 %v1658_v26, %v1680_v14  ;;  %v1637_v10 = vmax.f32 %v1385_v8, 0.0  ;;  %v1799_v16 = vadd.f32 %v2986_v6, %v1772_v56 }
 0x1dc   : > { %v1681_v2 = vmax.f32 %v1561_v15, 0.0  ;;  %v1661_v45 = vmax.f32 %v1481_v49, 0.0  ;;  %v1310_v8 = vadd.f32 %v2943_v47, %v2908_v57  ;;  %v1486_v56 = vadd.f32 %v2943_v47, %v2910_v58 }
 0x1dd   : > { %v1746_v13 = vmax.f32 %v1702_v9, %v1724_v38  ;;  %v1703_v24 = vmax.f32 %v1615_v29, %v1637_v10  ;;  %v2170_v32 = vpack.c.bf16 %v1799_v16, %v1798_v59  ;;  %v1313_v9 = vadd.f32 %v2943_v47, %v2912_v61 }
 0x1de   : > { %v1725_v5 = vmax.f32 %v1659_v22, %v1681_v2  ;;  %v1389_v31 = vpop.f32.mrb[68].mxu0  ;;  %v1565_v17 = vpop.f32.mrb[68].mxu1  ;;  %v1489_v57 = vadd.f32 %v2943_v47, %v2914_v62 }
 0x1df   : > { %v1390_v40 = vadd.f32 %v2943_v47, %v1389_v31  ;;  %v1566_v39 = vadd.f32 %v2943_v47, %v1565_v17  ;;  %v1391_v48 = vpop.f32.mrb[69].mxu0  ;;  %v1567_v51 = vpop.f32.mrb[69].mxu1  ;;  %2206 = vst [vmem:[%s2999_s26 + $0x20] sm:$0xff] %v2170_v32   ;;  %v1773_v50 = vmul.f32 %v2967_v0, %v1746_v13 }
 0x1e0   : > { %v1747_v18 = vmax.f32 %v1703_v24, %v1725_v5  ;;  %v1392_v41 = vpop.f32.mrb[70].mxu0  ;;  %v1568_v53 = vpop.f32.mrb[70].mxu1  ;;  %v1618_v24 = vmax.f32 %v1310_v8, 0.0  ;;  %v1662_v5 = vmax.f32 %v1486_v56, 0.0 }
 0x1e1   : > { %v1638_v63 = vmax.f32 %v1390_v40, 0.0  ;;  %v1682_v33 = vmax.f32 %v1566_v39, 0.0  ;;  %v1393_v52 = vadd.f32 %v2943_v47, %v1392_v41  ;;  %v1394_v55 = vpop.f32.mrb[71].mxu0  ;;  %v1570_v54 = vpop.f32.mrb[71].mxu1  ;;  %v1569_v1 = vadd.f32 %v2943_v47, %v1568_v53 }
 0x1e2   : > { %v1774_v21 = vmul.f32 %v2967_v0, %v1747_v18  ;;  %v1800_v37 = vadd.f32 %v2986_v6, %v1773_v50  ;;  %v1619_v39 = vmax.f32 %v1313_v9, 0.0  ;;  %v1318_v53 = vadd.f32 %v2943_v47, %v2916_v3 }
 0x1e3   : > { %v1704_v26 = vmax.f32 %v1616_v60, %v1638_v63  ;;  %v1726_v34 = vmax.f32 %v1660_v25, %v1682_v33  ;;  %v1639_v14 = vmax.f32 %v1393_v52, 0.0  ;;  %v1683_v29 = vmax.f32 %v1569_v1, 0.0 }
 0x1e4   : > { %v1801_v46 = vadd.f32 %v2986_v6, %v1774_v21  ;;  %v1663_v60 = vmax.f32 %v1489_v57, 0.0  ;;  %v1494_v52 = vadd.f32 %v2943_v47, %v2918_v4  ;;  %v1497_v3 = vadd.f32 %v2943_v47, %v2922_v12 }
 0x1e5   : > { %v1748_v15 = vmax.f32 %v1704_v26, %v1726_v34  ;;  %v1705_v22 = vmax.f32 %v1617_v42, %v1639_v14  ;;  %v1727_v10 = vmax.f32 %v1661_v45, %v1683_v29  ;;  %v1321_v42 = vadd.f32 %v2943_v47, %v2920_v11 }
 0x1e6   : > { %v2175_v38 = vpack.c.bf16 %v1801_v46, %v1800_v37  ;;  %v1397_v30 = vpop.f32.mrb[72].mxu0  ;;  %v1573_v59 = vpop.f32.mrb[72].mxu1  ;;  %v1620_v46 = vmax.f32 %v1318_v53, 0.0 }
 0x1e7   : > { %v1398_v16 = vadd.f32 %v2943_v47, %v1397_v30  ;;  %v1574_v2 = vadd.f32 %v2943_v47, %v1573_v59  ;;  %v1399_v7 = vpop.f32.mrb[73].mxu0  ;;  %v1575_v13 = vpop.f32.mrb[73].mxu1  ;;  %v1775_v58 = vmul.f32 %v2967_v0, %v1748_v15  ;;  %v1749_v23 = vmax.f32 %v1705_v22, %v1727_v10 }
 0x1e8   : > { %2207 = vst [vmem:[%s2999_s26 + $0x28] sm:$0xff] %v2175_v38   ;;  %v1400_v32 = vpop.f32.mrb[74].mxu0  ;;  %v1576_v61 = vpop.f32.mrb[74].mxu1  ;;  %v1664_v15 = vmax.f32 %v1494_v52, 0.0  ;;  %v1621_v30 = vmax.f32 %v1321_v42, 0.0 }
 0x1e9   : > { %v1640_v31 = vmax.f32 %v1398_v16, 0.0  ;;  %v1684_v17 = vmax.f32 %v1574_v2, 0.0  ;;  %v1401_v49 = vadd.f32 %v2943_v47, %v1400_v32  ;;  %v1402_v40 = vpop.f32.mrb[75].mxu0  ;;  %v1578_v62 = vpop.f32.mrb[75].mxu1  ;;  %v1776_v48 = vmul.f32 %v2967_v0, %v1749_v23 }
 0x1ea   : > { %v1577_v51 = vadd.f32 %v2943_v47, %v1576_v61  ;;  %v1802_v25 = vadd.f32 %v2986_v6, %v1775_v58  ;;  %v1665_v16 = vmax.f32 %v1497_v3, 0.0  ;;  %v1502_v61 = vadd.f32 %v2943_v47, %v2926_v20 }
 0x1eb   : > { %v1706_v50 = vmax.f32 %v1618_v24, %v1640_v31  ;;  %v1728_v18 = vmax.f32 %v1662_v5, %v1684_v17  ;;  %v1641_v41 = vmax.f32 %v1401_v49, 0.0  ;;  %v1803_v63 = vadd.f32 %v2986_v6, %v1776_v48 }
 0x1ec   : > { %v1685_v33 = vmax.f32 %v1577_v51, 0.0  ;;  %v1326_v24 = vadd.f32 %v2943_v47, %v2924_v19  ;;  %v1329_v17 = vadd.f32 %v2943_v47, %v2928_v27  ;;  %v1505_v19 = vadd.f32 %v2943_v47, %v2930_v28 }
 0x1ed   : > { %v1750_v55 = vmax.f32 %v1706_v50, %v1728_v18  ;;  %v1707_v54 = vmax.f32 %v1619_v39, %v1641_v41  ;;  %v2180_v21 = vpack.c.bf16 %v1803_v63, %v1802_v25  ;;  %v1666_v25 = vmax.f32 %v1502_v61, 0.0 }
 0x1ee   : > { %v1729_v1 = vmax.f32 %v1663_v60, %v1685_v33  ;;  %v1405_v45 = vpop.f32.mrb[76].mxu0  ;;  %v1581_v26 = vpop.f32.mrb[76].mxu1  ;;  %v1622_v18 = vmax.f32 %v1326_v24, 0.0 }
 0x1ef   : > { %v1406_v34 = vadd.f32 %v2943_v47, %v1405_v45  ;;  %v1582_v14 = vadd.f32 %v2943_v47, %v1581_v26  ;;  %v1407_v8 = vpop.f32.mrb[77].mxu0  ;;  %v1583_v37 = vpop.f32.mrb[77].mxu1  ;;  %2208 = vst [vmem:[%s2999_s26 + $0x30] sm:$0xff] %v2180_v21   ;;  %v1777_v4 = vmul.f32 %v2967_v0, %v1750_v55 }
 0x1f0   : > { %v1751_v29 = vmax.f32 %v1707_v54, %v1729_v1  ;;  %v1408_v56 = vpop.f32.mrb[78].mxu0  ;;  %v1584_v11 = vpop.f32.mrb[78].mxu1  ;;  %v1623_v54 = vmax.f32 %v1329_v17, 0.0  ;;  %v1667_v1 = vmax.f32 %v1505_v19, 0.0 }
 0x1f1   : > { %v1642_v22 = vmax.f32 %v1406_v34, 0.0  ;;  %v1686_v9 = vmax.f32 %v1582_v14, 0.0  ;;  %v1409_v38 = vadd.f32 %v2943_v47, %v1408_v56  ;;  %v1410_v10 = vpop.f32.mrb[79].mxu0  ;;  %v1586_v12 = vpop.f32.mrb[79].mxu1  ;;  %v1585_v57 = vadd.f32 %v2943_v47, %v1584_v11 }
 0x1f2   : > { %v1778_v59 = vmul.f32 %v2967_v0, %v1751_v29  ;;  %v1804_v58 = vadd.f32 %v2986_v6, %v1777_v4  ;;  %v1334_v34 = vadd.f32 %v2943_v47, %v2932_v35 }
 0x1f3   : > { %v1708_v2 = vmax.f32 %v1620_v46, %v1642_v22  ;;  %v1730_v7 = vmax.f32 %v1664_v15, %v1686_v9  ;;  %v1643_v13 = vmax.f32 %v1409_v38, 0.0  ;;  %v1687_v32 = vmax.f32 %v1585_v57, 0.0 }
 0x1f4   : > { %v1805_v23 = vadd.f32 %v2986_v6, %v1778_v59  ;;  %v1510_v46 = vadd.f32 %v2943_v47, %v2934_v36  ;;  %v1337_v9 = vadd.f32 %v2943_v47, %v2936_v43  ;;  %v1513_v59 = vadd.f32 %v2943_v47, %v2938_v44 }
 0x1f5   : > { %v1752_v5 = vmax.f32 %v1708_v2, %v1730_v7  ;;  %v1709_v31 = vmax.f32 %v1621_v30, %v1643_v13  ;;  %v1731_v40 = vmax.f32 %v1665_v16, %v1687_v32  ;;  %v1624_v30 = vmax.f32 %v1334_v34, 0.0 }
 0x1f6   : > { %v2185_v49 = vpack.c.bf16 %v1805_v23, %v1804_v58  ;;  %v1413_v62 = vpop.f32.mrb[80].mxu0  ;;  %v1589_v39 = vpop.f32.mrb[80].mxu1  ;;  %v1668_v7 = vmax.f32 %v1510_v46, 0.0 }
 0x1f7   : > { %v1414_v48 = vadd.f32 %v2943_v47, %v1413_v62  ;;  %v1590_v51 = vadd.f32 %v2943_v47, %v1589_v39  ;;  %v1415_v60 = vpop.f32.mrb[81].mxu0  ;;  %v1591_v50 = vpop.f32.mrb[81].mxu1  ;;  %v1779_v20 = vmul.f32 %v2967_v0, %v1752_v5  ;;  %v1753_v41 = vmax.f32 %v1709_v31, %v1731_v40 }
 0x1f8   : > { %2209 = vst [vmem:[%s2999_s26 + $0x38] sm:$0xff] %v2185_v49   ;;  %v1416_v53 = vpop.f32.mrb[82].mxu0  ;;  %v1592_v27 = vpop.f32.mrb[82].mxu1  ;;  %v1625_v5 = vmax.f32 %v1337_v9, 0.0  ;;  %v1669_v49 = vmax.f32 %v1513_v59, 0.0 }
 0x1f9   : > { %v1644_v63 = vmax.f32 %v1414_v48, 0.0  ;;  %v1688_v33 = vmax.f32 %v1590_v51, 0.0  ;;  %v1417_v52 = vadd.f32 %v2943_v47, %v1416_v53  ;;  %v1418_v55 = vpop.f32.mrb[83].mxu0  ;;  %v1594_v28 = vpop.f32.mrb[83].mxu1  ;;  %v1780_v42 = vmul.f32 %v2967_v0, %v1753_v41 }
 0x1fa   : > { %v1593_v21 = vadd.f32 %v2943_v47, %v1592_v27  ;;  %v1806_v14 = vadd.f32 %v2986_v6, %v1779_v20 }
 0x1fb   : > { %v1710_v45 = vmax.f32 %v1622_v18, %v1644_v63  ;;  %v1732_v26 = vmax.f32 %v1666_v25, %v1688_v33  ;;  %v1645_v3 = vmax.f32 %v1417_v52, 0.0  ;;  %v1807_v8 = vadd.f32 %v2986_v6, %v1780_v42 }
 0x1fc   : > { %v1689_v37 = vmax.f32 %v1593_v21, 0.0 }
 0x1fd   : > { %v1754_v4 = vmax.f32 %v1710_v45, %v1732_v26  ;;  %v1711_v29 = vmax.f32 %v1623_v54, %v1645_v3  ;;  %v2190_v56 = vpack.c.bf16 %v1807_v8, %v1806_v14 }
 0x1fe   : > { %v1733_v11 = vmax.f32 %v1667_v1, %v1689_v37  ;;  %v1421_v15 = vpop.f32.mrb[84].mxu0  ;;  %v1597_v22 = vpop.f32.mrb[84].mxu1 }
 0x1ff   : > { %v1422_v35 = vadd.f32 %v2943_v47, %v1421_v15  ;;  %v1598_v38 = vadd.f32 %v2943_v47, %v1597_v22  ;;  %v1423_v10 = vpop.f32.mrb[85].mxu0  ;;  %v1599_v12 = vpop.f32.mrb[85].mxu1  ;;  %2210 = vst [vmem:[%s2999_s26 + $0x40] sm:$0xff] %v2190_v56   ;;  %v1781_v36 = vmul.f32 %v2967_v0, %v1754_v4 }
 0x200   : > { %v1755_v57 = vmax.f32 %v1711_v29, %v1733_v11  ;;  %v1424_v16 = vpop.f32.mrb[86].mxu0  ;;  %v1600_v2 = vpop.f32.mrb[86].mxu1 }
 0x201   : > { %v1646_v13 = vmax.f32 %v1422_v35, 0.0  ;;  %v1690_v24 = vmax.f32 %v1598_v38, 0.0  ;;  %v1425_v43 = vadd.f32 %v2943_v47, %v1424_v16  ;;  %v1426_v58 = vpop.f32.mrb[87].mxu0  ;;  %v1602_v23 = vpop.f32.mrb[87].mxu1  ;;  %v1601_v61 = vadd.f32 %v2943_v47, %v1600_v2 }
 0x202   : > { %v1782_v32 = vmul.f32 %v2967_v0, %v1755_v57  ;;  %v1808_v40 = vadd.f32 %v2986_v6, %v1781_v36 }
 0x203   : > { %v1712_v44 = vmax.f32 %v1624_v30, %v1646_v13  ;;  %v1734_v31 = vmax.f32 %v1668_v7, %v1690_v24  ;;  %v1647_v17 = vmax.f32 %v1425_v43, 0.0  ;;  %v1691_v39 = vmax.f32 %v1601_v61, 0.0 }
 0x204   : > { %v1809_v62 = vadd.f32 %v2986_v6, %v1782_v32 }
 0x205   : > { %v1756_v19 = vmax.f32 %v1712_v44, %v1734_v31  ;;  %v1713_v48 = vmax.f32 %v1625_v5, %v1647_v17  ;;  %v1735_v60 = vmax.f32 %v1669_v49, %v1691_v39 }
 0x206   : > { %v2195_v51 = vpack.c.bf16 %v1809_v62, %v1808_v40 }
 0x207   : > { %v1783_v50 = vmul.f32 %v2967_v0, %v1756_v19  ;;  %v1757_v18 = vmax.f32 %v1713_v48, %v1735_v60 }
 0x208   : > { %2211 = vst [vmem:[%s2999_s26 + $0x48] sm:$0xff] %v2195_v51  }
 0x209   : > { %v1784_v47 = vmul.f32 %v2967_v0, %v1757_v18  ;;  %v1810_v20 = vadd.f32 %v2986_v6, %v1783_v50 }
 0x20b   : > { %v1811_v41 = vadd.f32 %v2986_v6, %v1784_v47 }
 0x20d   : > { %v2200_v53 = vpack.c.bf16 %v1811_v41, %v1810_v20 }
 0x20f   : > { %2212 = vst [vmem:[%s2999_s26 + $0x50] sm:$0xff] %v2200_v53  }
 0x210 PF: > { %p10_p9 = scmp.ge.s32.totalorder %s2482_s16, 4   ;;  %s3172_s12 = smov %s2438_s13 }
 0x211   : > { %s3173_s13 = smov %s2491_s19  ;;  %s3174_s14 = smov %s2482_s16 }
 0x212   :  { %12 = sbr.rel (!%p10_p9) target bundleno = 2 (0x2), region = 105 }

// kernel: encoder_forward.6
= control target key start
LH: loop header
LB: loop body
LE: loop exit
PB: predicated region body
PF: predicated region fallthrough
CT: control target
= control target key end

     0   :  { %s771_s12 = smov 0   ;;  %s773_s13 = smov 0   ;;  %s891_s0 = inlined_call_operand.vmem [shape: bf16[4,32,256], index: 0, kind: input, shape index: {}]   ;;  %s892_s1 = inlined_call_operand.vmem [shape: bf16[256,128], index: 1, kind: input, shape index: {}]   ;;  %s893_s2 = inlined_call_operand.vmem [shape: f32[8,128], index: 2, kind: input, shape index: {}]   ;;  %s894_s3 = inlined_call_operand.vmem [shape: f32[32,128], index: 3, kind: output, shape index: {}]  }
   0x1   :  { %s775_s14 = smov 0  }
   0x2 LB: > { %s576_s15 = sadd.s32 4294967295, %s749_s14   ;;  %s788_s16 = sadd.s32 1, %s749_s14   ;;  %s749_s14 = sphi %s775_s14, %s897_s14   ;;  %s745_s13 = sphi %s773_s13, %s896_s13   ;;  %s741_s12 = sphi %s771_s12, %s895_s12  }
   0x3   : > { %s17_s17 = ssub.s32 %s749_s14, %s788_s16  ;;  %s20_s18 = sadd.s32 1, %s745_s13 }
   0x4   : > { %p18_p0 = scmp.eq.s32.totalorder %s17_s17, 0  ;;  %p27_p1 = scmp.ne.s32.totalorder %s745_s13, %s741_s12 }
   0x5   : > { %p28_p2 = scmp.eq.s32.totalorder %s749_s14, 0  ;;  %p579_p4 = scmp.ge.s32.totalorder %s749_s14, 2 }
   0x6   : > { %s797_s19 = scalar_select %p18_p0, %s745_s13, %s20_s18  }
   0x7   : > { %p29_p3 = por %p28_p2, %p27_p1  ;;  %127 = sbr.rel (%p579_p4) target bundleno = 22 (0x16), region = 24 }
   0xe   : > { %130 = sbr.rel (!%p29_p3) target bundleno = 22 (0x16), region = 28  ;;  %s132_s20 = sand.u32 (%p29_p3), 1, %s745_s13  }
   0xf   : > { %s618_s21 = sshll.u32 (%p29_p3), %s749_s14, 4  ;;  %s580_s22 = sshll.u32 (%p29_p3), %s132_s20, 6 }
  0x10   : > { %s138_s25 = scalar_lea.vmem (%p29_p3), %s891_s0, %s618_s21  ;;  %s134_s26 = scalar_lea.vmem (%p29_p3), [#allocation2], %s580_s22 }
  0x11   : > { %v180_v0 = vld [vmem:[%s138_s25] sm:$0xff] (%p29_p3)  ;;  %v182_v1 = vld [vmem:[%s138_s25 + $0x8] sm:$0xff] (%p29_p3) }
  0x12   : > { %v184_v2 = vld [vmem:[%s138_s25 + $0x20] sm:$0xff] (%p29_p3)  ;;  %181 = vst [vmem:[%s134_s26] sm:$0xff] (%p29_p3), %v180_v0  ;;  %183 = vst [vmem:[%s134_s26 + $0x8] sm:$0xff] (%p29_p3), %v182_v1  ;;  %v186_v3 = vld [vmem:[%s138_s25 + $0x28] sm:$0xff] (%p29_p3) }
  0x13   : > { %185 = vst [vmem:[%s134_s26 + $0x10] sm:$0xff] (%p29_p3), %v184_v2  ;;  %v188_v4 = vld [vmem:[%s138_s25 + $0x40] sm:$0xff] (%p29_p3)  ;;  %v190_v5 = vld [vmem:[%s138_s25 + $0x48] sm:$0xff] (%p29_p3)  ;;  %187 = vst [vmem:[%s134_s26 + $0x18] sm:$0xff] (%p29_p3), %v186_v3 }
  0x14   : > { %189 = vst [vmem:[%s134_s26 + $0x20] sm:$0xff] (%p29_p3), %v188_v4  ;;  %191 = vst [vmem:[%s134_s26 + $0x28] sm:$0xff] (%p29_p3), %v190_v5  ;;  %v192_v6 = vld [vmem:[%s138_s25 + $0x60] sm:$0xff] (%p29_p3)  ;;  %v194_v7 = vld [vmem:[%s138_s25 + $0x68] sm:$0xff] (%p29_p3) }
  0x15   : > { %193 = vst [vmem:[%s134_s26 + $0x30] sm:$0xff] %v192_v6  ;;  %195 = vst [vmem:[%s134_s26 + $0x38] sm:$0xff] %v194_v7 }
  0x16 PF: > { %p584_p5 = scmp.ge.s32.totalorder %s749_s14, 1  ;;  %p200_p6 = scmp.lt.s32.totalorder %s749_s14, 3 }
  0x18   : > { %p201_p7 = pnand %p584_p5, %p200_p6 }
  0x19   : > { %v699_v8 = vld [vmem:[%s892_s1 + $0x40] sm:$0xff] (!%p201_p7)   ;;  %v701_v10 = vld [vmem:[%s892_s1 + $0x48] sm:$0xff] (!%p201_p7)   ;;  %v703_v12 = vld [vmem:[%s892_s1 + $0x50] sm:$0xff] (!%p201_p7)   ;;  %s207_s20 = sand.u32 (!%p201_p7), 1, %s741_s12   ;;  %s586_s21 = sshll.u32 (!%p201_p7), %s576_s15, 1 }
  0x1a   : > { %204 = sbr.rel (%p201_p7) target bundleno = 296 (0x128), region = 66  ;;  %v700_v9 = vld [vmem:[%s892_s1] sm:$0xff] (!%p201_p7)   ;;  %619 = vmatprep.subr.bf16.mxu0 (!%p201_p7), %v699_v8  ;;  %659 = vmatprep.subr.bf16.mxu1 (!%p201_p7), %v699_v8  ;;  %v702_v11 = vld [vmem:[%s892_s1 + $0x8] sm:$0xff] (!%p201_p7)   ;;  %v704_v13 = vld [vmem:[%s892_s1 + $0x10] sm:$0xff] (!%p201_p7)   ;;  %s585_s23 = sshll.u32 (!%p201_p7), %s207_s20, 6 }
  0x1b   : > { %620 = vmatpush3.bf16.msra.mxu0 (!%p201_p7), %v700_v9  ;;  %667 = vmatpush3.bf16.msra.mxu1 (!%p201_p7), %v700_v9  ;;  %v705_v14 = vld [vmem:[%s892_s1 + $0x58] sm:$0xff] (!%p201_p7)   ;;  %v707_v16 = vld [vmem:[%s892_s1 + $0x60] sm:$0xff] (!%p201_p7)   ;;  %v709_v18 = vld [vmem:[%s892_s1 + $0x68] sm:$0xff] (!%p201_p7)   ;;  %s841_s29 = scalar_lea.vmem (!%p201_p7), [#allocation2], %s585_s23  ;;  %p232_p8 = scmp.lt.s32.totalorder (!%p201_p7), %s586_s21, 3 }
  0x1c   : > { %621 = vmatprep.subr.bf16.mxu0 (!%p201_p7), %v701_v10  ;;  %660 = vmatprep.subr.bf16.mxu1 (!%p201_p7), %v701_v10  ;;  %v706_v15 = vld [vmem:[%s892_s1 + $0x18] sm:$0xff] (!%p201_p7)   ;;  %v708_v17 = vld [vmem:[%s892_s1 + $0x20] sm:$0xff] (!%p201_p7)   ;;  %v710_v21 = vld [vmem:[%s892_s1 + $0x28] sm:$0xff] (!%p201_p7)  }
  0x1d   : > { %v717_v19 = vld [vmem:[%s841_s29 + $0x4] ss:$8 sps:$4 sm:$0xff] (!%p201_p7)   ;;  %v711_v22 = vld [vmem:[%s892_s1 + $0x70] sm:$0xff] (!%p201_p7)   ;;  %v713_v24 = vld [vmem:[%s892_s1 + $0x78] sm:$0xff] (!%p201_p7)  }
  0x1e   : > { %v720_v20 = vld [vmem:[%s841_s29 + $0x24] ss:$8 sps:$4 sm:$0xff] (!%p201_p7)   ;;  %451 = vmatprep.mubr.bf16.mxu0 (!%p201_p7), %v717_v19  ;;  %v712_v23 = vld [vmem:[%s892_s1 + $0x30] sm:$0xff] (!%p201_p7)   ;;  %v714_v25 = vld [vmem:[%s892_s1 + $0x38] sm:$0xff] (!%p201_p7)  }
  0x1f   : > { %622 = vmatpush3.bf16.msra.mxu0 (!%p201_p7), %v702_v11  ;;  %668 = vmatpush3.bf16.msra.mxu1 (!%p201_p7), %v702_v11  ;;  %v715_v26 = vld [vmem:[%s841_s29] ss:$8 sps:$4 sm:$0xff] (!%p201_p7)   ;;  %v721_v28 = vld [vmem:[%s841_s29 + $0x14] ss:$8 sps:$4 sm:$0xff] (!%p201_p7)   ;;  %v725_v30 = vld [vmem:[%s841_s29 + $0x10] ss:$8 sps:$4 sm:$0xff] (!%p201_p7)  }
  0x20   : > { %623 = vmatprep.subr.bf16.mxu0 (!%p201_p7), %v703_v12  ;;  %661 = vmatprep.subr.bf16.mxu1 (!%p201_p7), %v703_v12  ;;  %v718_v27 = vld [vmem:[%s841_s29 + $0x20] ss:$8 sps:$4 sm:$0xff] (!%p201_p7)   ;;  %v723_v29 = vld [vmem:[%s841_s29 + $0x34] ss:$8 sps:$4 sm:$0xff] (!%p201_p7)   ;;  %v726_v31 = vld [vmem:[%s841_s29 + $0x30] ss:$8 sps:$4 sm:$0xff] (!%p201_p7)  }
  0x21   : > { %467 = vmatprep.mubr.bf16.mxu1 %v720_v20  ;;  %v588_v44 = vld [vmem:[%s893_s2] ss:$0 sm:$0xff]  ;;  %s899_s21 = smov (!%p232_p8, %s586_s21), 3  ;;  %v613_v11 = vld [vmem:[%s893_s2 + $0x1] ss:$0 sm:$0xff] }
  0x22   : > { %s587_s22 = sshll.u32 %s899_s21, 3 }
  0x23   : > { %624 = vmatpush3.bf16.msra.mxu0 %v704_v13  ;;  %669 = vmatpush3.bf16.msra.mxu1 %v704_v13  ;;  %s235_s27 = scalar_lea.vmem %s894_s3, %s587_s22 }
  0x24   : > { %625 = vmatprep.subr.bf16.mxu0 %v705_v14  ;;  %662 = vmatprep.subr.bf16.mxu1 %v705_v14 }
  0x27   : > { %626 = vmatpush3.bf16.msra.mxu0 %v706_v15  ;;  %670 = vmatpush3.bf16.msra.mxu1 %v706_v15  ;;  %v614_v15 = vld [vmem:[%s893_s2 + $0x2] ss:$0 sm:$0xff] }
  0x28   : > { %627 = vmatprep.subr.bf16.mxu0 %v707_v16  ;;  %663 = vmatprep.subr.bf16.mxu1 %v707_v16 }
  0x2b   : > { %628 = vmatpush3.bf16.msra.mxu0 %v708_v17  ;;  %671 = vmatpush3.bf16.msra.mxu1 %v708_v17 }
  0x2c   : > { %629 = vmatprep.subr.bf16.mxu0 %v709_v18  ;;  %664 = vmatprep.subr.bf16.mxu1 %v709_v18 }
  0x2f   : > { %630 = vmatpush3.bf16.msra.mxu0 %v710_v21  ;;  %672 = vmatpush3.bf16.msra.mxu1 %v710_v21 }
  0x30   : > { %631 = vmatprep.subr.bf16.mxu0 %v711_v22  ;;  %665 = vmatprep.subr.bf16.mxu1 %v711_v22 }
  0x33   : > { %632 = vmatpush3.bf16.msra.mxu0 %v712_v23  ;;  %673 = vmatpush3.bf16.msra.mxu1 %v712_v23 }
  0x34   : > { %633 = vmatprep.subr.bf16.mxu0 %v713_v24  ;;  %666 = vmatprep.subr.bf16.mxu1 %v713_v24 }
  0x37   : > { %634 = vmatpush3.bf16.msra.mxu0 %v714_v25  ;;  %674 = vmatpush3.bf16.msra.mxu1 %v714_v25 }
  0x3a   : > { %452 = vmatmul.mubr.bf16.vlgmr.msra.gmra.mrb[0].mxu0 %v715_v26  ;;  %468 = vmatmul.mubr.bf16.vlgmr.msra.gmra.mrb[0].mxu1 %v718_v27 }
  0x3b   : > { %459 = vmatprep.mubr.bf16.mxu0 %v721_v28  ;;  %475 = vmatprep.mubr.bf16.mxu1 %v723_v29 }
  0x42   : > { %460 = vmatmul.mubr.bf16.gmra.mrb[4].mxu0 %v725_v30  ;;  %476 = vmatmul.mubr.bf16.gmra.mrb[4].mxu1 %v726_v31 }
 0x10d   : > { %v635_v32 = vpop.f32.mrb[0].mxu0  ;;  %v647_v33 = vpop.f32.mrb[0].mxu1 }
 0x10e   : > { %v636_v34 = vpop.f32.mrb[1].mxu0  ;;  %v648_v35 = vpop.f32.mrb[1].mxu1 }
 0x10f   : > { %v637_v36 = vadd.f32 %v636_v34, %v635_v32  ;;  %v649_v37 = vadd.f32 %v648_v35, %v647_v33  ;;  %v638_v38 = vpop.f32.mrb[2].mxu0  ;;  %v650_v39 = vpop.f32.mrb[2].mxu1 }
 0x110   : > { %v639_v40 = vpop.f32.mrb[3].mxu0  ;;  %v651_v41 = vpop.f32.mrb[3].mxu1 }
 0x111   : > { %v640_v42 = vadd.f32 %v639_v40, %v638_v38  ;;  %v652_v43 = vadd.f32 %v651_v41, %v650_v39  ;;  %v454_v47 = vadd.f32 %v637_v36, %v588_v44  ;;  %v470_v48 = vadd.f32 %v649_v37, %v588_v44 }
 0x113   : > { %v457_v55 = vadd.f32 %v640_v42, %v588_v44  ;;  %v473_v56 = vadd.f32 %v652_v43, %v588_v44  ;;  %v484_v63 = vmax.f32 %v454_v47, 0.0  ;;  %v488_v0 = vmax.f32 %v470_v48, 0.0 }
 0x115   : > { %v641_v45 = vpop.f32.mrb[4].mxu0  ;;  %v653_v46 = vpop.f32.mrb[4].mxu1  ;;  %v485_v5 = vmax.f32 %v457_v55, 0.0  ;;  %v489_v6 = vmax.f32 %v473_v56, 0.0 }
 0x116   : > { %v642_v49 = vpop.f32.mrb[5].mxu0  ;;  %v654_v50 = vpop.f32.mrb[5].mxu1 }
 0x117   : > { %v643_v51 = vadd.f32 %v642_v49, %v641_v45  ;;  %v655_v52 = vadd.f32 %v654_v50, %v653_v46  ;;  %v644_v53 = vpop.f32.mrb[6].mxu0  ;;  %v656_v54 = vpop.f32.mrb[6].mxu1 }
 0x118   : > { %v645_v57 = vpop.f32.mrb[7].mxu0  ;;  %v657_v58 = vpop.f32.mrb[7].mxu1 }
 0x119   : > { %v462_v59 = vadd.f32 %v643_v51, %v588_v44  ;;  %v478_v60 = vadd.f32 %v655_v52, %v588_v44  ;;  %v646_v61 = vadd.f32 %v645_v57, %v644_v53  ;;  %v658_v62 = vadd.f32 %v657_v58, %v656_v54 }
 0x11b   : > { %v486_v1 = vmax.f32 %v462_v59, 0.0  ;;  %v490_v2 = vmax.f32 %v478_v60, 0.0  ;;  %v465_v3 = vadd.f32 %v646_v61, %v588_v44  ;;  %v481_v4 = vadd.f32 %v658_v62, %v588_v44 }
 0x11d   : > { %v492_v7 = vmax.f32 %v484_v63, %v486_v1  ;;  %v494_v8 = vmax.f32 %v488_v0, %v490_v2  ;;  %v487_v9 = vmax.f32 %v465_v3, 0.0  ;;  %v491_v10 = vmax.f32 %v481_v4, 0.0 }
 0x11f   : > { %v496_v12 = vmax.f32 %v492_v7, %v494_v8  ;;  %v493_v13 = vmax.f32 %v485_v5, %v487_v9  ;;  %v495_v14 = vmax.f32 %v489_v6, %v491_v10 }
 0x121   : > { %v503_v16 = vmul.f32 %v613_v11, %v496_v12  ;;  %v497_v17 = vmax.f32 %v493_v13, %v495_v14 }
 0x123   : > { %v510_v18 = vadd.f32 %v614_v15, %v503_v16  ;;  %v504_v19 = vmul.f32 %v613_v11, %v497_v17 }
 0x125   : > { %512 = vst [vmem:[%s235_s27] sm:$0xff] %v510_v18  ;;  %v511_v20 = vadd.f32 %v614_v15, %v504_v19 }
 0x127   : > { %513 = vst [vmem:[%s235_s27 + $0x8] sm:$0xff] %v511_v20 }
 0x128 PF: > { %p10_p9 = scmp.ge.s32.totalorder %s788_s16, 4   ;;  %s895_s12 = smov %s745_s13 }
 0x129   : > { %s896_s13 = smov %s797_s19  ;;  %s897_s14 = smov %s788_s16 }
 0x12a   :  { %12 = sbr.rel (!%p10_p9) target bundleno = 2 (0x2), region = 105 }

// kernel: encoder_forward.7
= control target key start
LH: loop header
LB: loop body
LE: loop exit
PB: predicated region body
PF: predicated region fallthrough
CT: control target
= control target key end

     0   :  { %s2631_s12 = smov 0   ;;  %s2633_s13 = smov 0   ;;  %s3630_s0 = inlined_call_operand.vmem [shape: bf16[4,416,128], index: 0, kind: input, shape index: {}]   ;;  %s3631_s1 = inlined_call_operand.vmem [shape: bf16[128,128], index: 1, kind: input, shape index: {}]   ;;  %s3632_s2 = inlined_call_operand.vmem [shape: f32[8,128], index: 2, kind: input, shape index: {}]   ;;  %s3633_s3 = inlined_call_operand.vmem [shape: bf16[416,128], index: 3, kind: output, shape index: {}]  }
   0x1   :  { %s2635_s14 = smov 0  }
   0x2 LB: > { %s2102_s15 = sadd.s32 4294967295, %s2609_s14   ;;  %s2648_s16 = sadd.s32 1, %s2609_s14   ;;  %s2609_s14 = sphi %s2635_s14, %s3867_s14   ;;  %s2605_s13 = sphi %s2633_s13, %s3866_s13   ;;  %s2601_s12 = sphi %s2631_s12, %s3865_s12  }
   0x3   : > { %s17_s17 = ssub.s32 %s2609_s14, %s2648_s16  ;;  %s20_s18 = sadd.s32 1, %s2605_s13 }
   0x4   : > { %p18_p0 = scmp.eq.s32.totalorder %s17_s17, 0  ;;  %p27_p1 = scmp.ne.s32.totalorder %s2605_s13, %s2601_s12 }
   0x5   : > { %p28_p2 = scmp.eq.s32.totalorder %s2609_s14, 0  ;;  %p2105_p4 = scmp.ge.s32.totalorder %s2609_s14, 2 }
   0x6   : > { %s2657_s19 = scalar_select %p18_p0, %s2605_s13, %s20_s18  }
   0x7   : > { %p29_p3 = por %p28_p2, %p27_p1  ;;  %127 = sbr.rel (%p2105_p4) target bundleno = 45 (0x2d), region = 24 }
   0xe   : > { %130 = sbr.rel (!%p29_p3) target bundleno = 45 (0x2d), region = 28  ;;  %s132_s20 = sand.u32 (%p29_p3), 1, %s2605_s13  }
   0xf   : > { %s2200_s21 = smul.u32 (%p29_p3), 104, %s2609_s14 }
  0x10   : > { %s2500_s22 = smul.u32 (%p29_p3), 416, %s132_s20 }
  0x11   : > { %s2665_s25 = scalar_lea.vmem (%p29_p3), %s3630_s0, %s2200_s21 }
  0x12   : > { %v153_v0 = vld [vmem:[%s2665_s25] sm:$0xff] (%p29_p3)   ;;  %v157_v1 = vld [vmem:[%s2665_s25 + $0x8] sm:$0xff] (%p29_p3)   ;;  %v161_v2 = vld [vmem:[%s2665_s25 + $0x10] sm:$0xff] (%p29_p3)   ;;  %s2670_s26 = scalar_lea.vmem (%p29_p3), [#allocation2], %s2500_s22 }
  0x13   : > { %154 = vst [vmem:[%s2670_s26] sm:$0xff] (%p29_p3), %v153_v0   ;;  %158 = vst [vmem:[%s2670_s26 + $0x8] sm:$0xff] (%p29_p3), %v157_v1   ;;  %v165_v3 = vld [vmem:[%s2665_s25 + $0x18] sm:$0xff] (%p29_p3)   ;;  %v169_v4 = vld [vmem:[%s2665_s25 + $0x20] sm:$0xff] (%p29_p3)  }
  0x14   : > { %162 = vst [vmem:[%s2670_s26 + $0x10] sm:$0xff] (%p29_p3), %v161_v2   ;;  %v173_v5 = vld [vmem:[%s2665_s25 + $0x28] sm:$0xff] (%p29_p3)   ;;  %166 = vst [vmem:[%s2670_s26 + $0x18] sm:$0xff] (%p29_p3), %v165_v3   ;;  %v177_v6 = vld [vmem:[%s2665_s25 + $0x30] sm:$0xff] (%p29_p3)  }
  0x15   : > { %170 = vst [vmem:[%s2670_s26 + $0x20] sm:$0xff] %v169_v4   ;;  %174 = vst [vmem:[%s2670_s26 + $0x28] sm:$0xff] %v173_v5   ;;  %v181_v7 = vld [vmem:[%s2665_s25 + $0x38] sm:$0xff]   ;;  %v185_v8 = vld [vmem:[%s2665_s25 + $0x40] sm:$0xff]  }
  0x16   : > { %178 = vst [vmem:[%s2670_s26 + $0x30] sm:$0xff] %v177_v6   ;;  %182 = vst [vmem:[%s2670_s26 + $0x38] sm:$0xff] %v181_v7   ;;  %v189_v9 = vld [vmem:[%s2665_s25 + $0x48] sm:$0xff]   ;;  %v193_v10 = vld [vmem:[%s2665_s25 + $0x50] sm:$0xff]  }
  0x17   : > { %186 = vst [vmem:[%s2670_s26 + $0x40] sm:$0xff] %v185_v8   ;;  %v197_v11 = vld [vmem:[%s2665_s25 + $0x58] sm:$0xff]   ;;  %190 = vst [vmem:[%s2670_s26 + $0x48] sm:$0xff] %v189_v9   ;;  %v201_v12 = vld [vmem:[%s2665_s25 + $0x60] sm:$0xff]  }
  0x18   : > { %194 = vst [vmem:[%s2670_s26 + $0x50] sm:$0xff] %v193_v10   ;;  %198 = vst [vmem:[%s2670_s26 + $0x58] sm:$0xff] %v197_v11   ;;  %v205_v13 = vld [vmem:[%s2665_s25 + $0xd0] sm:$0xff]   ;;  %v209_v14 = vld [vmem:[%s2665_s25 + $0xd8] sm:$0xff]  }
  0x19   : > { %202 = vst [vmem:[%s2670_s26 + $0x60] sm:$0xff] %v201_v12   ;;  %206 = vst [vmem:[%s2670_s26 + $0x68] sm:$0xff] %v205_v13   ;;  %v213_v15 = vld [vmem:[%s2665_s25 + $0xe0] sm:$0xff]   ;;  %v217_v16 = vld [vmem:[%s2665_s25 + $0xe8] sm:$0xff]  }
  0x1a   : > { %210 = vst [vmem:[%s2670_s26 + $0x70] sm:$0xff] %v209_v14   ;;  %v221_v17 = vld [vmem:[%s2665_s25 + $0xf0] sm:$0xff]   ;;  %214 = vst [vmem:[%s2670_s26 + $0x78] sm:$0xff] %v213_v15   ;;  %v225_v18 = vld [vmem:[%s2665_s25 + $0xf8] sm:$0xff]  }
  0x1b   : > { %218 = vst [vmem:[%s2670_s26 + $0x80] sm:$0xff] %v217_v16   ;;  %222 = vst [vmem:[%s2670_s26 + $0x88] sm:$0xff] %v221_v17   ;;  %v229_v19 = vld [vmem:[%s2665_s25 + $0x100] sm:$0xff]   ;;  %v233_v20 = vld [vmem:[%s2665_s25 + $0x108] sm:$0xff]  }
  0x1c   : > { %226 = vst [vmem:[%s2670_s26 + $0x90] sm:$0xff] %v225_v18   ;;  %230 = vst [vmem:[%s2670_s26 + $0x98] sm:$0xff] %v229_v19   ;;  %v237_v21 = vld [vmem:[%s2665_s25 + $0x110] sm:$0xff]   ;;  %v241_v22 = vld [vmem:[%s2665_s25 + $0x118] sm:$0xff]  }
  0x1d   : > { %234 = vst [vmem:[%s2670_s26 + $0xa0] sm:$0xff] %v233_v20   ;;  %v245_v23 = vld [vmem:[%s2665_s25 + $0x120] sm:$0xff]   ;;  %238 = vst [vmem:[%s2670_s26 + $0xa8] sm:$0xff] %v237_v21   ;;  %v249_v24 = vld [vmem:[%s2665_s25 + $0x128] sm:$0xff]  }
  0x1e   : > { %242 = vst [vmem:[%s2670_s26 + $0xb0] sm:$0xff] %v241_v22   ;;  %246 = vst [vmem:[%s2670_s26 + $0xb8] sm:$0xff] %v245_v23   ;;  %v253_v25 = vld [vmem:[%s2665_s25 + $0x130] sm:$0xff]   ;;  %v257_v26 = vld [vmem:[%s2665_s25 + $0x1a0] sm:$0xff]  }
  0x1f   : > { %250 = vst [vmem:[%s2670_s26 + $0xc0] sm:$0xff] %v249_v24   ;;  %254 = vst [vmem:[%s2670_s26 + $0xc8] sm:$0xff] %v253_v25   ;;  %v261_v27 = vld [vmem:[%s2665_s25 + $0x1a8] sm:$0xff]   ;;  %v265_v28 = vld [vmem:[%s2665_s25 + $0x1b0] sm:$0xff]  }
  0x20   : > { %258 = vst [vmem:[%s2670_s26 + $0xd0] sm:$0xff] %v257_v26   ;;  %v269_v29 = vld [vmem:[%s2665_s25 + $0x1b8] sm:$0xff]   ;;  %262 = vst [vmem:[%s2670_s26 + $0xd8] sm:$0xff] %v261_v27   ;;  %v273_v30 = vld [vmem:[%s2665_s25 + $0x1c0] sm:$0xff]  }
  0x21   : > { %266 = vst [vmem:[%s2670_s26 + $0xe0] sm:$0xff] %v265_v28   ;;  %270 = vst [vmem:[%s2670_s26 + $0xe8] sm:$0xff] %v269_v29   ;;  %v277_v31 = vld [vmem:[%s2665_s25 + $0x1c8] sm:$0xff]   ;;  %v281_v32 = vld [vmem:[%s2665_s25 + $0x1d0] sm:$0xff]  }
  0x22   : > { %274 = vst [vmem:[%s2670_s26 + $0xf0] sm:$0xff] %v273_v30   ;;  %278 = vst [vmem:[%s2670_s26 + $0xf8] sm:$0xff] %v277_v31   ;;  %v285_v33 = vld [vmem:[%s2665_s25 + $0x1d8] sm:$0xff]   ;;  %v289_v34 = vld [vmem:[%s2665_s25 + $0x1e0] sm:$0xff]  }
  0x23   : > { %282 = vst [vmem:[%s2670_s26 + $0x100] sm:$0xff] %v281_v32   ;;  %v293_v35 = vld [vmem:[%s2665_s25 + $0x1e8] sm:$0xff]   ;;  %286 = vst [vmem:[%s2670_s26 + $0x108] sm:$0xff] %v285_v33   ;;  %v297_v36 = vld [vmem:[%s2665_s25 + $0x1f0] sm:$0xff]  }
  0x24   : > { %290 = vst [vmem:[%s2670_s26 + $0x110] sm:$0xff] %v289_v34   ;;  %294 = vst [vmem:[%s2670_s26 + $0x118] sm:$0xff] %v293_v35   ;;  %v301_v37 = vld [vmem:[%s2665_s25 + $0x1f8] sm:$0xff]   ;;  %v305_v38 = vld [vmem:[%s2665_s25 + $0x200] sm:$0xff]  }
  0x25   : > { %298 = vst [vmem:[%s2670_s26 + $0x120] sm:$0xff] %v297_v36   ;;  %302 = vst [vmem:[%s2670_s26 + $0x128] sm:$0xff] %v301_v37   ;;  %v309_v39 = vld [vmem:[%s2665_s25 + $0x270] sm:$0xff]   ;;  %v313_v40 = vld [vmem:[%s2665_s25 + $0x278] sm:$0xff]  }
  0x26   : > { %306 = vst [vmem:[%s2670_s26 + $0x130] sm:$0xff] %v305_v38   ;;  %v317_v41 = vld [vmem:[%s2665_s25 + $0x280] sm:$0xff]   ;;  %310 = vst [vmem:[%s2670_s26 + $0x138] sm:$0xff] %v309_v39   ;;  %v321_v42 = vld [vmem:[%s2665_s25 + $0x288] sm:$0xff]  }
  0x27   : > { %314 = vst [vmem:[%s2670_s26 + $0x140] sm:$0xff] %v313_v40   ;;  %318 = vst [vmem:[%s2670_s26 + $0x148] sm:$0xff] %v317_v41   ;;  %v325_v43 = vld [vmem:[%s2665_s25 + $0x290] sm:$0xff]   ;;  %v329_v44 = vld [vmem:[%s2665_s25 + $0x298] sm:$0xff]  }
  0x28   : > { %322 = vst [vmem:[%s2670_s26 + $0x150] sm:$0xff] %v321_v42   ;;  %326 = vst [vmem:[%s2670_s26 + $0x158] sm:$0xff] %v325_v43   ;;  %v333_v45 = vld [vmem:[%s2665_s25 + $0x2a0] sm:$0xff]   ;;  %v337_v46 = vld [vmem:[%s2665_s25 + $0x2a8] sm:$0xff]  }
  0x29   : > { %330 = vst [vmem:[%s2670_s26 + $0x160] sm:$0xff] %v329_v44   ;;  %v341_v47 = vld [vmem:[%s2665_s25 + $0x2b0] sm:$0xff]   ;;  %334 = vst [vmem:[%s2670_s26 + $0x168] sm:$0xff] %v333_v45   ;;  %v345_v48 = vld [vmem:[%s2665_s25 + $0x2b8] sm:$0xff]  }
  0x2a   : > { %338 = vst [vmem:[%s2670_s26 + $0x170] sm:$0xff] %v337_v46   ;;  %342 = vst [vmem:[%s2670_s26 + $0x178] sm:$0xff] %v341_v47   ;;  %v349_v49 = vld [vmem:[%s2665_s25 + $0x2c0] sm:$0xff]   ;;  %v353_v50 = vld [vmem:[%s2665_s25 + $0x2c8] sm:$0xff]  }
  0x2b   : > { %346 = vst [vmem:[%s2670_s26 + $0x180] sm:$0xff] %v345_v48   ;;  %350 = vst [vmem:[%s2670_s26 + $0x188] sm:$0xff] %v349_v49   ;;  %v357_v51 = vld [vmem:[%s2665_s25 + $0x2d0] sm:$0xff]  }
  0x2c   : > { %354 = vst [vmem:[%s2670_s26 + $0x190] sm:$0xff] %v353_v50   ;;  %358 = vst [vmem:[%s2670_s26 + $0x198] sm:$0xff] %v357_v51  }
  0x2d PF: > { %p2107_p5 = scmp.ge.s32.totalorder %s2609_s14, 1  ;;  %p590_p6 = scmp.lt.s32.totalorder %s2609_s14, 3 }
  0x2f   : > { %p591_p7 = pnand %p2107_p5, %p590_p6 }
  0x31   : > { %594 = sbr.rel (%p591_p7) target bundleno = 451 (0x1c3), region = 69 }
  0x38   : > { %v2526_v52 = vld [vmem:[%s3631_s1] sm:$0xff]   ;;  %s597_s29 = sand.u32 1, %s2601_s12   ;;  %v2527_v53 = vld [vmem:[%s3631_s1 + $0x8] sm:$0xff]   ;;  %v2528_v54 = vld [vmem:[%s3631_s1 + $0x10] sm:$0xff]   ;;  %s3226_s26 = smul.u32 26, %s2102_s15 }
  0x39   : > { %s2501_s5 = smul.u32 416, %s597_s29  ;;  %2364 = vmatprep.subr.bf16.mxu0 %v2526_v52  ;;  %2484 = vmatprep.subr.bf16.mxu1 %v2526_v52  ;;  %v2529_v55 = vld [vmem:[%s3631_s1 + $0x18] sm:$0xff]   ;;  %v2530_v58 = vld [vmem:[%s3631_s1 + $0x20] sm:$0xff]   ;;  %v2531_v59 = vld [vmem:[%s3631_s1 + $0x28] sm:$0xff]  }
  0x3a   : > { %2365 = vmatpush3.bf16.msra.mxu0 %v2526_v52  ;;  %2492 = vmatpush3.bf16.msra.mxu1 %v2526_v52  ;;  %v2532_v60 = vld [vmem:[%s3631_s1 + $0x30] sm:$0xff]   ;;  %v2533_v61 = vld [vmem:[%s3631_s1 + $0x38] sm:$0xff]   ;;  %p622_p8 = scmp.lt.s32.totalorder %s3226_s26, 51 }
  0x3b   : > { %2366 = vmatprep.subr.bf16.mxu0 %v2527_v53  ;;  %2485 = vmatprep.subr.bf16.mxu1 %v2527_v53  ;;  %s2788_s10 = scalar_lea.vmem [#allocation2], %s2501_s5 }
  0x3c   : > { %v2534_v56 = vld [vmem:[%s2788_s10] sm:$0xff]   ;;  %v2535_v57 = vld [vmem:[%s2788_s10 + $0xd0] sm:$0xff]   ;;  %v2536_v62 = vld [vmem:[%s2788_s10 + $0x8] sm:$0xff]   ;;  %s3869_s26 = smov (!%p622_p8, %s3226_s26), 51 }
  0x3d   : > { %2380 = vmatprep.mubr.bf16.mxu0 %v2534_v56  ;;  %2432 = vmatprep.mubr.bf16.mxu1 %v2535_v57  ;;  %v2537_v63 = vld [vmem:[%s2788_s10 + $0xd8] sm:$0xff]   ;;  %v2538_v0 = vld [vmem:[%s2788_s10 + $0x10] sm:$0xff]   ;;  %v2539_v1 = vld [vmem:[%s2788_s10 + $0xe0] sm:$0xff]   ;;  %s2108_s29 = sshll.u32 %s3869_s26, 2 }
  0x3e   : > { %2367 = vmatpush3.bf16.msra.mxu0 %v2527_v53  ;;  %2493 = vmatpush3.bf16.msra.mxu1 %v2527_v53  ;;  %v2540_v2 = vld [vmem:[%s2788_s10 + $0x18] sm:$0xff]   ;;  %v2541_v3 = vld [vmem:[%s2788_s10 + $0xe8] sm:$0xff]   ;;  %v2542_v4 = vld [vmem:[%s2788_s10 + $0x20] sm:$0xff]   ;;  %s3320_s5 = scalar_lea.vmem %s3633_s3, %s2108_s29 }
  0x3f   : > { %2368 = vmatprep.subr.bf16.mxu0 %v2528_v54  ;;  %2486 = vmatprep.subr.bf16.mxu1 %v2528_v54  ;;  %v2543_v5 = vld [vmem:[%s2788_s10 + $0xf0] sm:$0xff]   ;;  %v2544_v6 = vld [vmem:[%s2788_s10 + $0x28] sm:$0xff]   ;;  %v2545_v7 = vld [vmem:[%s2788_s10 + $0xf8] sm:$0xff]  }
  0x40   : > { %v2546_v8 = vld [vmem:[%s2788_s10 + $0x30] sm:$0xff]   ;;  %v2547_v9 = vld [vmem:[%s2788_s10 + $0x100] sm:$0xff]   ;;  %v2548_v10 = vld [vmem:[%s2788_s10 + $0x38] sm:$0xff]  }
  0x41   : > { %v2549_v11 = vld [vmem:[%s2788_s10 + $0x108] sm:$0xff]   ;;  %v2550_v12 = vld [vmem:[%s2788_s10 + $0x40] sm:$0xff]   ;;  %v2551_v13 = vld [vmem:[%s2788_s10 + $0x110] sm:$0xff]  }
  0x42   : > { %2369 = vmatpush3.bf16.msra.mxu0 %v2528_v54  ;;  %2494 = vmatpush3.bf16.msra.mxu1 %v2528_v54  ;;  %v2552_v14 = vld [vmem:[%s2788_s10 + $0x48] sm:$0xff]   ;;  %v2553_v15 = vld [vmem:[%s2788_s10 + $0x118] sm:$0xff]   ;;  %v2554_v16 = vld [vmem:[%s2788_s10 + $0x50] sm:$0xff]  }
  0x43   : > { %2370 = vmatprep.subr.bf16.mxu0 %v2529_v55  ;;  %2487 = vmatprep.subr.bf16.mxu1 %v2529_v55  ;;  %v2555_v17 = vld [vmem:[%s2788_s10 + $0x120] sm:$0xff]   ;;  %v2556_v18 = vld [vmem:[%s2788_s10 + $0x58] sm:$0xff]   ;;  %v2557_v19 = vld [vmem:[%s2788_s10 + $0x128] sm:$0xff]  }
  0x44   : > { %v2558_v20 = vld [vmem:[%s2788_s10 + $0x60] sm:$0xff]   ;;  %v2559_v21 = vld [vmem:[%s2788_s10 + $0x130] sm:$0xff]   ;;  %v2560_v22 = vld [vmem:[%s2788_s10 + $0x68] sm:$0xff]  }
  0x45   : > { %v2561_v23 = vld [vmem:[%s2788_s10 + $0x138] sm:$0xff]   ;;  %v2562_v24 = vld [vmem:[%s2788_s10 + $0x70] sm:$0xff]   ;;  %v2563_v25 = vld [vmem:[%s2788_s10 + $0x140] sm:$0xff]  }
  0x46   : > { %2371 = vmatpush3.bf16.msra.mxu0 %v2529_v55  ;;  %2495 = vmatpush3.bf16.msra.mxu1 %v2529_v55  ;;  %v2564_v26 = vld [vmem:[%s2788_s10 + $0x78] sm:$0xff]   ;;  %v2565_v27 = vld [vmem:[%s2788_s10 + $0x148] sm:$0xff]   ;;  %v2566_v28 = vld [vmem:[%s2788_s10 + $0x80] sm:$0xff]  }
  0x47   : > { %2372 = vmatprep.subr.bf16.mxu0 %v2530_v58  ;;  %2488 = vmatprep.subr.bf16.mxu1 %v2530_v58  ;;  %v2567_v29 = vld [vmem:[%s2788_s10 + $0x150] sm:$0xff]   ;;  %v2568_v30 = vld [vmem:[%s2788_s10 + $0x88] sm:$0xff]   ;;  %v2569_v31 = vld [vmem:[%s2788_s10 + $0x158] sm:$0xff]  }
  0x48   : > { %v2570_v32 = vld [vmem:[%s2788_s10 + $0x90] sm:$0xff]   ;;  %v2571_v33 = vld [vmem:[%s2788_s10 + $0x160] sm:$0xff]   ;;  %v2572_v34 = vld [vmem:[%s2788_s10 + $0x98] sm:$0xff]  }
  0x49   : > { %v2573_v35 = vld [vmem:[%s2788_s10 + $0x168] sm:$0xff]   ;;  %v2574_v36 = vld [vmem:[%s2788_s10 + $0xa0] sm:$0xff]   ;;  %v2575_v37 = vld [vmem:[%s2788_s10 + $0x170] sm:$0xff]  }
  0x4a   : > { %2373 = vmatpush3.bf16.msra.mxu0 %v2530_v58  ;;  %2496 = vmatpush3.bf16.msra.mxu1 %v2530_v58  ;;  %v2576_v38 = vld [vmem:[%s2788_s10 + $0xa8] sm:$0xff]   ;;  %v2577_v39 = vld [vmem:[%s2788_s10 + $0x178] sm:$0xff]   ;;  %v2578_v40 = vld [vmem:[%s2788_s10 + $0xb0] sm:$0xff]  }
  0x4b   : > { %2374 = vmatprep.subr.bf16.mxu0 %v2531_v59  ;;  %2489 = vmatprep.subr.bf16.mxu1 %v2531_v59  ;;  %v2579_v41 = vld [vmem:[%s2788_s10 + $0x180] sm:$0xff]   ;;  %v2580_v42 = vld [vmem:[%s2788_s10 + $0xb8] sm:$0xff]   ;;  %v2581_v43 = vld [vmem:[%s2788_s10 + $0x188] sm:$0xff]  }
  0x4c   : > { %v2582_v44 = vld [vmem:[%s2788_s10 + $0xc0] sm:$0xff]   ;;  %v2583_v45 = vld [vmem:[%s2788_s10 + $0x190] sm:$0xff]   ;;  %v2584_v46 = vld [vmem:[%s2788_s10 + $0xc8] sm:$0xff]  }
  0x4d   : > { %v2585_v47 = vld [vmem:[%s2788_s10 + $0x198] sm:$0xff]   ;;  %v2857_v58 = vld [vmem:[%s3632_s2] ss:$0 sm:$0xff] }
  0x4e   : > { %2375 = vmatpush3.bf16.msra.mxu0 %v2531_v59  ;;  %2497 = vmatpush3.bf16.msra.mxu1 %v2531_v59 }
  0x4f   : > { %2376 = vmatprep.subr.bf16.mxu0 %v2532_v60  ;;  %2490 = vmatprep.subr.bf16.mxu1 %v2532_v60 }
  0x52   : > { %2377 = vmatpush3.bf16.msra.mxu0 %v2532_v60  ;;  %2498 = vmatpush3.bf16.msra.mxu1 %v2532_v60 }
  0x53   : > { %2378 = vmatprep.subr.bf16.mxu0 %v2533_v61  ;;  %2491 = vmatprep.subr.bf16.mxu1 %v2533_v61 }
  0x56   : > { %2379 = vmatpush3.bf16.msra.mxu0 %v2533_v61  ;;  %2499 = vmatpush3.bf16.msra.mxu1 %v2533_v61 }
  0x59   : > { %2381 = vmatmul.mubr.bf16.vlgmr.msra.gmra.mrb[0].mxu0 %v2536_v62  ;;  %2433 = vmatmul.mubr.bf16.vlgmr.msra.gmra.mrb[0].mxu1 %v2537_v63 }
  0x5a   : > { %2384 = vmatprep.mubr.bf16.mxu0 %v2538_v0  ;;  %2436 = vmatprep.mubr.bf16.mxu1 %v2539_v1 }
  0x61   : > { %2385 = vmatmul.mubr.bf16.gmra.mrb[4].mxu0 %v2540_v2  ;;  %2437 = vmatmul.mubr.bf16.gmra.mrb[4].mxu1 %v2541_v3 }
  0x62   : > { %2388 = vmatprep.mubr.bf16.mxu0 %v2542_v4  ;;  %2440 = vmatprep.mubr.bf16.mxu1 %v2543_v5 }
  0x69   : > { %2389 = vmatmul.mubr.bf16.gmra.mrb[8].mxu0 %v2544_v6  ;;  %2441 = vmatmul.mubr.bf16.gmra.mrb[8].mxu1 %v2545_v7 }
  0x6a   : > { %2392 = vmatprep.mubr.bf16.mxu0 %v2546_v8  ;;  %2444 = vmatprep.mubr.bf16.mxu1 %v2547_v9 }
  0x71   : > { %2393 = vmatmul.mubr.bf16.gmra.mrb[12].mxu0 %v2548_v10  ;;  %2445 = vmatmul.mubr.bf16.gmra.mrb[12].mxu1 %v2549_v11 }
  0x72   : > { %2396 = vmatprep.mubr.bf16.mxu0 %v2550_v12  ;;  %2448 = vmatprep.mubr.bf16.mxu1 %v2551_v13 }
  0x79   : > { %2397 = vmatmul.mubr.bf16.gmra.mrb[16].mxu0 %v2552_v14  ;;  %2449 = vmatmul.mubr.bf16.gmra.mrb[16].mxu1 %v2553_v15 }
  0x7a   : > { %2400 = vmatprep.mubr.bf16.mxu0 %v2554_v16  ;;  %2452 = vmatprep.mubr.bf16.mxu1 %v2555_v17 }
  0x81   : > { %2401 = vmatmul.mubr.bf16.gmra.mrb[20].mxu0 %v2556_v18  ;;  %2453 = vmatmul.mubr.bf16.gmra.mrb[20].mxu1 %v2557_v19 }
  0x82   : > { %2404 = vmatprep.mubr.bf16.mxu0 %v2558_v20  ;;  %2456 = vmatprep.mubr.bf16.mxu1 %v2559_v21 }
  0x89   : > { %2405 = vmatmul.mubr.bf16.gmra.mrb[24].mxu0 %v2560_v22  ;;  %2457 = vmatmul.mubr.bf16.gmra.mrb[24].mxu1 %v2561_v23 }
  0x8a   : > { %2408 = vmatprep.mubr.bf16.mxu0 %v2562_v24  ;;  %2460 = vmatprep.mubr.bf16.mxu1 %v2563_v25 }
  0x91   : > { %2409 = vmatmul.mubr.bf16.gmra.mrb[28].mxu0 %v2564_v26  ;;  %2461 = vmatmul.mubr.bf16.gmra.mrb[28].mxu1 %v2565_v27 }
  0x92   : > { %2412 = vmatprep.mubr.bf16.mxu0 %v2566_v28  ;;  %2464 = vmatprep.mubr.bf16.mxu1 %v2567_v29 }
  0x99   : > { %2413 = vmatmul.mubr.bf16.gmra.mrb[32].mxu0 %v2568_v30  ;;  %2465 = vmatmul.mubr.bf16.gmra.mrb[32].mxu1 %v2569_v31 }
  0x9a   : > { %2416 = vmatprep.mubr.bf16.mxu0 %v2570_v32  ;;  %2468 = vmatprep.mubr.bf16.mxu1 %v2571_v33 }
  0xa1   : > { %2417 = vmatmul.mubr.bf16.gmra.mrb[36].mxu0 %v2572_v34  ;;  %2469 = vmatmul.mubr.bf16.gmra.mrb[36].mxu1 %v2573_v35 }
  0xa2   : > { %2420 = vmatprep.mubr.bf16.mxu0 %v2574_v36  ;;  %2472 = vmatprep.mubr.bf16.mxu1 %v2575_v37 }
  0xa9   : > { %2421 = vmatmul.mubr.bf16.gmra.mrb[40].mxu0 %v2576_v38  ;;  %2473 = vmatmul.mubr.bf16.gmra.mrb[40].mxu1 %v2577_v39 }
  0xaa   : > { %2424 = vmatprep.mubr.bf16.mxu0 %v2578_v40  ;;  %2476 = vmatprep.mubr.bf16.mxu1 %v2579_v41 }
  0xb1   : > { %2425 = vmatmul.mubr.bf16.gmra.mrb[44].mxu0 %v2580_v42  ;;  %2477 = vmatmul.mubr.bf16.gmra.mrb[44].mxu1 %v2581_v43 }
  0xb2   : > { %2428 = vmatprep.mubr.bf16.mxu0 %v2582_v44  ;;  %2480 = vmatprep.mubr.bf16.mxu1 %v2583_v45 }
  0xb9   : > { %2429 = vmatmul.mubr.bf16.gmra.mrb[48].mxu0 %v2584_v46  ;;  %2481 = vmatmul.mubr.bf16.gmra.mrb[48].mxu1 %v2585_v47 }
 0x12c   : > { %v2382_v48 = vpop.f32.mrb[0].mxu0  ;;  %v2434_v49 = vpop.f32.mrb[0].mxu1 }
 0x12d   : > { %v1147_v50 = vpop.f32.mrb[1].mxu0  ;;  %v1355_v51 = vpop.f32.mrb[1].mxu1  ;;  %v2860_v1 = vadd.f32 %v2382_v48, %v2857_v58  ;;  %v2863_v2 = vadd.f32 %v2434_v49, %v2857_v58 }
 0x12e   : > { %v2383_v52 = vpop.f32.mrb[2].mxu0  ;;  %v2435_v53 = vpop.f32.mrb[2].mxu1  ;;  %v2866_v3 = vadd.f32 %v2857_v58, %v1147_v50  ;;  %v2869_v4 = vadd.f32 %v2857_v58, %v1355_v51 }
 0x12f   : > { %v1150_v54 = vpop.f32.mrb[3].mxu0  ;;  %v1358_v55 = vpop.f32.mrb[3].mxu1  ;;  %v2872_v5 = vadd.f32 %v2383_v52, %v2857_v58  ;;  %v2875_v6 = vadd.f32 %v2435_v53, %v2857_v58  ;;  %v2884_v9 = vmul.f32 0.01, %v2860_v1  ;;  %v2887_v10 = vmul.f32 0.01, %v2863_v2 }
 0x130   : > { %v2878_v7 = vadd.f32 %v2857_v58, %v1150_v54  ;;  %v2881_v8 = vadd.f32 %v2857_v58, %v1358_v55  ;;  %v2890_v13 = vmul.f32 0.01, %v2866_v3  ;;  %v2893_v14 = vmul.f32 0.01, %v2869_v4 }
 0x131   : > { %v2899_v18 = vmul.f32 0.01, %v2872_v5  ;;  %v2902_v19 = vmul.f32 0.01, %v2875_v6 }
 0x132   : > { %v2905_v22 = vmul.f32 0.01, %v2878_v7  ;;  %v2908_v23 = vmul.f32 0.01, %v2881_v8 }
 0x134   : > { %v2386_v56 = vpop.f32.mrb[4].mxu0  ;;  %v2438_v57 = vpop.f32.mrb[4].mxu1 }
 0x135   : > { %v1163_v59 = vpop.f32.mrb[5].mxu0  ;;  %v1371_v60 = vpop.f32.mrb[5].mxu1  ;;  %v2896_v15 = vadd.f32 %v2386_v56, %v2857_v58  ;;  %v2915_v28 = vadd.f32 %v2438_v57, %v2857_v58 }
 0x136   : > { %v2387_v61 = vpop.f32.mrb[6].mxu0  ;;  %v2439_v62 = vpop.f32.mrb[6].mxu1  ;;  %v2918_v29 = vadd.f32 %v2857_v58, %v1163_v59  ;;  %v2928_v33 = vadd.f32 %v2857_v58, %v1371_v60 }
 0x137   : > { %v1166_v63 = vpop.f32.mrb[7].mxu0  ;;  %v1374_v0 = vpop.f32.mrb[7].mxu1  ;;  %3694 = vst [vmem:[#allocation3_spill] sm:$0xff] %v2896_v15  ;;  %3695 = vst [vmem:[#allocation4_spill] sm:$0xff] %v2915_v28  ;;  %v2925_v32 = vmul.f32 0.01, %v2896_v15  ;;  %v2935_v36 = vadd.f32 %v2387_v61, %v2857_v58  ;;  %v2938_v37 = vadd.f32 %v2439_v62, %v2857_v58 }
 0x138   : > { %v2945_v40 = vadd.f32 %v2857_v58, %v1166_v63  ;;  %v2948_v41 = vadd.f32 %v2857_v58, %v1374_v0  ;;  %v2951_v42 = vmul.f32 0.01, %v2915_v28  ;;  %v2954_v43 = vmul.f32 0.01, %v2918_v29 }
 0x139   : > { %3696 = vst [vmem:[#allocation5_spill] sm:$0xff] %v2925_v32  ;;  %3697 = vst [vmem:[#allocation6_spill] sm:$0xff] %v2935_v36  ;;  %v2965_v49 = vmul.f32 0.01, %v2928_v33  ;;  %v2974_v54 = vmul.f32 0.01, %v2935_v36 }
 0x13a   : > { %3698 = vst [vmem:[#allocation7_spill] sm:$0xff] %v2938_v37  ;;  %3699 = vst [vmem:[#allocation8_spill] sm:$0xff] %v2951_v42  ;;  %v2977_v55 = vmul.f32 0.01, %v2938_v37  ;;  %v2986_v61 = vmul.f32 0.01, %v2945_v40 }
 0x13b   : > { %3702 = vst [vmem:[#allocation11_spill] sm:$0xff] %v2974_v54  ;;  %v2989_v62 = vmul.f32 0.01, %v2948_v41 }
 0x13c   : > { %v2390_v11 = vpop.f32.mrb[8].mxu0  ;;  %v2442_v12 = vpop.f32.mrb[8].mxu1  ;;  %3703 = vst [vmem:[#allocation12_spill] sm:$0xff] %v2977_v55 }
 0x13d   : > { %v1179_v16 = vpop.f32.mrb[9].mxu0  ;;  %v1387_v17 = vpop.f32.mrb[9].mxu1  ;;  %v2957_v44 = vadd.f32 %v2390_v11, %v2857_v58  ;;  %v2960_v45 = vadd.f32 %v2442_v12, %v2857_v58 }
 0x13e   : > { %v2391_v20 = vpop.f32.mrb[10].mxu0  ;;  %v2443_v21 = vpop.f32.mrb[10].mxu1  ;;  %v2968_v50 = vadd.f32 %v2857_v58, %v1179_v16  ;;  %v2971_v51 = vadd.f32 %v2857_v58, %v1387_v17 }
 0x13f   : > { %v1182_v24 = vpop.f32.mrb[11].mxu0  ;;  %v1390_v25 = vpop.f32.mrb[11].mxu1  ;;  %3700 = vst [vmem:[#allocation9_spill] sm:$0xff] %v2957_v44  ;;  %3701 = vst [vmem:[#allocation10_spill] sm:$0xff] %v2960_v45  ;;  %v2980_v56 = vadd.f32 %v2391_v20, %v2857_v58  ;;  %v2983_v57 = vadd.f32 %v2443_v21, %v2857_v58  ;;  %v3002_v20 = vmul.f32 0.01, %v2957_v44 }
 0x140   : > { %v2992_v63 = vadd.f32 %v2857_v58, %v1182_v24  ;;  %v2995_v0 = vadd.f32 %v2857_v58, %v1390_v25  ;;  %v3005_v21 = vmul.f32 0.01, %v2960_v45  ;;  %v3010_v25 = vmul.f32 0.01, %v2968_v50 }
 0x141   : > { %3704 = vst [vmem:[#allocation13_spill] sm:$0xff] %v2980_v56  ;;  %3705 = vst [vmem:[#allocation14_spill] sm:$0xff] %v2983_v57  ;;  %v3013_v48 = vmul.f32 0.01, %v2971_v51  ;;  %v3023_v27 = vmul.f32 0.01, %v2980_v56 }
 0x142   : > { %3706 = vst [vmem:[#allocation15_spill] sm:$0xff] %v2992_v63  ;;  %3707 = vst [vmem:[#allocation16_spill] sm:$0xff] %v2995_v0  ;;  %v3026_v26 = vmul.f32 0.01, %v2983_v57  ;;  %v3036_v35 = vmul.f32 0.01, %v2995_v0 }
 0x143   : > { %3708 = vst [vmem:[#allocation17_spill] sm:$0xff] %v3002_v20  ;;  %3709 = vst [vmem:[#allocation18_spill] sm:$0xff] %v3005_v21 }
 0x144   : > { %v2394_v46 = vpop.f32.mrb[12].mxu0  ;;  %v2446_v47 = vpop.f32.mrb[12].mxu1  ;;  %3711 = vst [vmem:[#allocation20_spill] sm:$0xff] %v3023_v27  ;;  %3712 = vst [vmem:[#allocation21_spill] sm:$0xff] %v3026_v26 }
 0x145   : > { %v1195_v52 = vpop.f32.mrb[13].mxu0  ;;  %v1403_v53 = vpop.f32.mrb[13].mxu1  ;;  %v3016_v16 = vadd.f32 %v2394_v46, %v2857_v58  ;;  %v3033_v46 = vmul.f32 0.01, %v2992_v63  ;;  %3714 = vst [vmem:[#allocation23_spill] sm:$0xff] %v3036_v35  ;;  %v3043_v38 = vadd.f32 %v2446_v47, %v2857_v58 }
 0x146   : > { %v2395_v59 = vpop.f32.mrb[14].mxu0  ;;  %v2447_v60 = vpop.f32.mrb[14].mxu1  ;;  %v3046_v24 = vadd.f32 %v2857_v58, %v1195_v52  ;;  %v3056_v34 = vadd.f32 %v2857_v58, %v1403_v53 }
 0x147   : > { %v1198_v11 = vpop.f32.mrb[15].mxu0  ;;  %v1406_v12 = vpop.f32.mrb[15].mxu1  ;;  %3710 = vst [vmem:[#allocation19_spill] sm:$0xff] %v3016_v16  ;;  %3713 = vst [vmem:[#allocation22_spill] sm:$0xff] %v3033_v46  ;;  %v3053_v37 = vmul.f32 0.01, %v3016_v16  ;;  %v3063_v45 = vadd.f32 %v2395_v59, %v2857_v58  ;;  %v3066_v30 = vadd.f32 %v2447_v60, %v2857_v58 }
 0x148   : > { %3715 = vst [vmem:[#allocation24_spill] sm:$0xff] %v3043_v38  ;;  %3716 = vst [vmem:[#allocation25_spill] sm:$0xff] %v3046_v24  ;;  %v3073_v54 = vadd.f32 %v2857_v58, %v1198_v11  ;;  %v3076_v52 = vadd.f32 %v2857_v58, %v1406_v12  ;;  %v3079_v26 = vmul.f32 0.01, %v3043_v38  ;;  %v3082_v60 = vmul.f32 0.01, %v3046_v24 }
 0x149   : > { %3717 = vst [vmem:[#allocation26_spill] sm:$0xff] %v3053_v37  ;;  %3718 = vst [vmem:[#allocation27_spill] sm:$0xff] %v3056_v34  ;;  %v3093_v12 = vmul.f32 0.01, %v3056_v34  ;;  %v3102_v56 = vmul.f32 0.01, %v3063_v45 }
 0x14a   : > { %3719 = vst [vmem:[#allocation28_spill] sm:$0xff] %v3063_v45  ;;  %3720 = vst [vmem:[#allocation29_spill] sm:$0xff] %v3066_v30  ;;  %v3114_v37 = vmul.f32 0.01, %v3073_v54 }
 0x14b   : > { %3721 = vst [vmem:[#allocation30_spill] sm:$0xff] %v3079_v26  ;;  %3722 = vst [vmem:[#allocation31_spill] sm:$0xff] %v3082_v60 }
 0x14c   : > { %v2398_v31 = vpop.f32.mrb[16].mxu0  ;;  %v2450_v17 = vpop.f32.mrb[16].mxu1  ;;  %3725 = vst [vmem:[#allocation34_spill] sm:$0xff] %v3093_v12  ;;  %3726 = vst [vmem:[#allocation35_spill] sm:$0xff] %v3102_v56 }
 0x14d   : > { %v1211_v39 = vpop.f32.mrb[17].mxu0  ;;  %v1419_v47 = vpop.f32.mrb[17].mxu1  ;;  %v3085_v57 = vadd.f32 %v2398_v31, %v2857_v58  ;;  %v3088_v53 = vadd.f32 %v2450_v17, %v2857_v58  ;;  %v3105_v31 = vmul.f32 0.01, %v3066_v30 }
 0x14e   : > { %v2399_v55 = vpop.f32.mrb[18].mxu0  ;;  %v2451_v20 = vpop.f32.mrb[18].mxu1  ;;  %v3096_v44 = vadd.f32 %v2857_v58, %v1211_v39  ;;  %v3099_v27 = vadd.f32 %v2857_v58, %v1419_v47  ;;  %v3117_v39 = vmul.f32 0.01, %v3076_v52 }
 0x14f   : > { %v1214_v21 = vpop.f32.mrb[19].mxu0  ;;  %v1422_v59 = vpop.f32.mrb[19].mxu1  ;;  %3723 = vst [vmem:[#allocation32_spill] sm:$0xff] %v3085_v57  ;;  %3724 = vst [vmem:[#allocation33_spill] sm:$0xff] %v3088_v53  ;;  %v3108_v17 = vadd.f32 %v2399_v55, %v2857_v58  ;;  %v3111_v11 = vadd.f32 %v2451_v20, %v2857_v58  ;;  %v3130_v20 = vmul.f32 0.01, %v3085_v57 }
 0x150   : > { %3727 = vst [vmem:[#allocation36_spill] sm:$0xff] %v3105_v31  ;;  %3730 = vst [vmem:[#allocation39_spill] sm:$0xff] %v3117_v39  ;;  %v3120_v47 = vadd.f32 %v2857_v58, %v1214_v21  ;;  %v3123_v16 = vadd.f32 %v2857_v58, %v1422_v59  ;;  %v3133_v35 = vmul.f32 0.01, %v3088_v53  ;;  %v3136_v21 = vmul.f32 0.01, %v3096_v44 }
 0x151   : > { %3728 = vst [vmem:[#allocation37_spill] sm:$0xff] %v3108_v17  ;;  %3729 = vst [vmem:[#allocation38_spill] sm:$0xff] %v3111_v11  ;;  %v3139_v59 = vmul.f32 0.01, %v3099_v27  ;;  %v3152_v24 = vmul.f32 0.01, %v3108_v17 }
 0x152   : > { %3731 = vst [vmem:[#allocation40_spill] sm:$0xff] %v3120_v47  ;;  %3732 = vst [vmem:[#allocation41_spill] sm:$0xff] %v3123_v16  ;;  %v3155_v42 = vmul.f32 0.01, %v3111_v11  ;;  %v3162_v15 = vmul.f32 0.01, %v3120_v47 }
 0x153   : > { %3733 = vst [vmem:[#allocation42_spill] sm:$0xff] %v3130_v20  ;;  %3734 = vst [vmem:[#allocation43_spill] sm:$0xff] %v3133_v35  ;;  %v3165_v38 = vmul.f32 0.01, %v3123_v16 }
 0x154   : > { %v2402_v0 = vpop.f32.mrb[20].mxu0  ;;  %v2454_v46 = vpop.f32.mrb[20].mxu1  ;;  %3735 = vst [vmem:[#allocation44_spill] sm:$0xff] %v3139_v59  ;;  %3738 = vst [vmem:[#allocation47_spill] sm:$0xff] %v3152_v24 }
 0x155   : > { %v3142_v63 = vadd.f32 %v2402_v0, %v2857_v58  ;;  %v3145_v36 = vadd.f32 %v2454_v46, %v2857_v58  ;;  %v1227_v55 = vpop.f32.mrb[21].mxu0  ;;  %v1435_v26 = vpop.f32.mrb[21].mxu1  ;;  %3739 = vst [vmem:[#allocation48_spill] sm:$0xff] %v3155_v42  ;;  %3740 = vst [vmem:[#allocation49_spill] sm:$0xff] %v3162_v15 }
 0x156   : > { %v2403_v28 = vpop.f32.mrb[22].mxu0  ;;  %v2455_v0 = vpop.f32.mrb[22].mxu1  ;;  %3741 = vst [vmem:[#allocation50_spill] sm:$0xff] %v3165_v38  ;;  %v3173_v34 = vadd.f32 %v2857_v58, %v1227_v55  ;;  %v3176_v46 = vadd.f32 %v2857_v58, %v1435_v26 }
 0x157   : > { %3736 = vst [vmem:[#allocation45_spill] sm:$0xff] %v3142_v63  ;;  %3737 = vst [vmem:[#allocation46_spill] sm:$0xff] %v3145_v36  ;;  %v1230_v60 = vpop.f32.mrb[23].mxu0  ;;  %v1438_v56 = vpop.f32.mrb[23].mxu1  ;;  %v3170_v12 = vmul.f32 0.01, %v3142_v63  ;;  %v3186_v45 = vadd.f32 %v2403_v28, %v2857_v58  ;;  %v3215_v31 = vadd.f32 %v2455_v0, %v2857_v58 }
 0x158   : > { %v3183_v30 = vmul.f32 0.01, %v3145_v36  ;;  %v3193_v26 = vadd.f32 %v2857_v58, %v1230_v60  ;;  %v3196_v32 = vadd.f32 %v2857_v58, %v1438_v56  ;;  %v3209_v55 = vmul.f32 0.01, %v3173_v34 }
 0x159   : > { %3742 = vst [vmem:[#allocation51_spill] sm:$0xff] %v3170_v12  ;;  %3744 = vst [vmem:[#allocation53_spill] sm:$0xff] %v3186_v45  ;;  %v3212_v56 = vmul.f32 0.01, %v3176_v46  ;;  %v3220_v42 = vmul.f32 0.01, %v3186_v45 }
 0x15a   : > { %3743 = vst [vmem:[#allocation52_spill] sm:$0xff] %v3183_v30  ;;  %3745 = vst [vmem:[#allocation54_spill] sm:$0xff] %v3215_v31  ;;  %v3229_v0 = vmul.f32 0.01, %v3193_v26  ;;  %v3232_v31 = vmul.f32 0.01, %v3196_v32 }
 0x15b   : > { %3746 = vst [vmem:[#allocation55_spill] sm:$0xff] %v3220_v42 }
 0x15c   : > { %v2406_v24 = vpop.f32.mrb[24].mxu0  ;;  %v2458_v28 = vpop.f32.mrb[24].mxu1  ;;  %3747 = vst [vmem:[#allocation56_spill] sm:$0xff] %v3229_v0 }
 0x15d   : > { %v1252_v39 = vadd.f32 %v2406_v24, %v2857_v58  ;;  %v1460_v60 = vadd.f32 %v2458_v28, %v2857_v58  ;;  %v1243_v12 = vpop.f32.mrb[25].mxu0  ;;  %v1451_v63 = vpop.f32.mrb[25].mxu1 }
 0x15e   : > { %v3235_v35 = vadd.f32 %v2857_v58, %v1243_v12  ;;  %v3238_v45 = vadd.f32 %v2857_v58, %v1451_v63  ;;  %v2407_v24 = vpop.f32.mrb[26].mxu0  ;;  %v2459_v28 = vpop.f32.mrb[26].mxu1 }
 0x15f   : > { %v1588_v42 = vmul.f32 0.01, %v1252_v39  ;;  %v1640_v30 = vmul.f32 0.01, %v1460_v60  ;;  %v1255_v36 = vadd.f32 %v2407_v24, %v2857_v58  ;;  %v1463_v11 = vadd.f32 %v2459_v28, %v2857_v58  ;;  %v1246_v17 = vpop.f32.mrb[27].mxu0  ;;  %v1454_v53 = vpop.f32.mrb[27].mxu1 }
 0x160   : > { %3748 = vst [vmem:[#allocation57_spill] sm:$0xff] %v3235_v35  ;;  %3749 = vst [vmem:[#allocation58_spill] sm:$0xff] %v3238_v45  ;;  %v3243_v20 = vmul.f32 0.01, %v3235_v35  ;;  %v3246_v12 = vmul.f32 0.01, %v3238_v45  ;;  %v3249_v63 = vadd.f32 %v2857_v58, %v1246_v17  ;;  %v3252_v57 = vadd.f32 %v2857_v58, %v1454_v53 }
 0x161   : > { %v1692_v38 = vmax.f32 %v1252_v39, %v1588_v42  ;;  %v1744_v16 = vmax.f32 %v1460_v60, %v1640_v30  ;;  %v1589_v15 = vmul.f32 0.01, %v1255_v36  ;;  %v1641_v24 = vmul.f32 0.01, %v1463_v11  ;;  %v3275_v17 = vld [vmem:[%s3632_s2 + $0x1] ss:$0 sm:$0xff] }
 0x162   : > { %3750 = vst [vmem:[#allocation59_spill] sm:$0xff] %v3243_v20  ;;  %3751 = vst [vmem:[#allocation60_spill] sm:$0xff] %v3246_v12  ;;  %v3262_v59 = vmul.f32 0.01, %v3249_v63  ;;  %v3755_v30 = vmax.f32 %v2866_v3, %v2890_v13  ;;  %v3756_v53 = vmax.f32 %v2869_v4, %v2893_v14  ;;  %v3282_v13 = vmul.f32 0.01, %v3252_v57 }
 0x163   : > { %3752 = vst [vmem:[#allocation61_spill] sm:$0xff] %v3249_v63  ;;  %3753 = vst [vmem:[#allocation62_spill] sm:$0xff] %v3252_v57  ;;  %v1693_v60 = vmax.f32 %v1255_v36, %v1589_v15  ;;  %v1745_v28 = vmax.f32 %v1463_v11, %v1641_v24  ;;  %v3757_v36 = vmax.f32 %v2878_v7, %v2905_v22  ;;  %v3299_v3 = vld [vmem:[%s3632_s2 + $0x2] ss:$0 sm:$0xff] }
 0x164   : > { %3754 = vst [vmem:[#allocation63_spill] sm:$0xff] %v3262_v59  ;;  %v1770_v42 = vmax.f32 %v3755_v30, %v1692_v38  ;;  %v1796_v39 = vmax.f32 %v3756_v53, %v1744_v16  ;;  %v2410_v4 = vpop.f32.mrb[28].mxu0  ;;  %v2462_v14 = vpop.f32.mrb[28].mxu1  ;;  %v3758_v16 = vmax.f32 %v2881_v8, %v2908_v23  ;;  %v3759_v20 = vmax.f32 %v2918_v29, %v2954_v43 }
 0x165   : > { %v1771_v38 = vmax.f32 %v3757_v36, %v1693_v60  ;;  %v1268_v24 = vadd.f32 %v2410_v4, %v2857_v58  ;;  %v1259_v30 = vpop.f32.mrb[29].mxu0  ;;  %v1467_v53 = vpop.f32.mrb[29].mxu1  ;;  %v1476_v22 = vadd.f32 %v2462_v14, %v2857_v58  ;;  %v3762_v29 = vmax.f32 %v2863_v2, %v2887_v10 }
 0x166   : > { %v1822_v15 = vmax.f32 %v1770_v42, %v1796_v39  ;;  %v1797_v11 = vmax.f32 %v3758_v16, %v1745_v28  ;;  %v1260_v42 = vadd.f32 %v2857_v58, %v1259_v30  ;;  %v1468_v8 = vadd.f32 %v2857_v58, %v1467_v53  ;;  %v2411_v23 = vpop.f32.mrb[30].mxu0  ;;  %v2463_v28 = vpop.f32.mrb[30].mxu1 }
 0x167   : > { %v1592_v4 = vmul.f32 0.01, %v1268_v24  ;;  %v1271_v36 = vadd.f32 %v2411_v23, %v2857_v58  ;;  %v1262_v16 = vpop.f32.mrb[31].mxu0  ;;  %v1470_v0 = vpop.f32.mrb[31].mxu1  ;;  %v1644_v47 = vmul.f32 0.01, %v1476_v22  ;;  %v1479_v14 = vadd.f32 %v2463_v28, %v2857_v58 }
 0x168   : > { %v1853_v39 = vmul.f32 %v3275_v17, %v1822_v15  ;;  %v1823_v60 = vmax.f32 %v1771_v38, %v1797_v11  ;;  %v1590_v12 = vmul.f32 0.01, %v1260_v42  ;;  %v1642_v7 = vmul.f32 0.01, %v1468_v8 }
 0x169   : > { %v1696_v53 = vmax.f32 %v1268_v24, %v1592_v4  ;;  %v1593_v63 = vmul.f32 0.01, %v1271_v36  ;;  %v1748_v45 = vmax.f32 %v1476_v22, %v1644_v47  ;;  %v1645_v11 = vmul.f32 0.01, %v1479_v14 }
 0x16a   : > { %v1884_v59 = vadd.f32 %v3299_v3, %v1853_v39  ;;  %v1854_v30 = vmul.f32 %v3275_v17, %v1823_v60  ;;  %v1694_v15 = vmax.f32 %v1260_v42, %v1590_v12  ;;  %v1746_v38 = vmax.f32 %v1468_v8, %v1642_v7 }
 0x16b   : > { %v1774_v35 = vmax.f32 %v3759_v20, %v1696_v53  ;;  %v1697_v57 = vmax.f32 %v1271_v36, %v1593_v63  ;;  %v1263_v28 = vadd.f32 %v2857_v58, %v1262_v16  ;;  %v3760_v47 = vmax.f32 %v2928_v33, %v2965_v49 }
 0x16c   : > { %v1885_v23 = vadd.f32 %v3299_v3, %v1854_v30  ;;  %v3761_v24 = vmax.f32 %v2860_v1, %v2884_v9  ;;  %v1798_v43 = vmax.f32 %v3762_v29, %v1746_v38  ;;  %v1749_v20 = vmax.f32 %v1479_v14, %v1645_v11  ;;  %v2414_v63 = vpop.f32.mrb[32].mxu0  ;;  %v2466_v22 = vpop.f32.mrb[32].mxu1 }
 0x16d   : > { %v1800_v12 = vmax.f32 %v3760_v47, %v1748_v45  ;;  %v3763_v8 = vmax.f32 %v2945_v40, %v2986_v61  ;;  %v1591_v60 = vmul.f32 0.01, %v1263_v28  ;;  %v1471_v33 = vadd.f32 %v2857_v58, %v1470_v0  ;;  %v1275_v45 = vpop.f32.mrb[33].mxu0  ;;  %v1483_v49 = vpop.f32.mrb[33].mxu1 }
 0x16e   : > { %v1772_v7 = vmax.f32 %v3761_v24, %v1694_v15  ;;  %v2230_v42 = vpack.c.bf16 %v1885_v23, %v1884_v59  ;;  %v3764_v2 = vmax.f32 %v2948_v41, %v2989_v62  ;;  %v1284_v4 = vadd.f32 %v2414_v63, %v2857_v58  ;;  %v2415_v36 = vpop.f32.mrb[34].mxu0  ;;  %v2467_v16 = vpop.f32.mrb[34].mxu1 }
 0x16f   : > { %v1775_v39 = vmax.f32 %v3763_v8, %v1697_v57  ;;  %v1826_v1 = vmax.f32 %v1774_v35, %v1800_v12  ;;  %v1695_v59 = vmax.f32 %v1263_v28, %v1591_v60  ;;  %v1643_v14 = vmul.f32 0.01, %v1471_v33  ;;  %v1278_v61 = vpop.f32.mrb[35].mxu0  ;;  %v1486_v0 = vpop.f32.mrb[35].mxu1 }
 0x170   : > { %v1824_v9 = vmax.f32 %v1772_v7, %v1798_v43  ;;  %v1801_v10 = vmax.f32 %v3764_v2, %v1749_v20  ;;  %2231 = vst [vmem:[%s3320_s5] sm:$0xff] %v2230_v42   ;;  %v1492_v40 = vadd.f32 %v2466_v22, %v2857_v58  ;;  %v1276_v57 = vadd.f32 %v2857_v58, %v1275_v45  ;;  %v3769_v45 = vld [vmem:[#allocation3_spill] sm:$0xff] }
 0x171   : > { %v1857_v35 = vmul.f32 %v3275_v17, %v1826_v1  ;;  %v1596_v41 = vmul.f32 0.01, %v1284_v4  ;;  %v3765_v62 = vmax.f32 %v2872_v5, %v2899_v18  ;;  %v1747_v38 = vmax.f32 %v1471_v33, %v1643_v14  ;;  %v3770_v1 = vld [vmem:[#allocation5_spill] sm:$0xff] }
 0x172   : > { %v1855_v30 = vmul.f32 %v3275_v17, %v1824_v9  ;;  %v1827_v53 = vmax.f32 %v1775_v39, %v1801_v10  ;;  %v1648_v11 = vmul.f32 0.01, %v1492_v40  ;;  %v1594_v23 = vmul.f32 0.01, %v1276_v57 }
 0x173   : > { %v1773_v15 = vmax.f32 %v3765_v62, %v1695_v59  ;;  %v1888_v28 = vadd.f32 %v3299_v3, %v1857_v35  ;;  %v1700_v24 = vmax.f32 %v1284_v4, %v1596_v41  ;;  %v3766_v7 = vmax.f32 %v2875_v6, %v2902_v19 }
 0x174   : > { %v1886_v47 = vadd.f32 %v3299_v3, %v1855_v30  ;;  %v1858_v12 = vmul.f32 %v3275_v17, %v1827_v53  ;;  %v1752_v43 = vmax.f32 %v1492_v40, %v1648_v11  ;;  %v1698_v20 = vmax.f32 %v1276_v57, %v1594_v23  ;;  %v2418_v39 = vpop.f32.mrb[36].mxu0  ;;  %v2470_v60 = vpop.f32.mrb[36].mxu1  ;;  %v3772_v11 = vld [vmem:[#allocation4_spill] sm:$0xff] }
 0x175   : > { %v1799_v29 = vmax.f32 %v3766_v7, %v1747_v38  ;;  %v1484_v63 = vadd.f32 %v2857_v58, %v1483_v49  ;;  %v3767_v18 = vmax.f32 %v2968_v50, %v3010_v25  ;;  %v1287_v42 = vadd.f32 %v2415_v36, %v2857_v58  ;;  %v1291_v10 = vpop.f32.mrb[37].mxu0  ;;  %v1499_v50 = vpop.f32.mrb[37].mxu1  ;;  %v3773_v23 = vld [vmem:[#allocation8_spill] sm:$0xff]  ;;  %v3776_v7 = vld [vmem:[#allocation22_spill] sm:$0xff] }
 0x176   : > { %v1889_v5 = vadd.f32 %v3299_v3, %v1858_v12  ;;  %v1495_v8 = vadd.f32 %v2467_v16, %v2857_v58  ;;  %v3768_v6 = vmax.f32 %v2971_v51, %v3013_v48  ;;  %v3771_v49 = vmax.f32 %v3769_v45, %v3770_v1  ;;  %v2419_v59 = vpop.f32.mrb[38].mxu0  ;;  %v2471_v14 = vpop.f32.mrb[38].mxu1  ;;  %v3781_v45 = vld [vmem:[#allocation6_spill] sm:$0xff]  ;;  %v3782_v1 = vld [vmem:[#allocation11_spill] sm:$0xff] }
 0x177   : > { %v1778_v22 = vmax.f32 %v3767_v18, %v1700_v24  ;;  %v1825_v33 = vmax.f32 %v1773_v15, %v1799_v29  ;;  %v1646_v2 = vmul.f32 0.01, %v1484_v63  ;;  %v1597_v4 = vmul.f32 0.01, %v1287_v42  ;;  %v1294_v35 = vpop.f32.mrb[39].mxu0  ;;  %v3369_v30 = vpop.f32.mrb[39].mxu1 }
 0x178   : > { %v1804_v19 = vmax.f32 %v3768_v6, %v1752_v43  ;;  %v1776_v9 = vmax.f32 %v3771_v49, %v1698_v20  ;;  %v2240_v25 = vpack.c.bf16 %v1889_v5, %v1888_v28  ;;  %v1649_v36 = vmul.f32 0.01, %v1495_v8  ;;  %v3778_v20 = vld [vmem:[#allocation16_spill] sm:$0xff] }
 0x179   : > { %v1279_v16 = vadd.f32 %v2857_v58, %v1278_v61  ;;  %v1856_v40 = vmul.f32 %v3275_v17, %v1825_v33  ;;  %v1750_v48 = vmax.f32 %v1484_v63, %v1646_v2  ;;  %v1487_v51 = vadd.f32 %v2857_v58, %v1486_v0  ;;  %v3775_v0 = vld [vmem:[#allocation15_spill] sm:$0xff] }
 0x17a   : > { %v1830_v57 = vmax.f32 %v1778_v22, %v1804_v19  ;;  %2293 = vst [vmem:[%s3320_s5 + $0x10] sm:$0xff] %v2240_v25   ;;  %v1701_v53 = vmax.f32 %v1287_v42, %v1597_v4  ;;  %v1753_v41 = vmax.f32 %v1495_v8, %v1649_v36  ;;  %v1300_v15 = vadd.f32 %v2418_v39, %v2857_v58  ;;  %v3779_v63 = vld [vmem:[#allocation23_spill] sm:$0xff] }
 0x17b   : > { %v1595_v62 = vmul.f32 0.01, %v1279_v16  ;;  %v1887_v38 = vadd.f32 %v3299_v3, %v1856_v40  ;;  %v3774_v28 = vmax.f32 %v3772_v11, %v3773_v23  ;;  %v1647_v24 = vmul.f32 0.01, %v1487_v51 }
 0x17c   : > { %v1861_v61 = vmul.f32 %v3275_v17, %v1830_v57  ;;  %v3777_v29 = vmax.f32 %v3775_v0, %v3776_v7  ;;  %v3780_v5 = vmax.f32 %v3778_v20, %v3779_v63  ;;  %v1600_v42 = vmul.f32 0.01, %v1300_v15  ;;  %v2422_v36 = vpop.f32.mrb[40].mxu0  ;;  %v2474_v40 = vpop.f32.mrb[40].mxu1 }
 0x17d   : > { %v1802_v12 = vmax.f32 %v3774_v28, %v1750_v48  ;;  %v1699_v22 = vmax.f32 %v1279_v16, %v1595_v62  ;;  %v2235_v8 = vpack.c.bf16 %v1887_v38, %v1886_v47  ;;  %v1751_v6 = vmax.f32 %v1487_v51, %v1647_v24  ;;  %v3784_v16 = vld [vmem:[#allocation7_spill] sm:$0xff]  ;;  %v3785_v48 = vld [vmem:[#allocation12_spill] sm:$0xff]  ;;  %v1515_v62 = vpop.f32.mrb[41].mxu1 }
 0x17e   : > { %v1779_v43 = vmax.f32 %v3777_v29, %v1701_v53  ;;  %v1805_v18 = vmax.f32 %v3780_v5, %v1753_v41  ;;  %v1892_v39 = vadd.f32 %v3299_v3, %v1861_v61  ;;  %v3783_v49 = vmax.f32 %v3781_v45, %v3782_v1  ;;  %v1307_v41 = vpop.f32.mrb[41].mxu0  ;;  %v3788_v61 = vld [vmem:[#allocation31_spill] sm:$0xff]  ;;  %v3401_v24 = vpop.f32.mrb[42].mxu1 }
 0x17f   : > { %v1828_v33 = vmax.f32 %v1776_v9, %v1802_v12  ;;  %v1704_v25 = vmax.f32 %v1300_v15, %v1600_v42  ;;  %v1508_v4 = vadd.f32 %v2470_v60, %v2857_v58  ;;  %2292 = vst [vmem:[%s3320_s5 + $0x8] sm:$0xff] %v2235_v8   ;;  %v3786_v47 = vmax.f32 %v3784_v16, %v3785_v48  ;;  %v3787_v15 = vld [vmem:[#allocation25_spill] sm:$0xff]  ;;  %v2423_v12 = vpop.f32.mrb[42].mxu0 }
 0x180   : > { %v1831_v19 = vmax.f32 %v1779_v43, %v1805_v18  ;;  %v1777_v2 = vmax.f32 %v3783_v49, %v1699_v22  ;;  %v1292_v9 = vadd.f32 %v2857_v58, %v1291_v10  ;;  %v1500_v51 = vadd.f32 %v2857_v58, %v1499_v50  ;;  %v3404_v50 = vpop.f32.mrb[43].mxu0  ;;  %v3406_v43 = vpop.f32.mrb[43].mxu1 }
 0x181   : > { %v1859_v57 = vmul.f32 %v3275_v17, %v1828_v33  ;;  %v1803_v53 = vmax.f32 %v3786_v47, %v1751_v6  ;;  %v3789_v60 = vmax.f32 %v3787_v15, %v3788_v61  ;;  %v1652_v23 = vmul.f32 0.01, %v1508_v4  ;;  %v3790_v6 = vld [vmem:[#allocation27_spill] sm:$0xff]  ;;  %v3797_v47 = vld [vmem:[#allocation18_spill] sm:$0xff] }
 0x182   : > { %v1862_v38 = vmul.f32 %v3275_v17, %v1831_v19  ;;  %v1303_v28 = vadd.f32 %v2419_v59, %v2857_v58  ;;  %v1598_v10 = vmul.f32 0.01, %v1292_v9  ;;  %v1650_v29 = vmul.f32 0.01, %v1500_v51  ;;  %v3791_v19 = vld [vmem:[#allocation34_spill] sm:$0xff] }
 0x183   : > { %v1782_v11 = vmax.f32 %v3789_v60, %v1704_v25  ;;  %v1890_v0 = vadd.f32 %v3299_v3, %v1859_v57  ;;  %v1829_v7 = vmax.f32 %v1777_v2, %v1803_v53  ;;  %v1756_v63 = vmax.f32 %v1508_v4, %v1652_v23  ;;  %v3793_v57 = vld [vmem:[#allocation9_spill] sm:$0xff] }
 0x184   : > { %v1893_v20 = vadd.f32 %v3299_v3, %v1862_v38  ;;  %v1601_v5 = vmul.f32 0.01, %v1303_v28  ;;  %v1511_v18 = vadd.f32 %v2471_v14, %v2857_v58  ;;  %v1702_v22 = vmax.f32 %v1292_v9, %v1598_v10  ;;  %v3794_v4 = vld [vmem:[#allocation17_spill] sm:$0xff]  ;;  %v3796_v14 = vld [vmem:[#allocation10_spill] sm:$0xff]  ;;  %v3428_v60 = vpop.f32.mrb[44].mxu0  ;;  %v3430_v23 = vpop.f32.mrb[44].mxu1 }
 0x185   : > { %v1860_v59 = vmul.f32 %v3275_v17, %v1829_v7  ;;  %v1754_v42 = vmax.f32 %v1500_v51, %v1650_v29  ;;  %v1295_v8 = vadd.f32 %v2857_v58, %v1294_v35  ;;  %v3792_v45 = vmax.f32 %v3790_v6, %v3791_v19 }
 0x186   : > { %v2250_v33 = vpack.c.bf16 %v1893_v20, %v1892_v39  ;;  %v1705_v49 = vmax.f32 %v1303_v28, %v1601_v5  ;;  %v1653_v2 = vmul.f32 0.01, %v1511_v18  ;;  %v3795_v16 = vmax.f32 %v3793_v57, %v3794_v4  ;;  %v3433_v20 = vpop.f32.mrb[45].mxu0 }
 0x187   : > { %v1808_v1 = vmax.f32 %v3792_v45, %v1756_v63  ;;  %v1891_v25 = vadd.f32 %v3299_v3, %v1860_v59  ;;  %v3798_v53 = vmax.f32 %v3796_v14, %v3797_v47  ;;  %v1599_v51 = vmul.f32 0.01, %v1295_v8  ;;  %v3442_v59 = vpop.f32.mrb[46].mxu0  ;;  %v3805_v14 = vld [vmem:[#allocation14_spill] sm:$0xff]  ;;  %v3806_v47 = vld [vmem:[#allocation21_spill] sm:$0xff] }
 0x188   : > { %v1780_v48 = vmax.f32 %v3795_v16, %v1702_v22  ;;  %2295 = vst [vmem:[%s3320_s5 + $0x20] sm:$0xff] %v2250_v33   ;;  %v3799_v39 = vmax.f32 %v3073_v54, %v3114_v37  ;;  %v1757_v15 = vmax.f32 %v1511_v18, %v1653_v2  ;;  %v1503_v61 = vadd.f32 %v2857_v58, %v3369_v30  ;;  %v3800_v54 = vld [vmem:[#allocation39_spill] sm:$0xff]  ;;  %v3802_v22 = vld [vmem:[#allocation13_spill] sm:$0xff]  ;;  %v3452_v45 = vpop.f32.mrb[47].mxu0 }
 0x189   : > { %v1806_v9 = vmax.f32 %v3798_v53, %v1754_v42  ;;  %v1834_v35 = vmax.f32 %v1782_v11, %v1808_v1  ;;  %v2245_v28 = vpack.c.bf16 %v1891_v25, %v1890_v0  ;;  %v1703_v10 = vmax.f32 %v1295_v8, %v1599_v51  ;;  %v3435_v11 = vpop.f32.mrb[45].mxu1  ;;  %v3803_v42 = vld [vmem:[#allocation20_spill] sm:$0xff] }
 0x18a   : > { %v1783_v38 = vmax.f32 %v3799_v39, %v1705_v49  ;;  %v1316_v29 = vadd.f32 %v2422_v36, %v2857_v58  ;;  %v3801_v63 = vmax.f32 %v3076_v52, %v3800_v54  ;;  %v1651_v30 = vmul.f32 0.01, %v1503_v61  ;;  %v3444_v0 = vpop.f32.mrb[46].mxu1 }
 0x18b   : > { %v1832_v7 = vmax.f32 %v1780_v48, %v1806_v9  ;;  %v1865_v37 = vmul.f32 %v3275_v17, %v1834_v35  ;;  %v1524_v18 = vadd.f32 %v2474_v40, %v2857_v58  ;;  %2294 = vst [vmem:[%s3320_s5 + $0x18] sm:$0xff] %v2245_v28   ;;  %v3804_v8 = vmax.f32 %v3802_v22, %v3803_v42  ;;  %v3454_v52 = vpop.f32.mrb[47].mxu1 }
 0x18c   : > { %v1809_v5 = vmax.f32 %v3801_v63, %v1757_v15  ;;  %v1604_v6 = vmul.f32 0.01, %v1316_v29  ;;  %v1308_v19 = vadd.f32 %v2857_v58, %v1307_v41  ;;  %v1755_v49 = vmax.f32 %v1503_v61, %v1651_v30  ;;  %v3473_v54 = vpop.f32.mrb[48].mxu0  ;;  %v3811_v63 = vld [vmem:[#allocation19_spill] sm:$0xff] }
 0x18d   : > { %v1863_v36 = vmul.f32 %v3275_v17, %v1832_v7  ;;  %v1781_v33 = vmax.f32 %v3804_v8, %v1703_v10  ;;  %v1896_v40 = vadd.f32 %v3299_v3, %v1865_v37  ;;  %v1656_v2 = vmul.f32 0.01, %v1524_v18  ;;  %v3809_v7 = vld [vmem:[#allocation44_spill] sm:$0xff] }
 0x18e   : > { %v1835_v1 = vmax.f32 %v1783_v38, %v1809_v5  ;;  %v1708_v57 = vmax.f32 %v1316_v29, %v1604_v6  ;;  %v1602_v4 = vmul.f32 0.01, %v1308_v19  ;;  %v1516_v16 = vadd.f32 %v2857_v58, %v1515_v62 }
 0x18f   : > { %v1894_v25 = vadd.f32 %v3299_v3, %v1863_v36  ;;  %v3807_v41 = vmax.f32 %v3805_v14, %v3806_v47  ;;  %v1760_v9 = vmax.f32 %v1524_v18, %v1656_v2  ;;  %v1319_v51 = vadd.f32 %v2423_v12, %v2857_v58  ;;  %v3475_v12 = vpop.f32.mrb[48].mxu1  ;;  %v3482_v36 = vpop.f32.mrb[49].mxu0 }
 0x190   : > { %v1866_v48 = vmul.f32 %v3275_v17, %v1835_v1  ;;  %v3808_v35 = vmax.f32 %v3096_v44, %v3136_v21  ;;  %v1706_v38 = vmax.f32 %v1308_v19, %v1602_v4  ;;  %v1654_v15 = vmul.f32 0.01, %v1516_v16  ;;  %v3812_v44 = vld [vmem:[#allocation26_spill] sm:$0xff]  ;;  %v3484_v22 = vpop.f32.mrb[49].mxu1  ;;  %v3487_v6 = vpop.f32.mrb[50].mxu0  ;;  %v3814_v1 = vld [vmem:[#allocation24_spill] sm:$0xff] }
 0x191   : > { %v1807_v53 = vmax.f32 %v3807_v41, %v1755_v49  ;;  %v1527_v61 = vadd.f32 %v3401_v24, %v2857_v58  ;;  %v3810_v10 = vmax.f32 %v3099_v27, %v3809_v7  ;;  %v1605_v37 = vmul.f32 0.01, %v1319_v51  ;;  %v3489_v19 = vpop.f32.mrb[50].mxu1  ;;  %v3815_v49 = vld [vmem:[#allocation30_spill] sm:$0xff]  ;;  %v3817_v41 = vld [vmem:[#allocation40_spill] sm:$0xff] }
 0x192   : > { %v1786_v39 = vmax.f32 %v3808_v35, %v1708_v57  ;;  %v1897_v62 = vadd.f32 %v3299_v3, %v1866_v48  ;;  %v3813_v21 = vmax.f32 %v3811_v63, %v3812_v44  ;;  %v1758_v30 = vmax.f32 %v1516_v16, %v1654_v15  ;;  %v3496_v48 = vpop.f32.mrb[51].mxu0 }
 0x193   : > { %v1833_v28 = vmax.f32 %v1781_v33, %v1807_v53  ;;  %v1812_v29 = vmax.f32 %v3810_v10, %v1760_v9  ;;  %v1657_v18 = vmul.f32 0.01, %v1527_v61  ;;  %v1311_v24 = vadd.f32 %v2857_v58, %v3404_v50  ;;  %v3818_v53 = vld [vmem:[#allocation49_spill] sm:$0xff] }
 0x194   : > { %v1784_v5 = vmax.f32 %v3813_v21, %v1706_v38  ;;  %v2260_v27 = vpack.c.bf16 %v1897_v62, %v1896_v40  ;;  %v1709_v33 = vmax.f32 %v1319_v51, %v1605_v37  ;;  %v3816_v2 = vmax.f32 %v3814_v1, %v3815_v49  ;;  %v3498_v40 = vpop.f32.mrb[51].mxu1  ;;  %v3820_v38 = vld [vmem:[#allocation41_spill] sm:$0xff]  ;;  %v3823_v21 = vld [vmem:[#allocation28_spill] sm:$0xff] }
 0x195   : > { %v1864_v42 = vmul.f32 %v3275_v17, %v1833_v28  ;;  %v1838_v8 = vmax.f32 %v1786_v39, %v1812_v29  ;;  %v1761_v4 = vmax.f32 %v1527_v61, %v1657_v18  ;;  %v1603_v16 = vmul.f32 0.01, %v1311_v24  ;;  %v3827_v1 = vld [vmem:[#allocation36_spill] sm:$0xff] }
 0x196   : > { %v1810_v57 = vmax.f32 %v3816_v2, %v1758_v30  ;;  %v1519_v50 = vadd.f32 %v2857_v58, %v3406_v43  ;;  %2297 = vst [vmem:[%s3320_s5 + $0x30] sm:$0xff] %v2260_v27   ;;  %v3819_v9 = vmax.f32 %v3817_v41, %v3818_v53  ;;  %v1332_v35 = vadd.f32 %v3428_v60, %v2857_v58  ;;  %v3821_v43 = vld [vmem:[#allocation50_spill] sm:$0xff]  ;;  %v3824_v30 = vld [vmem:[#allocation35_spill] sm:$0xff] }
 0x197   : > { %v1895_v14 = vadd.f32 %v3299_v3, %v1864_v42  ;;  %v1869_v47 = vmul.f32 %v3275_v17, %v1838_v8  ;;  %v3822_v15 = vmax.f32 %v3820_v38, %v3821_v43  ;;  %v1707_v62 = vmax.f32 %v1311_v24, %v1603_v16 }
 0x198   : > { %v1787_v51 = vmax.f32 %v3819_v9, %v1709_v33  ;;  %v1836_v39 = vmax.f32 %v1784_v5, %v1810_v57  ;;  %v1655_v28 = vmul.f32 0.01, %v1519_v50  ;;  %v1608_v29 = vmul.f32 0.01, %v1332_v35  ;;  %v3826_v33 = vld [vmem:[#allocation29_spill] sm:$0xff] }
 0x199   : > { %v1813_v61 = vmax.f32 %v3822_v15, %v1761_v4  ;;  %v2255_v7 = vpack.c.bf16 %v1895_v14, %v1894_v25  ;;  %v1900_v10 = vadd.f32 %v3299_v3, %v1869_v47  ;;  %v1540_v37 = vadd.f32 %v3430_v23, %v2857_v58 }
 0x19a   : > { %v1867_v63 = vmul.f32 %v3275_v17, %v1836_v39  ;;  %v3825_v60 = vmax.f32 %v3823_v21, %v3824_v30  ;;  %v1759_v18 = vmax.f32 %v1519_v50, %v1655_v28  ;;  %v1712_v27 = vmax.f32 %v1332_v35, %v1608_v29  ;;  %v3835_v29 = vld [vmem:[#allocation43_spill] sm:$0xff] }
 0x19b   : > { %v1839_v44 = vmax.f32 %v1787_v51, %v1813_v61  ;;  %2296 = vst [vmem:[%s3320_s5 + $0x28] sm:$0xff] %v2255_v7   ;;  %v1660_v42 = vmul.f32 0.01, %v1540_v37  ;;  %v1324_v25 = vadd.f32 %v2857_v58, %v3433_v20  ;;  %v1532_v24 = vadd.f32 %v2857_v58, %v3435_v11  ;;  %v3831_v61 = vld [vmem:[#allocation32_spill] sm:$0xff] }
 0x19c   : > { %v1785_v5 = vmax.f32 %v3825_v60, %v1707_v62  ;;  %v1898_v8 = vadd.f32 %v3299_v3, %v1867_v63  ;;  %v3828_v49 = vmax.f32 %v3826_v33, %v3827_v1  ;;  %v1335_v57 = vadd.f32 %v3442_v59, %v2857_v58  ;;  %v3832_v62 = vld [vmem:[#allocation42_spill] sm:$0xff] }
 0x19d   : > { %v1870_v23 = vmul.f32 %v3275_v17, %v1839_v44  ;;  %v3829_v4 = vmax.f32 %v3173_v34, %v3209_v55  ;;  %v1764_v50 = vmax.f32 %v1540_v37, %v1660_v42  ;;  %v1606_v20 = vmul.f32 0.01, %v1324_v25  ;;  %v3840_v33 = vld [vmem:[#allocation62_spill] sm:$0xff] }
 0x19e   : > { %v1811_v2 = vmax.f32 %v3828_v49, %v1759_v18  ;;  %v1658_v14 = vmul.f32 0.01, %v1532_v24  ;;  %v1609_v41 = vmul.f32 0.01, %v1335_v57  ;;  %v1543_v53 = vadd.f32 %v3444_v0, %v2857_v58  ;;  %v3834_v0 = vld [vmem:[#allocation33_spill] sm:$0xff] }
 0x19f   : > { %v1790_v16 = vmax.f32 %v3829_v4, %v1712_v27  ;;  %v1901_v11 = vadd.f32 %v3299_v3, %v1870_v23  ;;  %v3830_v9 = vmax.f32 %v3176_v46, %v3212_v56  ;;  %v1710_v59 = vmax.f32 %v1324_v25, %v1606_v20  ;;  %v3841_v49 = vld [vmem:[#allocation37_spill] sm:$0xff] }
 0x1a0   : > { %v1837_v47 = vmax.f32 %v1785_v5, %v1811_v2  ;;  %v1762_v35 = vmax.f32 %v1532_v24, %v1658_v14  ;;  %v1327_v34 = vadd.f32 %v2857_v58, %v3452_v45  ;;  %v1713_v38 = vmax.f32 %v1335_v57, %v1609_v41  ;;  %v3837_v45 = vld [vmem:[#allocation56_spill] sm:$0xff]  ;;  %v3842_v2 = vld [vmem:[#allocation47_spill] sm:$0xff] }
 0x1a1   : > { %v1816_v51 = vmax.f32 %v3830_v9, %v1764_v50  ;;  %v2270_v55 = vpack.c.bf16 %v1901_v11, %v1900_v10  ;;  %v1661_v43 = vmul.f32 0.01, %v1543_v53  ;;  %v3833_v28 = vmax.f32 %v3831_v61, %v3832_v62  ;;  %v3845_v41 = vld [vmem:[#allocation48_spill] sm:$0xff] }
 0x1a2   : > { %v1868_v39 = vmul.f32 %v3275_v17, %v1837_v47  ;;  %v3836_v37 = vmax.f32 %v3834_v0, %v3835_v29  ;;  %v1607_v56 = vmul.f32 0.01, %v1327_v34  ;;  %v3838_v10 = vmax.f32 %v3193_v26, %v3837_v45  ;;  %v3844_v47 = vld [vmem:[#allocation38_spill] sm:$0xff]  ;;  %v3853_v45 = vld [vmem:[#allocation45_spill] sm:$0xff] }
 0x1a3   : > { %v1842_v15 = vmax.f32 %v1790_v16, %v1816_v51  ;;  %v1788_v7 = vmax.f32 %v3833_v28, %v1710_v59  ;;  %2299 = vst [vmem:[%s3320_s5 + $0x40] sm:$0xff] %v2270_v55   ;;  %v1765_v21 = vmax.f32 %v1543_v53, %v1661_v43  ;;  %v1535_v30 = vadd.f32 %v2857_v58, %v3454_v52 }
 0x1a4   : > { %v1814_v46 = vmax.f32 %v3836_v37, %v1762_v35  ;;  %v1899_v63 = vadd.f32 %v3299_v3, %v1868_v39  ;;  %v1791_v44 = vmax.f32 %v3838_v10, %v1713_v38  ;;  %v1711_v18 = vmax.f32 %v1327_v34, %v1607_v56 }
 0x1a5   : > { %v1873_v60 = vmul.f32 %v3275_v17, %v1842_v15  ;;  %v1348_v27 = vadd.f32 %v3473_v54, %v2857_v58  ;;  %v3839_v25 = vmax.f32 %v3196_v32, %v3232_v31  ;;  %v1659_v23 = vmul.f32 0.01, %v1535_v30  ;;  %v3851_v15 = vld [vmem:[#allocation60_spill] sm:$0xff] }
 0x1a6   : > { %v1840_v5 = vmax.f32 %v1788_v7, %v1814_v46  ;;  %v2265_v42 = vpack.c.bf16 %v1899_v63, %v1898_v8  ;;  %v1556_v26 = vadd.f32 %v3475_v12, %v2857_v58  ;;  %v1743_v1 = vmax.f32 %v3840_v33, %v3282_v13  ;;  %v2586_v13 = vld [vmem:[%s3632_s2] ss:$0 sm:$0xff] }
 0x1a7   : > { %v1817_v24 = vmax.f32 %v3839_v25, %v1765_v21  ;;  %v1904_v52 = vadd.f32 %v3299_v3, %v1873_v60  ;;  %v3843_v57 = vmax.f32 %v3841_v49, %v3842_v2  ;;  %v1612_v16 = vmul.f32 0.01, %v1348_v27  ;;  %v3856_v21 = vld [vmem:[#allocation46_spill] sm:$0xff]  ;;  %v3863_v2 = vld [vmem:[#allocation55_spill] sm:$0xff] }
 0x1a8   : > { %2298 = vst [vmem:[%s3320_s5 + $0x38] sm:$0xff] %v2265_v42   ;;  %v1763_v8 = vmax.f32 %v1535_v30, %v1659_v23  ;;  %v1664_v50 = vmul.f32 0.01, %v1556_v26  ;;  %v1340_v32 = vadd.f32 %v2857_v58, %v3482_v36  ;;  %v1871_v31 = vmul.f32 %v3275_v17, %v1840_v5  ;;  %v3847_v58 = vld [vmem:[#allocation57_spill] sm:$0xff]  ;;  %v3848_v36 = vld [vmem:[#allocation59_spill] sm:$0xff]  ;;  %v3857_v30 = vld [vmem:[#allocation52_spill] sm:$0xff] }
 0x1a9   : > { %v1789_v4 = vmax.f32 %v3843_v57, %v1711_v18  ;;  %v1843_v54 = vmax.f32 %v1791_v44, %v1817_v24  ;;  %v1716_v12 = vmax.f32 %v1348_v27, %v1612_v16  ;;  %v1548_v20 = vadd.f32 %v2586_v13, %v3484_v22  ;;  %v3859_v18 = vld [vmem:[#allocation61_spill] sm:$0xff]  ;;  %v3860_v27 = vld [vmem:[#allocation63_spill] sm:$0xff] }
 0x1aa   : > { %v1351_v14 = vadd.f32 %v2586_v13, %v3487_v6  ;;  %v3846_v53 = vmax.f32 %v3844_v47, %v3845_v41  ;;  %v1768_v51 = vmax.f32 %v1556_v26, %v1664_v50  ;;  %v1610_v59 = vmul.f32 0.01, %v1340_v32  ;;  %v3850_v6 = vld [vmem:[#allocation58_spill] sm:$0xff]  ;;  %v3864_v57 = vld [vmem:[#allocation53_spill] sm:$0xff] }
 0x1ab   : > { %v1874_v11 = vmul.f32 %v3275_v17, %v1843_v54  ;;  %v3849_v35 = vmax.f32 %v3847_v58, %v3848_v36  ;;  %v1662_v55 = vmul.f32 0.01, %v1548_v20  ;;  %v1559_v38 = vadd.f32 %v2586_v13, %v3489_v19  ;;  %v3854_v19 = vld [vmem:[#allocation51_spill] sm:$0xff]  ;;  %v3862_v26 = vld [vmem:[#allocation54_spill] sm:$0xff] }
 0x1ac   : > { %v1815_v9 = vmax.f32 %v3846_v53, %v1763_v8  ;;  %v1613_v39 = vmul.f32 0.01, %v1351_v14  ;;  %v3852_v61 = vmax.f32 %v3850_v6, %v3851_v15  ;;  %v1714_v28 = vmax.f32 %v1340_v32, %v1610_v59 }
 0x1ad   : > { %v1794_v34 = vmax.f32 %v3849_v35, %v1716_v12  ;;  %v1905_v22 = vadd.f32 %v3299_v3, %v1874_v11  ;;  %v1766_v7 = vmax.f32 %v1548_v20, %v1662_v55  ;;  %v1665_v29 = vmul.f32 0.01, %v1559_v38 }
 0x1ae   : > { %v1841_v43 = vmax.f32 %v1789_v4, %v1815_v9  ;;  %v1820_v62 = vmax.f32 %v3852_v61, %v1768_v51  ;;  %v1717_v0 = vmax.f32 %v1351_v14, %v1613_v39  ;;  %v1343_v37 = vadd.f32 %v2586_v13, %v3496_v48 }
 0x1af   : > { %v2280_v46 = vpack.c.bf16 %v1905_v22, %v1904_v52  ;;  %v3855_v10 = vmax.f32 %v3853_v45, %v3854_v19  ;;  %v3858_v60 = vmax.f32 %v3856_v21, %v3857_v30  ;;  %v3861_v42 = vmax.f32 %v3859_v18, %v3860_v27 }
 0x1b0   : > { %v1872_v56 = vmul.f32 %v3275_v17, %v1841_v43  ;;  %v1846_v63 = vmax.f32 %v1794_v34, %v1820_v62  ;;  %v1769_v24 = vmax.f32 %v1559_v38, %v1665_v29  ;;  %v1611_v23 = vmul.f32 0.01, %v1343_v37 }
 0x1b1   : > { %v1792_v44 = vmax.f32 %v3855_v10, %v1714_v28  ;;  %v1818_v5 = vmax.f32 %v3858_v60, %v1766_v7  ;;  %v1795_v25 = vmax.f32 %v3861_v42, %v1717_v0  ;;  %v1637_v48 = vmul.f32 0.01, %v3862_v26  ;;  %2301 = vst [vmem:[%s3320_s5 + $0x50] sm:$0xff] %v2280_v46  }
 0x1b2   : > { %v1902_v33 = vadd.f32 %v3299_v3, %v1871_v31  ;;  %v1903_v52 = vadd.f32 %v3299_v3, %v1872_v56  ;;  %v1551_v49 = vadd.f32 %v2586_v13, %v3498_v40  ;;  %v1689_v4 = vmax.f32 %v3864_v57, %v3863_v2 }
 0x1b3   : > { %v1844_v16 = vmax.f32 %v1792_v44, %v1818_v5  ;;  %v1821_v54 = vmax.f32 %v1743_v1, %v1769_v24  ;;  %v1715_v8 = vmax.f32 %v1343_v37, %v1611_v23  ;;  %v1877_v12 = vmul.f32 %v3275_v17, %v1846_v63 }
 0x1b4   : > { %v2275_v50 = vpack.c.bf16 %v1903_v52, %v1902_v33  ;;  %v1663_v32 = vmul.f32 0.01, %v1551_v49  ;;  %v1741_v31 = vmax.f32 %v3862_v26, %v1637_v48 }
 0x1b5   : > { %v1847_v20 = vmax.f32 %v1795_v25, %v1821_v54  ;;  %v1793_v14 = vmax.f32 %v1689_v4, %v1715_v8  ;;  %v1908_v47 = vadd.f32 %v3299_v3, %v1877_v12  ;;  %v1875_v41 = vmul.f32 %v3275_v17, %v1844_v16 }
 0x1b6   : > { %2300 = vst [vmem:[%s3320_s5 + $0x48] sm:$0xff] %v2275_v50   ;;  %v1767_v11 = vmax.f32 %v1551_v49, %v1663_v32 }
 0x1b7   : > { %v1878_v40 = vmul.f32 %v3275_v17, %v1847_v20  ;;  %v1906_v59 = vadd.f32 %v3299_v3, %v1875_v41 }
 0x1b8   : > { %v1819_v13 = vmax.f32 %v1741_v31, %v1767_v11 }
 0x1b9   : > { %v1909_v1 = vadd.f32 %v3299_v3, %v1878_v40 }
 0x1ba   : > { %v1845_v53 = vmax.f32 %v1793_v14, %v1819_v13 }
 0x1bb   : > { %v2290_v9 = vpack.c.bf16 %v1909_v1, %v1908_v47 }
 0x1bc   : > { %v1876_v51 = vmul.f32 %v3275_v17, %v1845_v53 }
 0x1bd   : > { %2303 = vst [vmem:[%s3320_s5 + $0x60] sm:$0xff] %v2290_v9  }
 0x1be   : > { %v1907_v58 = vadd.f32 %v3299_v3, %v1876_v51 }
 0x1c0   : > { %v2285_v36 = vpack.c.bf16 %v1907_v58, %v1906_v59 }
 0x1c2   : > { %2302 = vst [vmem:[%s3320_s5 + $0x58] sm:$0xff] %v2285_v36  }
 0x1c3 PF: > { %p10_p9 = scmp.ge.s32.totalorder %s2648_s16, 4   ;;  %s3865_s12 = smov %s2605_s13 }
 0x1c4   : > { %s3866_s13 = smov %s2657_s19  ;;  %s3867_s14 = smov %s2648_s16 }
 0x1c5   :  { %12 = sbr.rel (!%p10_p9) target bundleno = 2 (0x2), region = 108 }

// kernel: encoder_forward.8
= control target key start
LH: loop header
LB: loop body
LE: loop exit
PB: predicated region body
PF: predicated region fallthrough
CT: control target
= control target key end

     0   :  { %s3349_s12 = smov 0   ;;  %s3351_s13 = smov 0   ;;  %s4373_s0 = inlined_call_operand.vmem [shape: bf16[4,96,1024], index: 0, kind: input, shape index: {}]   ;;  %s4374_s1 = inlined_call_operand.vmem [shape: bf16[1024,256], index: 1, kind: input, shape index: {}]   ;;  %s4375_s2 = inlined_call_operand.vmem [shape: f32[8,256], index: 2, kind: input, shape index: {}]   ;;  %s4376_s3 = inlined_call_operand.vmem [shape: bf16[96,256], index: 3, kind: output, shape index: {}]  }
   0x1   :  { %s3353_s14 = smov 0  }
   0x2 LB: > { %s2642_s15 = sadd.s32 4294967295, %s3327_s14   ;;  %s3366_s16 = sadd.s32 1, %s3327_s14   ;;  %s3327_s14 = sphi %s3353_s14, %s4379_s14   ;;  %s3323_s13 = sphi %s3351_s13, %s4378_s13   ;;  %s3319_s12 = sphi %s3349_s12, %s4377_s12  }
   0x3   : > { %s17_s17 = ssub.s32 %s3327_s14, %s3366_s16  ;;  %s20_s18 = sadd.s32 1, %s3323_s13 }
   0x4   : > { %p18_p0 = scmp.eq.s32.totalorder %s17_s17, 0  ;;  %p27_p1 = scmp.ne.s32.totalorder %s3323_s13, %s3319_s12 }
   0x5   : > { %p28_p2 = scmp.eq.s32.totalorder %s3327_s14, 0  ;;  %p2645_p4 = scmp.ge.s32.totalorder %s3327_s14, 2 }
   0x6   : > { %s3375_s19 = scalar_select %p18_p0, %s3323_s13, %s20_s18  }
   0x7   : > { %p29_p3 = por %p28_p2, %p27_p1  ;;  %127 = sbr.rel (%p2645_p4) target bundleno = 67 (0x43), region = 24 }
   0xe   : > { %130 = sbr.rel (!%p29_p3) target bundleno = 67 (0x43), region = 28  ;;  %s132_s20 = sand.u32 (%p29_p3), 1, %s3323_s13  }
   0xf   : > { %s2894_s21 = smul.u32 (%p29_p3), 192, %s3327_s14 }
  0x10   : > { %s3087_s22 = smul.u32 (%p29_p3), 768, %s132_s20 }
  0x11   : > { %s3383_s25 = scalar_lea.vmem (%p29_p3), %s4373_s0, %s2894_s21 }
  0x12   : > { %v151_v0 = vld [vmem:[%s3383_s25] sm:$0xff] (%p29_p3)  ;;  %v153_v1 = vld [vmem:[%s3383_s25 + $0x8] sm:$0xff] (%p29_p3)  ;;  %v155_v2 = vld [vmem:[%s3383_s25 + $0x10] sm:$0xff] (%p29_p3)  ;;  %s3388_s26 = scalar_lea.vmem (%p29_p3), [#allocation2], %s3087_s22 }
  0x13   : > { %152 = vst [vmem:[%s3388_s26] sm:$0xff] (%p29_p3), %v151_v0  ;;  %154 = vst [vmem:[%s3388_s26 + $0x8] sm:$0xff] (%p29_p3), %v153_v1  ;;  %v157_v3 = vld [vmem:[%s3383_s25 + $0x18] sm:$0xff] (%p29_p3)  ;;  %v159_v4 = vld [vmem:[%s3383_s25 + $0x20] sm:$0xff] (%p29_p3) }
  0x14   : > { %156 = vst [vmem:[%s3388_s26 + $0x10] sm:$0xff] (%p29_p3), %v155_v2  ;;  %v161_v5 = vld [vmem:[%s3383_s25 + $0x28] sm:$0xff] (%p29_p3)  ;;  %158 = vst [vmem:[%s3388_s26 + $0x18] sm:$0xff] (%p29_p3), %v157_v3  ;;  %v163_v6 = vld [vmem:[%s3383_s25 + $0x30] sm:$0xff] (%p29_p3) }
  0x15   : > { %160 = vst [vmem:[%s3388_s26 + $0x20] sm:$0xff] %v159_v4  ;;  %162 = vst [vmem:[%s3388_s26 + $0x28] sm:$0xff] %v161_v5  ;;  %v165_v7 = vld [vmem:[%s3383_s25 + $0x38] sm:$0xff]  ;;  %v167_v8 = vld [vmem:[%s3383_s25 + $0x40] sm:$0xff] }
  0x16   : > { %164 = vst [vmem:[%s3388_s26 + $0x30] sm:$0xff] %v163_v6  ;;  %166 = vst [vmem:[%s3388_s26 + $0x38] sm:$0xff] %v165_v7  ;;  %v169_v9 = vld [vmem:[%s3383_s25 + $0x48] sm:$0xff]  ;;  %v171_v10 = vld [vmem:[%s3383_s25 + $0x50] sm:$0xff] }
  0x17   : > { %168 = vst [vmem:[%s3388_s26 + $0x40] sm:$0xff] %v167_v8  ;;  %v173_v11 = vld [vmem:[%s3383_s25 + $0x58] sm:$0xff]  ;;  %170 = vst [vmem:[%s3388_s26 + $0x48] sm:$0xff] %v169_v9  ;;  %v175_v12 = vld [vmem:[%s3383_s25 + $0x60] sm:$0xff] }
  0x18   : > { %172 = vst [vmem:[%s3388_s26 + $0x50] sm:$0xff] %v171_v10  ;;  %174 = vst [vmem:[%s3388_s26 + $0x58] sm:$0xff] %v173_v11  ;;  %v177_v13 = vld [vmem:[%s3383_s25 + $0x68] sm:$0xff]  ;;  %v179_v14 = vld [vmem:[%s3383_s25 + $0x70] sm:$0xff] }
  0x19   : > { %176 = vst [vmem:[%s3388_s26 + $0x60] sm:$0xff] %v175_v12  ;;  %178 = vst [vmem:[%s3388_s26 + $0x68] sm:$0xff] %v177_v13  ;;  %v181_v15 = vld [vmem:[%s3383_s25 + $0x78] sm:$0xff]  ;;  %v183_v16 = vld [vmem:[%s3383_s25 + $0x80] sm:$0xff] }
  0x1a   : > { %180 = vst [vmem:[%s3388_s26 + $0x70] sm:$0xff] %v179_v14  ;;  %v185_v17 = vld [vmem:[%s3383_s25 + $0x88] sm:$0xff]  ;;  %182 = vst [vmem:[%s3388_s26 + $0x78] sm:$0xff] %v181_v15  ;;  %v187_v18 = vld [vmem:[%s3383_s25 + $0x90] sm:$0xff] }
  0x1b   : > { %184 = vst [vmem:[%s3388_s26 + $0x80] sm:$0xff] %v183_v16  ;;  %186 = vst [vmem:[%s3388_s26 + $0x88] sm:$0xff] %v185_v17  ;;  %v189_v19 = vld [vmem:[%s3383_s25 + $0x98] sm:$0xff]  ;;  %v191_v20 = vld [vmem:[%s3383_s25 + $0xa0] sm:$0xff] }
  0x1c   : > { %188 = vst [vmem:[%s3388_s26 + $0x90] sm:$0xff] %v187_v18  ;;  %190 = vst [vmem:[%s3388_s26 + $0x98] sm:$0xff] %v189_v19  ;;  %v193_v21 = vld [vmem:[%s3383_s25 + $0xa8] sm:$0xff]  ;;  %v195_v22 = vld [vmem:[%s3383_s25 + $0xb0] sm:$0xff] }
  0x1d   : > { %192 = vst [vmem:[%s3388_s26 + $0xa0] sm:$0xff] %v191_v20  ;;  %v197_v23 = vld [vmem:[%s3383_s25 + $0xb8] sm:$0xff]  ;;  %194 = vst [vmem:[%s3388_s26 + $0xa8] sm:$0xff] %v193_v21  ;;  %v199_v24 = vld [vmem:[%s3383_s25 + $0x180] sm:$0xff] }
  0x1e   : > { %196 = vst [vmem:[%s3388_s26 + $0xb0] sm:$0xff] %v195_v22  ;;  %198 = vst [vmem:[%s3388_s26 + $0xb8] sm:$0xff] %v197_v23  ;;  %v201_v25 = vld [vmem:[%s3383_s25 + $0x188] sm:$0xff]  ;;  %v203_v26 = vld [vmem:[%s3383_s25 + $0x190] sm:$0xff] }
  0x1f   : > { %200 = vst [vmem:[%s3388_s26 + $0xc0] sm:$0xff] %v199_v24  ;;  %202 = vst [vmem:[%s3388_s26 + $0xc8] sm:$0xff] %v201_v25  ;;  %v205_v27 = vld [vmem:[%s3383_s25 + $0x198] sm:$0xff]  ;;  %v207_v28 = vld [vmem:[%s3383_s25 + $0x1a0] sm:$0xff] }
  0x20   : > { %204 = vst [vmem:[%s3388_s26 + $0xd0] sm:$0xff] %v203_v26  ;;  %v209_v29 = vld [vmem:[%s3383_s25 + $0x1a8] sm:$0xff]  ;;  %206 = vst [vmem:[%s3388_s26 + $0xd8] sm:$0xff] %v205_v27  ;;  %v211_v30 = vld [vmem:[%s3383_s25 + $0x1b0] sm:$0xff] }
  0x21   : > { %208 = vst [vmem:[%s3388_s26 + $0xe0] sm:$0xff] %v207_v28  ;;  %210 = vst [vmem:[%s3388_s26 + $0xe8] sm:$0xff] %v209_v29  ;;  %v213_v31 = vld [vmem:[%s3383_s25 + $0x1b8] sm:$0xff]  ;;  %v215_v32 = vld [vmem:[%s3383_s25 + $0x1c0] sm:$0xff] }
  0x22   : > { %212 = vst [vmem:[%s3388_s26 + $0xf0] sm:$0xff] %v211_v30  ;;  %214 = vst [vmem:[%s3388_s26 + $0xf8] sm:$0xff] %v213_v31  ;;  %v217_v33 = vld [vmem:[%s3383_s25 + $0x1c8] sm:$0xff]  ;;  %v219_v34 = vld [vmem:[%s3383_s25 + $0x1d0] sm:$0xff] }
  0x23   : > { %216 = vst [vmem:[%s3388_s26 + $0x100] sm:$0xff] %v215_v32  ;;  %v221_v35 = vld [vmem:[%s3383_s25 + $0x1d8] sm:$0xff]  ;;  %218 = vst [vmem:[%s3388_s26 + $0x108] sm:$0xff] %v217_v33  ;;  %v223_v36 = vld [vmem:[%s3383_s25 + $0x1e0] sm:$0xff] }
  0x24   : > { %220 = vst [vmem:[%s3388_s26 + $0x110] sm:$0xff] %v219_v34  ;;  %222 = vst [vmem:[%s3388_s26 + $0x118] sm:$0xff] %v221_v35  ;;  %v225_v37 = vld [vmem:[%s3383_s25 + $0x1e8] sm:$0xff]  ;;  %v227_v38 = vld [vmem:[%s3383_s25 + $0x1f0] sm:$0xff] }
  0x25   : > { %224 = vst [vmem:[%s3388_s26 + $0x120] sm:$0xff] %v223_v36  ;;  %226 = vst [vmem:[%s3388_s26 + $0x128] sm:$0xff] %v225_v37  ;;  %v229_v39 = vld [vmem:[%s3383_s25 + $0x1f8] sm:$0xff]  ;;  %v231_v40 = vld [vmem:[%s3383_s25 + $0x200] sm:$0xff] }
  0x26   : > { %228 = vst [vmem:[%s3388_s26 + $0x130] sm:$0xff] %v227_v38  ;;  %v233_v41 = vld [vmem:[%s3383_s25 + $0x208] sm:$0xff]  ;;  %230 = vst [vmem:[%s3388_s26 + $0x138] sm:$0xff] %v229_v39  ;;  %v235_v42 = vld [vmem:[%s3383_s25 + $0x210] sm:$0xff] }
  0x27   : > { %232 = vst [vmem:[%s3388_s26 + $0x140] sm:$0xff] %v231_v40  ;;  %234 = vst [vmem:[%s3388_s26 + $0x148] sm:$0xff] %v233_v41  ;;  %v237_v43 = vld [vmem:[%s3383_s25 + $0x218] sm:$0xff]  ;;  %v239_v44 = vld [vmem:[%s3383_s25 + $0x220] sm:$0xff] }
  0x28   : > { %236 = vst [vmem:[%s3388_s26 + $0x150] sm:$0xff] %v235_v42  ;;  %238 = vst [vmem:[%s3388_s26 + $0x158] sm:$0xff] %v237_v43  ;;  %v241_v45 = vld [vmem:[%s3383_s25 + $0x228] sm:$0xff]  ;;  %v243_v46 = vld [vmem:[%s3383_s25 + $0x230] sm:$0xff] }
  0x29   : > { %240 = vst [vmem:[%s3388_s26 + $0x160] sm:$0xff] %v239_v44  ;;  %v245_v47 = vld [vmem:[%s3383_s25 + $0x238] sm:$0xff]  ;;  %242 = vst [vmem:[%s3388_s26 + $0x168] sm:$0xff] %v241_v45  ;;  %v247_v48 = vld [vmem:[%s3383_s25 + $0x300] sm:$0xff] }
  0x2a   : > { %244 = vst [vmem:[%s3388_s26 + $0x170] sm:$0xff] %v243_v46  ;;  %246 = vst [vmem:[%s3388_s26 + $0x178] sm:$0xff] %v245_v47  ;;  %v249_v49 = vld [vmem:[%s3383_s25 + $0x308] sm:$0xff]  ;;  %v251_v50 = vld [vmem:[%s3383_s25 + $0x310] sm:$0xff] }
  0x2b   : > { %248 = vst [vmem:[%s3388_s26 + $0x180] sm:$0xff] %v247_v48  ;;  %250 = vst [vmem:[%s3388_s26 + $0x188] sm:$0xff] %v249_v49  ;;  %v253_v51 = vld [vmem:[%s3383_s25 + $0x318] sm:$0xff]  ;;  %v255_v52 = vld [vmem:[%s3383_s25 + $0x320] sm:$0xff] }
  0x2c   : > { %252 = vst [vmem:[%s3388_s26 + $0x190] sm:$0xff] %v251_v50  ;;  %v257_v53 = vld [vmem:[%s3383_s25 + $0x328] sm:$0xff]  ;;  %254 = vst [vmem:[%s3388_s26 + $0x198] sm:$0xff] %v253_v51  ;;  %v259_v54 = vld [vmem:[%s3383_s25 + $0x330] sm:$0xff] }
  0x2d   : > { %256 = vst [vmem:[%s3388_s26 + $0x1a0] sm:$0xff] %v255_v52  ;;  %258 = vst [vmem:[%s3388_s26 + $0x1a8] sm:$0xff] %v257_v53  ;;  %v261_v55 = vld [vmem:[%s3383_s25 + $0x338] sm:$0xff]  ;;  %v263_v56 = vld [vmem:[%s3383_s25 + $0x340] sm:$0xff] }
  0x2e   : > { %260 = vst [vmem:[%s3388_s26 + $0x1b0] sm:$0xff] %v259_v54  ;;  %262 = vst [vmem:[%s3388_s26 + $0x1b8] sm:$0xff] %v261_v55  ;;  %v265_v57 = vld [vmem:[%s3383_s25 + $0x348] sm:$0xff]  ;;  %v267_v58 = vld [vmem:[%s3383_s25 + $0x350] sm:$0xff] }
  0x2f   : > { %264 = vst [vmem:[%s3388_s26 + $0x1c0] sm:$0xff] %v263_v56  ;;  %v269_v59 = vld [vmem:[%s3383_s25 + $0x358] sm:$0xff]  ;;  %266 = vst [vmem:[%s3388_s26 + $0x1c8] sm:$0xff] %v265_v57  ;;  %v271_v60 = vld [vmem:[%s3383_s25 + $0x360] sm:$0xff] }
  0x30   : > { %268 = vst [vmem:[%s3388_s26 + $0x1d0] sm:$0xff] %v267_v58  ;;  %270 = vst [vmem:[%s3388_s26 + $0x1d8] sm:$0xff] %v269_v59  ;;  %v273_v61 = vld [vmem:[%s3383_s25 + $0x368] sm:$0xff]  ;;  %v275_v62 = vld [vmem:[%s3383_s25 + $0x370] sm:$0xff] }
  0x31   : > { %272 = vst [vmem:[%s3388_s26 + $0x1e0] sm:$0xff] %v271_v60  ;;  %274 = vst [vmem:[%s3388_s26 + $0x1e8] sm:$0xff] %v273_v61  ;;  %v277_v63 = vld [vmem:[%s3383_s25 + $0x378] sm:$0xff]  ;;  %v279_v0 = vld [vmem:[%s3383_s25 + $0x380] sm:$0xff] }
  0x32   : > { %276 = vst [vmem:[%s3388_s26 + $0x1f0] sm:$0xff] %v275_v62  ;;  %v281_v1 = vld [vmem:[%s3383_s25 + $0x388] sm:$0xff]  ;;  %278 = vst [vmem:[%s3388_s26 + $0x1f8] sm:$0xff] %v277_v63  ;;  %v283_v2 = vld [vmem:[%s3383_s25 + $0x390] sm:$0xff] }
  0x33   : > { %280 = vst [vmem:[%s3388_s26 + $0x200] sm:$0xff] %v279_v0  ;;  %282 = vst [vmem:[%s3388_s26 + $0x208] sm:$0xff] %v281_v1  ;;  %v285_v3 = vld [vmem:[%s3383_s25 + $0x398] sm:$0xff]  ;;  %v287_v4 = vld [vmem:[%s3383_s25 + $0x3a0] sm:$0xff] }
  0x34   : > { %284 = vst [vmem:[%s3388_s26 + $0x210] sm:$0xff] %v283_v2  ;;  %286 = vst [vmem:[%s3388_s26 + $0x218] sm:$0xff] %v285_v3  ;;  %v289_v5 = vld [vmem:[%s3383_s25 + $0x3a8] sm:$0xff]  ;;  %v291_v6 = vld [vmem:[%s3383_s25 + $0x3b0] sm:$0xff] }
  0x35   : > { %288 = vst [vmem:[%s3388_s26 + $0x220] sm:$0xff] %v287_v4  ;;  %v293_v7 = vld [vmem:[%s3383_s25 + $0x3b8] sm:$0xff]  ;;  %290 = vst [vmem:[%s3388_s26 + $0x228] sm:$0xff] %v289_v5  ;;  %v295_v8 = vld [vmem:[%s3383_s25 + $0x480] sm:$0xff] }
  0x36   : > { %292 = vst [vmem:[%s3388_s26 + $0x230] sm:$0xff] %v291_v6  ;;  %294 = vst [vmem:[%s3388_s26 + $0x238] sm:$0xff] %v293_v7  ;;  %v297_v9 = vld [vmem:[%s3383_s25 + $0x488] sm:$0xff]  ;;  %v299_v10 = vld [vmem:[%s3383_s25 + $0x490] sm:$0xff] }
  0x37   : > { %296 = vst [vmem:[%s3388_s26 + $0x240] sm:$0xff] %v295_v8  ;;  %298 = vst [vmem:[%s3388_s26 + $0x248] sm:$0xff] %v297_v9  ;;  %v301_v11 = vld [vmem:[%s3383_s25 + $0x498] sm:$0xff]  ;;  %v303_v12 = vld [vmem:[%s3383_s25 + $0x4a0] sm:$0xff] }
  0x38   : > { %300 = vst [vmem:[%s3388_s26 + $0x250] sm:$0xff] %v299_v10  ;;  %v305_v13 = vld [vmem:[%s3383_s25 + $0x4a8] sm:$0xff]  ;;  %302 = vst [vmem:[%s3388_s26 + $0x258] sm:$0xff] %v301_v11  ;;  %v307_v14 = vld [vmem:[%s3383_s25 + $0x4b0] sm:$0xff] }
  0x39   : > { %304 = vst [vmem:[%s3388_s26 + $0x260] sm:$0xff] %v303_v12  ;;  %306 = vst [vmem:[%s3388_s26 + $0x268] sm:$0xff] %v305_v13  ;;  %v309_v15 = vld [vmem:[%s3383_s25 + $0x4b8] sm:$0xff]  ;;  %v311_v16 = vld [vmem:[%s3383_s25 + $0x4c0] sm:$0xff] }
  0x3a   : > { %308 = vst [vmem:[%s3388_s26 + $0x270] sm:$0xff] %v307_v14  ;;  %310 = vst [vmem:[%s3388_s26 + $0x278] sm:$0xff] %v309_v15  ;;  %v313_v17 = vld [vmem:[%s3383_s25 + $0x4c8] sm:$0xff]  ;;  %v315_v18 = vld [vmem:[%s3383_s25 + $0x4d0] sm:$0xff] }
  0x3b   : > { %312 = vst [vmem:[%s3388_s26 + $0x280] sm:$0xff] %v311_v16  ;;  %v317_v19 = vld [vmem:[%s3383_s25 + $0x4d8] sm:$0xff]  ;;  %314 = vst [vmem:[%s3388_s26 + $0x288] sm:$0xff] %v313_v17  ;;  %v319_v20 = vld [vmem:[%s3383_s25 + $0x4e0] sm:$0xff] }
  0x3c   : > { %316 = vst [vmem:[%s3388_s26 + $0x290] sm:$0xff] %v315_v18  ;;  %318 = vst [vmem:[%s3388_s26 + $0x298] sm:$0xff] %v317_v19  ;;  %v321_v21 = vld [vmem:[%s3383_s25 + $0x4e8] sm:$0xff]  ;;  %v323_v22 = vld [vmem:[%s3383_s25 + $0x4f0] sm:$0xff] }
  0x3d   : > { %320 = vst [vmem:[%s3388_s26 + $0x2a0] sm:$0xff] %v319_v20  ;;  %322 = vst [vmem:[%s3388_s26 + $0x2a8] sm:$0xff] %v321_v21  ;;  %v325_v23 = vld [vmem:[%s3383_s25 + $0x4f8] sm:$0xff]  ;;  %v327_v24 = vld [vmem:[%s3383_s25 + $0x500] sm:$0xff] }
  0x3e   : > { %324 = vst [vmem:[%s3388_s26 + $0x2b0] sm:$0xff] %v323_v22  ;;  %v329_v25 = vld [vmem:[%s3383_s25 + $0x508] sm:$0xff]  ;;  %326 = vst [vmem:[%s3388_s26 + $0x2b8] sm:$0xff] %v325_v23  ;;  %v331_v26 = vld [vmem:[%s3383_s25 + $0x510] sm:$0xff] }
  0x3f   : > { %328 = vst [vmem:[%s3388_s26 + $0x2c0] sm:$0xff] %v327_v24  ;;  %330 = vst [vmem:[%s3388_s26 + $0x2c8] sm:$0xff] %v329_v25  ;;  %v333_v27 = vld [vmem:[%s3383_s25 + $0x518] sm:$0xff]  ;;  %v335_v28 = vld [vmem:[%s3383_s25 + $0x520] sm:$0xff] }
  0x40   : > { %332 = vst [vmem:[%s3388_s26 + $0x2d0] sm:$0xff] %v331_v26  ;;  %334 = vst [vmem:[%s3388_s26 + $0x2d8] sm:$0xff] %v333_v27  ;;  %v337_v29 = vld [vmem:[%s3383_s25 + $0x528] sm:$0xff]  ;;  %v339_v30 = vld [vmem:[%s3383_s25 + $0x530] sm:$0xff] }
  0x41   : > { %336 = vst [vmem:[%s3388_s26 + $0x2e0] sm:$0xff] %v335_v28  ;;  %v341_v31 = vld [vmem:[%s3383_s25 + $0x538] sm:$0xff]  ;;  %338 = vst [vmem:[%s3388_s26 + $0x2e8] sm:$0xff] %v337_v29 }
  0x42   : > { %340 = vst [vmem:[%s3388_s26 + $0x2f0] sm:$0xff] %v339_v30  ;;  %342 = vst [vmem:[%s3388_s26 + $0x2f8] sm:$0xff] %v341_v31 }
  0x43 PF: > { %p2648_p5 = scmp.ge.s32.totalorder %s3327_s14, 1  ;;  %p347_p6 = scmp.lt.s32.totalorder %s3327_s14, 3 }
  0x45   : > { %p348_p7 = pnand %p2648_p5, %p347_p6 }
  0x46   : > { %v3113_v32 = vld [vmem:[%s4374_s1 + $0x4] ss:$8 sps:$4 sm:$0xff] (!%p348_p7)   ;;  %v3117_v34 = vld [vmem:[%s4374_s1] ss:$8 sps:$4 sm:$0xff] (!%p348_p7)   ;;  %v3119_v36 = vld [vmem:[%s4374_s1 + $0x14] ss:$8 sps:$4 sm:$0xff] (!%p348_p7)  }
  0x47   : > { %351 = sbr.rel (%p348_p7) target bundleno = 555 (0x22b), region = 51  ;;  %v3115_v33 = vld [vmem:[%s4374_s1 + $0x204] ss:$8 sps:$4 sm:$0xff] (!%p348_p7)   ;;  %1742 = vmatprep.subr.bf16.mxu1 (!%p348_p7), %v3113_v32  ;;  %v3118_v35 = vld [vmem:[%s4374_s1 + $0x200] ss:$8 sps:$4 sm:$0xff] (!%p348_p7)   ;;  %s354_s11 = sand.u32 (!%p348_p7), 1, %s3319_s12  }
  0x48   : > { %2048 = vmatprep.subr.bf16.mxu0 (!%p348_p7), %v3115_v33  ;;  %1743 = vmatpush1.bf16.msra.mxu1 (!%p348_p7), %v3117_v34  ;;  %v3121_v37 = vld [vmem:[%s4374_s1 + $0x214] ss:$8 sps:$4 sm:$0xff] (!%p348_p7)   ;;  %v3123_v38 = vld [vmem:[%s4374_s1 + $0x10] ss:$8 sps:$4 sm:$0xff] (!%p348_p7)   ;;  %v3125_v40 = vld [vmem:[%s4374_s1 + $0x24] ss:$8 sps:$4 sm:$0xff] (!%p348_p7)  }
  0x49   : > { %2049 = vmatpush1.bf16.msra.mxu0 (!%p348_p7), %v3118_v35  ;;  %1744 = vmatprep.subr.bf16.mxu1 (!%p348_p7), %v3119_v36  ;;  %v3124_v39 = vld [vmem:[%s4374_s1 + $0x210] ss:$8 sps:$4 sm:$0xff] (!%p348_p7)   ;;  %v3127_v41 = vld [vmem:[%s4374_s1 + $0x224] ss:$8 sps:$4 sm:$0xff] (!%p348_p7)   ;;  %v3129_v42 = vld [vmem:[%s4374_s1 + $0x20] ss:$8 sps:$4 sm:$0xff] (!%p348_p7)  }
  0x4a   : > { %2050 = vmatprep.subr.bf16.mxu0 (!%p348_p7), %v3121_v37  ;;  %v3130_v43 = vld [vmem:[%s4374_s1 + $0x220] ss:$8 sps:$4 sm:$0xff] (!%p348_p7)   ;;  %v3131_v44 = vld [vmem:[%s4374_s1 + $0x34] ss:$8 sps:$4 sm:$0xff] (!%p348_p7)   ;;  %v3135_v46 = vld [vmem:[%s4374_s1 + $0x30] ss:$8 sps:$4 sm:$0xff] (!%p348_p7)  }
  0x4b   : > { %v3133_v45 = vld [vmem:[%s4374_s1 + $0x234] ss:$8 sps:$4 sm:$0xff] (!%p348_p7)   ;;  %v3136_v47 = vld [vmem:[%s4374_s1 + $0x230] ss:$8 sps:$4 sm:$0xff] (!%p348_p7)   ;;  %v3137_v48 = vld [vmem:[%s4374_s1 + $0x44] ss:$8 sps:$4 sm:$0xff] (!%p348_p7)  }
  0x4c   : > { %1745 = vmatpush1.bf16.msra.mxu1 (!%p348_p7), %v3123_v38  ;;  %v3139_v49 = vld [vmem:[%s4374_s1 + $0x244] ss:$8 sps:$4 sm:$0xff] (!%p348_p7)   ;;  %v3141_v50 = vld [vmem:[%s4374_s1 + $0x40] ss:$8 sps:$4 sm:$0xff] (!%p348_p7)   ;;  %v3143_v52 = vld [vmem:[%s4374_s1 + $0x54] ss:$8 sps:$4 sm:$0xff] (!%p348_p7)  }
  0x4d   : > { %2051 = vmatpush1.bf16.msra.mxu0 (!%p348_p7), %v3124_v39  ;;  %1746 = vmatprep.subr.bf16.mxu1 (!%p348_p7), %v3125_v40  ;;  %v3142_v51 = vld [vmem:[%s4374_s1 + $0x240] ss:$8 sps:$4 sm:$0xff] (!%p348_p7)   ;;  %v3145_v53 = vld [vmem:[%s4374_s1 + $0x254] ss:$8 sps:$4 sm:$0xff] (!%p348_p7)   ;;  %v3147_v54 = vld [vmem:[%s4374_s1 + $0x50] ss:$8 sps:$4 sm:$0xff] (!%p348_p7)  }
  0x4e   : > { %2052 = vmatprep.subr.bf16.mxu0 %v3127_v41  ;;  %v3148_v55 = vld [vmem:[%s4374_s1 + $0x250] ss:$8 sps:$4 sm:$0xff]   ;;  %v3149_v56 = vld [vmem:[%s4374_s1 + $0x64] ss:$8 sps:$4 sm:$0xff]   ;;  %v3153_v58 = vld [vmem:[%s4374_s1 + $0x60] ss:$8 sps:$4 sm:$0xff]  }
  0x4f   : > { %v3151_v57 = vld [vmem:[%s4374_s1 + $0x264] ss:$8 sps:$4 sm:$0xff]   ;;  %v3154_v59 = vld [vmem:[%s4374_s1 + $0x260] ss:$8 sps:$4 sm:$0xff]   ;;  %v3155_v60 = vld [vmem:[%s4374_s1 + $0x74] ss:$8 sps:$4 sm:$0xff]  }
  0x50   : > { %1747 = vmatpush1.bf16.msra.mxu1 %v3129_v42  ;;  %v3157_v61 = vld [vmem:[%s4374_s1 + $0x274] ss:$8 sps:$4 sm:$0xff]   ;;  %v3159_v62 = vld [vmem:[%s4374_s1 + $0x70] ss:$8 sps:$4 sm:$0xff]   ;;  %v3161_v0 = vld [vmem:[%s4374_s1 + $0x84] ss:$8 sps:$4 sm:$0xff]  }
  0x51   : > { %2053 = vmatpush1.bf16.msra.mxu0 %v3130_v43  ;;  %1748 = vmatprep.subr.bf16.mxu1 %v3131_v44  ;;  %v3160_v63 = vld [vmem:[%s4374_s1 + $0x270] ss:$8 sps:$4 sm:$0xff]   ;;  %v3163_v1 = vld [vmem:[%s4374_s1 + $0x284] ss:$8 sps:$4 sm:$0xff]   ;;  %v3165_v2 = vld [vmem:[%s4374_s1 + $0x80] ss:$8 sps:$4 sm:$0xff]  }
  0x52   : > { %2054 = vmatprep.subr.bf16.mxu0 %v3133_v45  ;;  %v3166_v3 = vld [vmem:[%s4374_s1 + $0x280] ss:$8 sps:$4 sm:$0xff]   ;;  %v3167_v4 = vld [vmem:[%s4374_s1 + $0x94] ss:$8 sps:$4 sm:$0xff]   ;;  %v3171_v6 = vld [vmem:[%s4374_s1 + $0x90] ss:$8 sps:$4 sm:$0xff]  }
  0x53   : > { %v3169_v5 = vld [vmem:[%s4374_s1 + $0x294] ss:$8 sps:$4 sm:$0xff]   ;;  %s3088_s22 = smul.u32 768, %s354_s11  ;;  %v3172_v7 = vld [vmem:[%s4374_s1 + $0x290] ss:$8 sps:$4 sm:$0xff]  }
  0x54   : > { %1749 = vmatpush1.bf16.msra.mxu1 %v3135_v46  ;;  %v3173_v8 = vld [vmem:[%s4374_s1 + $0xa4] ss:$8 sps:$4 sm:$0xff]   ;;  %v3177_v10 = vld [vmem:[%s4374_s1 + $0xa0] ss:$8 sps:$4 sm:$0xff]   ;;  %v3179_v12 = vld [vmem:[%s4374_s1 + $0xb4] ss:$8 sps:$4 sm:$0xff]  }
  0x55   : > { %2055 = vmatpush1.bf16.msra.mxu0 %v3136_v47  ;;  %1750 = vmatprep.subr.bf16.mxu1 %v3137_v48  ;;  %v3175_v9 = vld [vmem:[%s4374_s1 + $0x2a4] ss:$8 sps:$4 sm:$0xff]   ;;  %v3178_v11 = vld [vmem:[%s4374_s1 + $0x2a0] ss:$8 sps:$4 sm:$0xff]   ;;  %v3181_v13 = vld [vmem:[%s4374_s1 + $0x2b4] ss:$8 sps:$4 sm:$0xff]  }
  0x56   : > { %2056 = vmatprep.subr.bf16.mxu0 %v3139_v49  ;;  %v3183_v14 = vld [vmem:[%s4374_s1 + $0xb0] ss:$8 sps:$4 sm:$0xff]   ;;  %s3726_s18 = scalar_lea.vmem [#allocation2], %s3088_s22  ;;  %v3185_v20 = vld [vmem:[%s4374_s1 + $0xc4] ss:$8 sps:$4 sm:$0xff]   ;;  %s4234_s10 = smul.u32 6, %s2642_s15 }
  0x57   : > { %v3184_v15 = vld [vmem:[%s4374_s1 + $0x2b0] ss:$8 sps:$4 sm:$0xff]   ;;  %v386_v16 = vld [vmem:[%s3726_s18] sm:$0xff]  ;;  %v3191_v26 = vld [vmem:[%s4374_s1 + $0xd4] ss:$8 sps:$4 sm:$0xff]  }
  0x58   : > { %1751 = vmatpush1.bf16.msra.mxu1 %v3141_v50  ;;  %v390_v17 = vld [vmem:[%s3726_s18 + $0x20] sm:$0xff]  ;;  %v388_v18 = vld [vmem:[%s3726_s18 + $0x10] sm:$0xff]  ;;  %p380_p8 = scmp.lt.s32.totalorder %s4234_s10, 11 }
  0x59   : > { %2057 = vmatpush1.bf16.msra.mxu0 %v3142_v51  ;;  %1752 = vmatprep.subr.bf16.mxu1 %v3143_v52  ;;  %v392_v19 = vld [vmem:[%s3726_s18 + $0x30] sm:$0xff]  ;;  %v2652_v21 = vcombine.high %v386_v16, %v390_v17  ;;  %v3187_v22 = vld [vmem:[%s4374_s1 + $0x2c4] ss:$8 sps:$4 sm:$0xff]   ;;  %v3189_v24 = vld [vmem:[%s4374_s1 + $0xc0] ss:$8 sps:$4 sm:$0xff]   ;;  %v2651_v42 = vcombine.low %v386_v16, %v390_v17 }
  0x5a   : > { %2058 = vmatprep.subr.bf16.mxu0 %v3145_v53  ;;  %v2656_v23 = vcombine.high %v388_v18, %v392_v19  ;;  %v3190_v25 = vld [vmem:[%s4374_s1 + $0x2c0] ss:$8 sps:$4 sm:$0xff]   ;;  %v3193_v27 = vld [vmem:[%s4374_s1 + $0x2d4] ss:$8 sps:$4 sm:$0xff]   ;;  %v3195_v28 = vld [vmem:[%s4374_s1 + $0xd0] ss:$8 sps:$4 sm:$0xff]   ;;  %v2655_v43 = vcombine.low %v388_v18, %v392_v19 }
  0x5b   : > { %1774 = vmatprep.mubr.bf16.mxu1 %v2652_v21  ;;  %v3196_v29 = vld [vmem:[%s4374_s1 + $0x2d0] ss:$8 sps:$4 sm:$0xff]   ;;  %v3197_v30 = vld [vmem:[%s4374_s1 + $0xe4] ss:$8 sps:$4 sm:$0xff]   ;;  %v3201_v32 = vld [vmem:[%s4374_s1 + $0xe0] ss:$8 sps:$4 sm:$0xff]  }
  0x5c   : > { %1753 = vmatpush1.bf16.msra.mxu1 %v3147_v54  ;;  %2080 = vmatprep.mubr.bf16.mxu0 %v2656_v23  ;;  %v3199_v31 = vld [vmem:[%s4374_s1 + $0x2e4] ss:$8 sps:$4 sm:$0xff]   ;;  %v3202_v33 = vld [vmem:[%s4374_s1 + $0x2e0] ss:$8 sps:$4 sm:$0xff]   ;;  %v3203_v34 = vld [vmem:[%s4374_s1 + $0xf4] ss:$8 sps:$4 sm:$0xff]  }
  0x5d   : > { %2059 = vmatpush1.bf16.msra.mxu0 %v3148_v55  ;;  %1754 = vmatprep.subr.bf16.mxu1 %v3149_v56  ;;  %v3205_v35 = vld [vmem:[%s4374_s1 + $0x2f4] ss:$8 sps:$4 sm:$0xff]   ;;  %v3207_v36 = vld [vmem:[%s4374_s1 + $0xf0] ss:$8 sps:$4 sm:$0xff]   ;;  %v3211_v38 = vld [vmem:[%s4374_s1 + $0x104] ss:$8 sps:$4 sm:$0xff]  }
  0x5e   : > { %2060 = vmatprep.subr.bf16.mxu0 %v3151_v57  ;;  %v3208_v37 = vld [vmem:[%s4374_s1 + $0x2f0] ss:$8 sps:$4 sm:$0xff]   ;;  %v3214_v39 = vld [vmem:[%s4374_s1 + $0x304] ss:$8 sps:$4 sm:$0xff]   ;;  %v3209_v44 = vld [vmem:[%s4374_s1 + $0x100] ss:$8 sps:$4 sm:$0xff]  }
  0x5f   : > { %v394_v40 = vld [vmem:[%s3726_s18 + $0x40] sm:$0xff]  ;;  %v396_v45 = vld [vmem:[%s3726_s18 + $0x50] sm:$0xff]  ;;  %s4381_s10 = smov (!%p380_p8, %s4234_s10), 11 }
  0x60   : > { %1755 = vmatpush1.bf16.msra.mxu1 %v3153_v58  ;;  %v398_v41 = vld [vmem:[%s3726_s18 + $0x60] sm:$0xff]  ;;  %v400_v46 = vld [vmem:[%s3726_s18 + $0x70] sm:$0xff]  ;;  %s2887_s14 = sshll.u32 %s4381_s10, 3 }
  0x61   : > { %2061 = vmatpush1.bf16.msra.mxu0 %v3154_v59  ;;  %1756 = vmatprep.subr.bf16.mxu1 %v3155_v60  ;;  %v3212_v47 = vld [vmem:[%s4374_s1 + $0x300] ss:$8 sps:$4 sm:$0xff]   ;;  %v3217_v48 = vld [vmem:[%s4374_s1 + $0x114] ss:$8 sps:$4 sm:$0xff]   ;;  %v2660_v49 = vcombine.high %v394_v40, %v398_v41  ;;  %v2664_v50 = vcombine.high %v396_v45, %v400_v46  ;;  %v3215_v52 = vld [vmem:[%s4374_s1 + $0x110] ss:$8 sps:$4 sm:$0xff]   ;;  %v2659_v60 = vcombine.low %v394_v40, %v398_v41  ;;  %s4306_s17 = scalar_lea.vmem %s4376_s3, %s2887_s14 }
  0x62   : > { %2062 = vmatprep.subr.bf16.mxu0 %v3157_v61  ;;  %v3220_v51 = vld [vmem:[%s4374_s1 + $0x314] ss:$8 sps:$4 sm:$0xff]   ;;  %v3218_v53 = vld [vmem:[%s4374_s1 + $0x310] ss:$8 sps:$4 sm:$0xff]   ;;  %v3223_v54 = vld [vmem:[%s4374_s1 + $0x124] ss:$8 sps:$4 sm:$0xff]   ;;  %v2663_v61 = vcombine.low %v396_v45, %v400_v46 }
  0x63   : > { %v3226_v55 = vld [vmem:[%s4374_s1 + $0x324] ss:$8 sps:$4 sm:$0xff]   ;;  %v404_v58 = vld [vmem:[%s3726_s18 + $0x90] sm:$0xff]  ;;  %v3233_v16 = vld [vmem:[%s4374_s1 + $0x140] ss:$8 sps:$4 sm:$0xff]  }
  0x64   : > { %1757 = vmatpush1.bf16.msra.mxu1 %v3159_v62  ;;  %v402_v56 = vld [vmem:[%s3726_s18 + $0x80] sm:$0xff]  ;;  %v408_v59 = vld [vmem:[%s3726_s18 + $0xb0] sm:$0xff] }
  0x65   : > { %2063 = vmatpush1.bf16.msra.mxu0 %v3160_v63  ;;  %1758 = vmatprep.subr.bf16.mxu1 %v3161_v0  ;;  %v406_v57 = vld [vmem:[%s3726_s18 + $0xa0] sm:$0xff]  ;;  %v3241_v18 = vld [vmem:[%s4374_s1 + $0x154] ss:$8 sps:$4 sm:$0xff]   ;;  %v3251_v40 = vld [vmem:[%s4374_s1 + $0x170] ss:$8 sps:$4 sm:$0xff]  }
  0x66   : > { %2064 = vmatprep.subr.bf16.mxu0 %v3163_v1  ;;  %v3221_v62 = vld [vmem:[%s4374_s1 + $0x120] ss:$8 sps:$4 sm:$0xff]   ;;  %v2668_v63 = vcombine.high %v402_v56, %v406_v57  ;;  %v2672_v1 = vcombine.high %v404_v58, %v408_v59  ;;  %v3244_v19 = vld [vmem:[%s4374_s1 + $0x354] ss:$8 sps:$4 sm:$0xff]   ;;  %v3254_v41 = vld [vmem:[%s4374_s1 + $0x370] ss:$8 sps:$4 sm:$0xff]  }
  0x67   : > { %v3224_v0 = vld [vmem:[%s4374_s1 + $0x320] ss:$8 sps:$4 sm:$0xff]   ;;  %v420_v23 = vld [vmem:[%s3726_s18 + $0x110] sm:$0xff] }
  0x68   : > { %1759 = vmatpush1.bf16.msra.mxu1 %v3165_v2  ;;  %v3227_v2 = vld [vmem:[%s4374_s1 + $0x130] ss:$8 sps:$4 sm:$0xff]   ;;  %v3236_v17 = vld [vmem:[%s4374_s1 + $0x340] ss:$8 sps:$4 sm:$0xff]  }
  0x69   : > { %2065 = vmatpush1.bf16.msra.mxu0 %v3166_v3  ;;  %1760 = vmatprep.subr.bf16.mxu1 %v3167_v4  ;;  %v3229_v3 = vld [vmem:[%s4374_s1 + $0x134] ss:$8 sps:$4 sm:$0xff]   ;;  %v418_v21 = vld [vmem:[%s3726_s18 + $0x100] sm:$0xff] }
  0x6a   : > { %2066 = vmatprep.subr.bf16.mxu0 %v3169_v5  ;;  %v3232_v4 = vld [vmem:[%s4374_s1 + $0x334] ss:$8 sps:$4 sm:$0xff]   ;;  %v3230_v5 = vld [vmem:[%s4374_s1 + $0x330] ss:$8 sps:$4 sm:$0xff]  }
  0x6c   : > { %1761 = vmatpush1.bf16.msra.mxu1 %v3171_v6  ;;  %v410_v6 = vld [vmem:[%s3726_s18 + $0xc0] sm:$0xff] }
  0x6d   : > { %2067 = vmatpush1.bf16.msra.mxu0 %v3172_v7  ;;  %1762 = vmatprep.subr.bf16.mxu1 %v3173_v8  ;;  %v414_v7 = vld [vmem:[%s3726_s18 + $0xe0] sm:$0xff]  ;;  %v412_v8 = vld [vmem:[%s3726_s18 + $0xd0] sm:$0xff] }
  0x6e   : > { %2068 = vmatprep.subr.bf16.mxu0 %v3175_v9  ;;  %v416_v9 = vld [vmem:[%s3726_s18 + $0xf0] sm:$0xff] }
  0x70   : > { %1763 = vmatpush1.bf16.msra.mxu1 %v3177_v10  ;;  %v3235_v10 = vld [vmem:[%s4374_s1 + $0x144] ss:$8 sps:$4 sm:$0xff]  }
  0x71   : > { %2069 = vmatpush1.bf16.msra.mxu0 %v3178_v11  ;;  %1764 = vmatprep.subr.bf16.mxu1 %v3179_v12  ;;  %v3238_v11 = vld [vmem:[%s4374_s1 + $0x344] ss:$8 sps:$4 sm:$0xff]   ;;  %v2667_v12 = vcombine.low %v402_v56, %v406_v57  ;;  %v3263_v56 = vld [vmem:[%s4374_s1 + $0x190] ss:$8 sps:$4 sm:$0xff]  }
  0x72   : > { %2070 = vmatprep.subr.bf16.mxu0 %v3181_v13  ;;  %v2671_v13 = vcombine.low %v404_v58, %v408_v59  ;;  %v3266_v57 = vld [vmem:[%s4374_s1 + $0x390] ss:$8 sps:$4 sm:$0xff]   ;;  %v3271_v58 = vld [vmem:[%s4374_s1 + $0x1a4] ss:$8 sps:$4 sm:$0xff]  }
  0x73   : > { %v3274_v59 = vld [vmem:[%s4374_s1 + $0x3a4] ss:$8 sps:$4 sm:$0xff]  }
  0x74   : > { %1765 = vmatpush1.bf16.msra.mxu1 %v3183_v14  ;;  %v2676_v14 = vcombine.high %v410_v6, %v414_v7 }
  0x75   : > { %2071 = vmatpush1.bf16.msra.mxu0 %v3184_v15  ;;  %1766 = vmatprep.subr.bf16.mxu1 %v3185_v20  ;;  %v2680_v15 = vcombine.high %v412_v8, %v416_v9  ;;  %v3239_v20 = vld [vmem:[%s4374_s1 + $0x150] ss:$8 sps:$4 sm:$0xff]  }
  0x76   : > { %2072 = vmatprep.subr.bf16.mxu0 %v3187_v22  ;;  %v422_v22 = vld [vmem:[%s3726_s18 + $0x120] sm:$0xff] }
  0x78   : > { %1767 = vmatpush1.bf16.msra.mxu1 %v3189_v24  ;;  %v424_v24 = vld [vmem:[%s3726_s18 + $0x130] sm:$0xff] }
  0x79   : > { %2073 = vmatpush1.bf16.msra.mxu0 %v3190_v25  ;;  %1768 = vmatprep.subr.bf16.mxu1 %v3191_v26  ;;  %v3242_v25 = vld [vmem:[%s4374_s1 + $0x350] ss:$8 sps:$4 sm:$0xff]   ;;  %v3247_v26 = vld [vmem:[%s4374_s1 + $0x164] ss:$8 sps:$4 sm:$0xff]   ;;  %v2687_v45 = vcombine.low %v420_v23, %v424_v24 }
  0x7a   : > { %2074 = vmatprep.subr.bf16.mxu0 %v3193_v27  ;;  %v3250_v27 = vld [vmem:[%s4374_s1 + $0x364] ss:$8 sps:$4 sm:$0xff]  }
  0x7c   : > { %1769 = vmatpush1.bf16.msra.mxu1 %v3195_v28  ;;  %v2675_v28 = vcombine.low %v410_v6, %v414_v7  ;;  %v444_v6 = vld [vmem:[%s3726_s18 + $0x1d0] sm:$0xff] }
  0x7d   : > { %2075 = vmatpush1.bf16.msra.mxu0 %v3196_v29  ;;  %1770 = vmatprep.subr.bf16.mxu1 %v3197_v30  ;;  %v2679_v29 = vcombine.low %v412_v8, %v416_v9  ;;  %v2684_v30 = vcombine.high %v418_v21, %v422_v22  ;;  %v448_v7 = vld [vmem:[%s3726_s18 + $0x1f0] sm:$0xff] }
  0x7e   : > { %2076 = vmatprep.subr.bf16.mxu0 %v3199_v31  ;;  %v2688_v31 = vcombine.high %v420_v23, %v424_v24  ;;  %v3275_v8 = vld [vmem:[%s4374_s1 + $0x1b0] ss:$8 sps:$4 sm:$0xff]  }
  0x7f   : > { %v3278_v9 = vld [vmem:[%s4374_s1 + $0x3b0] ss:$8 sps:$4 sm:$0xff]  }
  0x80   : > { %1771 = vmatpush1.bf16.msra.mxu1 %v3201_v32  ;;  %v3245_v32 = vld [vmem:[%s4374_s1 + $0x160] ss:$8 sps:$4 sm:$0xff]   ;;  %v456_v23 = vld [vmem:[%s3726_s18 + $0x230] sm:$0xff] }
  0x81   : > { %2077 = vmatpush1.bf16.msra.mxu0 %v3202_v33  ;;  %1772 = vmatprep.subr.bf16.mxu1 %v3203_v34  ;;  %v3248_v33 = vld [vmem:[%s4374_s1 + $0x360] ss:$8 sps:$4 sm:$0xff]   ;;  %v3253_v34 = vld [vmem:[%s4374_s1 + $0x174] ss:$8 sps:$4 sm:$0xff]   ;;  %v3287_v24 = vld [vmem:[%s4374_s1 + $0x1d0] ss:$8 sps:$4 sm:$0xff]  }
  0x82   : > { %2078 = vmatprep.subr.bf16.mxu0 %v3205_v35  ;;  %v3256_v35 = vld [vmem:[%s4374_s1 + $0x374] ss:$8 sps:$4 sm:$0xff]  }
  0x84   : > { %1773 = vmatpush1.bf16.msra.mxu1 %v3207_v36  ;;  %v426_v36 = vld [vmem:[%s3726_s18 + $0x140] sm:$0xff] }
  0x85   : > { %2079 = vmatpush1.bf16.msra.mxu0 %v3208_v37  ;;  %1895 = vmatprep.subr.bf16.mxu1 %v3211_v38  ;;  %v430_v37 = vld [vmem:[%s3726_s18 + $0x160] sm:$0xff]  ;;  %v428_v38 = vld [vmem:[%s3726_s18 + $0x150] sm:$0xff] }
  0x86   : > { %2201 = vmatprep.subr.bf16.mxu0 %v3214_v39  ;;  %v432_v39 = vld [vmem:[%s3726_s18 + $0x170] sm:$0xff]  ;;  %v2692_v46 = vcombine.high %v426_v36, %v430_v37 }
  0x87   : > { %1775 = vmatmul.mubr.bf16.vlgmr.msra.gmra.mrb[0].mxu1 %v2651_v42  ;;  %v3259_v42 = vld [vmem:[%s4374_s1 + $0x184] ss:$8 sps:$4 sm:$0xff]  }
  0x88   : > { %2081 = vmatmul.mubr.bf16.vlgmr.msra.gmra.mrb[0].mxu0 %v2655_v43  ;;  %1896 = vmatpush1.bf16.msra.mxu1 %v3209_v44  ;;  %v3262_v43 = vld [vmem:[%s4374_s1 + $0x384] ss:$8 sps:$4 sm:$0xff]   ;;  %v2683_v44 = vcombine.low %v418_v21, %v422_v22  ;;  %v452_v22 = vld [vmem:[%s3726_s18 + $0x210] sm:$0xff] }
  0x89   : > { %2202 = vmatpush1.bf16.msra.mxu0 %v3212_v47  ;;  %1897 = vmatprep.subr.bf16.mxu1 %v3217_v48  ;;  %v2696_v47 = vcombine.high %v428_v38, %v432_v39  ;;  %v3257_v48 = vld [vmem:[%s4374_s1 + $0x180] ss:$8 sps:$4 sm:$0xff]  }
  0x8a   : > { %1784 = vmatprep.mubr.bf16.mxu1 %v2660_v49  ;;  %2090 = vmatprep.mubr.bf16.mxu0 %v2664_v50  ;;  %v3260_v49 = vld [vmem:[%s4374_s1 + $0x380] ss:$8 sps:$4 sm:$0xff]   ;;  %v3265_v50 = vld [vmem:[%s4374_s1 + $0x194] ss:$8 sps:$4 sm:$0xff]  }
  0x8b   : > { %2203 = vmatprep.subr.bf16.mxu0 %v3220_v51  ;;  %v3268_v51 = vld [vmem:[%s4374_s1 + $0x394] ss:$8 sps:$4 sm:$0xff]   ;;  %v454_v21 = vld [vmem:[%s3726_s18 + $0x220] sm:$0xff] }
  0x8c   : > { %1898 = vmatpush1.bf16.msra.mxu1 %v3215_v52  ;;  %v434_v52 = vld [vmem:[%s3726_s18 + $0x180] sm:$0xff] }
  0x8d   : > { %2204 = vmatpush1.bf16.msra.mxu0 %v3218_v53  ;;  %1899 = vmatprep.subr.bf16.mxu1 %v3223_v54  ;;  %v438_v53 = vld [vmem:[%s3726_s18 + $0x1a0] sm:$0xff]  ;;  %v436_v54 = vld [vmem:[%s3726_s18 + $0x190] sm:$0xff] }
  0x8e   : > { %2205 = vmatprep.subr.bf16.mxu0 %v3226_v55  ;;  %v440_v55 = vld [vmem:[%s3726_s18 + $0x1b0] sm:$0xff] }
  0x8f   : > { %1785 = vmatmul.mubr.bf16.gmra.mrb[4].mxu1 %v2659_v60  ;;  %v2691_v60 = vcombine.low %v426_v36, %v430_v37  ;;  %v458_v36 = vld [vmem:[%s3726_s18 + $0x240] sm:$0xff] }
  0x90   : > { %2091 = vmatmul.mubr.bf16.gmra.mrb[4].mxu0 %v2663_v61  ;;  %1900 = vmatpush1.bf16.msra.mxu1 %v3221_v62  ;;  %v2695_v61 = vcombine.low %v428_v38, %v432_v39  ;;  %v2700_v62 = vcombine.high %v434_v52, %v438_v53  ;;  %v462_v37 = vld [vmem:[%s3726_s18 + $0x260] sm:$0xff]  ;;  %v460_v38 = vld [vmem:[%s3726_s18 + $0x250] sm:$0xff] }
  0x91   : > { %1794 = vmatprep.mubr.bf16.mxu1 %v2668_v63  ;;  %2100 = vmatprep.mubr.bf16.mxu0 %v2672_v1  ;;  %v2704_v63 = vcombine.high %v436_v54, %v440_v55  ;;  %v3272_v1 = vld [vmem:[%s4374_s1 + $0x3a0] ss:$8 sps:$4 sm:$0xff]   ;;  %v464_v39 = vld [vmem:[%s3726_s18 + $0x270] sm:$0xff] }
  0x92   : > { %2206 = vmatpush1.bf16.msra.mxu0 %v3224_v0  ;;  %1901 = vmatprep.subr.bf16.mxu1 %v3229_v3  ;;  %v3269_v0 = vld [vmem:[%s4374_s1 + $0x1a0] ss:$8 sps:$4 sm:$0xff]   ;;  %v3280_v3 = vld [vmem:[%s4374_s1 + $0x3b4] ss:$8 sps:$4 sm:$0xff]  }
  0x93   : > { %2207 = vmatprep.subr.bf16.mxu0 %v3232_v4  ;;  %v442_v4 = vld [vmem:[%s3726_s18 + $0x1c0] sm:$0xff] }
  0x94   : > { %1902 = vmatpush1.bf16.msra.mxu1 %v3227_v2  ;;  %v3277_v2 = vld [vmem:[%s4374_s1 + $0x1b4] ss:$8 sps:$4 sm:$0xff]  }
  0x95   : > { %1903 = vmatprep.subr.bf16.mxu1 %v3235_v10  ;;  %v3283_v10 = vld [vmem:[%s4374_s1 + $0x1c4] ss:$8 sps:$4 sm:$0xff]  }
  0x96   : > { %2208 = vmatpush1.bf16.msra.mxu0 %v3230_v5  ;;  %v446_v5 = vld [vmem:[%s3726_s18 + $0x1e0] sm:$0xff] }
  0x97   : > { %2209 = vmatprep.subr.bf16.mxu0 %v3238_v11  ;;  %1795 = vmatmul.mubr.bf16.gmra.mrb[8].mxu1 %v2667_v12  ;;  %v3286_v11 = vld [vmem:[%s4374_s1 + $0x3c4] ss:$8 sps:$4 sm:$0xff]   ;;  %v2699_v12 = vcombine.low %v434_v52, %v438_v53 }
  0x98   : > { %2101 = vmatmul.mubr.bf16.gmra.mrb[8].mxu0 %v2671_v13  ;;  %1804 = vmatprep.mubr.bf16.mxu1 %v2676_v14  ;;  %v2703_v13 = vcombine.low %v436_v54, %v440_v55  ;;  %v2708_v14 = vcombine.high %v442_v4, %v446_v5  ;;  %v474_v54 = vld [vmem:[%s3726_s18 + $0x2c0] sm:$0xff] }
  0x99   : > { %2110 = vmatprep.mubr.bf16.mxu0 %v2680_v15  ;;  %1904 = vmatpush1.bf16.msra.mxu1 %v3233_v16  ;;  %v2712_v15 = vcombine.high %v444_v6, %v448_v7  ;;  %v3281_v16 = vld [vmem:[%s4374_s1 + $0x1c0] ss:$8 sps:$4 sm:$0xff]  }
  0x9a   : > { %2210 = vmatpush1.bf16.msra.mxu0 %v3236_v17  ;;  %1905 = vmatprep.subr.bf16.mxu1 %v3241_v18  ;;  %v3284_v17 = vld [vmem:[%s4374_s1 + $0x3c0] ss:$8 sps:$4 sm:$0xff]   ;;  %v3289_v18 = vld [vmem:[%s4374_s1 + $0x1d4] ss:$8 sps:$4 sm:$0xff]  }
  0x9b   : > { %2211 = vmatprep.subr.bf16.mxu0 %v3244_v19  ;;  %v3292_v19 = vld [vmem:[%s4374_s1 + $0x3d4] ss:$8 sps:$4 sm:$0xff]   ;;  %v478_v55 = vld [vmem:[%s3726_s18 + $0x2e0] sm:$0xff] }
  0x9d   : > { %1906 = vmatpush1.bf16.msra.mxu1 %v3239_v20  ;;  %v450_v20 = vld [vmem:[%s3726_s18 + $0x200] sm:$0xff] }
  0x9e   : > { %2212 = vmatpush1.bf16.msra.mxu0 %v3242_v25  ;;  %1907 = vmatprep.subr.bf16.mxu1 %v3247_v26  ;;  %v3290_v25 = vld [vmem:[%s4374_s1 + $0x3d0] ss:$8 sps:$4 sm:$0xff]   ;;  %v3295_v26 = vld [vmem:[%s4374_s1 + $0x1e4] ss:$8 sps:$4 sm:$0xff]  }
  0x9f   : > { %2213 = vmatprep.subr.bf16.mxu0 %v3250_v27  ;;  %1805 = vmatmul.mubr.bf16.gmra.mrb[12].mxu1 %v2675_v28  ;;  %v3298_v27 = vld [vmem:[%s4374_s1 + $0x3e4] ss:$8 sps:$4 sm:$0xff]   ;;  %v2707_v28 = vcombine.low %v442_v4, %v446_v5 }
  0xa0   : > { %2111 = vmatmul.mubr.bf16.gmra.mrb[12].mxu0 %v2679_v29  ;;  %1814 = vmatprep.mubr.bf16.mxu1 %v2684_v30  ;;  %v2711_v29 = vcombine.low %v444_v6, %v448_v7  ;;  %v2716_v30 = vcombine.high %v450_v20, %v454_v21  ;;  %v395_v6 = vld [vmem:[%s3726_s18 + $0x48] sm:$0xff] }
  0xa1   : > { %2120 = vmatprep.mubr.bf16.mxu0 %v2688_v31  ;;  %1908 = vmatpush1.bf16.msra.mxu1 %v3245_v32  ;;  %v2720_v31 = vcombine.high %v452_v22, %v456_v23  ;;  %v3293_v32 = vld [vmem:[%s4374_s1 + $0x1e0] ss:$8 sps:$4 sm:$0xff]  }
  0xa2   : > { %2214 = vmatpush1.bf16.msra.mxu0 %v3248_v33  ;;  %1909 = vmatprep.subr.bf16.mxu1 %v3253_v34  ;;  %v3296_v33 = vld [vmem:[%s4374_s1 + $0x3e0] ss:$8 sps:$4 sm:$0xff]   ;;  %v3301_v34 = vld [vmem:[%s4374_s1 + $0x1f4] ss:$8 sps:$4 sm:$0xff]  }
  0xa3   : > { %2215 = vmatprep.subr.bf16.mxu0 %v3256_v35  ;;  %v3304_v35 = vld [vmem:[%s4374_s1 + $0x3f4] ss:$8 sps:$4 sm:$0xff]   ;;  %v399_v7 = vld [vmem:[%s3726_s18 + $0x68] sm:$0xff] }
  0xa5   : > { %1910 = vmatpush1.bf16.msra.mxu1 %v3251_v40  ;;  %v3299_v40 = vld [vmem:[%s4374_s1 + $0x1f0] ss:$8 sps:$4 sm:$0xff]  }
  0xa6   : > { %2216 = vmatpush1.bf16.msra.mxu0 %v3254_v41  ;;  %1911 = vmatprep.subr.bf16.mxu1 %v3259_v42  ;;  %v3302_v41 = vld [vmem:[%s4374_s1 + $0x3f0] ss:$8 sps:$4 sm:$0xff]   ;;  %v2715_v42 = vcombine.low %v450_v20, %v454_v21 }
  0xa7   : > { %2217 = vmatprep.subr.bf16.mxu0 %v3262_v43  ;;  %1815 = vmatmul.mubr.bf16.gmra.mrb[16].mxu1 %v2683_v44  ;;  %v2719_v43 = vcombine.low %v452_v22, %v456_v23  ;;  %v2724_v44 = vcombine.high %v458_v36, %v462_v37  ;;  %v411_v22 = vld [vmem:[%s3726_s18 + $0xc8] sm:$0xff] }
  0xa8   : > { %2121 = vmatmul.mubr.bf16.gmra.mrb[16].mxu0 %v2687_v45  ;;  %1824 = vmatprep.mubr.bf16.mxu1 %v2692_v46  ;;  %v2728_v45 = vcombine.high %v460_v38, %v464_v39  ;;  %v466_v46 = vld [vmem:[%s3726_s18 + $0x280] sm:$0xff]  ;;  %v415_v23 = vld [vmem:[%s3726_s18 + $0xe8] sm:$0xff] }
  0xa9   : > { %2130 = vmatprep.mubr.bf16.mxu0 %v2696_v47  ;;  %1912 = vmatpush1.bf16.msra.mxu1 %v3257_v48  ;;  %v470_v47 = vld [vmem:[%s3726_s18 + $0x2a0] sm:$0xff]  ;;  %v468_v48 = vld [vmem:[%s3726_s18 + $0x290] sm:$0xff] }
  0xaa   : > { %2218 = vmatpush1.bf16.msra.mxu0 %v3260_v49  ;;  %1913 = vmatprep.subr.bf16.mxu1 %v3265_v50  ;;  %v472_v49 = vld [vmem:[%s3726_s18 + $0x2b0] sm:$0xff]  ;;  %v2723_v50 = vcombine.low %v458_v36, %v462_v37  ;;  %v2732_v52 = vcombine.high %v466_v46, %v470_v47 }
  0xab   : > { %2219 = vmatprep.subr.bf16.mxu0 %v3268_v51  ;;  %v2727_v51 = vcombine.low %v460_v38, %v464_v39  ;;  %v2736_v53 = vcombine.high %v468_v48, %v472_v49  ;;  %v427_v38 = vld [vmem:[%s3726_s18 + $0x148] sm:$0xff] }
  0xac   : > { %v431_v39 = vld [vmem:[%s3726_s18 + $0x168] sm:$0xff] }
  0xad   : > { %1914 = vmatpush1.bf16.msra.mxu1 %v3263_v56  ;;  %v476_v56 = vld [vmem:[%s3726_s18 + $0x2d0] sm:$0xff] }
  0xae   : > { %2220 = vmatpush1.bf16.msra.mxu0 %v3266_v57  ;;  %1915 = vmatprep.subr.bf16.mxu1 %v3271_v58  ;;  %v480_v57 = vld [vmem:[%s3726_s18 + $0x2f0] sm:$0xff]  ;;  %v2731_v58 = vcombine.low %v466_v46, %v470_v47  ;;  %v435_v46 = vld [vmem:[%s3726_s18 + $0x188] sm:$0xff] }
  0xaf   : > { %2221 = vmatprep.subr.bf16.mxu0 %v3274_v59  ;;  %1825 = vmatmul.mubr.bf16.gmra.mrb[20].mxu1 %v2691_v60  ;;  %v2735_v59 = vcombine.low %v468_v48, %v472_v49  ;;  %v2740_v60 = vcombine.high %v474_v54, %v478_v55  ;;  %v439_v47 = vld [vmem:[%s3726_s18 + $0x1a8] sm:$0xff]  ;;  %v437_v48 = vld [vmem:[%s3726_s18 + $0x198] sm:$0xff] }
  0xb0   : > { %2131 = vmatmul.mubr.bf16.gmra.mrb[20].mxu0 %v2695_v61  ;;  %1834 = vmatprep.mubr.bf16.mxu1 %v2700_v62  ;;  %v2744_v61 = vcombine.high %v476_v56, %v480_v57  ;;  %v387_v62 = vld [vmem:[%s3726_s18 + $0x8] sm:$0xff]  ;;  %v441_v49 = vld [vmem:[%s3726_s18 + $0x1b8] sm:$0xff] }
  0xb1   : > { %2140 = vmatprep.mubr.bf16.mxu0 %v2704_v63  ;;  %1916 = vmatpush1.bf16.msra.mxu1 %v3269_v0  ;;  %v391_v63 = vld [vmem:[%s3726_s18 + $0x28] sm:$0xff]  ;;  %v389_v0 = vld [vmem:[%s3726_s18 + $0x18] sm:$0xff] }
  0xb2   : > { %2222 = vmatpush1.bf16.msra.mxu0 %v3272_v1  ;;  %1917 = vmatprep.subr.bf16.mxu1 %v3277_v2  ;;  %v393_v1 = vld [vmem:[%s3726_s18 + $0x38] sm:$0xff]  ;;  %v2739_v2 = vcombine.low %v474_v54, %v478_v55  ;;  %v2654_v4 = vcombine.high %v387_v62, %v391_v63  ;;  %v443_v54 = vld [vmem:[%s3726_s18 + $0x1c8] sm:$0xff] }
  0xb3   : > { %2223 = vmatprep.subr.bf16.mxu0 %v3280_v3  ;;  %v2743_v3 = vcombine.low %v476_v56, %v480_v57  ;;  %v2658_v5 = vcombine.high %v389_v0, %v393_v1  ;;  %v447_v55 = vld [vmem:[%s3726_s18 + $0x1e8] sm:$0xff]  ;;  %v445_v56 = vld [vmem:[%s3726_s18 + $0x1d8] sm:$0xff] }
  0xb4   : > { %v449_v57 = vld [vmem:[%s3726_s18 + $0x1f8] sm:$0xff] }
  0xb5   : > { %1918 = vmatpush1.bf16.msra.mxu1 %v3275_v8  ;;  %v397_v8 = vld [vmem:[%s3726_s18 + $0x58] sm:$0xff] }
  0xb6   : > { %2224 = vmatpush1.bf16.msra.mxu0 %v3278_v9  ;;  %1919 = vmatprep.subr.bf16.mxu1 %v3283_v10  ;;  %v401_v9 = vld [vmem:[%s3726_s18 + $0x78] sm:$0xff]  ;;  %v2653_v10 = vcombine.low %v387_v62, %v391_v63  ;;  %v451_v62 = vld [vmem:[%s3726_s18 + $0x208] sm:$0xff] }
  0xb7   : > { %2225 = vmatprep.subr.bf16.mxu0 %v3286_v11  ;;  %1835 = vmatmul.mubr.bf16.gmra.mrb[24].mxu1 %v2699_v12  ;;  %v2657_v11 = vcombine.low %v389_v0, %v393_v1  ;;  %v2662_v12 = vcombine.high %v395_v6, %v399_v7  ;;  %v455_v63 = vld [vmem:[%s3726_s18 + $0x228] sm:$0xff]  ;;  %v453_v0 = vld [vmem:[%s3726_s18 + $0x218] sm:$0xff] }
  0xb8   : > { %2141 = vmatmul.mubr.bf16.gmra.mrb[24].mxu0 %v2703_v13  ;;  %1844 = vmatprep.mubr.bf16.mxu1 %v2708_v14  ;;  %v2666_v13 = vcombine.high %v397_v8, %v401_v9  ;;  %v403_v14 = vld [vmem:[%s3726_s18 + $0x88] sm:$0xff]  ;;  %v457_v1 = vld [vmem:[%s3726_s18 + $0x238] sm:$0xff] }
  0xb9   : > { %2150 = vmatprep.mubr.bf16.mxu0 %v2712_v15  ;;  %1920 = vmatpush1.bf16.msra.mxu1 %v3281_v16  ;;  %v407_v15 = vld [vmem:[%s3726_s18 + $0xa8] sm:$0xff]  ;;  %v405_v16 = vld [vmem:[%s3726_s18 + $0x98] sm:$0xff] }
  0xba   : > { %2226 = vmatpush1.bf16.msra.mxu0 %v3284_v17  ;;  %1921 = vmatprep.subr.bf16.mxu1 %v3289_v18  ;;  %v409_v17 = vld [vmem:[%s3726_s18 + $0xb8] sm:$0xff]  ;;  %v2661_v18 = vcombine.low %v395_v6, %v399_v7  ;;  %v2670_v20 = vcombine.high %v403_v14, %v407_v15  ;;  %v459_v6 = vld [vmem:[%s3726_s18 + $0x248] sm:$0xff] }
  0xbb   : > { %2227 = vmatprep.subr.bf16.mxu0 %v3292_v19  ;;  %v2665_v19 = vcombine.low %v397_v8, %v401_v9  ;;  %v2674_v21 = vcombine.high %v405_v16, %v409_v17  ;;  %v463_v7 = vld [vmem:[%s3726_s18 + $0x268] sm:$0xff]  ;;  %v461_v8 = vld [vmem:[%s3726_s18 + $0x258] sm:$0xff] }
  0xbc   : > { %v465_v9 = vld [vmem:[%s3726_s18 + $0x278] sm:$0xff] }
  0xbd   : > { %1922 = vmatpush1.bf16.msra.mxu1 %v3287_v24  ;;  %v413_v24 = vld [vmem:[%s3726_s18 + $0xd8] sm:$0xff] }
  0xbe   : > { %2228 = vmatpush1.bf16.msra.mxu0 %v3290_v25  ;;  %1923 = vmatprep.subr.bf16.mxu1 %v3295_v26  ;;  %v417_v25 = vld [vmem:[%s3726_s18 + $0xf8] sm:$0xff]  ;;  %v2669_v26 = vcombine.low %v403_v14, %v407_v15  ;;  %v467_v14 = vld [vmem:[%s3726_s18 + $0x288] sm:$0xff] }
  0xbf   : > { %2229 = vmatprep.subr.bf16.mxu0 %v3298_v27  ;;  %1845 = vmatmul.mubr.bf16.gmra.mrb[28].mxu1 %v2707_v28  ;;  %v2673_v27 = vcombine.low %v405_v16, %v409_v17  ;;  %v2678_v28 = vcombine.high %v411_v22, %v415_v23  ;;  %v471_v15 = vld [vmem:[%s3726_s18 + $0x2a8] sm:$0xff]  ;;  %v469_v16 = vld [vmem:[%s3726_s18 + $0x298] sm:$0xff] }
  0xc0   : > { %2151 = vmatmul.mubr.bf16.gmra.mrb[28].mxu0 %v2711_v29  ;;  %1854 = vmatprep.mubr.bf16.mxu1 %v2716_v30  ;;  %v2682_v29 = vcombine.high %v413_v24, %v417_v25  ;;  %v419_v30 = vld [vmem:[%s3726_s18 + $0x108] sm:$0xff]  ;;  %v473_v17 = vld [vmem:[%s3726_s18 + $0x2b8] sm:$0xff] }
  0xc1   : > { %2160 = vmatprep.mubr.bf16.mxu0 %v2720_v31  ;;  %1924 = vmatpush1.bf16.msra.mxu1 %v3293_v32  ;;  %v423_v31 = vld [vmem:[%s3726_s18 + $0x128] sm:$0xff]  ;;  %v421_v32 = vld [vmem:[%s3726_s18 + $0x118] sm:$0xff] }
  0xc2   : > { %2230 = vmatpush1.bf16.msra.mxu0 %v3296_v33  ;;  %1925 = vmatprep.subr.bf16.mxu1 %v3301_v34  ;;  %v425_v33 = vld [vmem:[%s3726_s18 + $0x138] sm:$0xff]  ;;  %v2677_v34 = vcombine.low %v411_v22, %v415_v23  ;;  %v2686_v36 = vcombine.high %v419_v30, %v423_v31  ;;  %v475_v22 = vld [vmem:[%s3726_s18 + $0x2c8] sm:$0xff] }
  0xc3   : > { %2231 = vmatprep.subr.bf16.mxu0 %v3304_v35  ;;  %v2681_v35 = vcombine.low %v413_v24, %v417_v25  ;;  %v2690_v37 = vcombine.high %v421_v32, %v425_v33  ;;  %v479_v23 = vld [vmem:[%s3726_s18 + $0x2e8] sm:$0xff]  ;;  %v477_v24 = vld [vmem:[%s3726_s18 + $0x2d8] sm:$0xff] }
  0xc4   : > { %v481_v25 = vld [vmem:[%s3726_s18 + $0x2f8] sm:$0xff] }
  0xc5   : > { %1926 = vmatpush1.bf16.msra.mxu1 %v3299_v40  ;;  %v429_v40 = vld [vmem:[%s3726_s18 + $0x158] sm:$0xff] }
  0xc6   : > { %2232 = vmatpush1.bf16.msra.mxu0 %v3302_v41  ;;  %v433_v41 = vld [vmem:[%s3726_s18 + $0x178] sm:$0xff] }
  0xc7   : > { %1855 = vmatmul.mubr.bf16.gmra.mrb[32].mxu1 %v2715_v42  ;;  %v2685_v42 = vcombine.low %v419_v30, %v423_v31  ;;  %v2741_v30 = vcombine.low %v475_v22, %v479_v23  ;;  %v2745_v31 = vcombine.low %v477_v24, %v481_v25 }
  0xc8   : > { %2161 = vmatmul.mubr.bf16.gmra.mrb[32].mxu0 %v2719_v43  ;;  %1864 = vmatprep.mubr.bf16.mxu1 %v2724_v44  ;;  %v2689_v43 = vcombine.low %v421_v32, %v425_v33  ;;  %v2694_v44 = vcombine.high %v427_v38, %v431_v39  ;;  %v612_v32 = vlaneseq }
  0xc9   : > { %2170 = vmatprep.mubr.bf16.mxu0 %v2728_v45  ;;  %v2698_v45 = vcombine.high %v429_v40, %v433_v41 }
  0xca   : > { %v613_v33 = vshrl.u32 %v612_v32, 7 }
  0xcf   : > { %1865 = vmatmul.mubr.bf16.gmra.mrb[36].mxu1 %v2723_v50  ;;  %v2693_v50 = vcombine.low %v427_v38, %v431_v39 }
  0xd0   : > { %2171 = vmatmul.mubr.bf16.gmra.mrb[36].mxu0 %v2727_v51  ;;  %1874 = vmatprep.mubr.bf16.mxu1 %v2732_v52  ;;  %v2697_v51 = vcombine.low %v429_v40, %v433_v41  ;;  %v2702_v52 = vcombine.high %v435_v46, %v439_v47 }
  0xd1   : > { %2180 = vmatprep.mubr.bf16.mxu0 %v2736_v53  ;;  %v2706_v53 = vcombine.high %v437_v48, %v441_v49 }
  0xd7   : > { %1875 = vmatmul.mubr.bf16.gmra.mrb[40].mxu1 %v2731_v58  ;;  %v2701_v58 = vcombine.low %v435_v46, %v439_v47 }
  0xd8   : > { %2181 = vmatmul.mubr.bf16.gmra.mrb[40].mxu0 %v2735_v59  ;;  %1884 = vmatprep.mubr.bf16.mxu1 %v2740_v60  ;;  %v2705_v59 = vcombine.low %v437_v48, %v441_v49  ;;  %v2710_v60 = vcombine.high %v443_v54, %v447_v55 }
  0xd9   : > { %2190 = vmatprep.mubr.bf16.mxu0 %v2744_v61  ;;  %v2714_v61 = vcombine.high %v445_v56, %v449_v57 }
  0xdf   : > { %1885 = vmatmul.mubr.bf16.gmra.mrb[44].mxu1 %v2739_v2  ;;  %v2709_v2 = vcombine.low %v443_v54, %v447_v55 }
  0xe0   : > { %2191 = vmatmul.mubr.bf16.gmra.mrb[44].mxu0 %v2743_v3  ;;  %1927 = vmatprep.mubr.bf16.mxu1 %v2654_v4  ;;  %v2713_v3 = vcombine.low %v445_v56, %v449_v57  ;;  %v2718_v4 = vcombine.high %v451_v62, %v455_v63 }
  0xe1   : > { %2233 = vmatprep.mubr.bf16.mxu0 %v2658_v5  ;;  %v2722_v5 = vcombine.high %v453_v0, %v457_v1 }
  0xe7   : > { %1928 = vmatmul.mubr.bf16.vlgmr.msra.gmra.mrb[0].mxu1 %v2653_v10  ;;  %v2717_v10 = vcombine.low %v451_v62, %v455_v63 }
  0xe8   : > { %2234 = vmatmul.mubr.bf16.vlgmr.msra.gmra.mrb[0].mxu0 %v2657_v11  ;;  %1937 = vmatprep.mubr.bf16.mxu1 %v2662_v12  ;;  %v2721_v11 = vcombine.low %v453_v0, %v457_v1  ;;  %v2726_v12 = vcombine.high %v459_v6, %v463_v7 }
  0xe9   : > { %2243 = vmatprep.mubr.bf16.mxu0 %v2666_v13  ;;  %v2730_v13 = vcombine.high %v461_v8, %v465_v9 }
  0xef   : > { %1938 = vmatmul.mubr.bf16.gmra.mrb[4].mxu1 %v2661_v18  ;;  %v2725_v18 = vcombine.low %v459_v6, %v463_v7 }
  0xf0   : > { %2244 = vmatmul.mubr.bf16.gmra.mrb[4].mxu0 %v2665_v19  ;;  %1947 = vmatprep.mubr.bf16.mxu1 %v2670_v20  ;;  %v2729_v19 = vcombine.low %v461_v8, %v465_v9  ;;  %v2734_v20 = vcombine.high %v467_v14, %v471_v15 }
  0xf1   : > { %2253 = vmatprep.mubr.bf16.mxu0 %v2674_v21  ;;  %v2738_v21 = vcombine.high %v469_v16, %v473_v17 }
  0xf7   : > { %1948 = vmatmul.mubr.bf16.gmra.mrb[8].mxu1 %v2669_v26  ;;  %v2733_v26 = vcombine.low %v467_v14, %v471_v15 }
  0xf8   : > { %2254 = vmatmul.mubr.bf16.gmra.mrb[8].mxu0 %v2673_v27  ;;  %1957 = vmatprep.mubr.bf16.mxu1 %v2678_v28  ;;  %v2737_v27 = vcombine.low %v469_v16, %v473_v17  ;;  %v2742_v28 = vcombine.high %v475_v22, %v479_v23 }
  0xf9   : > { %2263 = vmatprep.mubr.bf16.mxu0 %v2682_v29  ;;  %v2746_v29 = vcombine.high %v477_v24, %v481_v25 }
  0xff   : > { %1958 = vmatmul.mubr.bf16.gmra.mrb[12].mxu1 %v2677_v34  ;;  %v4064_v34 = vsub.s32 0, %v613_v33 }
 0x100   : > { %2264 = vmatmul.mubr.bf16.gmra.mrb[12].mxu0 %v2681_v35  ;;  %1967 = vmatprep.mubr.bf16.mxu1 %v2686_v36  ;;  %v610_v35 = vld [vmem:[%s4375_s2] ss:$8 sm:$0x3]  ;;  %v4069_v36 = vsub.s32 1, %v613_v33 }
 0x101   : > { %2273 = vmatprep.mubr.bf16.mxu0 %v2690_v37  ;;  %v4072_v37 = vrot.slane %v610_v35, %v4064_v34 }
 0x102   : > { %v4075_v38 = vrot.slane %v610_v35, %v4069_v36 }
 0x107   : > { %1968 = vmatmul.mubr.bf16.gmra.mrb[16].mxu1 %v2685_v42 }
 0x108   : > { %2274 = vmatmul.mubr.bf16.gmra.mrb[16].mxu0 %v2689_v43  ;;  %1977 = vmatprep.mubr.bf16.mxu1 %v2694_v44 }
 0x109   : > { %2283 = vmatprep.mubr.bf16.mxu0 %v2698_v45 }
 0x10f   : > { %1978 = vmatmul.mubr.bf16.gmra.mrb[20].mxu1 %v2693_v50 }
 0x110   : > { %2284 = vmatmul.mubr.bf16.gmra.mrb[20].mxu0 %v2697_v51  ;;  %1987 = vmatprep.mubr.bf16.mxu1 %v2702_v52 }
 0x111   : > { %2293 = vmatprep.mubr.bf16.mxu0 %v2706_v53 }
 0x117   : > { %1988 = vmatmul.mubr.bf16.gmra.mrb[24].mxu1 %v2701_v58 }
 0x118   : > { %2294 = vmatmul.mubr.bf16.gmra.mrb[24].mxu0 %v2705_v59  ;;  %1997 = vmatprep.mubr.bf16.mxu1 %v2710_v60 }
 0x119   : > { %2303 = vmatprep.mubr.bf16.mxu0 %v2714_v61 }
 0x11f   : > { %1998 = vmatmul.mubr.bf16.gmra.mrb[28].mxu1 %v2709_v2 }
 0x120   : > { %2304 = vmatmul.mubr.bf16.gmra.mrb[28].mxu0 %v2713_v3  ;;  %2007 = vmatprep.mubr.bf16.mxu1 %v2718_v4 }
 0x121   : > { %2313 = vmatprep.mubr.bf16.mxu0 %v2722_v5 }
 0x127   : > { %2008 = vmatmul.mubr.bf16.gmra.mrb[32].mxu1 %v2717_v10 }
 0x128   : > { %2314 = vmatmul.mubr.bf16.gmra.mrb[32].mxu0 %v2721_v11  ;;  %2017 = vmatprep.mubr.bf16.mxu1 %v2726_v12 }
 0x129   : > { %2323 = vmatprep.mubr.bf16.mxu0 %v2730_v13 }
 0x12f   : > { %2018 = vmatmul.mubr.bf16.gmra.mrb[36].mxu1 %v2725_v18 }
 0x130   : > { %2324 = vmatmul.mubr.bf16.gmra.mrb[36].mxu0 %v2729_v19  ;;  %2027 = vmatprep.mubr.bf16.mxu1 %v2734_v20 }
 0x131   : > { %2333 = vmatprep.mubr.bf16.mxu0 %v2738_v21 }
 0x137   : > { %2028 = vmatmul.mubr.bf16.gmra.mrb[40].mxu1 %v2733_v26 }
 0x138   : > { %2334 = vmatmul.mubr.bf16.gmra.mrb[40].mxu0 %v2737_v27  ;;  %2037 = vmatprep.mubr.bf16.mxu1 %v2742_v28 }
 0x139   : > { %2343 = vmatprep.mubr.bf16.mxu0 %v2746_v29 }
 0x13f   : > { %2038 = vmatmul.mubr.bf16.gmra.mrb[44].mxu1 %v2741_v30 }
 0x140   : > { %2344 = vmatmul.mubr.bf16.gmra.mrb[44].mxu0 %v2745_v31 }
 0x1ba   : > { %v1929_v39 = vpop.f32.mrb[0].mxu1 }
 0x1bb   : > { %v2235_v40 = vpop.f32.mrb[0].mxu0  ;;  %v2895_v41 = vadd.f32 %v1929_v39, %v4072_v37  ;;  %v1931_v42 = vpop.f32.mrb[1].mxu1 }
 0x1bc   : > { %v2237_v43 = vpop.f32.mrb[1].mxu0  ;;  %v2897_v44 = vadd.f32 %v1931_v42, %v4075_v38  ;;  %v1933_v45 = vpop.f32.mrb[2].mxu1 }
 0x1bd   : > { %v2239_v46 = vpop.f32.mrb[2].mxu0  ;;  %v4079_v47 = vadd.f32 %v2895_v41, %v2235_v40  ;;  %v2899_v48 = vadd.f32 %v1933_v45, %v4072_v37  ;;  %v1935_v49 = vpop.f32.mrb[3].mxu1 }
 0x1be   : > { %v2241_v50 = vpop.f32.mrb[3].mxu0  ;;  %v4082_v51 = vadd.f32 %v2897_v44, %v2237_v43  ;;  %v2901_v52 = vadd.f32 %v1935_v49, %v4075_v38 }
 0x1bf   : > { %v4085_v53 = vadd.f32 %v2899_v48, %v2239_v46  ;;  %v2354_v31 = vmul.f32 0.01, %v4079_v47 }
 0x1c0   : > { %v4087_v54 = vadd.f32 %v2901_v52, %v2241_v50  ;;  %v2355_v40 = vmul.f32 0.01, %v4082_v51 }
 0x1c1   : > { %v2356_v43 = vmul.f32 0.01, %v4085_v53  ;;  %v2402_v50 = vmax.f32 %v4079_v47, %v2354_v31 }
 0x1c2   : > { %v1939_v55 = vpop.f32.mrb[4].mxu1  ;;  %v2357_v46 = vmul.f32 0.01, %v4087_v54 }
 0x1c3   : > { %v2245_v56 = vpop.f32.mrb[4].mxu0  ;;  %v2903_v57 = vadd.f32 %v1939_v55, %v4072_v37  ;;  %v1941_v58 = vpop.f32.mrb[5].mxu1 }
 0x1c4   : > { %v2247_v59 = vpop.f32.mrb[5].mxu0  ;;  %v2905_v60 = vadd.f32 %v1941_v58, %v4075_v38  ;;  %v1943_v61 = vpop.f32.mrb[6].mxu1 }
 0x1c5   : > { %v2249_v62 = vpop.f32.mrb[6].mxu0  ;;  %v4091_v63 = vadd.f32 %v2903_v57, %v2245_v56  ;;  %v2907_v0 = vadd.f32 %v1943_v61, %v4072_v37  ;;  %v1945_v1 = vpop.f32.mrb[7].mxu1  ;;  %v2403_v56 = vmax.f32 %v4082_v51, %v2355_v40  ;;  %v2404_v61 = vmax.f32 %v4085_v53, %v2356_v43 }
 0x1c6   : > { %v2251_v2 = vpop.f32.mrb[7].mxu0  ;;  %v4094_v3 = vadd.f32 %v2905_v60, %v2247_v59  ;;  %v2909_v4 = vadd.f32 %v1945_v1, %v4075_v38 }
 0x1c7   : > { %v4097_v5 = vadd.f32 %v2907_v0, %v2249_v62 }
 0x1c8   : > { %v4099_v6 = vadd.f32 %v2909_v4, %v2251_v2 }
 0x1ca   : > { %v1949_v7 = vpop.f32.mrb[8].mxu1 }
 0x1cb   : > { %v2255_v8 = vpop.f32.mrb[8].mxu0  ;;  %v2911_v9 = vadd.f32 %v1949_v7, %v4072_v37  ;;  %v1951_v10 = vpop.f32.mrb[9].mxu1  ;;  %v2405_v7 = vmax.f32 %v4087_v54, %v2357_v46 }
 0x1cc   : > { %v2257_v11 = vpop.f32.mrb[9].mxu0  ;;  %v2913_v12 = vadd.f32 %v1951_v10, %v4075_v38  ;;  %v1953_v13 = vpop.f32.mrb[10].mxu1 }
 0x1cd   : > { %v2259_v14 = vpop.f32.mrb[10].mxu0  ;;  %v4103_v15 = vadd.f32 %v2911_v9, %v2255_v8  ;;  %v2915_v16 = vadd.f32 %v1953_v13, %v4072_v37  ;;  %v1955_v17 = vpop.f32.mrb[11].mxu1 }
 0x1ce   : > { %v2261_v18 = vpop.f32.mrb[11].mxu0  ;;  %v4106_v19 = vadd.f32 %v2913_v12, %v2257_v11  ;;  %v2917_v20 = vadd.f32 %v1955_v17, %v4075_v38  ;;  %v2358_v11 = vmul.f32 0.01, %v4091_v63  ;;  %v2359_v17 = vmul.f32 0.01, %v4094_v3 }
 0x1cf   : > { %v4109_v21 = vadd.f32 %v2915_v16, %v2259_v14 }
 0x1d0   : > { %v4111_v22 = vadd.f32 %v2917_v20, %v2261_v18 }
 0x1d2   : > { %v1959_v23 = vpop.f32.mrb[12].mxu1 }
 0x1d3   : > { %v2265_v24 = vpop.f32.mrb[12].mxu0  ;;  %v2919_v25 = vadd.f32 %v1959_v23, %v4072_v37  ;;  %v1961_v26 = vpop.f32.mrb[13].mxu1  ;;  %v2360_v23 = vmul.f32 0.01, %v4097_v5 }
 0x1d4   : > { %v2267_v27 = vpop.f32.mrb[13].mxu0  ;;  %v2921_v28 = vadd.f32 %v1961_v26, %v4075_v38  ;;  %v1963_v29 = vpop.f32.mrb[14].mxu1  ;;  %v2361_v26 = vmul.f32 0.01, %v4099_v6 }
 0x1d5   : > { %v2269_v30 = vpop.f32.mrb[14].mxu0  ;;  %v2920_v32 = vadd.f32 %v2919_v25, %v2265_v24  ;;  %v2923_v33 = vadd.f32 %v1963_v29, %v4072_v37  ;;  %v1965_v35 = vpop.f32.mrb[15].mxu1  ;;  %v2406_v29 = vmax.f32 %v4091_v63, %v2358_v11 }
 0x1d6   : > { %v2271_v39 = vpop.f32.mrb[15].mxu0  ;;  %v2922_v41 = vadd.f32 %v2921_v28, %v2267_v27  ;;  %v2925_v42 = vadd.f32 %v1965_v35, %v4075_v38 }
 0x1d7   : > { %v2366_v44 = vmul.f32 0.01, %v2920_v32  ;;  %v2924_v45 = vadd.f32 %v2923_v33, %v2269_v30 }
 0x1d8   : > { %v2367_v48 = vmul.f32 0.01, %v2922_v41  ;;  %v2926_v49 = vadd.f32 %v2925_v42, %v2271_v39 }
 0x1d9   : > { %v2414_v52 = vmax.f32 %v2920_v32, %v2366_v44  ;;  %v2368_v55 = vmul.f32 0.01, %v2924_v45  ;;  %v2407_v32 = vmax.f32 %v4094_v3, %v2359_v17 }
 0x1da   : > { %v2415_v57 = vmax.f32 %v2922_v41, %v2367_v48  ;;  %v2369_v58 = vmul.f32 0.01, %v2926_v49  ;;  %v1969_v59 = vpop.f32.mrb[16].mxu1  ;;  %v2408_v41 = vmax.f32 %v4097_v5, %v2360_v23  ;;  %v2409_v48 = vmax.f32 %v4099_v6, %v2361_v26 }
 0x1db   : > { %v2275_v60 = vpop.f32.mrb[16].mxu0  ;;  %v4124_v62 = vmax.f32 %v2402_v50, %v2414_v52  ;;  %v2416_v0 = vmax.f32 %v2924_v45, %v2368_v55  ;;  %v2927_v1 = vadd.f32 %v1969_v59, %v4072_v37  ;;  %v1971_v2 = vpop.f32.mrb[17].mxu1  ;;  %v2362_v55 = vmul.f32 0.01, %v4103_v15 }
 0x1dc   : > { %v2277_v4 = vpop.f32.mrb[17].mxu0  ;;  %v4128_v47 = vmax.f32 %v2403_v56, %v2415_v57  ;;  %v2417_v8 = vmax.f32 %v2926_v49, %v2369_v58  ;;  %v2929_v51 = vadd.f32 %v1971_v2, %v4075_v38  ;;  %v1973_v9 = vpop.f32.mrb[18].mxu1 }
 0x1dd   : > { %v2279_v10 = vpop.f32.mrb[18].mxu0  ;;  %v4132_v12 = vmax.f32 %v2404_v61, %v2416_v0  ;;  %v2928_v53 = vadd.f32 %v2927_v1, %v2275_v60  ;;  %v2931_v13 = vadd.f32 %v1973_v9, %v4072_v37  ;;  %v1975_v14 = vpop.f32.mrb[19].mxu1  ;;  %v2363_v60 = vmul.f32 0.01, %v4106_v19 }
 0x1de   : > { %v2281_v16 = vpop.f32.mrb[19].mxu0  ;;  %v4136_v18 = vmax.f32 %v2405_v7, %v2417_v8  ;;  %v2930_v54 = vadd.f32 %v2929_v51, %v2277_v4  ;;  %v2933_v20 = vadd.f32 %v1975_v14, %v4075_v38  ;;  %v2364_v1 = vmul.f32 0.01, %v4109_v21 }
 0x1df   : > { %v2370_v24 = vmul.f32 0.01, %v2928_v53  ;;  %v2932_v25 = vadd.f32 %v2931_v13, %v2279_v10  ;;  %v2365_v7 = vmul.f32 0.01, %v4111_v22  ;;  %v2410_v9 = vmax.f32 %v4103_v15, %v2362_v55 }
 0x1e0   : > { %v2371_v27 = vmul.f32 0.01, %v2930_v54  ;;  %v2934_v28 = vadd.f32 %v2933_v20, %v2281_v16 }
 0x1e1   : > { %v2418_v30 = vmax.f32 %v2928_v53, %v2370_v24  ;;  %v2372_v31 = vmul.f32 0.01, %v2932_v25  ;;  %v2411_v53 = vmax.f32 %v4106_v19, %v2363_v60 }
 0x1e2   : > { %v2419_v33 = vmax.f32 %v2930_v54, %v2371_v27  ;;  %v2373_v35 = vmul.f32 0.01, %v2934_v28  ;;  %v1979_v39 = vpop.f32.mrb[20].mxu1  ;;  %v2412_v54 = vmax.f32 %v4109_v21, %v2364_v1  ;;  %v2413_v27 = vmax.f32 %v4111_v22, %v2365_v7 }
 0x1e3   : > { %v2285_v40 = vpop.f32.mrb[20].mxu0  ;;  %v4144_v42 = vmax.f32 %v2406_v29, %v2418_v30  ;;  %v2420_v43 = vmax.f32 %v2932_v25, %v2372_v31  ;;  %v2935_v44 = vadd.f32 %v1979_v39, %v4072_v37  ;;  %v1981_v45 = vpop.f32.mrb[21].mxu1 }
 0x1e4   : > { %v2287_v46 = vpop.f32.mrb[21].mxu0  ;;  %v4148_v63 = vmax.f32 %v2407_v32, %v2419_v33  ;;  %v2421_v49 = vmax.f32 %v2934_v28, %v2373_v35  ;;  %v2937_v3 = vadd.f32 %v1981_v45, %v4075_v38  ;;  %v1983_v50 = vpop.f32.mrb[22].mxu1 }
 0x1e5   : > { %v2289_v52 = vpop.f32.mrb[22].mxu0  ;;  %v4152_v56 = vmax.f32 %v2408_v41, %v2420_v43  ;;  %v2936_v5 = vadd.f32 %v2935_v44, %v2285_v40  ;;  %v2939_v57 = vadd.f32 %v1983_v50, %v4072_v37  ;;  %v1985_v58 = vpop.f32.mrb[23].mxu1 }
 0x1e6   : > { %v2291_v59 = vpop.f32.mrb[23].mxu0  ;;  %v4156_v61 = vmax.f32 %v2409_v48, %v2421_v49  ;;  %v2938_v6 = vadd.f32 %v2937_v3, %v2287_v46  ;;  %v2941_v0 = vadd.f32 %v1985_v58, %v4075_v38 }
 0x1e7   : > { %v2374_v2 = vmul.f32 0.01, %v2936_v5  ;;  %v2940_v4 = vadd.f32 %v2939_v57, %v2289_v52 }
 0x1e8   : > { %v2375_v8 = vmul.f32 0.01, %v2938_v6  ;;  %v2942_v51 = vadd.f32 %v2941_v0, %v2291_v59 }
 0x1e9   : > { %v2422_v10 = vmax.f32 %v2936_v5, %v2374_v2  ;;  %v2376_v11 = vmul.f32 0.01, %v2940_v4 }
 0x1ea   : > { %v2423_v13 = vmax.f32 %v2938_v6, %v2375_v8  ;;  %v2377_v14 = vmul.f32 0.01, %v2942_v51  ;;  %v1989_v16 = vpop.f32.mrb[24].mxu1 }
 0x1eb   : > { %v2295_v17 = vpop.f32.mrb[24].mxu0  ;;  %v4164_v20 = vmax.f32 %v2410_v9, %v2422_v10  ;;  %v2424_v23 = vmax.f32 %v2940_v4, %v2376_v11  ;;  %v2943_v24 = vadd.f32 %v1989_v16, %v4072_v37  ;;  %v1991_v25 = vpop.f32.mrb[25].mxu1 }
 0x1ec   : > { %v2297_v26 = vpop.f32.mrb[25].mxu0  ;;  %v4168_v15 = vmax.f32 %v2411_v53, %v2423_v13  ;;  %v2425_v28 = vmax.f32 %v2942_v51, %v2377_v14  ;;  %v2945_v19 = vadd.f32 %v1991_v25, %v4075_v38  ;;  %v1993_v29 = vpop.f32.mrb[26].mxu1  ;;  %v2876_v25 = vld [vmem:[%s4375_s2 + $0x2] ss:$8 sm:$0x3] }
 0x1ed   : > { %v2299_v30 = vpop.f32.mrb[26].mxu0  ;;  %v4171_v31 = vmax.f32 %v2412_v54, %v2424_v23  ;;  %v4173_v32 = vadd.f32 %v2943_v24, %v2295_v17  ;;  %v2947_v21 = vadd.f32 %v1993_v29, %v4072_v37  ;;  %v1995_v33 = vpop.f32.mrb[27].mxu1  ;;  %v2875_v54 = vld [vmem:[%s4375_s2 + $0x1] ss:$8 sm:$0x3] }
 0x1ee   : > { %v2301_v35 = vpop.f32.mrb[27].mxu0  ;;  %v4176_v39 = vmax.f32 %v2413_v27, %v2425_v28  ;;  %v4178_v40 = vadd.f32 %v2945_v19, %v2297_v26  ;;  %v2949_v22 = vadd.f32 %v1995_v33, %v4075_v38  ;;  %v4227_v33 = vrot.slane %v2875_v54, %v4069_v36 }
 0x1ef   : > { %v4181_v41 = vadd.f32 %v2947_v21, %v2299_v30  ;;  %v2378_v23 = vmul.f32 0.01, %v4173_v32  ;;  %v4221_v30 = vrot.slane %v2875_v54, %v4064_v34  ;;  %v4224_v21 = vrot.slane %v2876_v25, %v4064_v34 }
 0x1f0   : > { %v4183_v43 = vadd.f32 %v2949_v22, %v2301_v35  ;;  %v2379_v26 = vmul.f32 0.01, %v4178_v40 }
 0x1f1   : > { %v4218_v28 = vmul.f32 0.01, %v4181_v41  ;;  %v2426_v35 = vmax.f32 %v4173_v32, %v2378_v23 }
 0x1f2   : > { %v1999_v44 = vpop.f32.mrb[28].mxu1  ;;  %v2381_v22 = vmul.f32 0.01, %v4183_v43  ;;  %v2427_v34 = vmax.f32 %v4178_v40, %v2379_v26 }
 0x1f3   : > { %v2305_v45 = vpop.f32.mrb[28].mxu0  ;;  %v2951_v46 = vadd.f32 %v1999_v44, %v4072_v37  ;;  %v2001_v48 = vpop.f32.mrb[29].mxu1 }
 0x1f4   : > { %v2307_v49 = vpop.f32.mrb[29].mxu0  ;;  %v2953_v3 = vadd.f32 %v2001_v48, %v4075_v38  ;;  %v2003_v50 = vpop.f32.mrb[30].mxu1  ;;  %v4237_v48 = vrot.slane %v2876_v25, %v4069_v36 }
 0x1f5   : > { %v2309_v52 = vpop.f32.mrb[30].mxu0  ;;  %v4187_v55 = vadd.f32 %v2951_v46, %v2305_v45  ;;  %v2955_v5 = vadd.f32 %v2003_v50, %v4072_v37  ;;  %v2005_v57 = vpop.f32.mrb[31].mxu1 }
 0x1f6   : > { %v2311_v58 = vpop.f32.mrb[31].mxu0  ;;  %v4190_v59 = vadd.f32 %v2953_v3, %v2307_v49  ;;  %v2957_v60 = vadd.f32 %v2005_v57, %v4075_v38 }
 0x1f7   : > { %v4193_v6 = vadd.f32 %v2955_v5, %v2309_v52  ;;  %v4241_v49 = vmul.f32 0.01, %v4187_v55 }
 0x1f8   : > { %v4195_v0 = vadd.f32 %v2957_v60, %v2311_v58  ;;  %v4244_v3 = vmul.f32 0.01, %v4190_v59 }
 0x1f9   : > { %v4248_v5 = vmul.f32 0.01, %v4193_v6 }
 0x1fa   : > { %v2009_v1 = vpop.f32.mrb[32].mxu1  ;;  %v4251_v57 = vmul.f32 0.01, %v4195_v0 }
 0x1fb   : > { %v2315_v2 = vpop.f32.mrb[32].mxu0  ;;  %v2959_v4 = vadd.f32 %v2009_v1, %v4072_v37  ;;  %v2011_v7 = vpop.f32.mrb[33].mxu1  ;;  %v2428_v1 = vmax.f32 %v4181_v41, %v4218_v28 }
 0x1fc   : > { %v2317_v8 = vpop.f32.mrb[33].mxu0  ;;  %v2961_v51 = vadd.f32 %v2011_v7, %v4075_v38  ;;  %v2013_v9 = vpop.f32.mrb[34].mxu1 }
 0x1fd   : > { %v2319_v10 = vpop.f32.mrb[34].mxu0  ;;  %v4199_v11 = vadd.f32 %v2959_v4, %v2315_v2  ;;  %v2963_v53 = vadd.f32 %v2013_v9, %v4072_v37  ;;  %v2015_v13 = vpop.f32.mrb[35].mxu1 }
 0x1fe   : > { %v2321_v14 = vpop.f32.mrb[35].mxu0  ;;  %v4202_v16 = vadd.f32 %v2961_v51, %v2317_v8  ;;  %v2965_v17 = vadd.f32 %v2015_v13, %v4075_v38  ;;  %v2429_v8 = vmax.f32 %v4183_v43, %v2381_v22  ;;  %v2431_v13 = vmax.f32 %v4190_v59, %v4244_v3 }
 0x1ff   : > { %v4209_v24 = vadd.f32 %v2963_v53, %v2319_v10  ;;  %v4257_v2 = vmul.f32 0.01, %v4199_v11  ;;  %v2430_v53 = vmax.f32 %v4187_v55, %v4241_v49  ;;  %v2433_v43 = vmax.f32 %v4195_v0, %v4251_v57 }
 0x200   : > { %v4215_v27 = vadd.f32 %v2965_v17, %v2321_v14  ;;  %v4262_v51 = vmul.f32 0.01, %v4202_v16  ;;  %v2432_v17 = vmax.f32 %v4193_v6, %v4248_v5 }
 0x201   : > { %v2434_v25 = vmax.f32 %v4199_v11, %v4257_v2  ;;  %v4276_v55 = vmul.f32 0.01, %v4209_v24 }
 0x202   : > { %v2019_v19 = vpop.f32.mrb[36].mxu1  ;;  %v2435_v22 = vmax.f32 %v4202_v16, %v4262_v51 }
 0x203   : > { %v2325_v29 = vpop.f32.mrb[36].mxu0  ;;  %v2967_v44 = vadd.f32 %v2019_v19, %v4072_v37  ;;  %v2021_v45 = vpop.f32.mrb[37].mxu1 }
 0x204   : > { %v2327_v46 = vpop.f32.mrb[37].mxu0  ;;  %v2969_v32 = vadd.f32 %v2021_v45, %v4075_v38  ;;  %v2023_v50 = vpop.f32.mrb[38].mxu1 }
 0x205   : > { %v2329_v52 = vpop.f32.mrb[38].mxu0  ;;  %v2968_v36 = vadd.f32 %v2967_v44, %v2325_v29  ;;  %v2971_v40 = vadd.f32 %v2023_v50, %v4072_v37  ;;  %v2025_v58 = vpop.f32.mrb[39].mxu1  ;;  %v4282_v50 = vmul.f32 0.01, %v4215_v27 }
 0x206   : > { %v2331_v60 = vpop.f32.mrb[39].mxu0  ;;  %v2970_v4 = vadd.f32 %v2969_v32, %v2327_v46  ;;  %v2973_v7 = vadd.f32 %v2025_v58, %v4075_v38 }
 0x207   : > { %v2390_v9 = vmul.f32 0.01, %v2968_v36  ;;  %v2972_v10 = vadd.f32 %v2971_v40, %v2329_v52 }
 0x208   : > { %v2391_v41 = vmul.f32 0.01, %v2970_v4  ;;  %v2974_v14 = vadd.f32 %v2973_v7, %v2331_v60 }
 0x209   : > { %v2438_v54 = vmax.f32 %v2968_v36, %v2390_v9  ;;  %v2392_v23 = vmul.f32 0.01, %v2972_v10 }
 0x20a   : > { %v2439_v26 = vmax.f32 %v2970_v4, %v2391_v41  ;;  %v2393_v28 = vmul.f32 0.01, %v2974_v14  ;;  %v2029_v19 = vpop.f32.mrb[40].mxu1 }
 0x20b   : > { %v2335_v29 = vpop.f32.mrb[40].mxu0  ;;  %v2462_v44 = vmax.f32 %v2426_v35, %v2438_v54  ;;  %v2440_v45 = vmax.f32 %v2972_v10, %v2392_v23  ;;  %v2975_v46 = vadd.f32 %v2029_v19, %v4072_v37  ;;  %v2031_v49 = vpop.f32.mrb[41].mxu1 }
 0x20c   : > { %v2337_v32 = vpop.f32.mrb[41].mxu0  ;;  %v2463_v52 = vmax.f32 %v2427_v34, %v2439_v26  ;;  %v2441_v36 = vmax.f32 %v2974_v14, %v2393_v28  ;;  %v2977_v40 = vadd.f32 %v2031_v49, %v4075_v38  ;;  %v2033_v58 = vpop.f32.mrb[42].mxu1 }
 0x20d   : > { %v2339_v60 = vpop.f32.mrb[42].mxu0  ;;  %v2474_v35 = vmax.f32 %v4124_v62, %v2462_v44  ;;  %v2464_v4 = vmax.f32 %v2428_v1, %v2440_v45  ;;  %v2976_v7 = vadd.f32 %v2975_v46, %v2335_v29  ;;  %v2979_v9 = vadd.f32 %v2033_v58, %v4072_v37  ;;  %v2035_v10 = vpop.f32.mrb[43].mxu1 }
 0x20e   : > { %v2341_v41 = vpop.f32.mrb[43].mxu0  ;;  %v2475_v54 = vmax.f32 %v4128_v47, %v2463_v52  ;;  %v2465_v23 = vmax.f32 %v2429_v8, %v2441_v36  ;;  %v2978_v19 = vadd.f32 %v2977_v40, %v2337_v32  ;;  %v2981_v34 = vadd.f32 %v2035_v10, %v4075_v38 }
 0x20f   : > { %v2499_v14 = vmul.f32 %v4221_v30, %v2474_v35  ;;  %v2476_v26 = vmax.f32 %v4132_v12, %v2464_v4  ;;  %v2394_v28 = vmul.f32 0.01, %v2976_v7  ;;  %v2980_v49 = vadd.f32 %v2979_v9, %v2339_v60 }
 0x210   : > { %v2500_v62 = vmul.f32 %v4227_v33, %v2475_v54  ;;  %v2477_v1 = vmax.f32 %v4136_v18, %v2465_v23  ;;  %v2395_v29 = vmul.f32 0.01, %v2978_v19  ;;  %v2982_v44 = vadd.f32 %v2981_v34, %v2341_v41 }
 0x211   : > { %v2524_v45 = vadd.f32 %v4224_v21, %v2499_v14  ;;  %v2501_v47 = vmul.f32 %v4221_v30, %v2476_v26  ;;  %v2442_v8 = vmax.f32 %v2976_v7, %v2394_v28  ;;  %v2396_v46 = vmul.f32 0.01, %v2980_v49 }
 0x212   : > { %v2525_v32 = vadd.f32 %v4237_v48, %v2500_v62  ;;  %v2502_v52 = vmul.f32 %v4227_v33, %v2477_v1  ;;  %v2443_v12 = vmax.f32 %v2978_v19, %v2395_v29  ;;  %v2397_v36 = vmul.f32 0.01, %v2982_v44  ;;  %v2039_v40 = vpop.f32.mrb[44].mxu1 }
 0x213   : > { %v2345_v58 = vpop.f32.mrb[44].mxu0  ;;  %v2526_v18 = vadd.f32 %v4224_v21, %v2501_v47  ;;  %v2466_v60 = vmax.f32 %v2430_v53, %v2442_v8  ;;  %v2444_v35 = vmax.f32 %v2980_v49, %v2396_v46  ;;  %v2983_v4 = vadd.f32 %v2039_v40, %v4072_v37  ;;  %v2041_v7 = vpop.f32.mrb[45].mxu1 }
 0x214   : > { %v2347_v9 = vpop.f32.mrb[45].mxu0  ;;  %v2888_v10 = vpack.c.bf16 %v2525_v32, %v2524_v45  ;;  %v2527_v41 = vadd.f32 %v4237_v48, %v2502_v52  ;;  %v2467_v54 = vmax.f32 %v2431_v13, %v2443_v12  ;;  %v2445_v23 = vmax.f32 %v2982_v44, %v2397_v36  ;;  %v2043_v19 = vpop.f32.mrb[46].mxu1 }
 0x215   : > { %v2349_v34 = vpop.f32.mrb[46].mxu0  ;;  %v2478_v14 = vmax.f32 %v4144_v42, %v2466_v60  ;;  %v2468_v53 = vmax.f32 %v2432_v17, %v2444_v35  ;;  %v2984_v26 = vadd.f32 %v2983_v4, %v2345_v58  ;;  %v2985_v28 = vadd.f32 %v2041_v7, %v4075_v38  ;;  %v2045_v49 = vpop.f32.mrb[47].mxu1 }
 0x216   : > { %v2351_v62 = vpop.f32.mrb[47].mxu0  ;;  %2572 = vst [vmem:[%s4306_s17] sm:$0xff] %v2888_v10  ;;  %v2889_v1 = vpack.c.bf16 %v2527_v41, %v2526_v18  ;;  %v2479_v59 = vmax.f32 %v4148_v63, %v2467_v54  ;;  %v2469_v3 = vmax.f32 %v2433_v43, %v2445_v23  ;;  %v2987_v13 = vadd.f32 %v2043_v19, %v4072_v37 }
 0x217   : > { %v2503_v42 = vmul.f32 %v4221_v30, %v2478_v14  ;;  %v2480_v6 = vmax.f32 %v4152_v56, %v2468_v53  ;;  %v2398_v5 = vmul.f32 0.01, %v2984_v26  ;;  %v2986_v17 = vadd.f32 %v2985_v28, %v2347_v9 }
 0x218   : > { %2573 = vst [vmem:[%s4306_s17 + $0x8] sm:$0xff] %v2889_v1  ;;  %v2504_v29 = vmul.f32 %v4227_v33, %v2479_v59  ;;  %v2481_v44 = vmax.f32 %v4156_v61, %v2469_v3  ;;  %v2988_v45 = vadd.f32 %v2987_v13, %v2349_v34  ;;  %v2989_v63 = vadd.f32 %v2045_v49, %v4075_v38 }
 0x219   : > { %v2528_v47 = vadd.f32 %v4224_v21, %v2503_v42  ;;  %v2505_v0 = vmul.f32 %v4221_v30, %v2480_v6  ;;  %v2446_v57 = vmax.f32 %v2984_v26, %v2398_v5  ;;  %v2399_v37 = vmul.f32 0.01, %v2986_v17 }
 0x21a   : > { %v2529_v43 = vadd.f32 %v4237_v48, %v2504_v29  ;;  %v2506_v56 = vmul.f32 %v4227_v33, %v2481_v44  ;;  %v2400_v8 = vmul.f32 0.01, %v2988_v45  ;;  %v2990_v46 = vadd.f32 %v2989_v63, %v2351_v62 }
 0x21b   : > { %v2436_v32 = vmax.f32 %v4209_v24, %v4276_v55  ;;  %v2530_v61 = vadd.f32 %v4224_v21, %v2505_v0  ;;  %v2470_v38 = vmax.f32 %v2434_v25, %v2446_v57  ;;  %v2447_v52 = vmax.f32 %v2986_v17, %v2399_v37 }
 0x21c   : > { %v2890_v12 = vpack.c.bf16 %v2529_v43, %v2528_v47  ;;  %v2531_v36 = vadd.f32 %v4237_v48, %v2506_v56  ;;  %v2448_v40 = vmax.f32 %v2988_v45, %v2400_v8  ;;  %v2401_v58 = vmul.f32 0.01, %v2990_v46 }
 0x21d   : > { %v2482_v18 = vmax.f32 %v4164_v20, %v2470_v38  ;;  %v2471_v60 = vmax.f32 %v2435_v22, %v2447_v52  ;;  %v2437_v24 = vmax.f32 %v4215_v27, %v4282_v50 }
 0x21e   : > { %2574 = vst [vmem:[%s4306_s17 + $0x10] sm:$0xff] %v2890_v12  ;;  %v2891_v55 = vpack.c.bf16 %v2531_v36, %v2530_v61  ;;  %v2472_v11 = vmax.f32 %v2436_v32, %v2448_v40  ;;  %v2449_v2 = vmax.f32 %v2990_v46, %v2401_v58 }
 0x21f   : > { %v2507_v25 = vmul.f32 %v4221_v30, %v2482_v18  ;;  %v2483_v35 = vmax.f32 %v4168_v15, %v2471_v60 }
 0x220   : > { %2575 = vst [vmem:[%s4306_s17 + $0x18] sm:$0xff] %v2891_v55  ;;  %v2484_v20 = vmax.f32 %v4171_v31, %v2472_v11  ;;  %v2473_v4 = vmax.f32 %v2437_v24, %v2449_v2 }
 0x221   : > { %v2532_v16 = vadd.f32 %v4224_v21, %v2507_v25  ;;  %v2508_v51 = vmul.f32 %v4227_v33, %v2483_v35 }
 0x222   : > { %v2509_v27 = vmul.f32 %v4221_v30, %v2484_v20  ;;  %v2485_v22 = vmax.f32 %v4176_v39, %v2473_v4 }
 0x223   : > { %v2533_v50 = vadd.f32 %v4237_v48, %v2508_v51 }
 0x224   : > { %v2534_v7 = vadd.f32 %v4224_v21, %v2509_v27  ;;  %v2510_v9 = vmul.f32 %v4227_v33, %v2485_v22 }
 0x225   : > { %v2892_v10 = vpack.c.bf16 %v2533_v50, %v2532_v16 }
 0x226   : > { %v2535_v15 = vadd.f32 %v4237_v48, %v2510_v9 }
 0x227   : > { %2576 = vst [vmem:[%s4306_s17 + $0x20] sm:$0xff] %v2892_v10 }
 0x228   : > { %v2893_v31 = vpack.c.bf16 %v2535_v15, %v2534_v7 }
 0x22a   : > { %2577 = vst [vmem:[%s4306_s17 + $0x28] sm:$0xff] %v2893_v31 }
 0x22b PF: > { %p10_p9 = scmp.ge.s32.totalorder %s3366_s16, 4   ;;  %s4377_s12 = smov %s3323_s13 }
 0x22c   : > { %s4378_s13 = smov %s3375_s19  ;;  %s4379_s14 = smov %s3366_s16 }
 0x22d   :  { %12 = sbr.rel (!%p10_p9) target bundleno = 2 (0x2), region = 92 }

// kernel: encoder_forward.9
= control target key start
LH: loop header
LB: loop body
LE: loop exit
PB: predicated region body
PF: predicated region fallthrough
CT: control target
= control target key end

     0   :  { %s3282_s1 = inlined_call_operand.vmem [shape: bf16[1408,256], index: 1, kind: input, shape index: {}]   ;;  %s3283_s0 = inlined_call_operand.vmem [shape: bf16[4,16,1408], index: 0, kind: input, shape index: {}]   ;;  %s3284_s2 = inlined_call_operand.vmem [shape: f32[8,256], index: 2, kind: input, shape index: {}]   ;;  %s3285_s3 = inlined_call_operand.vmem [shape: f32[16,256], index: 3, kind: output, shape index: {}]  }
   0x1   :  { %v2198_v0 = vld [vmem:[%s3282_s1 + $0x4] ss:$8 sps:$4 sm:$0xff]   ;;  %v2202_v2 = vld [vmem:[%s3282_s1] ss:$8 sps:$4 sm:$0xff]   ;;  %v2204_v4 = vld [vmem:[%s3282_s1 + $0x14] ss:$8 sps:$4 sm:$0xff]  }
   0x2   :  { %v2200_v1 = vld [vmem:[%s3282_s1 + $0x304] ss:$8 sps:$4 sm:$0xff]   ;;  %1355 = vmatprep.subr.bf16.mxu1 %v2198_v0  ;;  %v2203_v3 = vld [vmem:[%s3282_s1 + $0x300] ss:$8 sps:$4 sm:$0xff]   ;;  %v2206_v5 = vld [vmem:[%s3282_s1 + $0x314] ss:$8 sps:$4 sm:$0xff]  }
   0x3   :  { %1574 = vmatprep.subr.bf16.mxu0 %v2200_v1  ;;  %1356 = vmatpush1.bf16.msra.mxu1 %v2202_v2  ;;  %v2208_v6 = vld [vmem:[%s3282_s1 + $0x10] ss:$8 sps:$4 sm:$0xff]   ;;  %v2210_v8 = vld [vmem:[%s3282_s1 + $0x24] ss:$8 sps:$4 sm:$0xff]   ;;  %v2214_v10 = vld [vmem:[%s3282_s1 + $0x20] ss:$8 sps:$4 sm:$0xff]  }
   0x4   :  { %1575 = vmatpush1.bf16.msra.mxu0 %v2203_v3  ;;  %1357 = vmatprep.subr.bf16.mxu1 %v2204_v4  ;;  %v2209_v7 = vld [vmem:[%s3282_s1 + $0x310] ss:$8 sps:$4 sm:$0xff]   ;;  %v2212_v9 = vld [vmem:[%s3282_s1 + $0x324] ss:$8 sps:$4 sm:$0xff]   ;;  %v2215_v11 = vld [vmem:[%s3282_s1 + $0x320] ss:$8 sps:$4 sm:$0xff]  }
   0x5   :  { %1576 = vmatprep.subr.bf16.mxu0 %v2206_v5  ;;  %v2216_v12 = vld [vmem:[%s3282_s1 + $0x34] ss:$8 sps:$4 sm:$0xff]   ;;  %v2220_v14 = vld [vmem:[%s3282_s1 + $0x30] ss:$8 sps:$4 sm:$0xff]   ;;  %v2222_v16 = vld [vmem:[%s3282_s1 + $0x44] ss:$8 sps:$4 sm:$0xff]  }
   0x6   :  { %v2218_v13 = vld [vmem:[%s3282_s1 + $0x334] ss:$8 sps:$4 sm:$0xff]   ;;  %v2221_v15 = vld [vmem:[%s3282_s1 + $0x330] ss:$8 sps:$4 sm:$0xff]   ;;  %v2224_v17 = vld [vmem:[%s3282_s1 + $0x344] ss:$8 sps:$4 sm:$0xff]  }
   0x7   :  { %1358 = vmatpush1.bf16.msra.mxu1 %v2208_v6  ;;  %v2226_v18 = vld [vmem:[%s3282_s1 + $0x40] ss:$8 sps:$4 sm:$0xff]   ;;  %v2228_v20 = vld [vmem:[%s3282_s1 + $0x54] ss:$8 sps:$4 sm:$0xff]   ;;  %v2232_v22 = vld [vmem:[%s3282_s1 + $0x50] ss:$8 sps:$4 sm:$0xff]  }
   0x8   :  { %1577 = vmatpush1.bf16.msra.mxu0 %v2209_v7  ;;  %1359 = vmatprep.subr.bf16.mxu1 %v2210_v8  ;;  %v2227_v19 = vld [vmem:[%s3282_s1 + $0x340] ss:$8 sps:$4 sm:$0xff]   ;;  %v2230_v21 = vld [vmem:[%s3282_s1 + $0x354] ss:$8 sps:$4 sm:$0xff]   ;;  %v2233_v23 = vld [vmem:[%s3282_s1 + $0x350] ss:$8 sps:$4 sm:$0xff]  }
   0x9   :  { %1578 = vmatprep.subr.bf16.mxu0 %v2212_v9  ;;  %v2234_v24 = vld [vmem:[%s3282_s1 + $0x64] ss:$8 sps:$4 sm:$0xff]   ;;  %v2238_v26 = vld [vmem:[%s3282_s1 + $0x60] ss:$8 sps:$4 sm:$0xff]   ;;  %v2240_v28 = vld [vmem:[%s3282_s1 + $0x74] ss:$8 sps:$4 sm:$0xff]  }
   0xa   :  { %v2236_v25 = vld [vmem:[%s3282_s1 + $0x364] ss:$8 sps:$4 sm:$0xff]   ;;  %v2239_v27 = vld [vmem:[%s3282_s1 + $0x360] ss:$8 sps:$4 sm:$0xff]   ;;  %v2242_v29 = vld [vmem:[%s3282_s1 + $0x374] ss:$8 sps:$4 sm:$0xff]  }
   0xb   :  { %1360 = vmatpush1.bf16.msra.mxu1 %v2214_v10  ;;  %v2244_v30 = vld [vmem:[%s3282_s1 + $0x70] ss:$8 sps:$4 sm:$0xff]   ;;  %v2246_v32 = vld [vmem:[%s3282_s1 + $0x84] ss:$8 sps:$4 sm:$0xff]   ;;  %v2250_v34 = vld [vmem:[%s3282_s1 + $0x80] ss:$8 sps:$4 sm:$0xff]  }
   0xc   :  { %1579 = vmatpush1.bf16.msra.mxu0 %v2215_v11  ;;  %1361 = vmatprep.subr.bf16.mxu1 %v2216_v12  ;;  %v2245_v31 = vld [vmem:[%s3282_s1 + $0x370] ss:$8 sps:$4 sm:$0xff]   ;;  %v2248_v33 = vld [vmem:[%s3282_s1 + $0x384] ss:$8 sps:$4 sm:$0xff]   ;;  %v2251_v35 = vld [vmem:[%s3282_s1 + $0x380] ss:$8 sps:$4 sm:$0xff]  }
   0xd   :  { %1580 = vmatprep.subr.bf16.mxu0 %v2218_v13  ;;  %v2252_v36 = vld [vmem:[%s3282_s1 + $0x94] ss:$8 sps:$4 sm:$0xff]   ;;  %v2256_v38 = vld [vmem:[%s3282_s1 + $0x90] ss:$8 sps:$4 sm:$0xff]   ;;  %v2258_v40 = vld [vmem:[%s3282_s1 + $0xa4] ss:$8 sps:$4 sm:$0xff]  }
   0xe   :  { %v2254_v37 = vld [vmem:[%s3282_s1 + $0x394] ss:$8 sps:$4 sm:$0xff]   ;;  %v2257_v39 = vld [vmem:[%s3282_s1 + $0x390] ss:$8 sps:$4 sm:$0xff]   ;;  %v2260_v41 = vld [vmem:[%s3282_s1 + $0x3a4] ss:$8 sps:$4 sm:$0xff]  }
   0xf   :  { %1362 = vmatpush1.bf16.msra.mxu1 %v2220_v14  ;;  %v2262_v42 = vld [vmem:[%s3282_s1 + $0xa0] ss:$8 sps:$4 sm:$0xff]   ;;  %v2264_v44 = vld [vmem:[%s3282_s1 + $0xb4] ss:$8 sps:$4 sm:$0xff]   ;;  %v2268_v46 = vld [vmem:[%s3282_s1 + $0xb0] ss:$8 sps:$4 sm:$0xff]  }
  0x10   :  { %1581 = vmatpush1.bf16.msra.mxu0 %v2221_v15  ;;  %1363 = vmatprep.subr.bf16.mxu1 %v2222_v16  ;;  %v2263_v43 = vld [vmem:[%s3282_s1 + $0x3a0] ss:$8 sps:$4 sm:$0xff]   ;;  %v2266_v45 = vld [vmem:[%s3282_s1 + $0x3b4] ss:$8 sps:$4 sm:$0xff]   ;;  %v2269_v47 = vld [vmem:[%s3282_s1 + $0x3b0] ss:$8 sps:$4 sm:$0xff]  }
  0x11   :  { %1582 = vmatprep.subr.bf16.mxu0 %v2224_v17  ;;  %v2296_v48 = vld [vmem:[%s3283_s0 + $0x4] ss:$44 sps:$4 sm:$0xff]   ;;  %v2302_v51 = vld [vmem:[%s3283_s0 + $0x1c] ss:$44 sps:$4 sm:$0xff]   ;;  %v2294_v4 = vld [vmem:[%s3283_s0] ss:$44 sps:$4 sm:$0xff]  }
  0x12   :  { %v2270_v49 = vld [vmem:[%s3282_s1 + $0xc4] ss:$8 sps:$4 sm:$0xff]   ;;  %1387 = vmatprep.mubr.bf16.mxu1 %v2296_v48  ;;  %v2274_v52 = vld [vmem:[%s3282_s1 + $0xc0] ss:$8 sps:$4 sm:$0xff]   ;;  %v2276_v54 = vld [vmem:[%s3282_s1 + $0xd4] ss:$8 sps:$4 sm:$0xff]   ;;  %1606 = vmatprep.mubr.bf16.mxu0 %v2302_v51 }
  0x13   :  { %1364 = vmatpush1.bf16.msra.mxu1 %v2226_v18  ;;  %v2272_v50 = vld [vmem:[%s3282_s1 + $0x3c4] ss:$8 sps:$4 sm:$0xff]   ;;  %v2275_v53 = vld [vmem:[%s3282_s1 + $0x3c0] ss:$8 sps:$4 sm:$0xff]   ;;  %v2278_v55 = vld [vmem:[%s3282_s1 + $0x3d4] ss:$8 sps:$4 sm:$0xff]  }
  0x14   :  { %1583 = vmatpush1.bf16.msra.mxu0 %v2227_v19  ;;  %1365 = vmatprep.subr.bf16.mxu1 %v2228_v20  ;;  %v2280_v56 = vld [vmem:[%s3282_s1 + $0xd0] ss:$8 sps:$4 sm:$0xff]   ;;  %v2282_v58 = vld [vmem:[%s3282_s1 + $0xe4] ss:$8 sps:$4 sm:$0xff]   ;;  %v2286_v60 = vld [vmem:[%s3282_s1 + $0xe0] ss:$8 sps:$4 sm:$0xff]  }
  0x15   :  { %1584 = vmatprep.subr.bf16.mxu0 %v2230_v21  ;;  %v2281_v57 = vld [vmem:[%s3282_s1 + $0x3d0] ss:$8 sps:$4 sm:$0xff]   ;;  %v2284_v59 = vld [vmem:[%s3282_s1 + $0x3e4] ss:$8 sps:$4 sm:$0xff]   ;;  %v2287_v61 = vld [vmem:[%s3282_s1 + $0x3e0] ss:$8 sps:$4 sm:$0xff]  }
  0x16   :  { %v2288_v62 = vld [vmem:[%s3282_s1 + $0xf4] ss:$8 sps:$4 sm:$0xff]   ;;  %v2292_v0 = vld [vmem:[%s3282_s1 + $0xf0] ss:$8 sps:$4 sm:$0xff]   ;;  %v2299_v2 = vld [vmem:[%s3282_s1 + $0x104] ss:$8 sps:$4 sm:$0xff]  }
  0x17   :  { %1366 = vmatpush1.bf16.msra.mxu1 %v2232_v22  ;;  %v2290_v63 = vld [vmem:[%s3282_s1 + $0x3f4] ss:$8 sps:$4 sm:$0xff]   ;;  %v2293_v1 = vld [vmem:[%s3282_s1 + $0x3f0] ss:$8 sps:$4 sm:$0xff]   ;;  %v2305_v3 = vld [vmem:[%s3282_s1 + $0x404] ss:$8 sps:$4 sm:$0xff]  }
  0x18   :  { %1585 = vmatpush1.bf16.msra.mxu0 %v2233_v23  ;;  %1367 = vmatprep.subr.bf16.mxu1 %v2234_v24  ;;  %v2297_v5 = vld [vmem:[%s3282_s1 + $0x100] ss:$8 sps:$4 sm:$0xff]   ;;  %v2300_v6 = vld [vmem:[%s3283_s0 + $0x18] ss:$44 sps:$4 sm:$0xff]   ;;  %v2308_v8 = vld [vmem:[%s3282_s1 + $0x114] ss:$8 sps:$4 sm:$0xff]  }
  0x19   :  { %1586 = vmatprep.subr.bf16.mxu0 %v2236_v25  ;;  %v2303_v7 = vld [vmem:[%s3282_s1 + $0x400] ss:$8 sps:$4 sm:$0xff]   ;;  %v2311_v9 = vld [vmem:[%s3282_s1 + $0x414] ss:$8 sps:$4 sm:$0xff]   ;;  %v2306_v10 = vld [vmem:[%s3282_s1 + $0x110] ss:$8 sps:$4 sm:$0xff]  }
  0x1a   :  { %v2309_v11 = vld [vmem:[%s3282_s1 + $0x410] ss:$8 sps:$4 sm:$0xff]   ;;  %v2314_v12 = vld [vmem:[%s3282_s1 + $0x124] ss:$8 sps:$4 sm:$0xff]   ;;  %v2312_v14 = vld [vmem:[%s3282_s1 + $0x120] ss:$8 sps:$4 sm:$0xff]  }
  0x1b   :  { %1368 = vmatpush1.bf16.msra.mxu1 %v2238_v26  ;;  %v2317_v13 = vld [vmem:[%s3282_s1 + $0x424] ss:$8 sps:$4 sm:$0xff]   ;;  %v2315_v15 = vld [vmem:[%s3282_s1 + $0x420] ss:$8 sps:$4 sm:$0xff]   ;;  %v2320_v16 = vld [vmem:[%s3282_s1 + $0x134] ss:$8 sps:$4 sm:$0xff]  }
  0x1c   :  { %1587 = vmatpush1.bf16.msra.mxu0 %v2239_v27  ;;  %1369 = vmatprep.subr.bf16.mxu1 %v2240_v28  ;;  %v2323_v17 = vld [vmem:[%s3282_s1 + $0x434] ss:$8 sps:$4 sm:$0xff]   ;;  %v2318_v20 = vld [vmem:[%s3282_s1 + $0x130] ss:$8 sps:$4 sm:$0xff]   ;;  %v2326_v23 = vld [vmem:[%s3282_s1 + $0x144] ss:$8 sps:$4 sm:$0xff]  }
  0x1d   :  { %1588 = vmatprep.subr.bf16.mxu0 %v2242_v29  ;;  %v2360_v18 = vld [vmem:[%s3283_s0 + $0x74] ss:$44 sps:$4 sm:$0xff]   ;;  %v2362_v19 = vld [vmem:[%s3283_s0 + $0x5c] ss:$44 sps:$4 sm:$0xff]   ;;  %v2321_v21 = vld [vmem:[%s3282_s1 + $0x430] ss:$8 sps:$4 sm:$0xff]  }
  0x1e   :  { %v2367_v22 = vld [vmem:[%s3283_s0 + $0x70] ss:$44 sps:$4 sm:$0xff]   ;;  %v2329_v24 = vld [vmem:[%s3282_s1 + $0x444] ss:$8 sps:$4 sm:$0xff]   ;;  %v2324_v26 = vld [vmem:[%s3282_s1 + $0x140] ss:$8 sps:$4 sm:$0xff]  }
  0x1f   :  { %1370 = vmatpush1.bf16.msra.mxu1 %v2244_v30  ;;  %v2371_v25 = vld [vmem:[%s3283_s0 + $0x58] ss:$44 sps:$4 sm:$0xff]   ;;  %v2327_v27 = vld [vmem:[%s3282_s1 + $0x440] ss:$8 sps:$4 sm:$0xff]   ;;  %v2332_v28 = vld [vmem:[%s3282_s1 + $0x154] ss:$8 sps:$4 sm:$0xff]  }
  0x20   :  { %1589 = vmatpush1.bf16.msra.mxu0 %v2245_v31  ;;  %1371 = vmatprep.subr.bf16.mxu1 %v2246_v32  ;;  %v2335_v29 = vld [vmem:[%s3282_s1 + $0x454] ss:$8 sps:$4 sm:$0xff]   ;;  %v2378_v30 = vld [vmem:[%s3283_s0 + $0xcc] ss:$44 sps:$4 sm:$0xff]   ;;  %v2351_v51 = vld [vmem:[%s3282_s1 + $0x480] ss:$8 sps:$4 sm:$0xff]  }
  0x21   :  { %1590 = vmatprep.subr.bf16.mxu0 %v2248_v33  ;;  %v2380_v31 = vld [vmem:[%s3283_s0 + $0xb4] ss:$44 sps:$4 sm:$0xff]   ;;  %v2330_v32 = vld [vmem:[%s3282_s1 + $0x150] ss:$8 sps:$4 sm:$0xff]   ;;  %v2353_v48 = vld [vmem:[%s3282_s1 + $0x484] ss:$8 sps:$4 sm:$0xff]  }
  0x22   :  { %v2333_v33 = vld [vmem:[%s3282_s1 + $0x450] ss:$8 sps:$4 sm:$0xff]  }
  0x23   :  { %1372 = vmatpush1.bf16.msra.mxu1 %v2250_v34  ;;  %v2385_v34 = vld [vmem:[%s3283_s0 + $0xc8] ss:$44 sps:$4 sm:$0xff]  }
  0x24   :  { %1591 = vmatpush1.bf16.msra.mxu0 %v2251_v35  ;;  %1373 = vmatprep.subr.bf16.mxu1 %v2252_v36  ;;  %v2338_v35 = vld [vmem:[%s3282_s1 + $0x164] ss:$8 sps:$4 sm:$0xff]  }
  0x25   :  { %1592 = vmatprep.subr.bf16.mxu0 %v2254_v37  ;;  %v2341_v36 = vld [vmem:[%s3282_s1 + $0x464] ss:$8 sps:$4 sm:$0xff]   ;;  %v2389_v37 = vld [vmem:[%s3283_s0 + $0xb0] ss:$44 sps:$4 sm:$0xff]  }
  0x27   :  { %1374 = vmatpush1.bf16.msra.mxu1 %v2256_v38  ;;  %v2336_v38 = vld [vmem:[%s3282_s1 + $0x160] ss:$8 sps:$4 sm:$0xff]  }
  0x28   :  { %1593 = vmatpush1.bf16.msra.mxu0 %v2257_v39  ;;  %1375 = vmatprep.subr.bf16.mxu1 %v2258_v40  ;;  %v2339_v39 = vld [vmem:[%s3282_s1 + $0x460] ss:$8 sps:$4 sm:$0xff]   ;;  %v2344_v40 = vld [vmem:[%s3282_s1 + $0x174] ss:$8 sps:$4 sm:$0xff]  }
  0x29   :  { %1594 = vmatprep.subr.bf16.mxu0 %v2260_v41  ;;  %v2347_v41 = vld [vmem:[%s3282_s1 + $0x474] ss:$8 sps:$4 sm:$0xff]  }
  0x2b   :  { %1376 = vmatpush1.bf16.msra.mxu1 %v2262_v42  ;;  %v2396_v42 = vld [vmem:[%s3283_s0 + $0x124] ss:$44 sps:$4 sm:$0xff]  }
  0x2c   :  { %1595 = vmatpush1.bf16.msra.mxu0 %v2263_v43  ;;  %1377 = vmatprep.subr.bf16.mxu1 %v2264_v44  ;;  %v2398_v43 = vld [vmem:[%s3283_s0 + $0x10c] ss:$44 sps:$4 sm:$0xff]  }
  0x2d   :  { %1596 = vmatprep.subr.bf16.mxu0 %v2266_v45  ;;  %v2342_v44 = vld [vmem:[%s3282_s1 + $0x170] ss:$8 sps:$4 sm:$0xff]  }
  0x2e   :  { %v2345_v45 = vld [vmem:[%s3282_s1 + $0x470] ss:$8 sps:$4 sm:$0xff]  }
  0x2f   :  { %1378 = vmatpush1.bf16.msra.mxu1 %v2268_v46  ;;  %v2403_v46 = vld [vmem:[%s3283_s0 + $0x120] ss:$44 sps:$4 sm:$0xff]  }
  0x30   :  { %1597 = vmatpush1.bf16.msra.mxu0 %v2269_v47  ;;  %1379 = vmatprep.subr.bf16.mxu1 %v2270_v49  ;;  %v2350_v47 = vld [vmem:[%s3282_s1 + $0x184] ss:$8 sps:$4 sm:$0xff]   ;;  %v2407_v49 = vld [vmem:[%s3283_s0 + $0x108] ss:$44 sps:$4 sm:$0xff]  }
  0x31   :  { %1598 = vmatprep.subr.bf16.mxu0 %v2272_v50  ;;  %v2348_v50 = vld [vmem:[%s3282_s1 + $0x180] ss:$8 sps:$4 sm:$0xff]  }
  0x33   :  { %1380 = vmatpush1.bf16.msra.mxu1 %v2274_v52  ;;  %v2356_v52 = vld [vmem:[%s3282_s1 + $0x194] ss:$8 sps:$4 sm:$0xff]  }
  0x34   :  { %1599 = vmatpush1.bf16.msra.mxu0 %v2275_v53  ;;  %1381 = vmatprep.subr.bf16.mxu1 %v2276_v54  ;;  %v2359_v53 = vld [vmem:[%s3282_s1 + $0x494] ss:$8 sps:$4 sm:$0xff]   ;;  %v2416_v54 = vld [vmem:[%s3283_s0 + $0x24] ss:$44 sps:$4 sm:$0xff]  }
  0x35   :  { %1600 = vmatprep.subr.bf16.mxu0 %v2278_v55  ;;  %v2419_v55 = vld [vmem:[%s3283_s0 + $0xc] ss:$44 sps:$4 sm:$0xff]  }
  0x37   :  { %1382 = vmatpush1.bf16.msra.mxu1 %v2280_v56  ;;  %v2354_v56 = vld [vmem:[%s3282_s1 + $0x190] ss:$8 sps:$4 sm:$0xff]  }
  0x38   :  { %1601 = vmatpush1.bf16.msra.mxu0 %v2281_v57  ;;  %1383 = vmatprep.subr.bf16.mxu1 %v2282_v58  ;;  %v2357_v57 = vld [vmem:[%s3282_s1 + $0x490] ss:$8 sps:$4 sm:$0xff]   ;;  %v2366_v58 = vld [vmem:[%s3282_s1 + $0x1a4] ss:$8 sps:$4 sm:$0xff]  }
  0x39   :  { %1602 = vmatprep.subr.bf16.mxu0 %v2284_v59  ;;  %v2370_v59 = vld [vmem:[%s3282_s1 + $0x4a4] ss:$8 sps:$4 sm:$0xff]  }
  0x3b   :  { %1384 = vmatpush1.bf16.msra.mxu1 %v2286_v60  ;;  %v2364_v60 = vld [vmem:[%s3282_s1 + $0x1a0] ss:$8 sps:$4 sm:$0xff]  }
  0x3c   :  { %1603 = vmatpush1.bf16.msra.mxu0 %v2287_v61  ;;  %1385 = vmatprep.subr.bf16.mxu1 %v2288_v62  ;;  %v2368_v61 = vld [vmem:[%s3282_s1 + $0x4a0] ss:$8 sps:$4 sm:$0xff]   ;;  %v2374_v62 = vld [vmem:[%s3282_s1 + $0x1b4] ss:$8 sps:$4 sm:$0xff]  }
  0x3d   :  { %1604 = vmatprep.subr.bf16.mxu0 %v2290_v63  ;;  %v2377_v63 = vld [vmem:[%s3282_s1 + $0x4b4] ss:$8 sps:$4 sm:$0xff]  }
  0x3f   :  { %1386 = vmatpush1.bf16.msra.mxu1 %v2292_v0  ;;  %v2372_v0 = vld [vmem:[%s3282_s1 + $0x1b0] ss:$8 sps:$4 sm:$0xff]  }
  0x40   :  { %1605 = vmatpush1.bf16.msra.mxu0 %v2293_v1  ;;  %1428 = vmatprep.subr.bf16.mxu1 %v2299_v2  ;;  %v2375_v1 = vld [vmem:[%s3282_s1 + $0x4b0] ss:$8 sps:$4 sm:$0xff]   ;;  %v2384_v2 = vld [vmem:[%s3282_s1 + $0x1c4] ss:$8 sps:$4 sm:$0xff]  }
  0x41   :  { %1647 = vmatprep.subr.bf16.mxu0 %v2305_v3  ;;  %v2388_v3 = vld [vmem:[%s3282_s1 + $0x4c4] ss:$8 sps:$4 sm:$0xff]  }
  0x42   :  { %1388 = vmatmul.mubr.bf16.vlgmr.msra.gmra.mrb[0].mxu1 %v2294_v4  ;;  %v2382_v4 = vld [vmem:[%s3282_s1 + $0x1c0] ss:$8 sps:$4 sm:$0xff]  }
  0x43   :  { %1607 = vmatmul.mubr.bf16.vlgmr.msra.gmra.mrb[0].mxu0 %v2300_v6  ;;  %1429 = vmatpush1.bf16.msra.mxu1 %v2297_v5  ;;  %v2386_v5 = vld [vmem:[%s3282_s1 + $0x4c0] ss:$8 sps:$4 sm:$0xff]   ;;  %v2392_v6 = vld [vmem:[%s3282_s1 + $0x1d4] ss:$8 sps:$4 sm:$0xff]  }
  0x44   :  { %1648 = vmatpush1.bf16.msra.mxu0 %v2303_v7  ;;  %1430 = vmatprep.subr.bf16.mxu1 %v2308_v8  ;;  %v2395_v7 = vld [vmem:[%s3282_s1 + $0x4d4] ss:$8 sps:$4 sm:$0xff]   ;;  %v2390_v8 = vld [vmem:[%s3282_s1 + $0x1d0] ss:$8 sps:$4 sm:$0xff]  }
  0x45   :  { %1649 = vmatprep.subr.bf16.mxu0 %v2311_v9  ;;  %1616 = vmatprep.mubr.bf16.mxu0 %v2360_v18  ;;  %v2393_v9 = vld [vmem:[%s3282_s1 + $0x4d0] ss:$8 sps:$4 sm:$0xff]   ;;  %v2422_v18 = vld [vmem:[%s3282_s1 + $0x204] ss:$8 sps:$4 sm:$0xff]  }
  0x46   :  { %1397 = vmatprep.mubr.bf16.mxu1 %v2362_v19  ;;  %v2414_v19 = vld [vmem:[%s3283_s0 + $0x20] ss:$44 sps:$4 sm:$0xff]  }
  0x47   :  { %1431 = vmatpush1.bf16.msra.mxu1 %v2306_v10  ;;  %v2402_v10 = vld [vmem:[%s3282_s1 + $0x1e4] ss:$8 sps:$4 sm:$0xff]  }
  0x48   :  { %1650 = vmatpush1.bf16.msra.mxu0 %v2309_v11  ;;  %1432 = vmatprep.subr.bf16.mxu1 %v2314_v12  ;;  %v2406_v11 = vld [vmem:[%s3282_s1 + $0x4e4] ss:$8 sps:$4 sm:$0xff]   ;;  %v2400_v12 = vld [vmem:[%s3282_s1 + $0x1e0] ss:$8 sps:$4 sm:$0xff]  }
  0x49   :  { %1651 = vmatprep.subr.bf16.mxu0 %v2317_v13  ;;  %v2404_v13 = vld [vmem:[%s3282_s1 + $0x4e0] ss:$8 sps:$4 sm:$0xff]  }
  0x4a   :  { %1398 = vmatmul.mubr.bf16.gmra.mrb[4].mxu1 %v2371_v25  ;;  %v2431_v25 = vld [vmem:[%s3282_s1 + $0x514] ss:$8 sps:$4 sm:$0xff]  }
  0x4b   :  { %1433 = vmatpush1.bf16.msra.mxu1 %v2312_v14  ;;  %1617 = vmatmul.mubr.bf16.gmra.mrb[4].mxu0 %v2367_v22  ;;  %v2410_v14 = vld [vmem:[%s3282_s1 + $0x1f4] ss:$8 sps:$4 sm:$0xff]   ;;  %v2420_v22 = vld [vmem:[%s3282_s1 + $0x200] ss:$8 sps:$4 sm:$0xff]  }
  0x4c   :  { %1652 = vmatpush1.bf16.msra.mxu0 %v2315_v15  ;;  %1434 = vmatprep.subr.bf16.mxu1 %v2320_v16  ;;  %v2413_v15 = vld [vmem:[%s3282_s1 + $0x4f4] ss:$8 sps:$4 sm:$0xff]   ;;  %v2408_v16 = vld [vmem:[%s3282_s1 + $0x1f0] ss:$8 sps:$4 sm:$0xff]  }
  0x4d   :  { %1653 = vmatprep.subr.bf16.mxu0 %v2323_v17  ;;  %1626 = vmatprep.mubr.bf16.mxu0 %v2378_v30  ;;  %v2411_v17 = vld [vmem:[%s3282_s1 + $0x4f0] ss:$8 sps:$4 sm:$0xff]   ;;  %v2436_v30 = vld [vmem:[%s3282_s1 + $0x224] ss:$8 sps:$4 sm:$0xff]  }
  0x4e   :  { %1407 = vmatprep.mubr.bf16.mxu1 %v2380_v31  ;;  %v2440_v31 = vld [vmem:[%s3282_s1 + $0x524] ss:$8 sps:$4 sm:$0xff]  }
  0x4f   :  { %1435 = vmatpush1.bf16.msra.mxu1 %v2318_v20  ;;  %v2425_v20 = vld [vmem:[%s3282_s1 + $0x504] ss:$8 sps:$4 sm:$0xff]  }
  0x50   :  { %1654 = vmatpush1.bf16.msra.mxu0 %v2321_v21  ;;  %1436 = vmatprep.subr.bf16.mxu1 %v2326_v23  ;;  %v2417_v21 = vld [vmem:[%s3283_s0 + $0x8] ss:$44 sps:$4 sm:$0xff]  }
  0x51   :  { %1655 = vmatprep.subr.bf16.mxu0 %v2329_v24  ;;  %v2423_v23 = vld [vmem:[%s3282_s1 + $0x500] ss:$8 sps:$4 sm:$0xff]   ;;  %v2428_v24 = vld [vmem:[%s3282_s1 + $0x214] ss:$8 sps:$4 sm:$0xff]  }
  0x52   :  { %1408 = vmatmul.mubr.bf16.gmra.mrb[8].mxu1 %v2389_v37  ;;  %v2446_v37 = vld [vmem:[%s3282_s1 + $0x534] ss:$8 sps:$4 sm:$0xff]  }
  0x53   :  { %1437 = vmatpush1.bf16.msra.mxu1 %v2324_v26  ;;  %1627 = vmatmul.mubr.bf16.gmra.mrb[8].mxu0 %v2385_v34  ;;  %v2432_v26 = vld [vmem:[%s3283_s0 + $0x7c] ss:$44 sps:$4 sm:$0xff]   ;;  %v2486_v34 = vld [vmem:[%s3283_s0 + $0x60] ss:$44 sps:$4 sm:$0xff]  }
  0x54   :  { %1656 = vmatpush1.bf16.msra.mxu0 %v2327_v27  ;;  %1438 = vmatprep.subr.bf16.mxu1 %v2332_v28  ;;  %v2484_v27 = vld [vmem:[%s3283_s0 + $0x64] ss:$44 sps:$4 sm:$0xff]  }
  0x55   :  { %1657 = vmatprep.subr.bf16.mxu0 %v2335_v29  ;;  %1636 = vmatprep.mubr.bf16.mxu0 %v2396_v42  ;;  %v2426_v28 = vld [vmem:[%s3282_s1 + $0x210] ss:$8 sps:$4 sm:$0xff]   ;;  %v2451_v42 = vld [vmem:[%s3282_s1 + $0x244] ss:$8 sps:$4 sm:$0xff]  }
  0x56   :  { %1417 = vmatprep.mubr.bf16.mxu1 %v2398_v43  ;;  %v2429_v29 = vld [vmem:[%s3282_s1 + $0x510] ss:$8 sps:$4 sm:$0xff]   ;;  %v2455_v43 = vld [vmem:[%s3282_s1 + $0x544] ss:$8 sps:$4 sm:$0xff]  }
  0x57   :  { %1439 = vmatpush1.bf16.msra.mxu1 %v2330_v32  ;;  %v2434_v32 = vld [vmem:[%s3282_s1 + $0x220] ss:$8 sps:$4 sm:$0xff]  }
  0x58   :  { %1658 = vmatpush1.bf16.msra.mxu0 %v2333_v33  ;;  %1440 = vmatprep.subr.bf16.mxu1 %v2338_v35  ;;  %v2437_v33 = vld [vmem:[%s3283_s0 + $0x78] ss:$44 sps:$4 sm:$0xff]   ;;  %v2438_v35 = vld [vmem:[%s3282_s1 + $0x520] ss:$8 sps:$4 sm:$0xff]  }
  0x59   :  { %1659 = vmatprep.subr.bf16.mxu0 %v2341_v36  ;;  %v2443_v36 = vld [vmem:[%s3282_s1 + $0x234] ss:$8 sps:$4 sm:$0xff]  }
  0x5a   :  { %1418 = vmatmul.mubr.bf16.gmra.mrb[12].mxu1 %v2407_v49  ;;  %v2461_v49 = vld [vmem:[%s3282_s1 + $0x554] ss:$8 sps:$4 sm:$0xff]  }
  0x5b   :  { %1441 = vmatpush1.bf16.msra.mxu1 %v2336_v38  ;;  %1637 = vmatmul.mubr.bf16.gmra.mrb[12].mxu0 %v2403_v46  ;;  %v2441_v38 = vld [vmem:[%s3282_s1 + $0x230] ss:$8 sps:$4 sm:$0xff]   ;;  %v2453_v46 = vld [vmem:[%s3282_s1 + $0x540] ss:$8 sps:$4 sm:$0xff]  }
  0x5c   :  { %1660 = vmatpush1.bf16.msra.mxu0 %v2339_v39  ;;  %1442 = vmatprep.subr.bf16.mxu1 %v2344_v40  ;;  %v2447_v39 = vld [vmem:[%s3283_s0 + $0xd4] ss:$44 sps:$4 sm:$0xff]   ;;  %v2494_v40 = vld [vmem:[%s3283_s0 + $0xbc] ss:$44 sps:$4 sm:$0xff]  }
  0x5d   :  { %1661 = vmatprep.subr.bf16.mxu0 %v2347_v41  ;;  %1679 = vmatprep.mubr.bf16.mxu0 %v2416_v54  ;;  %v2444_v41 = vld [vmem:[%s3282_s1 + $0x530] ss:$8 sps:$4 sm:$0xff]   ;;  %v2466_v54 = vld [vmem:[%s3282_s1 + $0x264] ss:$8 sps:$4 sm:$0xff]  }
  0x5e   :  { %1460 = vmatprep.mubr.bf16.mxu1 %v2419_v55  ;;  %v2470_v55 = vld [vmem:[%s3282_s1 + $0x564] ss:$8 sps:$4 sm:$0xff]  }
  0x5f   :  { %1443 = vmatpush1.bf16.msra.mxu1 %v2342_v44  ;;  %v2449_v44 = vld [vmem:[%s3282_s1 + $0x240] ss:$8 sps:$4 sm:$0xff]  }
  0x60   :  { %1662 = vmatpush1.bf16.msra.mxu0 %v2345_v45  ;;  %1444 = vmatprep.subr.bf16.mxu1 %v2350_v47  ;;  %v2452_v45 = vld [vmem:[%s3283_s0 + $0xd0] ss:$44 sps:$4 sm:$0xff]   ;;  %v2496_v47 = vld [vmem:[%s3283_s0 + $0xb8] ss:$44 sps:$4 sm:$0xff]  }
  0x61   :  { %1663 = vmatprep.subr.bf16.mxu0 %v2353_v48  ;;  %v2458_v48 = vld [vmem:[%s3282_s1 + $0x254] ss:$8 sps:$4 sm:$0xff]  }
  0x63   :  { %1445 = vmatpush1.bf16.msra.mxu1 %v2348_v50  ;;  %v2462_v50 = vld [vmem:[%s3283_s0 + $0x12c] ss:$44 sps:$4 sm:$0xff]  }
  0x64   :  { %1664 = vmatpush1.bf16.msra.mxu0 %v2351_v51  ;;  %1446 = vmatprep.subr.bf16.mxu1 %v2356_v52  ;;  %v2504_v51 = vld [vmem:[%s3283_s0 + $0x114] ss:$44 sps:$4 sm:$0xff]   ;;  %v2456_v52 = vld [vmem:[%s3282_s1 + $0x250] ss:$8 sps:$4 sm:$0xff]  }
  0x65   :  { %1665 = vmatprep.subr.bf16.mxu0 %v2359_v53  ;;  %v2459_v53 = vld [vmem:[%s3282_s1 + $0x550] ss:$8 sps:$4 sm:$0xff]  }
  0x67   :  { %1447 = vmatpush1.bf16.msra.mxu1 %v2354_v56  ;;  %v2467_v56 = vld [vmem:[%s3283_s0 + $0x128] ss:$44 sps:$4 sm:$0xff]  }
  0x68   :  { %1666 = vmatpush1.bf16.msra.mxu0 %v2357_v57  ;;  %1448 = vmatprep.subr.bf16.mxu1 %v2366_v58  ;;  %v2506_v57 = vld [vmem:[%s3283_s0 + $0x110] ss:$44 sps:$4 sm:$0xff]   ;;  %v2464_v58 = vld [vmem:[%s3282_s1 + $0x260] ss:$8 sps:$4 sm:$0xff]  }
  0x69   :  { %1667 = vmatprep.subr.bf16.mxu0 %v2370_v59  ;;  %v2468_v59 = vld [vmem:[%s3282_s1 + $0x560] ss:$8 sps:$4 sm:$0xff]  }
  0x6b   :  { %1449 = vmatpush1.bf16.msra.mxu1 %v2364_v60  ;;  %v2473_v60 = vld [vmem:[%s3282_s1 + $0x274] ss:$8 sps:$4 sm:$0xff]  }
  0x6c   :  { %1668 = vmatpush1.bf16.msra.mxu0 %v2368_v61  ;;  %1450 = vmatprep.subr.bf16.mxu1 %v2374_v62  ;;  %v2476_v61 = vld [vmem:[%s3282_s1 + $0x574] ss:$8 sps:$4 sm:$0xff]  }
  0x6d   :  { %1669 = vmatprep.subr.bf16.mxu0 %v2377_v63  ;;  %v2516_v62 = vld [vmem:[%s3283_s0 + $0x14] ss:$44 sps:$4 sm:$0xff]   ;;  %v2471_v63 = vld [vmem:[%s3282_s1 + $0x270] ss:$8 sps:$4 sm:$0xff]  }
  0x6f   :  { %1451 = vmatpush1.bf16.msra.mxu1 %v2372_v0  ;;  %v2474_v0 = vld [vmem:[%s3282_s1 + $0x570] ss:$8 sps:$4 sm:$0xff]  }
  0x70   :  { %1670 = vmatpush1.bf16.msra.mxu0 %v2375_v1  ;;  %1452 = vmatprep.subr.bf16.mxu1 %v2384_v2  ;;  %v2479_v1 = vld [vmem:[%s3282_s1 + $0x284] ss:$8 sps:$4 sm:$0xff]   ;;  %v2526_v2 = vmov 0  }
  0x71   :  { %1671 = vmatprep.subr.bf16.mxu0 %v2388_v3  ;;  %v2480_v3 = vld [vmem:[%s3283_s0 + $0x28] ss:$44 sps:$4 sm:$0xff]  }
  0x73   :  { %1453 = vmatpush1.bf16.msra.mxu1 %v2382_v4  ;;  %v2477_v4 = vld [vmem:[%s3282_s1 + $0x280] ss:$8 sps:$4 sm:$0xff]  }
  0x74   :  { %1672 = vmatpush1.bf16.msra.mxu0 %v2386_v5  ;;  %1454 = vmatprep.subr.bf16.mxu1 %v2392_v6  ;;  %v2483_v5 = vld [vmem:[%s3282_s1 + $0x294] ss:$8 sps:$4 sm:$0xff]   ;;  %v2481_v6 = vld [vmem:[%s3282_s1 + $0x290] ss:$8 sps:$4 sm:$0xff]  }
  0x75   :  { %1673 = vmatprep.subr.bf16.mxu0 %v2395_v7  ;;  %v2489_v7 = vld [vmem:[%s3282_s1 + $0x2a4] ss:$8 sps:$4 sm:$0xff]  }
  0x77   :  { %1455 = vmatpush1.bf16.msra.mxu1 %v2390_v8  ;;  %v2490_v8 = vld [vmem:[%s3283_s0 + $0x80] ss:$44 sps:$4 sm:$0xff]  }
  0x78   :  { %1674 = vmatpush1.bf16.msra.mxu0 %v2393_v9  ;;  %1456 = vmatprep.subr.bf16.mxu1 %v2402_v10  ;;  %v2487_v9 = vld [vmem:[%s3282_s1 + $0x2a0] ss:$8 sps:$4 sm:$0xff]   ;;  %v2493_v10 = vld [vmem:[%s3282_s1 + $0x2b4] ss:$8 sps:$4 sm:$0xff]  }
  0x79   :  { %1675 = vmatprep.subr.bf16.mxu0 %v2406_v11  ;;  %v2491_v11 = vld [vmem:[%s3282_s1 + $0x2b0] ss:$8 sps:$4 sm:$0xff]  }
  0x7b   :  { %1457 = vmatpush1.bf16.msra.mxu1 %v2400_v12  ;;  %v2499_v12 = vld [vmem:[%s3282_s1 + $0x2c4] ss:$8 sps:$4 sm:$0xff]  }
  0x7c   :  { %1676 = vmatpush1.bf16.msra.mxu0 %v2404_v13  ;;  %1458 = vmatprep.subr.bf16.mxu1 %v2410_v14  ;;  %v2500_v13 = vld [vmem:[%s3283_s0 + $0xd8] ss:$44 sps:$4 sm:$0xff]   ;;  %v2497_v14 = vld [vmem:[%s3282_s1 + $0x2c0] ss:$8 sps:$4 sm:$0xff]  }
  0x7d   :  { %1677 = vmatprep.subr.bf16.mxu0 %v2413_v15  ;;  %v2503_v15 = vld [vmem:[%s3282_s1 + $0x2d4] ss:$8 sps:$4 sm:$0xff]  }
  0x7f   :  { %1459 = vmatpush1.bf16.msra.mxu1 %v2408_v16  ;;  %v2501_v16 = vld [vmem:[%s3282_s1 + $0x2d0] ss:$8 sps:$4 sm:$0xff]  }
  0x80   :  { %1678 = vmatpush1.bf16.msra.mxu0 %v2411_v17  ;;  %1501 = vmatprep.subr.bf16.mxu1 %v2422_v18  ;;  %v2509_v17 = vld [vmem:[%s3282_s1 + $0x2e4] ss:$8 sps:$4 sm:$0xff]   ;;  %v2510_v18 = vld [vmem:[%s3283_s0 + $0x130] ss:$44 sps:$4 sm:$0xff]  }
  0x81   :  { %1720 = vmatprep.subr.bf16.mxu0 %v2425_v20  ;;  %v2513_v20 = vld [vmem:[%s3282_s1 + $0x2f4] ss:$8 sps:$4 sm:$0xff]  }
  0x82   :  { %1461 = vmatmul.mubr.bf16.vlgmr.msra.gmra.mrb[0].mxu1 %v2417_v21  ;;  %v2511_v21 = vld [vmem:[%s3282_s1 + $0x2f0] ss:$8 sps:$4 sm:$0xff]  }
  0x83   :  { %1680 = vmatmul.mubr.bf16.vlgmr.msra.gmra.mrb[0].mxu0 %v2414_v19  ;;  %1502 = vmatpush1.bf16.msra.mxu1 %v2420_v22  ;;  %v2507_v19 = vld [vmem:[%s3282_s1 + $0x2e0] ss:$8 sps:$4 sm:$0xff]   ;;  %v2514_v22 = vld [vmem:[%s3283_s0 + $0x10] ss:$44 sps:$4 sm:$0xff]  }
  0x84   :  { %1721 = vmatpush1.bf16.msra.mxu0 %v2423_v23  ;;  %1503 = vmatprep.subr.bf16.mxu1 %v2428_v24  ;;  %v2517_v23 = vld [vmem:[%s3283_s0 + $0x6c] ss:$44 sps:$4 sm:$0xff]   ;;  %v2519_v24 = vld [vmem:[%s3283_s0 + $0x68] ss:$44 sps:$4 sm:$0xff]  }
  0x85   :  { %1722 = vmatprep.subr.bf16.mxu0 %v2431_v25  ;;  %1689 = vmatprep.mubr.bf16.mxu0 %v2432_v26  ;;  %v2520_v25 = vld [vmem:[%s3283_s0 + $0xc4] ss:$44 sps:$4 sm:$0xff]   ;;  %v2522_v26 = vld [vmem:[%s3283_s0 + $0xc0] ss:$44 sps:$4 sm:$0xff]  }
  0x86   :  { %1470 = vmatprep.mubr.bf16.mxu1 %v2484_v27  ;;  %v2523_v27 = vld [vmem:[%s3283_s0 + $0x11c] ss:$44 sps:$4 sm:$0xff]  }
  0x87   :  { %1504 = vmatpush1.bf16.msra.mxu1 %v2426_v28  ;;  %v2525_v28 = vld [vmem:[%s3283_s0 + $0x118] ss:$44 sps:$4 sm:$0xff]  }
  0x88   :  { %1723 = vmatpush1.bf16.msra.mxu0 %v2429_v29  ;;  %1505 = vmatprep.subr.bf16.mxu1 %v2436_v30 }
  0x89   :  { %1724 = vmatprep.subr.bf16.mxu0 %v2440_v31 }
  0x8a   :  { %1471 = vmatmul.mubr.bf16.gmra.mrb[4].mxu1 %v2486_v34 }
  0x8b   :  { %1690 = vmatmul.mubr.bf16.gmra.mrb[4].mxu0 %v2437_v33  ;;  %1506 = vmatpush1.bf16.msra.mxu1 %v2434_v32 }
  0x8c   :  { %1725 = vmatpush1.bf16.msra.mxu0 %v2438_v35  ;;  %1507 = vmatprep.subr.bf16.mxu1 %v2443_v36 }
  0x8d   :  { %1726 = vmatprep.subr.bf16.mxu0 %v2446_v37  ;;  %1699 = vmatprep.mubr.bf16.mxu0 %v2447_v39  ;;  %v241_v39 = vlaneseq }
  0x8e   :  { %1480 = vmatprep.mubr.bf16.mxu1 %v2494_v40 }
  0x8f   :  { %1508 = vmatpush1.bf16.msra.mxu1 %v2441_v38 }
  0x90   :  { %1727 = vmatpush1.bf16.msra.mxu0 %v2444_v41  ;;  %1509 = vmatprep.subr.bf16.mxu1 %v2451_v42  ;;  %v242_v42 = vshrl.u32 %v241_v39, 7 }
  0x91   :  { %1728 = vmatprep.subr.bf16.mxu0 %v2455_v43 }
  0x92   :  { %1481 = vmatmul.mubr.bf16.gmra.mrb[8].mxu1 %v2496_v47  ;;  %v239_v47 = vld [vmem:[%s3284_s2] ss:$8 sm:$0x3] }
  0x93   :  { %1700 = vmatmul.mubr.bf16.gmra.mrb[8].mxu0 %v2452_v45  ;;  %1510 = vmatpush1.bf16.msra.mxu1 %v2449_v44  ;;  %v3219_v45 = vsub.s32 0, %v242_v42 }
  0x94   :  { %1729 = vmatpush1.bf16.msra.mxu0 %v2453_v46  ;;  %1511 = vmatprep.subr.bf16.mxu1 %v2458_v48  ;;  %v3226_v48 = vsub.s32 1, %v242_v42 }
  0x95   :  { %1730 = vmatprep.subr.bf16.mxu0 %v2461_v49  ;;  %1709 = vmatprep.mubr.bf16.mxu0 %v2462_v50  ;;  %v3231_v50 = vrot.slane %v239_v47, %v3219_v45 }
  0x96   :  { %1490 = vmatprep.mubr.bf16.mxu1 %v2504_v51  ;;  %v3234_v51 = vrot.slane %v239_v47, %v3226_v48 }
  0x97   :  { %1512 = vmatpush1.bf16.msra.mxu1 %v2456_v52 }
  0x98   :  { %1731 = vmatpush1.bf16.msra.mxu0 %v2459_v53  ;;  %1513 = vmatprep.subr.bf16.mxu1 %v2466_v54 }
  0x99   :  { %1732 = vmatprep.subr.bf16.mxu0 %v2470_v55 }
  0x9a   :  { %1491 = vmatmul.mubr.bf16.gmra.mrb[12].mxu1 %v2506_v57 }
  0x9b   :  { %1710 = vmatmul.mubr.bf16.gmra.mrb[12].mxu0 %v2467_v56  ;;  %1514 = vmatpush1.bf16.msra.mxu1 %v2464_v58 }
  0x9c   :  { %1733 = vmatpush1.bf16.msra.mxu0 %v2468_v59  ;;  %1515 = vmatprep.subr.bf16.mxu1 %v2473_v60 }
  0x9d   :  { %1734 = vmatprep.subr.bf16.mxu0 %v2476_v61  ;;  %1752 = vmatprep.mubr.bf16.mxu0 %v2526_v2 }
  0x9e   :  { %1533 = vmatprep.mubr.bf16.mxu1 %v2516_v62 }
  0x9f   :  { %1516 = vmatpush1.bf16.msra.mxu1 %v2471_v63 }
  0xa0   :  { %1735 = vmatpush1.bf16.msra.mxu0 %v2474_v0  ;;  %1517 = vmatprep.subr.bf16.mxu1 %v2479_v1 }
  0xa3   :  { %1753 = vmatmul.mubr.bf16.vlgmr.msra.gmra.mrb[0].mxu0 %v2480_v3  ;;  %1518 = vmatpush1.bf16.msra.mxu1 %v2477_v4 }
  0xa4   :  { %1762 = vmatprep.mubr.bf16.mxu0 %v2526_v2  ;;  %1519 = vmatprep.subr.bf16.mxu1 %v2483_v5 }
  0xa7   :  { %1520 = vmatpush1.bf16.msra.mxu1 %v2481_v6 }
  0xa8   :  { %1521 = vmatprep.subr.bf16.mxu1 %v2489_v7 }
  0xab   :  { %1763 = vmatmul.mubr.bf16.gmra.mrb[4].mxu0 %v2490_v8  ;;  %1522 = vmatpush1.bf16.msra.mxu1 %v2487_v9 }
  0xac   :  { %1772 = vmatprep.mubr.bf16.mxu0 %v2526_v2  ;;  %1523 = vmatprep.subr.bf16.mxu1 %v2493_v10 }
  0xaf   :  { %1524 = vmatpush1.bf16.msra.mxu1 %v2491_v11 }
  0xb0   :  { %1525 = vmatprep.subr.bf16.mxu1 %v2499_v12 }
  0xb3   :  { %1773 = vmatmul.mubr.bf16.gmra.mrb[8].mxu0 %v2500_v13  ;;  %1526 = vmatpush1.bf16.msra.mxu1 %v2497_v14 }
  0xb4   :  { %1782 = vmatprep.mubr.bf16.mxu0 %v2526_v2  ;;  %1527 = vmatprep.subr.bf16.mxu1 %v2503_v15 }
  0xb7   :  { %1528 = vmatpush1.bf16.msra.mxu1 %v2501_v16 }
  0xb8   :  { %1529 = vmatprep.subr.bf16.mxu1 %v2509_v17 }
  0xbb   :  { %1783 = vmatmul.mubr.bf16.gmra.mrb[12].mxu0 %v2510_v18  ;;  %1530 = vmatpush1.bf16.msra.mxu1 %v2507_v19 }
  0xbc   :  { %1531 = vmatprep.subr.bf16.mxu1 %v2513_v20 }
  0xbf   :  { %1532 = vmatpush1.bf16.msra.mxu1 %v2511_v21 }
  0xc2   :  { %1534 = vmatmul.mubr.bf16.vlgmr.msra.gmra.mrb[0].mxu1 %v2514_v22 }
  0xc3   :  { %1543 = vmatprep.mubr.bf16.mxu1 %v2517_v23 }
  0xca   :  { %1544 = vmatmul.mubr.bf16.gmra.mrb[4].mxu1 %v2519_v24 }
  0xcb   :  { %1553 = vmatprep.mubr.bf16.mxu1 %v2520_v25 }
  0xd2   :  { %1554 = vmatmul.mubr.bf16.gmra.mrb[8].mxu1 %v2522_v26 }
  0xd3   :  { %1563 = vmatprep.mubr.bf16.mxu1 %v2523_v27 }
  0xda   :  { %1564 = vmatmul.mubr.bf16.gmra.mrb[12].mxu1 %v2525_v28 }
 0x176   :  { %v1754_v29 = vpop.f32.mrb[0].mxu0 }
 0x177   :  { %v1756_v30 = vpop.f32.mrb[1].mxu0 }
 0x178   :  { %v1758_v31 = vpop.f32.mrb[2].mxu0 }
 0x179   :  { %v1760_v32 = vpop.f32.mrb[3].mxu0 }
 0x17e   :  { %v1764_v33 = vpop.f32.mrb[4].mxu0 }
 0x17f   :  { %v1766_v34 = vpop.f32.mrb[5].mxu0 }
 0x180   :  { %v1768_v35 = vpop.f32.mrb[6].mxu0 }
 0x181   :  { %v1770_v36 = vpop.f32.mrb[7].mxu0 }
 0x186   :  { %v3207_v37 = vpop.f32.mrb[8].mxu0 }
 0x187   :  { %v3209_v38 = vpop.f32.mrb[9].mxu0 }
 0x188   :  { %v3211_v40 = vpop.f32.mrb[10].mxu0 }
 0x189   :  { %v3213_v41 = vpop.f32.mrb[11].mxu0 }
 0x18e   :  { %v3215_v43 = vpop.f32.mrb[12].mxu0 }
 0x18f   :  { %v3217_v44 = vpop.f32.mrb[13].mxu0 }
 0x190   :  { %v3221_v46 = vpop.f32.mrb[14].mxu0 }
 0x191   :  { %v3228_v49 = vpop.f32.mrb[15].mxu0 }
 0x195   :  { %v1535_v52 = vpop.f32.mrb[0].mxu1 }
 0x196   :  { %v2101_v53 = vadd.f32 %v1535_v52, %v3231_v50  ;;  %v1537_v54 = vpop.f32.mrb[1].mxu1 }
 0x197   :  { %v2103_v55 = vadd.f32 %v1537_v54, %v3234_v51  ;;  %v1539_v56 = vpop.f32.mrb[2].mxu1 }
 0x198   :  { %v2102_v57 = vadd.f32 %v2101_v53, %v1754_v29  ;;  %v2105_v58 = vadd.f32 %v1539_v56, %v3231_v50  ;;  %v1541_v59 = vpop.f32.mrb[3].mxu1 }
 0x199   :  { %v2104_v60 = vadd.f32 %v2103_v55, %v1756_v30  ;;  %v2107_v61 = vadd.f32 %v1541_v59, %v3234_v51 }
 0x19a   :  { %v2106_v62 = vadd.f32 %v2105_v58, %v1758_v31  ;;  %v1793_v5 = vmul.f32 0.01, %v2102_v57 }
 0x19b   :  { %v2108_v63 = vadd.f32 %v2107_v61, %v1760_v32  ;;  %v1794_v9 = vmul.f32 0.01, %v2104_v60 }
 0x19c   :  { %v1795_v12 = vmul.f32 0.01, %v2106_v62  ;;  %v1809_v18 = vmax.f32 %v2102_v57, %v1793_v5 }
 0x19d   :  { %v1545_v0 = vpop.f32.mrb[4].mxu1  ;;  %v1796_v15 = vmul.f32 0.01, %v2108_v63  ;;  %v1810_v21 = vmax.f32 %v2104_v60, %v1794_v9  ;;  %v2100_v9 = vld [vmem:[%s3284_s2 + $0x2] ss:$8 sm:$0x3] }
 0x19e   :  { %v2109_v1 = vadd.f32 %v1545_v0, %v3231_v50  ;;  %v1547_v2 = vpop.f32.mrb[5].mxu1  ;;  %v1811_v25 = vmax.f32 %v2106_v62, %v1795_v12 }
 0x19f   :  { %v2111_v3 = vadd.f32 %v1547_v2, %v3234_v51  ;;  %v1549_v4 = vpop.f32.mrb[6].mxu1  ;;  %v1812_v30 = vmax.f32 %v2108_v63, %v1796_v15 }
 0x1a0   :  { %v2110_v6 = vadd.f32 %v2109_v1, %v1764_v33  ;;  %v2113_v7 = vadd.f32 %v1549_v4, %v3231_v50  ;;  %v1551_v8 = vpop.f32.mrb[7].mxu1 }
 0x1a1   :  { %v2112_v10 = vadd.f32 %v2111_v3, %v1766_v34  ;;  %v2115_v11 = vadd.f32 %v1551_v8, %v3234_v51 }
 0x1a2   :  { %v1797_v13 = vmul.f32 0.01, %v2110_v6  ;;  %v2114_v14 = vadd.f32 %v2113_v7, %v1768_v35 }
 0x1a3   :  { %v1798_v16 = vmul.f32 0.01, %v2112_v10  ;;  %v2116_v17 = vadd.f32 %v2115_v11, %v1770_v36 }
 0x1a4   :  { %v1813_v19 = vmax.f32 %v2110_v6, %v1797_v13  ;;  %v1799_v20 = vmul.f32 0.01, %v2114_v14 }
 0x1a5   :  { %v1814_v22 = vmax.f32 %v2112_v10, %v1798_v16  ;;  %v1800_v23 = vmul.f32 0.01, %v2116_v17  ;;  %v1555_v24 = vpop.f32.mrb[8].mxu1 }
 0x1a6   :  { %v1825_v26 = vmax.f32 %v1809_v18, %v1813_v19  ;;  %v1815_v27 = vmax.f32 %v2114_v14, %v1799_v20  ;;  %v2117_v28 = vadd.f32 %v1555_v24, %v3231_v50  ;;  %v1557_v29 = vpop.f32.mrb[9].mxu1  ;;  %v1864_v20 = vrot.slane %v2100_v9, %v3226_v48 }
 0x1a7   :  { %v1826_v31 = vmax.f32 %v1810_v21, %v1814_v22  ;;  %v1816_v32 = vmax.f32 %v2116_v17, %v1800_v23  ;;  %v2119_v33 = vadd.f32 %v1557_v29, %v3234_v51  ;;  %v1559_v34 = vpop.f32.mrb[10].mxu1  ;;  %v1860_v17 = vrot.slane %v2100_v9, %v3219_v45 }
 0x1a8   :  { %v1827_v35 = vmax.f32 %v1811_v25, %v1815_v27  ;;  %v2118_v36 = vadd.f32 %v2117_v28, %v3207_v37  ;;  %v2121_v39 = vadd.f32 %v1559_v34, %v3231_v50  ;;  %v1561_v42 = vpop.f32.mrb[11].mxu1 }
 0x1a9   :  { %v1828_v47 = vmax.f32 %v1812_v30, %v1816_v32  ;;  %v2120_v52 = vadd.f32 %v2119_v33, %v3209_v38  ;;  %v2123_v53 = vadd.f32 %v1561_v42, %v3234_v51 }
 0x1aa   :  { %v2122_v54 = vadd.f32 %v2121_v39, %v3211_v40  ;;  %v1801_v37 = vmul.f32 0.01, %v2118_v36  ;;  %v2099_v40 = vld [vmem:[%s3284_s2 + $0x1] ss:$8 sm:$0x3] }
 0x1ab   :  { %v2124_v55 = vadd.f32 %v2123_v53, %v3213_v41  ;;  %v1802_v38 = vmul.f32 0.01, %v2120_v52  ;;  %v1843_v12 = vrot.slane %v2099_v40, %v3219_v45  ;;  %v1847_v15 = vrot.slane %v2099_v40, %v3226_v48 }
 0x1ac   :  { %v1803_v1 = vmul.f32 0.01, %v2122_v54  ;;  %v1817_v6 = vmax.f32 %v2118_v36, %v1801_v37 }
 0x1ad   :  { %v1565_v56 = vpop.f32.mrb[12].mxu1  ;;  %v1804_v4 = vmul.f32 0.01, %v2124_v55  ;;  %v1818_v8 = vmax.f32 %v2120_v52, %v1802_v38 }
 0x1ae   :  { %v2125_v57 = vadd.f32 %v1565_v56, %v3231_v50  ;;  %v1567_v58 = vpop.f32.mrb[13].mxu1  ;;  %v1819_v11 = vmax.f32 %v2122_v54, %v1803_v1 }
 0x1af   :  { %v2127_v59 = vadd.f32 %v1567_v58, %v3234_v51  ;;  %v1569_v60 = vpop.f32.mrb[14].mxu1 }
 0x1b0   :  { %v2126_v61 = vadd.f32 %v2125_v57, %v3215_v43  ;;  %v2129_v62 = vadd.f32 %v1569_v60, %v3231_v50  ;;  %v1571_v63 = vpop.f32.mrb[15].mxu1 }
 0x1b1   :  { %v2128_v41 = vadd.f32 %v2127_v59, %v3217_v44  ;;  %v2131_v0 = vadd.f32 %v1571_v63, %v3234_v51 }
 0x1b2   :  { %v1805_v2 = vmul.f32 0.01, %v2126_v61  ;;  %v2130_v3 = vadd.f32 %v2129_v62, %v3221_v46  ;;  %v1820_v46 = vmax.f32 %v2124_v55, %v1804_v4 }
 0x1b3   :  { %v1806_v5 = vmul.f32 0.01, %v2128_v41  ;;  %v2132_v43 = vadd.f32 %v2131_v0, %v3228_v49 }
 0x1b4   :  { %v1821_v50 = vmax.f32 %v2126_v61, %v1805_v2  ;;  %v1807_v7 = vmul.f32 0.01, %v2130_v3 }
 0x1b5   :  { %v1822_v10 = vmax.f32 %v2128_v41, %v1806_v5  ;;  %v1808_v44 = vmul.f32 0.01, %v2132_v43 }
 0x1b6   :  { %v1829_v51 = vmax.f32 %v1817_v6, %v1821_v50  ;;  %v1823_v13 = vmax.f32 %v2130_v3, %v1807_v7 }
 0x1b7   :  { %v1830_v14 = vmax.f32 %v1818_v8, %v1822_v10  ;;  %v1824_v49 = vmax.f32 %v2132_v43, %v1808_v44 }
 0x1b8   :  { %v1833_v16 = vmax.f32 %v1825_v26, %v1829_v51  ;;  %v1831_v18 = vmax.f32 %v1819_v11, %v1823_v13 }
 0x1b9   :  { %v1834_v19 = vmax.f32 %v1826_v31, %v1830_v14  ;;  %v1832_v21 = vmax.f32 %v1820_v46, %v1824_v49 }
 0x1ba   :  { %v1850_v22 = vmul.f32 %v1843_v12, %v1833_v16  ;;  %v1835_v23 = vmax.f32 %v1827_v35, %v1831_v18 }
 0x1bb   :  { %v1851_v24 = vmul.f32 %v1847_v15, %v1834_v19  ;;  %v1836_v25 = vmax.f32 %v1828_v47, %v1832_v21 }
 0x1bc   :  { %v1867_v27 = vadd.f32 %v1860_v17, %v1850_v22  ;;  %v1852_v28 = vmul.f32 %v1843_v12, %v1835_v23 }
 0x1bd   :  { %v1868_v29 = vadd.f32 %v1864_v20, %v1851_v24  ;;  %v1853_v30 = vmul.f32 %v1847_v15, %v1836_v25 }
 0x1be   :  { %1871 = vst [vmem:[%s3285_s3] sm:$0xff] %v1867_v27  ;;  %v1869_v26 = vadd.f32 %v1860_v17, %v1852_v28 }
 0x1bf   :  { %1872 = vst [vmem:[%s3285_s3 + $0x8] sm:$0xff] %v1868_v29  ;;  %v1870_v45 = vadd.f32 %v1864_v20, %v1853_v30 }
 0x1c0   :  { %1873 = vst [vmem:[%s3285_s3 + $0x10] sm:$0xff] %v1869_v26 }
 0x1c1   :  { %1874 = vst [vmem:[%s3285_s3 + $0x18] sm:$0xff] %v1870_v45 }

</bundles_post_ra>
